<compile_context>
chip_gen: v5e
topology: v5e:2x2
jax: 0.10.0
libtpu: 0.0.40
codegen_flags: <defaults>
</compile_context>

<pallas_src>
import functools

import jax
import jax.numpy as jnp
from jax.experimental import pallas as pl
from jax.experimental.pallas import tpu as pltpu


def _round_up(v, m):
    return (v + m - 1) // m * m


def _cdiv(a, b):
    return (a + b - 1) // b


# ----------------------------- Pallas kernels ------------------------------

def _fft_lowpass_kernel(x_ref, fhr_ref, fhi_ref, bwr_ref, bwi_ref, mask_ref,
                        o_ref, *, inv_hw):
    """All-images low-pass filter in one shot.

    x_ref is (H, N*W) with column index (n, w) n-major; the left DFT along H is
    a dense (H,H) matmul, the right DFT along W is a block-diagonal (N*W, N*W)
    matmul (one F_W^T block per image).  Only the real output is produced."""
    f32 = jnp.float32
    x = x_ref[...]                                   # (H, N*W), real
    fhr, fhi = fhr_ref[...], fhi_ref[...]            # F_H real / imag (H, H)
    bwr, bwi = bwr_ref[...], bwi_ref[...]            # blockdiag(F_W^T) (NW, NW)

    # forward DFT along H (x is real)
    b1r = jnp.dot(fhr, x, preferred_element_type=f32)
    b1i = jnp.dot(fhi, x, preferred_element_type=f32)
    # forward DFT along W (block-diagonal right-multiply)
    sr = (jnp.dot(b1r, bwr, preferred_element_type=f32)
          - jnp.dot(b1i, bwi, preferred_element_type=f32))
    si = (jnp.dot(b1r, bwi, preferred_element_type=f32)
          + jnp.dot(b1i, bwr, preferred_element_type=f32))
    # radial low-pass mask (tiled per image)
    m = mask_ref[...]
    pr = m * sr
    pi = m * si
    # inverse DFT along H: G_H = conj(F_H) = (fhr, -fhi)
    qr = (jnp.dot(fhr, pr, preferred_element_type=f32)
          + jnp.dot(fhi, pi, preferred_element_type=f32))
    qi = (jnp.dot(fhr, pi, preferred_element_type=f32)
          - jnp.dot(fhi, pr, preferred_element_type=f32))
    # inverse DFT along W: G_W^T blockdiag = (bwr, -bwi); keep real part only
    outr = (jnp.dot(qr, bwr, preferred_element_type=f32)
            + jnp.dot(qi, bwi, preferred_element_type=f32))
    o_ref[...] = outr * inv_hw


def _matmul_bn_act_kernel(a_ref, w_ref, s_ref, b_ref, o_ref, *, act):
    """Fused (im2col_bf16 @ weight_bf16) -> f32 acc, * scale + shift, act,
    store in o_ref.dtype (bf16 for intermediate layers, f32 for the last)."""
    acc = jnp.dot(a_ref[...], w_ref[...], preferred_element_type=jnp.float32)
    acc = acc * s_ref[...] + b_ref[...]
    if act == "relu":
        acc = jnp.maximum(acc, 0.0)
    elif act == "leaky_relu":
        acc = jnp.where(acc > 0, acc, 0.01 * acc)
    o_ref[...] = acc.astype(o_ref.dtype)


# ------------------------------- wrappers -----------------------------------

def fft_lowpass(x, truncate_ratio):
    """torch.fft.fftn over (H,W), radial mask (no fftshift, as in reference),
    ifftn, take real part.  One Pallas call for the whole (B*C, H, W) slab.

    Input x is NCHW; output is NHWC (B, H, W, C) in f32."""
    B, C, H, W = x.shape
    N = B * C

    u = jnp.arange(H, dtype=jnp.float32)
    ang_h = -2.0 * jnp.pi * jnp.outer(u, u) / H
    fhr, fhi = jnp.cos(ang_h), jnp.sin(ang_h)        # forward DFT along H
    v = jnp.arange(W, dtype=jnp.float32)
    ang_w = -2.0 * jnp.pi * jnp.outer(v, v) / W
    fwr, fwi = jnp.cos(ang_w), jnp.sin(ang_w)        # F_W (symmetric => == F_W^T)

    # block-diagonal right-DFT over the N images folded into the lane dim
    eye_n = jnp.eye(N, dtype=jnp.float32)
    bwr = jnp.kron(eye_n, fwr)                       # (N*W, N*W)
    bwi = jnp.kron(eye_n, fwi)

    radius = min(H, W) * truncate_ratio
    idx = jnp.arange(-H // 2, H // 2, dtype=jnp.float32)
    idy = jnp.arange(-W // 2, W // 2, dtype=jnp.float32)
    mask = ((idx[:, None] ** 2 + idy[None, :] ** 2) <= radius ** 2).astype(
        jnp.float32)
    mask_tiled = jnp.tile(mask, (1, N))              # (H, N*W)

    # (B, C, H, W) -> (H, B*C*W): lane-dense columns indexed (b, c, w)
    xc = x.astype(jnp.float32).transpose(2, 0, 1, 3).reshape(H, N * W)

    out = pl.pallas_call(
        functools.partial(_fft_lowpass_kernel, inv_hw=1.0 / (H * W)),
        out_shape=jax.ShapeDtypeStruct((H, N * W), jnp.float32),
    )(xc, fhr, fhi, bwr, bwi, mask_tiled)

    # (H, B*C*W) -> (B, H, W, C)
    return out.reshape(H, B, C, W).transpose(1, 0, 3, 2)


def _im2col_nhwc(x, kh, kw, stride, pad):
    """Channels-last im2col: pure slicing + concat, no transposes."""
    B, H, W, C = x.shape
    if pad > 0:
        x = jnp.pad(x, ((0, 0), (pad, pad), (pad, pad), (0, 0)))
    Hp, Wp = H + 2 * pad, W + 2 * pad
    Ho = (Hp - kh) // stride + 1
    Wo = (Wp - kw) // stride + 1
    cols = []
    for i in range(kh):
        for j in range(kw):
            cols.append(x[:, i:i + stride * Ho:stride,
                          j:j + stride * Wo:stride, :])
    A = jnp.concatenate(cols, axis=-1)               # (B, Ho, Wo, kh*kw*C)
    return A.reshape(B * Ho * Wo, kh * kw * C), Ho, Wo


def conv2d_bn_act(x, w, scale, shift, *, stride=1, pad=0, act="none",
                  out_dtype=jnp.float32):
    """Conv2d (PyTorch weight layout) fused with folded BN and activation.

    x is NHWC (any float dtype); returns NHWC (B, Ho, Wo, Cout) in out_dtype."""
    B, H, W_, Cin = x.shape
    Cout, _, kh, kw = w.shape

    # bf16 MXU operands (f32 accumulation inside the kernel)
    A, Ho, Wo = _im2col_nhwc(x.astype(jnp.bfloat16), kh, kw, stride, pad)
    Wm = w.transpose(2, 3, 1, 0).reshape(kh * kw * Cin, Cout).astype(
        jnp.bfloat16)

    M, K = A.shape
    Np = _round_up(Cout, 128)                        # single lane-dense N tile
    TN = Np

    # Row tiling: big (~1K-row) tiles, few grid steps, and >=2 row tiles on the
    # large layers so megacore / a second TensorCore gets work.  Tiles are
    # rounded to 8 sublanes (not 128) to minimise padded rows.  Small layers
    # use one full-array tile.
    if M > 1024:
        n_m = max(2, _cdiv(M, 1024))
        TM = _round_up(_cdiv(M, n_m), 8)
        Mp = TM * n_m
    else:
        n_m = 1
        Mp = _round_up(M, 8)
        TM = Mp

    A_p = jnp.pad(A, ((0, Mp - M), (0, 0)))
    W_p = jnp.pad(Wm, ((0, 0), (0, Np - Cout)))
    s_p = jnp.pad(scale.astype(jnp.float32), (0, Np - Cout)).reshape(1, Np)
    b_p = jnp.pad(shift.astype(jnp.float32), (0, Np - Cout)).reshape(1, Np)

    out = pl.pallas_call(
        functools.partial(_matmul_bn_act_kernel, act=act),
        grid=(n_m,),
        in_specs=[pl.BlockSpec((TM, K), lambda i: (i, 0)),
                  pl.BlockSpec((K, TN), lambda i: (0, 0)),
                  pl.BlockSpec((1, TN), lambda i: (0, 0)),
                  pl.BlockSpec((1, TN), lambda i: (0, 0))],
        out_specs=pl.BlockSpec((TM, TN), lambda i: (i, 0)),
        out_shape=jax.ShapeDtypeStruct((Mp, Np), out_dtype),
        compiler_params=pltpu.CompilerParams(
            dimension_semantics=("parallel",)),
    )(A_p, W_p, s_p, b_p)

    out = out[:M, :Cout]
    return out.reshape(B, Ho, Wo, Cout)


def maxpool2x2(x):
    """nn.MaxPool2d(2, 2) semantics (floor, drop remainder) on NHWC.

    Plain jnp.maximum chain: XLA fuses it; a Pallas launch would cost more
    than the op itself.  Exact for bf16 inputs too (max commutes with the
    monotone bf16 rounding already applied by the producing conv kernel)."""
    B, H, W, C = x.shape
    Ho, Wo = H // 2, W // 2
    x = x[:, :2 * Ho, :2 * Wo, :]
    a = jnp.maximum(x[:, 0::2, 0::2, :], x[:, 0::2, 1::2, :])
    b = jnp.maximum(x[:, 1::2, 0::2, :], x[:, 1::2, 1::2, :])
    return jnp.maximum(a, b)


# ----------------------------- parameters -----------------------------------

def init_params(key, rot_elems=8):
    cin_egcm = 6                     # cat([x_rec, x]) of a 3-channel input
    c_egcm = 6 * rot_elems           # 48 (6 regular fields of size N=8)
    c_irl, c_osl1, c_osl2 = 48, 48, 480   # net_channel == 'narrow'
    ks = jax.random.split(key, 6)

    def kaiming(k, shape):           # kaiming_normal_, mode=fan_out, leaky_relu
        fan_out = shape[0] * shape[2] * shape[3]
        gain = jnp.sqrt(2.0 / (1.0 + 0.01 ** 2))
        std = gain / jnp.sqrt(jnp.float32(fan_out))
        return std * jax.random.normal(k, shape, jnp.float32)

    params = {
        "egcm_w": kaiming(ks[0], (c_egcm, cin_egcm, 3, 3)),
        "egcm_b": 0.01 * jax.random.normal(ks[1], (c_egcm,), jnp.float32),
        "irl_w": kaiming(ks[2], (c_irl, c_egcm, 3, 3)),
        "osl1_w": kaiming(ks[3], (c_osl1, c_irl, 3, 3)),
        "osl2_w": kaiming(ks[4], (c_osl2, c_osl1, 3, 3)),
    }
    # BatchNorm2d init (weight=1, bias=0, running stats = 0 / 1), eval mode,
    # folded into per-channel scale/shift for the fused kernel.
    eps = 1e-5
    for name, c in (("irl", c_irl), ("osl1", c_osl1), ("osl2", c_osl2)):
        gamma = jnp.ones((c,), jnp.float32)
        beta = jnp.zeros((c,), jnp.float32)
        mean = jnp.zeros((c,), jnp.float32)
        var = jnp.ones((c,), jnp.float32)
        sc = gamma / jnp.sqrt(var + eps)
        params[name + "_scale"] = sc
        params[name + "_shift"] = beta - mean * sc
    return params


# ------------------------------- forward ------------------------------------

def re_vision_eresnet_forward(x, params, *, truncate_ratio=0.85):
    x = x.astype(jnp.float32)
    bf16 = jnp.bfloat16

    # vision_layer: FFT low-pass reconstruction, concat with raw input (6 ch).
    # Everything below runs channels-last (NHWC) internally.
    x_rec = fft_lowpass(x, truncate_ratio)                  # (B, H, W, 3)
    x_nhwc = x.transpose(0, 2, 3, 1)                        # (B, H, W, 3)
    x0 = jnp.concatenate([x_rec, x_nhwc], axis=-1)          # (B, H, W, 6)

    # EGCM: R2Conv(6 trivial -> 6 regular, kernel=3, padding=0) + ReLU
    x1 = conv2d_bn_act(
        x0, params["egcm_w"],
        jnp.ones((params["egcm_w"].shape[0],), jnp.float32),
        params["egcm_b"], stride=1, pad=0, act="relu", out_dtype=bf16)

    # IRL / OSL blocks (narrow): conv3x3 s2 p1 -> BN -> LeakyReLU -> MaxPool2
    # Intermediate activations stay bf16 (exactly what the next layer's im2col
    # would have consumed); only the final layer emits f32.
    x2 = maxpool2x2(conv2d_bn_act(x1, params["irl_w"], params["irl_scale"],
                                  params["irl_shift"], stride=2, pad=1,
                                  act="leaky_relu", out_dtype=bf16))
    x3 = maxpool2x2(conv2d_bn_act(x2, params["osl1_w"], params["osl1_scale"],
                                  params["osl1_shift"], stride=2, pad=1,
                                  act="leaky_relu", out_dtype=bf16))
    x4 = maxpool2x2(conv2d_bn_act(x3, params["osl2_w"], params["osl2_scale"],
                                  params["osl2_shift"], stride=2, pad=1,
                                  act="leaky_relu", out_dtype=jnp.float32))

    # back to NCHW only at the model boundary
    return x4.transpose(0, 3, 1, 2)


if __name__ == "__main__":
    key = jax.random.PRNGKey(0)
    kx, kp = jax.random.split(key)
    # small NCHW input consistent with the module (3-channel RGB image)
    x = jax.random.normal(kx, (2, 3, 48, 48), jnp.float32)
    params = init_params(kp, rot_elems=8)

    fwd = jax.jit(functools.partial(re_vision_eresnet_forward,
                                    truncate_ratio=0.85))
    out = fwd(x, params)
    jax.block_until_ready(out)
    assert out.shape == (2, 480, 1, 1), out.shape
    assert out.dtype == jnp.float32
    assert bool(jnp.all(jnp.isfinite(out)))
    print("KERNEL_OK")
</pallas_src>

<mosaic_0001>
module attributes {stable_mosaic.version = 11 : i64} {
  func.func @_fft_lowpass_kernel(%arg0: memref<48x288xf32, #tpu.memory_space<vmem>>, %arg1: memref<48x48xf32, #tpu.memory_space<vmem>>, %arg2: memref<48x48xf32, #tpu.memory_space<vmem>>, %arg3: memref<288x288xf32, #tpu.memory_space<vmem>>, %arg4: memref<288x288xf32, #tpu.memory_space<vmem>>, %arg5: memref<48x288xf32, #tpu.memory_space<vmem>>, %arg6: memref<48x288xf32, #tpu.memory_space<vmem>>) attributes {dimension_semantics = [], scalar_prefetch = 0 : i64, scratch_operands = 0 : i64, tpu.core_type = #tpu.core_type<tc>} {
    %c0 = arith.constant 0 : index
    %c0_0 = arith.constant 0 : index
    %0 = vector.load %arg0[%c0, %c0_0] : memref<48x288xf32, #tpu.memory_space<vmem>>, vector<48x288xf32>
    %c0_1 = arith.constant 0 : index
    %c0_2 = arith.constant 0 : index
    %1 = vector.load %arg1[%c0_1, %c0_2] : memref<48x48xf32, #tpu.memory_space<vmem>>, vector<48x48xf32>
    %c0_3 = arith.constant 0 : index
    %c0_4 = arith.constant 0 : index
    %2 = vector.load %arg2[%c0_3, %c0_4] : memref<48x48xf32, #tpu.memory_space<vmem>>, vector<48x48xf32>
    %c0_5 = arith.constant 0 : index
    %c0_6 = arith.constant 0 : index
    %3 = vector.load %arg3[%c0_5, %c0_6] : memref<288x288xf32, #tpu.memory_space<vmem>>, vector<288x288xf32>
    %c0_7 = arith.constant 0 : index
    %c0_8 = arith.constant 0 : index
    %4 = vector.load %arg4[%c0_7, %c0_8] : memref<288x288xf32, #tpu.memory_space<vmem>>, vector<288x288xf32>
    %cst = arith.constant dense<0.000000e+00> : vector<48x288xf32>
    %5 = tpu.matmul %1, %0, %cst {dimension_numbers = #tpu.dot_dimension_numbers<[1], [0], [0], [1], [0, 0, 1, 1], [], []>} : vector<48x48xf32>, vector<48x288xf32>, vector<48x288xf32> -> vector<48x288xf32>
    %cst_9 = arith.constant dense<0.000000e+00> : vector<48x288xf32>
    %6 = tpu.matmul %2, %0, %cst_9 {dimension_numbers = #tpu.dot_dimension_numbers<[1], [0], [0], [1], [0, 0, 1, 1], [], []>} : vector<48x48xf32>, vector<48x288xf32>, vector<48x288xf32> -> vector<48x288xf32>
    %cst_10 = arith.constant dense<0.000000e+00> : vector<48x288xf32>
    %7 = tpu.matmul %5, %3, %cst_10 {dimension_numbers = #tpu.dot_dimension_numbers<[1], [0], [0], [1], [0, 0, 1, 1], [], []>} : vector<48x288xf32>, vector<288x288xf32>, vector<48x288xf32> -> vector<48x288xf32>
    %cst_11 = arith.constant dense<0.000000e+00> : vector<48x288xf32>
    %8 = tpu.matmul %6, %4, %cst_11 {dimension_numbers = #tpu.dot_dimension_numbers<[1], [0], [0], [1], [0, 0, 1, 1], [], []>} : vector<48x288xf32>, vector<288x288xf32>, vector<48x288xf32> -> vector<48x288xf32>
    %9 = arith.subf %7, %8 : vector<48x288xf32>
    %cst_12 = arith.constant dense<0.000000e+00> : vector<48x288xf32>
    %10 = tpu.matmul %5, %4, %cst_12 {dimension_numbers = #tpu.dot_dimension_numbers<[1], [0], [0], [1], [0, 0, 1, 1], [], []>} : vector<48x288xf32>, vector<288x288xf32>, vector<48x288xf32> -> vector<48x288xf32>
    %cst_13 = arith.constant dense<0.000000e+00> : vector<48x288xf32>
    %11 = tpu.matmul %6, %3, %cst_13 {dimension_numbers = #tpu.dot_dimension_numbers<[1], [0], [0], [1], [0, 0, 1, 1], [], []>} : vector<48x288xf32>, vector<288x288xf32>, vector<48x288xf32> -> vector<48x288xf32>
    %12 = arith.addf %10, %11 : vector<48x288xf32>
    %c0_14 = arith.constant 0 : index
    %c0_15 = arith.constant 0 : index
    %13 = vector.load %arg5[%c0_14, %c0_15] : memref<48x288xf32, #tpu.memory_space<vmem>>, vector<48x288xf32>
    %14 = arith.mulf %13, %9 : vector<48x288xf32>
    %15 = arith.mulf %13, %12 : vector<48x288xf32>
    %cst_16 = arith.constant dense<0.000000e+00> : vector<48x288xf32>
    %16 = tpu.matmul %1, %14, %cst_16 {dimension_numbers = #tpu.dot_dimension_numbers<[1], [0], [0], [1], [0, 0, 1, 1], [], []>} : vector<48x48xf32>, vector<48x288xf32>, vector<48x288xf32> -> vector<48x288xf32>
    %cst_17 = arith.constant dense<0.000000e+00> : vector<48x288xf32>
    %17 = tpu.matmul %2, %15, %cst_17 {dimension_numbers = #tpu.dot_dimension_numbers<[1], [0], [0], [1], [0, 0, 1, 1], [], []>} : vector<48x48xf32>, vector<48x288xf32>, vector<48x288xf32> -> vector<48x288xf32>
    %18 = arith.addf %16, %17 : vector<48x288xf32>
    %cst_18 = arith.constant dense<0.000000e+00> : vector<48x288xf32>
    %19 = tpu.matmul %1, %15, %cst_18 {dimension_numbers = #tpu.dot_dimension_numbers<[1], [0], [0], [1], [0, 0, 1, 1], [], []>} : vector<48x48xf32>, vector<48x288xf32>, vector<48x288xf32> -> vector<48x288xf32>
    %cst_19 = arith.constant dense<0.000000e+00> : vector<48x288xf32>
    %20 = tpu.matmul %2, %14, %cst_19 {dimension_numbers = #tpu.dot_dimension_numbers<[1], [0], [0], [1], [0, 0, 1, 1], [], []>} : vector<48x48xf32>, vector<48x288xf32>, vector<48x288xf32> -> vector<48x288xf32>
    %21 = arith.subf %19, %20 : vector<48x288xf32>
    %cst_20 = arith.constant dense<0.000000e+00> : vector<48x288xf32>
    %22 = tpu.matmul %18, %3, %cst_20 {dimension_numbers = #tpu.dot_dimension_numbers<[1], [0], [0], [1], [0, 0, 1, 1], [], []>} : vector<48x288xf32>, vector<288x288xf32>, vector<48x288xf32> -> vector<48x288xf32>
    %cst_21 = arith.constant dense<0.000000e+00> : vector<48x288xf32>
    %23 = tpu.matmul %21, %4, %cst_21 {dimension_numbers = #tpu.dot_dimension_numbers<[1], [0], [0], [1], [0, 0, 1, 1], [], []>} : vector<48x288xf32>, vector<288x288xf32>, vector<48x288xf32> -> vector<48x288xf32>
    %24 = arith.addf %22, %23 : vector<48x288xf32>
    %cst_22 = arith.constant 4.34027781E-4 : f32
    %25 = vector.broadcast %cst_22 : f32 to vector<48x288xf32>
    %26 = arith.mulf %24, %25 : vector<48x288xf32>
    %c0_23 = arith.constant 0 : index
    %c0_24 = arith.constant 0 : index
    %27 = vector.load %arg6[%c0_23, %c0_24] : memref<48x288xf32, #tpu.memory_space<vmem>>, vector<48x288xf32>
    tpu.vector_store %arg6[%c0_23, %c0_24], %26 {strides = array<i32>} : memref<48x288xf32, #tpu.memory_space<vmem>>, vector<48x288xf32>,
    return
  }
}

module attributes {stable_mosaic.version = 11 : i64} {
  func.func @_matmul_bn_act_kernel(%arg0: i32, %arg1: memref<848x54xbf16, #tpu.memory_space<vmem>>, %arg2: memref<54x128xbf16, #tpu.memory_space<vmem>>, %arg3: memref<1x128xf32, #tpu.memory_space<vmem>>, %arg4: memref<1x128xf32, #tpu.memory_space<vmem>>, %arg5: memref<848x128xbf16, #tpu.memory_space<vmem>>) attributes {dimension_semantics = [#tpu.dimension_semantics<parallel>], iteration_bounds = array<i64: 5>, scalar_prefetch = 0 : i64, scratch_operands = 0 : i64, tpu.core_type = #tpu.core_type<tc>, window_params = [{transform_indices = @transform_0, window_bounds = array<i64: 848, 54>}, {pipeline_mode = #tpu.pipeline_mode<synchronous>, transform_indices = @transform_1, window_bounds = array<i64: 54, 128>}, {pipeline_mode = #tpu.pipeline_mode<synchronous>, transform_indices = @transform_2, window_bounds = array<i64: 1, 128>}, {pipeline_mode = #tpu.pipeline_mode<synchronous>, transform_indices = @transform_3, window_bounds = array<i64: 1, 128>}, {transform_indices = @transform_4, window_bounds = array<i64: 848, 128>}]} {
    %c0 = arith.constant 0 : index
    %c0_0 = arith.constant 0 : index
    %0 = vector.load %arg1[%c0, %c0_0] : memref<848x54xbf16, #tpu.memory_space<vmem>>, vector<848x54xbf16>
    %c0_1 = arith.constant 0 : index
    %c0_2 = arith.constant 0 : index
    %1 = vector.load %arg2[%c0_1, %c0_2] : memref<54x128xbf16, #tpu.memory_space<vmem>>, vector<54x128xbf16>
    %cst = arith.constant dense<0.000000e+00> : vector<848x128xf32>
    %2 = tpu.matmul %0, %1, %cst {dimension_numbers = #tpu.dot_dimension_numbers<[1], [0], [0], [1], [0, 0, 1, 1], [], []>} : vector<848x54xbf16>, vector<54x128xbf16>, vector<848x128xf32> -> vector<848x128xf32>
    %c0_3 = arith.constant 0 : index
    %c0_4 = arith.constant 0 : index
    %3 = vector.load %arg3[%c0_3, %c0_4] : memref<1x128xf32, #tpu.memory_space<vmem>>, vector<1x128xf32>
    %4 = vector.broadcast %3 : vector<1x128xf32> to vector<848x128xf32>
    %5 = arith.mulf %2, %4 : vector<848x128xf32>
    %c0_5 = arith.constant 0 : index
    %c0_6 = arith.constant 0 : index
    %6 = vector.load %arg4[%c0_5, %c0_6] : memref<1x128xf32, #tpu.memory_space<vmem>>, vector<1x128xf32>
    %7 = vector.broadcast %6 : vector<1x128xf32> to vector<848x128xf32>
    %8 = arith.addf %5, %7 : vector<848x128xf32>
    %cst_7 = arith.constant 0.000000e+00 : f32
    %9 = vector.broadcast %cst_7 : f32 to vector<848x128xf32>
    %10 = arith.maximumf %8, %9 : vector<848x128xf32>
    %11 = arith.truncf %10 : vector<848x128xf32> to vector<848x128xbf16>
    %c0_8 = arith.constant 0 : index
    %c0_9 = arith.constant 0 : index
    %12 = vector.load %arg5[%c0_8, %c0_9] : memref<848x128xbf16, #tpu.memory_space<vmem>>, vector<848x128xbf16>
    tpu.vector_store %arg5[%c0_8, %c0_9], %11 {strides = array<i32>} : memref<848x128xbf16, #tpu.memory_space<vmem>>, vector<848x128xbf16>,
    return
  }
  func.func @transform_0(%arg0: i32) -> (i32, i32) {
    %c0_i32 = arith.constant 0 : i32
    %c0_i32_0 = arith.constant 0 : i32
    return %arg0, %c0_i32 : i32, i32
  }
  func.func @transform_1(%arg0: i32) -> (i32, i32) {
    %c0_i32 = arith.constant 0 : i32
    %c0_i32_0 = arith.constant 0 : i32
    %c0_i32_1 = arith.constant 0 : i32
    return %c0_i32, %c0_i32_0 : i32, i32
  }
  func.func @transform_2(%arg0: i32) -> (i32, i32) {
    %c0_i32 = arith.constant 0 : i32
    %c0_i32_0 = arith.constant 0 : i32
    %c0_i32_1 = arith.constant 0 : i32
    return %c0_i32, %c0_i32_0 : i32, i32
  }
  func.func @transform_3(%arg0: i32) -> (i32, i32) {
    %c0_i32 = arith.constant 0 : i32
    %c0_i32_0 = arith.constant 0 : i32
    %c0_i32_1 = arith.constant 0 : i32
    return %c0_i32, %c0_i32_0 : i32, i32
  }
  func.func @transform_4(%arg0: i32) -> (i32, i32) {
    %c0_i32 = arith.constant 0 : i32
    %c0_i32_0 = arith.constant 0 : i32
    return %arg0, %c0_i32 : i32, i32
  }
}

module attributes {stable_mosaic.version = 11 : i64} {
  func.func @_matmul_bn_act_kernel(%arg0: i32, %arg1: memref<536x432xbf16, #tpu.memory_space<vmem>>, %arg2: memref<432x128xbf16, #tpu.memory_space<vmem>>, %arg3: memref<1x128xf32, #tpu.memory_space<vmem>>, %arg4: memref<1x128xf32, #tpu.memory_space<vmem>>, %arg5: memref<536x128xbf16, #tpu.memory_space<vmem>>) attributes {dimension_semantics = [#tpu.dimension_semantics<parallel>], iteration_bounds = array<i64: 2>, scalar_prefetch = 0 : i64, scratch_operands = 0 : i64, tpu.core_type = #tpu.core_type<tc>, window_params = [{transform_indices = @transform_0, window_bounds = array<i64: 536, 432>}, {pipeline_mode = #tpu.pipeline_mode<synchronous>, transform_indices = @transform_1, window_bounds = array<i64: 432, 128>}, {pipeline_mode = #tpu.pipeline_mode<synchronous>, transform_indices = @transform_2, window_bounds = array<i64: 1, 128>}, {pipeline_mode = #tpu.pipeline_mode<synchronous>, transform_indices = @transform_3, window_bounds = array<i64: 1, 128>}, {transform_indices = @transform_4, window_bounds = array<i64: 536, 128>}]} {
    %c0 = arith.constant 0 : index
    %c0_0 = arith.constant 0 : index
    %0 = vector.load %arg1[%c0, %c0_0] : memref<536x432xbf16, #tpu.memory_space<vmem>>, vector<536x432xbf16>
    %c0_1 = arith.constant 0 : index
    %c0_2 = arith.constant 0 : index
    %1 = vector.load %arg2[%c0_1, %c0_2] : memref<432x128xbf16, #tpu.memory_space<vmem>>, vector<432x128xbf16>
    %cst = arith.constant dense<0.000000e+00> : vector<536x128xf32>
    %2 = tpu.matmul %0, %1, %cst {dimension_numbers = #tpu.dot_dimension_numbers<[1], [0], [0], [1], [0, 0, 1, 1], [], []>} : vector<536x432xbf16>, vector<432x128xbf16>, vector<536x128xf32> -> vector<536x128xf32>
    %c0_3 = arith.constant 0 : index
    %c0_4 = arith.constant 0 : index
    %3 = vector.load %arg3[%c0_3, %c0_4] : memref<1x128xf32, #tpu.memory_space<vmem>>, vector<1x128xf32>
    %4 = vector.broadcast %3 : vector<1x128xf32> to vector<536x128xf32>
    %5 = arith.mulf %2, %4 : vector<536x128xf32>
    %c0_5 = arith.constant 0 : index
    %c0_6 = arith.constant 0 : index
    %6 = vector.load %arg4[%c0_5, %c0_6] : memref<1x128xf32, #tpu.memory_space<vmem>>, vector<1x128xf32>
    %7 = vector.broadcast %6 : vector<1x128xf32> to vector<536x128xf32>
    %8 = arith.addf %5, %7 : vector<536x128xf32>
    %cst_7 = arith.constant 0.000000e+00 : f32
    %9 = vector.broadcast %cst_7 : f32 to vector<536x128xf32>
    %10 = arith.cmpf ogt, %8, %9 : vector<536x128xf32>
    %cst_8 = arith.constant 0.00999999977 : f32
    %11 = vector.broadcast %cst_8 : f32 to vector<536x128xf32>
    %12 = arith.mulf %11, %8 : vector<536x128xf32>
    %13 = arith.select %10, %8, %12 : vector<536x128xi1>, vector<536x128xf32>
    %14 = arith.truncf %13 : vector<536x128xf32> to vector<536x128xbf16>
    %c0_9 = arith.constant 0 : index
    %c0_10 = arith.constant 0 : index
    %15 = vector.load %arg5[%c0_9, %c0_10] : memref<536x128xbf16, #tpu.memory_space<vmem>>, vector<536x128xbf16>
    tpu.vector_store %arg5[%c0_9, %c0_10], %14 {strides = array<i32>} : memref<536x128xbf16, #tpu.memory_space<vmem>>, vector<536x128xbf16>,
    return
  }
  func.func @transform_0(%arg0: i32) -> (i32, i32) {
    %c0_i32 = arith.constant 0 : i32
    %c0_i32_0 = arith.constant 0 : i32
    return %arg0, %c0_i32 : i32, i32
  }
  func.func @transform_1(%arg0: i32) -> (i32, i32) {
    %c0_i32 = arith.constant 0 : i32
    %c0_i32_0 = arith.constant 0 : i32
    %c0_i32_1 = arith.constant 0 : i32
    return %c0_i32, %c0_i32_0 : i32, i32
  }
  func.func @transform_2(%arg0: i32) -> (i32, i32) {
    %c0_i32 = arith.constant 0 : i32
    %c0_i32_0 = arith.constant 0 : i32
    %c0_i32_1 = arith.constant 0 : i32
    return %c0_i32, %c0_i32_0 : i32, i32
  }
  func.func @transform_3(%arg0: i32) -> (i32, i32) {
    %c0_i32 = arith.constant 0 : i32
    %c0_i32_0 = arith.constant 0 : i32
    %c0_i32_1 = arith.constant 0 : i32
    return %c0_i32, %c0_i32_0 : i32, i32
  }
  func.func @transform_4(%arg0: i32) -> (i32, i32) {
    %c0_i32 = arith.constant 0 : i32
    %c0_i32_0 = arith.constant 0 : i32
    return %arg0, %c0_i32 : i32, i32
  }
}

module attributes {stable_mosaic.version = 11 : i64} {
  func.func @_matmul_bn_act_kernel(%arg0: i32, %arg1: memref<72x432xbf16, #tpu.memory_space<vmem>>, %arg2: memref<432x128xbf16, #tpu.memory_space<vmem>>, %arg3: memref<1x128xf32, #tpu.memory_space<vmem>>, %arg4: memref<1x128xf32, #tpu.memory_space<vmem>>, %arg5: memref<72x128xbf16, #tpu.memory_space<vmem>>) attributes {dimension_semantics = [#tpu.dimension_semantics<parallel>], iteration_bounds = array<i64: 1>, scalar_prefetch = 0 : i64, scratch_operands = 0 : i64, tpu.core_type = #tpu.core_type<tc>, window_params = [{transform_indices = @transform_0, window_bounds = array<i64: 72, 432>}, {pipeline_mode = #tpu.pipeline_mode<synchronous>, transform_indices = @transform_1, window_bounds = array<i64: 432, 128>}, {pipeline_mode = #tpu.pipeline_mode<synchronous>, transform_indices = @transform_2, window_bounds = array<i64: 1, 128>}, {pipeline_mode = #tpu.pipeline_mode<synchronous>, transform_indices = @transform_3, window_bounds = array<i64: 1, 128>}, {transform_indices = @transform_4, window_bounds = array<i64: 72, 128>}]} {
    %c0 = arith.constant 0 : index
    %c0_0 = arith.constant 0 : index
    %0 = vector.load %arg1[%c0, %c0_0] : memref<72x432xbf16, #tpu.memory_space<vmem>>, vector<72x432xbf16>
    %c0_1 = arith.constant 0 : index
    %c0_2 = arith.constant 0 : index
    %1 = vector.load %arg2[%c0_1, %c0_2] : memref<432x128xbf16, #tpu.memory_space<vmem>>, vector<432x128xbf16>
    %cst = arith.constant dense<0.000000e+00> : vector<72x128xf32>
    %2 = tpu.matmul %0, %1, %cst {dimension_numbers = #tpu.dot_dimension_numbers<[1], [0], [0], [1], [0, 0, 1, 1], [], []>} : vector<72x432xbf16>, vector<432x128xbf16>, vector<72x128xf32> -> vector<72x128xf32>
    %c0_3 = arith.constant 0 : index
    %c0_4 = arith.constant 0 : index
    %3 = vector.load %arg3[%c0_3, %c0_4] : memref<1x128xf32, #tpu.memory_space<vmem>>, vector<1x128xf32>
    %4 = vector.broadcast %3 : vector<1x128xf32> to vector<72x128xf32>
    %5 = arith.mulf %2, %4 : vector<72x128xf32>
    %c0_5 = arith.constant 0 : index
    %c0_6 = arith.constant 0 : index
    %6 = vector.load %arg4[%c0_5, %c0_6] : memref<1x128xf32, #tpu.memory_space<vmem>>, vector<1x128xf32>
    %7 = vector.broadcast %6 : vector<1x128xf32> to vector<72x128xf32>
    %8 = arith.addf %5, %7 : vector<72x128xf32>
    %cst_7 = arith.constant 0.000000e+00 : f32
    %9 = vector.broadcast %cst_7 : f32 to vector<72x128xf32>
    %10 = arith.cmpf ogt, %8, %9 : vector<72x128xf32>
    %cst_8 = arith.constant 0.00999999977 : f32
    %11 = vector.broadcast %cst_8 : f32 to vector<72x128xf32>
    %12 = arith.mulf %11, %8 : vector<72x128xf32>
    %13 = arith.select %10, %8, %12 : vector<72x128xi1>, vector<72x128xf32>
    %14 = arith.truncf %13 : vector<72x128xf32> to vector<72x128xbf16>
    %c0_9 = arith.constant 0 : index
    %c0_10 = arith.constant 0 : index
    %15 = vector.load %arg5[%c0_9, %c0_10] : memref<72x128xbf16, #tpu.memory_space<vmem>>, vector<72x128xbf16>
    tpu.vector_store %arg5[%c0_9, %c0_10], %14 {strides = array<i32>} : memref<72x128xbf16, #tpu.memory_space<vmem>>, vector<72x128xbf16>,
    return
  }
  func.func @transform_0(%arg0: i32) -> (i32, i32) {
    %c0_i32 = arith.constant 0 : i32
    %c0_i32_0 = arith.constant 0 : i32
    return %arg0, %c0_i32 : i32, i32
  }
  func.func @transform_1(%arg0: i32) -> (i32, i32) {
    %c0_i32 = arith.constant 0 : i32
    %c0_i32_0 = arith.constant 0 : i32
    %c0_i32_1 = arith.constant 0 : i32
    return %c0_i32, %c0_i32_0 : i32, i32
  }
  func.func @transform_2(%arg0: i32) -> (i32, i32) {
    %c0_i32 = arith.constant 0 : i32
    %c0_i32_0 = arith.constant 0 : i32
    %c0_i32_1 = arith.constant 0 : i32
    return %c0_i32, %c0_i32_0 : i32, i32
  }
  func.func @transform_3(%arg0: i32) -> (i32, i32) {
    %c0_i32 = arith.constant 0 : i32
    %c0_i32_0 = arith.constant 0 : i32
    %c0_i32_1 = arith.constant 0 : i32
    return %c0_i32, %c0_i32_0 : i32, i32
  }
  func.func @transform_4(%arg0: i32) -> (i32, i32) {
    %c0_i32 = arith.constant 0 : i32
    %c0_i32_0 = arith.constant 0 : i32
    return %arg0, %c0_i32 : i32, i32
  }
}

module attributes {stable_mosaic.version = 11 : i64} {
  func.func @_matmul_bn_act_kernel(%arg0: i32, %arg1: memref<8x432xbf16, #tpu.memory_space<vmem>>, %arg2: memref<432x512xbf16, #tpu.memory_space<vmem>>, %arg3: memref<1x512xf32, #tpu.memory_space<vmem>>, %arg4: memref<1x512xf32, #tpu.memory_space<vmem>>, %arg5: memref<8x512xf32, #tpu.memory_space<vmem>>) attributes {dimension_semantics = [#tpu.dimension_semantics<parallel>], iteration_bounds = array<i64: 1>, scalar_prefetch = 0 : i64, scratch_operands = 0 : i64, tpu.core_type = #tpu.core_type<tc>, window_params = [{transform_indices = @transform_0, window_bounds = array<i64: 8, 432>}, {pipeline_mode = #tpu.pipeline_mode<synchronous>, transform_indices = @transform_1, window_bounds = array<i64: 432, 512>}, {pipeline_mode = #tpu.pipeline_mode<synchronous>, transform_indices = @transform_2, window_bounds = array<i64: 1, 512>}, {pipeline_mode = #tpu.pipeline_mode<synchronous>, transform_indices = @transform_3, window_bounds = array<i64: 1, 512>}, {transform_indices = @transform_4, window_bounds = array<i64: 8, 512>}]} {
    %c0 = arith.constant 0 : index
    %c0_0 = arith.constant 0 : index
    %0 = vector.load %arg1[%c0, %c0_0] : memref<8x432xbf16, #tpu.memory_space<vmem>>, vector<8x432xbf16>
    %c0_1 = arith.constant 0 : index
    %c0_2 = arith.constant 0 : index
    %1 = vector.load %arg2[%c0_1, %c0_2] : memref<432x512xbf16, #tpu.memory_space<vmem>>, vector<432x512xbf16>
    %cst = arith.constant dense<0.000000e+00> : vector<8x512xf32>
    %2 = tpu.matmul %0, %1, %cst {dimension_numbers = #tpu.dot_dimension_numbers<[1], [0], [0], [1], [0, 0, 1, 1], [], []>} : vector<8x432xbf16>, vector<432x512xbf16>, vector<8x512xf32> -> vector<8x512xf32>
    %c0_3 = arith.constant 0 : index
    %c0_4 = arith.constant 0 : index
    %3 = vector.load %arg3[%c0_3, %c0_4] : memref<1x512xf32, #tpu.memory_space<vmem>>, vector<1x512xf32>
    %4 = vector.broadcast %3 : vector<1x512xf32> to vector<8x512xf32>
    %5 = arith.mulf %2, %4 : vector<8x512xf32>
    %c0_5 = arith.constant 0 : index
    %c0_6 = arith.constant 0 : index
    %6 = vector.load %arg4[%c0_5, %c0_6] : memref<1x512xf32, #tpu.memory_space<vmem>>, vector<1x512xf32>
    %7 = vector.broadcast %6 : vector<1x512xf32> to vector<8x512xf32>
    %8 = arith.addf %5, %7 : vector<8x512xf32>
    %cst_7 = arith.constant 0.000000e+00 : f32
    %9 = vector.broadcast %cst_7 : f32 to vector<8x512xf32>
    %10 = arith.cmpf ogt, %8, %9 : vector<8x512xf32>
    %cst_8 = arith.constant 0.00999999977 : f32
    %11 = vector.broadcast %cst_8 : f32 to vector<8x512xf32>
    %12 = arith.mulf %11, %8 : vector<8x512xf32>
    %13 = arith.select %10, %8, %12 : vector<8x512xi1>, vector<8x512xf32>
    %c0_9 = arith.constant 0 : index
    %c0_10 = arith.constant 0 : index
    %14 = vector.load %arg5[%c0_9, %c0_10] : memref<8x512xf32, #tpu.memory_space<vmem>>, vector<8x512xf32>
    tpu.vector_store %arg5[%c0_9, %c0_10], %13 {strides = array<i32>} : memref<8x512xf32, #tpu.memory_space<vmem>>, vector<8x512xf32>,
    return
  }
  func.func @transform_0(%arg0: i32) -> (i32, i32) {
    %c0_i32 = arith.constant 0 : i32
    %c0_i32_0 = arith.constant 0 : i32
    return %arg0, %c0_i32 : i32, i32
  }
  func.func @transform_1(%arg0: i32) -> (i32, i32) {
    %c0_i32 = arith.constant 0 : i32
    %c0_i32_0 = arith.constant 0 : i32
    %c0_i32_1 = arith.constant 0 : i32
    return %c0_i32, %c0_i32_0 : i32, i32
  }
  func.func @transform_2(%arg0: i32) -> (i32, i32) {
    %c0_i32 = arith.constant 0 : i32
    %c0_i32_0 = arith.constant 0 : i32
    %c0_i32_1 = arith.constant 0 : i32
    return %c0_i32, %c0_i32_0 : i32, i32
  }
  func.func @transform_3(%arg0: i32) -> (i32, i32) {
    %c0_i32 = arith.constant 0 : i32
    %c0_i32_0 = arith.constant 0 : i32
    %c0_i32_1 = arith.constant 0 : i32
    return %c0_i32, %c0_i32_0 : i32, i32
  }
  func.func @transform_4(%arg0: i32) -> (i32, i32) {
    %c0_i32 = arith.constant 0 : i32
    %c0_i32_0 = arith.constant 0 : i32
    return %arg0, %c0_i32 : i32, i32
  }
}

</mosaic_0001>

<bundles_post_ra>
// kernel: tile.9
= control target key start
LH: loop header
LB: loop body
LE: loop exit
PB: predicated region body
PF: predicated region fallthrough
CT: control target
= control target key end

     0   :  { %vm4_vm0 = vcmask 1047556   ;;  %vm65_vm1 = vcmask 130048   ;;  %s657_s22 = smov 112   ;;  %vm69_vm2 = vcmask 261120   ;;  %s658_s23 = smov 96   ;;  %vm6_vm3 = vcmask 392192   ;;  %s1236_s0 = inlined_call_operand.vmem [shape: f32[48,6,48], index: 0, kind: input, shape index: {}]   ;;  %s1237_s1 = inlined_call_operand.vmem [shape: f32[48,288], index: 1, kind: output, shape index: {}]  }
   0x1   :  { %v540_v0 = vld [vmem:[%s1236_s0 + $0x145] ss:$8 sm:$0xf]   ;;  %v569_v27 = vld [vmem:[%s1236_s0 + $0x142] ss:$8 sm:$0xf]  }
   0x2   :  { %v541_v1 = vld [vmem:[%s1236_s0 + $0x145] ss:$8 sm:$0xf0]   ;;  %v570_v28 = vld [vmem:[%s1236_s0 + $0x142] ss:$8 sm:$0xf0]  }
   0x3   :  { %v102_v2 = vsel %vm4_vm0, %v541_v1, %v540_v0  ;;  %v542_v3 = vld [vmem:[%s1236_s0 + $0x5] ss:$8 sm:$0xf]   ;;  %v571_v29 = vld [vmem:[%s1236_s0 + $0x102] ss:$8 sm:$0xf]   ;;  %v211_v41 = vsel %vm4_vm0, %v570_v28, %v569_v27 }
   0x4   :  { %v543_v4 = vld [vmem:[%s1236_s0 + $0x5] ss:$8 sm:$0xf0]   ;;  %v572_v30 = vld [vmem:[%s1236_s0 + $0x102] ss:$8 sm:$0xf0]  }
   0x5   :  { %v108_v5 = vsel %vm4_vm0, %v543_v4, %v542_v3  ;;  %v528_v6 = vld [vmem:[%s1236_s0 + $0x85] ss:$8 sm:$0xf]   ;;  %v564_v32 = vld [vmem:[%s1236_s0 + $0x42] ss:$8 sm:$0xf]   ;;  %v217_v42 = vsel %vm4_vm0, %v572_v30, %v571_v29 }
   0x6   :  { %v529_v7 = vld [vmem:[%s1236_s0 + $0x85] ss:$8 sm:$0xf0]   ;;  %v110_v8 = vsel %vm65_vm1, %v108_v5, %v102_v2  ;;  %v565_v33 = vld [vmem:[%s1236_s0 + $0x42] ss:$8 sm:$0xf0]   ;;  %v219_v47 = vsel %vm69_vm2, %v217_v42, %v211_v41 }
   0x7   :  { %v58_v9 = vsel %vm4_vm0, %v529_v7, %v528_v6  ;;  %v530_v10 = vld [vmem:[%s1236_s0 + $0x45] ss:$8 sm:$0xf]   ;;  %111 = vrot.lane.b32.xlu1 %v110_v8, %s657_s22  ;;  %v566_v34 = vld [vmem:[%s1236_s0 + $0x2] ss:$8 sm:$0xf]   ;;  %v190_v45 = vsel %vm4_vm0, %v565_v33, %v564_v32 }
   0x8   :  { %v531_v11 = vld [vmem:[%s1236_s0 + $0x45] ss:$8 sm:$0xf0]   ;;  %v567_v35 = vld [vmem:[%s1236_s0 + $0x2] ss:$8 sm:$0xf0]  }
   0x9   :  { %v64_v12 = vsel %vm4_vm0, %v531_v11, %v530_v10  ;;  %v546_v13 = vld [vmem:[%s1236_s0 + $0x5] ss:$8 sm:$0xf]   ;;  %v196_v46 = vsel %vm4_vm0, %v567_v35, %v566_v34  ;;  %v587_v48 = vld [vmem:[%s1236_s0 + $0xc2] ss:$8 sm:$0xf]  }
   0xa   :  { %v547_v14 = vld [vmem:[%s1236_s0 + $0x5] ss:$8 sm:$0xf0]   ;;  %v66_v15 = vsel %vm65_vm1, %v64_v12, %v58_v9  ;;  %v588_v49 = vld [vmem:[%s1236_s0 + $0xc2] ss:$8 sm:$0xf0]   ;;  %v198_v54 = vsel %vm69_vm2, %v196_v46, %v190_v45 }
   0xb   :  { %v548_v16 = vld [vmem:[%s1236_s0 + $0x105] ss:$8 sm:$0xf]   ;;  %67 = vrot.lane.b32.xlu0 %v66_v15, %s657_s22  ;;  %v124_v18 = vsel %vm4_vm0, %v547_v14, %v546_v13  ;;  %v589_v50 = vld [vmem:[%s1236_s0 + $0x42] ss:$8 sm:$0xf]   ;;  %v277_v0 = vsel %vm4_vm0, %v588_v49, %v587_v48 }
   0xc   :  { %v549_v17 = vld [vmem:[%s1236_s0 + $0x105] ss:$8 sm:$0xf0]   ;;  %v590_v51 = vld [vmem:[%s1236_s0 + $0x42] ss:$8 sm:$0xf0]  }
   0xd   :  { %v130_v19 = vsel %vm4_vm0, %v549_v17, %v548_v16  ;;  %v534_v20 = vld [vmem:[%s1236_s0 + $0x45] ss:$8 sm:$0xf]   ;;  %v581_v58 = vld [vmem:[%s1236_s0 + $0x102] ss:$8 sm:$0xf]   ;;  %v283_v1 = vsel %vm4_vm0, %v590_v51, %v589_v50 }
   0xe   :  { %v535_v21 = vld [vmem:[%s1236_s0 + $0x45] ss:$8 sm:$0xf0]   ;;  %v132_v26 = vsel %vm65_vm1, %v130_v19, %v124_v18  ;;  %v582_v59 = vld [vmem:[%s1236_s0 + $0x102] ss:$8 sm:$0xf0]   ;;  %v285_v8 = vsel %vm69_vm2, %v283_v1, %v277_v0 }
   0xf   :  { %v536_v22 = vld [vmem:[%s1236_s0 + $0x145] ss:$8 sm:$0xf]   ;;  %v80_v24 = vsel %vm4_vm0, %v535_v21, %v534_v20  ;;  %133 = vrot.lane.b32.xlu1 %v132_v26, %s657_s22  ;;  %v583_v61 = vld [vmem:[%s1236_s0 + $0x82] ss:$8 sm:$0xf]   ;;  %v255_v5 = vsel %vm4_vm0, %v582_v59, %v581_v58 }
  0x10   :  { %v537_v23 = vld [vmem:[%s1236_s0 + $0x145] ss:$8 sm:$0xf0]   ;;  %v584_v62 = vld [vmem:[%s1236_s0 + $0x82] ss:$8 sm:$0xf0]  }
  0x11   :  { %v86_v25 = vsel %vm4_vm0, %v537_v23, %v536_v22  ;;  %v552_v36 = vld [vmem:[%s1236_s0 + $0x105] ss:$8 sm:$0xf]   ;;  %v575_v2 = vld [vmem:[%s1236_s0 + $0x2] ss:$8 sm:$0xf]   ;;  %v261_v6 = vsel %vm4_vm0, %v584_v62, %v583_v61 }
  0x12   :  { %v88_v31 = vsel %vm65_vm1, %v86_v25, %v80_v24  ;;  %v553_v37 = vld [vmem:[%s1236_s0 + $0x105] ss:$8 sm:$0xf0]   ;;  %v576_v3 = vld [vmem:[%s1236_s0 + $0x2] ss:$8 sm:$0xf0]   ;;  %v263_v11 = vsel %vm69_vm2, %v261_v6, %v255_v5 }
  0x13   :  { %v146_v38 = vsel %vm4_vm0, %v553_v37, %v552_v36  ;;  %v554_v39 = vld [vmem:[%s1236_s0 + $0xc5] ss:$8 sm:$0xf]   ;;  %89 = vrot.lane.b32.xlu0 %v88_v31, %s657_s22  ;;  %v577_v4 = vld [vmem:[%s1236_s0 + $0xc2] ss:$8 sm:$0xf]   ;;  %v233_v9 = vsel %vm4_vm0, %v576_v3, %v575_v2 }
  0x14   :  { %v555_v40 = vld [vmem:[%s1236_s0 + $0xc5] ss:$8 sm:$0xf0]   ;;  %v578_v7 = vld [vmem:[%s1236_s0 + $0xc2] ss:$8 sm:$0xf0]  }
  0x15   :  { %v152_v43 = vsel %vm4_vm0, %v555_v40, %v554_v39  ;;  %v558_v52 = vld [vmem:[%s1236_s0 + $0xc5] ss:$8 sm:$0xf]   ;;  %v239_v10 = vsel %vm4_vm0, %v578_v7, %v577_v4  ;;  %v602_v12 = vld [vmem:[%s1236_s0 + $0x144] ss:$8 sm:$0xf]  }
  0x16   :  { %v154_v44 = vsel %vm65_vm1, %v152_v43, %v146_v38  ;;  %v559_v53 = vld [vmem:[%s1236_s0 + $0xc5] ss:$8 sm:$0xf0]   ;;  %v603_v13 = vld [vmem:[%s1236_s0 + $0x144] ss:$8 sm:$0xf0]   ;;  %v241_v14 = vsel %vm69_vm2, %v239_v10, %v233_v9 }
  0x17   :  { %155 = vrot.lane.b32.xlu2 %v154_v44, %s657_s22  ;;  %v168_v55 = vsel %vm4_vm0, %v559_v53, %v558_v52  ;;  %v560_v56 = vld [vmem:[%s1236_s0 + $0x85] ss:$8 sm:$0xf]   ;;  %220 = vrot.lane.b32.xlu1 %v219_v47, %s658_s23  ;;  %v593_v15 = vld [vmem:[%s1236_s0 + $0x82] ss:$8 sm:$0xf]   ;;  %v332_v21 = vsel %vm4_vm0, %v603_v13, %v602_v12 }
  0x18   :  { %v561_v57 = vld [vmem:[%s1236_s0 + $0x85] ss:$8 sm:$0xf0]   ;;  %v594_v16 = vld [vmem:[%s1236_s0 + $0x82] ss:$8 sm:$0xf0]  }
  0x19   :  { %v174_v60 = vsel %vm4_vm0, %v561_v57, %v560_v56  ;;  %v595_v17 = vld [vmem:[%s1236_s0 + $0x142] ss:$8 sm:$0xf]   ;;  %v599_v19 = vld [vmem:[%s1236_s0 + $0x44] ss:$8 sm:$0xf]   ;;  %v299_v22 = vsel %vm4_vm0, %v594_v16, %v593_v15 }
  0x1a   :  { %v176_v63 = vsel %vm65_vm1, %v174_v60, %v168_v55  ;;  %v596_v18 = vld [vmem:[%s1236_s0 + $0x142] ss:$8 sm:$0xf0]   ;;  %v600_v20 = vld [vmem:[%s1236_s0 + $0x44] ss:$8 sm:$0xf0]  }
  0x1b   :  { %199 = vrot.lane.b32.xlu0 %v198_v54, %s658_s23  ;;  %v305_v23 = vsel %vm4_vm0, %v596_v18, %v595_v17  ;;  %v321_v24 = vsel %vm4_vm0, %v600_v20, %v599_v19  ;;  %s659_s28 = smov 64   ;;  %v611_v26 = vld [vmem:[%s1236_s0 + $0xc4] ss:$8 sm:$0xf]   ;;  %s660_s24 = smov 48   ;;  %vm72_vm4 = vcmask 1048448  }
  0x1c   :  { %v307_v25 = vsel %vm69_vm2, %v305_v23, %v299_v22  ;;  %v612_v27 = vld [vmem:[%s1236_s0 + $0xc4] ss:$8 sm:$0xf0]   ;;  %v619_v35 = vld [vmem:[%s1236_s0 + $0x101] ss:$8 sm:$0xf]  }
  0x1d   :  { %v608_v28 = vld [vmem:[%s1236_s0 + $0x104] ss:$8 sm:$0xf]   ;;  %v365_v30 = vsel %vm4_vm0, %v612_v27, %v611_v26  ;;  %v620_v36 = vld [vmem:[%s1236_s0 + $0x101] ss:$8 sm:$0xf0]  }
  0x1e   :  { %v609_v29 = vld [vmem:[%s1236_s0 + $0x104] ss:$8 sm:$0xf0]   ;;  %v617_v37 = vld [vmem:[%s1236_s0 + $0x1] ss:$8 sm:$0xf]   ;;  %v397_v39 = vsel %vm4_vm0, %v620_v36, %v619_v35 }
  0x1f   :  { %177 = vrot.lane.b32.xlu2 %v176_v63, %s657_s22  ;;  %286 = vrot.lane.b32.xlu1 %v285_v8, %s658_s23  ;;  %v605_v31 = vld [vmem:[%s1236_s0 + $0x4] ss:$8 sm:$0xf]   ;;  %v354_v33 = vsel %vm4_vm0, %v609_v29, %v608_v28  ;;  %v618_v38 = vld [vmem:[%s1236_s0 + $0x1] ss:$8 sm:$0xf0]  }
  0x20   :  { %v606_v32 = vld [vmem:[%s1236_s0 + $0x4] ss:$8 sm:$0xf0]   ;;  %v387_v42 = vsel %vm4_vm0, %v618_v38, %v617_v37  ;;  %v628_v44 = vld [vmem:[%s1236_s0 + $0x41] ss:$8 sm:$0xf]  }
  0x21   :  { %v343_v34 = vsel %vm4_vm0, %v606_v32, %v605_v31  ;;  %v614_v40 = vld [vmem:[%s1236_s0 + $0x84] ss:$8 sm:$0xf]   ;;  %v629_v45 = vld [vmem:[%s1236_s0 + $0x41] ss:$8 sm:$0xf0]  }
  0x22   :  { %v615_v41 = vld [vmem:[%s1236_s0 + $0x84] ss:$8 sm:$0xf0]   ;;  %v625_v46 = vld [vmem:[%s1236_s0 + $0x81] ss:$8 sm:$0xf]   ;;  %v430_v48 = vsel %vm4_vm0, %v629_v45, %v628_v44 }
  0x23   :  { %264 = vrot.lane.b32.xlu0 %v263_v11, %s658_s23  ;;  %v376_v43 = vsel %vm4_vm0, %v615_v41, %v614_v40  ;;  %v626_v47 = vld [vmem:[%s1236_s0 + $0x81] ss:$8 sm:$0xf0]   ;;  %v637_v53 = vld [vmem:[%s1236_s0 + $0x143] ss:$8 sm:$0xf]  }
  0x24   :  { %v622_v49 = vld [vmem:[%s1236_s0 + $0xc1] ss:$8 sm:$0xf]   ;;  %v419_v51 = vsel %vm4_vm0, %v626_v47, %v625_v46  ;;  %v638_v54 = vld [vmem:[%s1236_s0 + $0x143] ss:$8 sm:$0xf0]  }
  0x25   :  { %v623_v50 = vld [vmem:[%s1236_s0 + $0xc1] ss:$8 sm:$0xf0]   ;;  %v634_v55 = vld [vmem:[%s1236_s0 + $0x43] ss:$8 sm:$0xf]   ;;  %v463_v57 = vsel %vm4_vm0, %v638_v54, %v637_v53 }
  0x26   :  { %v408_v52 = vsel %vm4_vm0, %v623_v50, %v622_v49  ;;  %v635_v56 = vld [vmem:[%s1236_s0 + $0x43] ss:$8 sm:$0xf0]   ;;  %v631_v58 = vld [vmem:[%s1236_s0 + $0x141] ss:$8 sm:$0xf]  }
  0x27   :  { %242 = vrot.lane.b32.xlu2 %v241_v14, %s658_s23  ;;  %333 = vrot.lane.b32.xlu1 %v332_v21, %s659_s28  ;;  %v632_v59 = vld [vmem:[%s1236_s0 + $0x141] ss:$8 sm:$0xf0]   ;;  %v452_v60 = vsel %vm4_vm0, %v635_v56, %v634_v55  ;;  %s661_s18 = smov 16   ;;  %vm204_vm5 = vcmask 1048320   ;;  %vm324_vm6 = vcmask 916992  }
  0x28   :  { %v441_v61 = vsel %vm4_vm0, %v632_v59, %v631_v58  ;;  %v646_v62 = vld [vmem:[%s1236_s0 + $0xc3] ss:$8 sm:$0xf]   ;;  %v519_v10 = vld [vmem:[%s1236_s0 + $0xc0] ss:$8 sm:$0xf]  }
  0x29   :  { %v647_v63 = vld [vmem:[%s1236_s0 + $0xc3] ss:$8 sm:$0xf0]   ;;  %v520_v11 = vld [vmem:[%s1236_s0 + $0xc0] ss:$8 sm:$0xf0]  }
  0x2a   :  { %v643_v0 = vld [vmem:[%s1236_s0 + $0x103] ss:$8 sm:$0xf]   ;;  %v496_v2 = vsel %vm4_vm0, %v647_v63, %v646_v62  ;;  %v31_v12 = vsel %vm4_vm0, %v520_v11, %v519_v10  ;;  %v522_v13 = vld [vmem:[%s1236_s0 + $0x100] ss:$8 sm:$0xf]  }
  0x2b   :  { %322 = vrot.lane.b32.xlu0 %v321_v24, %s659_s28  ;;  %v644_v1 = vld [vmem:[%s1236_s0 + $0x103] ss:$8 sm:$0xf0]   ;;  %521 = vst.msk [vmem:[%s1237_s1 + $0x48] sm:$0xff] %vm6_vm3, %v31_v12   ;;  %vm390_vm7 = vcmask 785792   ;;  %vm455_vm8 = vcmask 523392  }
  0x2c   :  { %v640_v3 = vld [vmem:[%s1236_s0 + $0x3] ss:$8 sm:$0xf]   ;;  %v485_v5 = vsel %vm4_vm0, %v644_v1, %v643_v0  ;;  %v523_v14 = vld [vmem:[%s1236_s0 + $0x100] ss:$8 sm:$0xf0]  }
  0x2d   :  { %v641_v4 = vld [vmem:[%s1236_s0 + $0x3] ss:$8 sm:$0xf0]   ;;  %v40_v15 = vsel %vm4_vm0, %v523_v14, %v522_v13  ;;  %v2_v16 = vld [vmem:[%s1236_s0] ss:$8 sm:$0xf]  }
  0x2e   :  { %v474_v6 = vsel %vm4_vm0, %v641_v4, %v640_v3  ;;  %v649_v7 = vld [vmem:[%s1236_s0 + $0x83] ss:$8 sm:$0xf]   ;;  %v3_v17 = vld [vmem:[%s1236_s0] ss:$8 sm:$0xf0]  }
  0x2f   :  { %308 = vrot.lane.b32.xlu2 %v307_v25, %s658_s23  ;;  %366 = vrot.lane.b32.xlu1 %v365_v30, %s659_s28  ;;  %v650_v8 = vld [vmem:[%s1236_s0 + $0x83] ss:$8 sm:$0xf0]   ;;  %524 = vst.msk [vmem:[%s1237_s1 + $0x60] sm:$0xff] %vm6_vm3, %v40_v15   ;;  %v5_v18 = vsel %vm4_vm0, %v3_v17, %v2_v16 }
  0x30   :  { %v507_v9 = vsel %vm4_vm0, %v650_v8, %v649_v7  ;;  %7 = vst.msk [vmem:[%s1237_s1] sm:$0xff] %vm6_vm3, %v5_v18   ;;  %v525_v20 = vld [vmem:[%s1236_s0 + $0x140] ss:$8 sm:$0xf]  }
  0x31   :  { %v526_v21 = vld [vmem:[%s1236_s0 + $0x140] ss:$8 sm:$0xf0]  }
  0x32   :  { %v49_v22 = vsel %vm4_vm0, %v526_v21, %v525_v20  ;;  %v513_v23 = vld [vmem:[%s1236_s0 + $0x40] ss:$8 sm:$0xf]  }
  0x33   :  { %355 = vrot.lane.b32.xlu0 %v354_v33, %s659_s28  ;;  %527 = vst.msk [vmem:[%s1237_s1 + $0x78] sm:$0xff] %vm6_vm3, %v49_v22   ;;  %v514_v24 = vld [vmem:[%s1236_s0 + $0x40] ss:$8 sm:$0xf0]  }
  0x34   :  { %v13_v25 = vsel %vm4_vm0, %v514_v24, %v513_v23  ;;  %v516_v26 = vld [vmem:[%s1236_s0 + $0x80] ss:$8 sm:$0xf]  }
  0x35   :  { %v517_v27 = vld [vmem:[%s1236_s0 + $0x80] ss:$8 sm:$0xf0]   ;;  %515 = vst.msk [vmem:[%s1237_s1 + $0x18] sm:$0xff] %vm6_vm3, %v13_v25  }
  0x36   :  { %v22_v28 = vsel %vm4_vm0, %v517_v27, %v516_v26 }
  0x37   :  { %344 = vrot.lane.b32.xlu2 %v343_v34, %s659_s28  ;;  %398 = vrot.lane.b32.xlu1 %v397_v39, %s660_s24  ;;  %518 = vst.msk [vmem:[%s1237_s1 + $0x30] sm:$0xff] %vm6_vm3, %v22_v28  }
  0x3b   :  { %388 = vrot.lane.b32.xlu0 %v387_v42, %s660_s24 }
  0x3f   :  { %377 = vrot.lane.b32.xlu2 %v376_v43, %s659_s28  ;;  %431 = vrot.lane.b32.xlu1 %v430_v48, %s660_s24 }
  0x43   :  { %420 = vrot.lane.b32.xlu0 %v419_v51, %s660_s24 }
  0x47   :  { %409 = vrot.lane.b32.xlu2 %v408_v52, %s660_s24  ;;  %464 = vrot.lane.b32.xlu1 %v463_v57, %s661_s18 }
  0x4b   :  { %453 = vrot.lane.b32.xlu0 %v452_v60, %s661_s18 }
  0x4f   :  { %442 = vrot.lane.b32.xlu2 %v441_v61, %s660_s24  ;;  %497 = vrot.lane.b32.xlu1 %v496_v2, %s661_s18 }
  0x53   :  { %486 = vrot.lane.b32.xlu0 %v485_v5, %s661_s18 }
  0x57   :  { %475 = vrot.lane.b32.xlu2 %v474_v6, %s661_s18 }
  0x5f   :  { %508 = vrot.lane.b32.xlu2 %v507_v9, %s661_s18 }
  0x71   :  { %v156_v19 = vpop.permute.xlu2 %155  }
  0x72   :  { %556 = vst.msk [vmem:[%s1237_s1 + $0x70] sm:$0xff] %vm69_vm2, %v156_v19  }
  0x73   :  { %557 = vst.msk [vmem:[%s1237_s1 + $0x50] sm:$0xff] %vm72_vm4, %v156_v19  }
  0x79   :  { %v178_v29 = vpop.permute.xlu2 %177   ;;  %v112_v30 = vpop.permute.xlu1 %111  }
  0x7a   :  { %562 = vst.msk [vmem:[%s1237_s1 + $0x58] sm:$0xff] %vm69_vm2, %v178_v29  }
  0x7b   :  { %563 = vst.msk [vmem:[%s1237_s1 + $0x38] sm:$0xff] %vm72_vm4, %v178_v29  }
  0x7c   :  { %544 = vst.msk [vmem:[%s1237_s1 + $0x88] sm:$0xff] %vm69_vm2, %v112_v30  }
  0x7d   :  { %545 = vst.msk [vmem:[%s1237_s1 + $0x8] sm:$0xff] %vm72_vm4, %v112_v30   ;;  %v68_v31 = vpop.permute.xlu0 %67  }
  0x7e   :  { %532 = vst.msk [vmem:[%s1237_s1 + $0x40] sm:$0xff] %vm69_vm2, %v68_v31  }
  0x7f   :  { %533 = vst.msk [vmem:[%s1237_s1 + $0x20] sm:$0xff] %vm72_vm4, %v68_v31  }
  0x81   :  { %v243_v32 = vpop.permute.xlu2 %242   ;;  %v134_v33 = vpop.permute.xlu1 %133  }
  0x82   :  { %579 = vst.msk [vmem:[%s1237_s1 + $0x8] sm:$0xff] %vm65_vm1, %v243_v32  }
  0x83   :  { %580 = vst.msk [vmem:[%s1237_s1 + $0x48] sm:$0xff] %vm204_vm5, %v243_v32  }
  0x84   :  { %550 = vst.msk [vmem:[%s1237_s1 + $0x10] sm:$0xff] %vm69_vm2, %v134_v33  }
  0x85   :  { %551 = vst.msk [vmem:[%s1237_s1 + $0x68] sm:$0xff] %vm72_vm4, %v134_v33   ;;  %v90_v34 = vpop.permute.xlu0 %89  }
  0x86   :  { %538 = vst.msk [vmem:[%s1237_s1 + $0x28] sm:$0xff] %vm69_vm2, %v90_v34  }
  0x87   :  { %539 = vst.msk [vmem:[%s1237_s1 + $0x80] sm:$0xff] %vm72_vm4, %v90_v34  }
  0x89   :  { %v309_v35 = vpop.permute.xlu2 %308   ;;  %v221_v36 = vpop.permute.xlu1 %220  }
  0x8a   :  { %597 = vst.msk [vmem:[%s1237_s1 + $0x38] sm:$0xff] %vm65_vm1, %v309_v35  }
  0x8b   :  { %598 = vst.msk [vmem:[%s1237_s1 + $0x78] sm:$0xff] %vm204_vm5, %v309_v35  }
  0x8c   :  { %573 = vst.msk [vmem:[%s1237_s1 + $0x80] sm:$0xff] %vm65_vm1, %v221_v36  }
  0x8d   :  { %574 = vst.msk [vmem:[%s1237_s1 + $0x60] sm:$0xff] %vm204_vm5, %v221_v36   ;;  %v200_v37 = vpop.permute.xlu0 %199  }
  0x8e   :  { %568 = vst.msk [vmem:[%s1237_s1 + $0x20] sm:$0xff] %vm65_vm1, %v200_v37  }
  0x8f   :  { %205 = vst.msk [vmem:[%s1237_s1] sm:$0xff] %vm204_vm5, %v200_v37  }
  0x91   :  { %v345_v38 = vpop.permute.xlu2 %344   ;;  %v287_v39 = vpop.permute.xlu1 %286  }
  0x92   :  { %607 = vst.msk [vmem:[%s1237_s1 + $0x8] sm:$0xff] %vm324_vm6, %v345_v38  }
  0x93   :  { %591 = vst.msk [vmem:[%s1237_s1 + $0x50] sm:$0xff] %vm65_vm1, %v287_v39  }
  0x94   :  { %592 = vst.msk [vmem:[%s1237_s1 + $0x18] sm:$0xff] %vm204_vm5, %v287_v39  }
  0x95   :  { %v265_v40 = vpop.permute.xlu0 %264  }
  0x96   :  { %585 = vst.msk [vmem:[%s1237_s1 + $0x68] sm:$0xff] %vm65_vm1, %v265_v40  }
  0x97   :  { %586 = vst.msk [vmem:[%s1237_s1 + $0x30] sm:$0xff] %vm204_vm5, %v265_v40  }
  0x99   :  { %v378_v41 = vpop.permute.xlu2 %377   ;;  %v334_v42 = vpop.permute.xlu1 %333  }
  0x9a   :  { %616 = vst.msk [vmem:[%s1237_s1 + $0x38] sm:$0xff] %vm324_vm6, %v378_v41  }
  0x9b   :  { %604 = vst.msk [vmem:[%s1237_s1 + $0x80] sm:$0xff] %vm324_vm6, %v334_v42  }
  0x9d   :  { %v323_v43 = vpop.permute.xlu0 %322  }
  0x9e   :  { %601 = vst.msk [vmem:[%s1237_s1 + $0x20] sm:$0xff] %vm324_vm6, %v323_v43  }
  0xa1   :  { %v410_v44 = vpop.permute.xlu2 %409   ;;  %v367_v45 = vpop.permute.xlu1 %366  }
  0xa2   :  { %624 = vst.msk [vmem:[%s1237_s1 + $0x48] sm:$0xff] %vm390_vm7, %v410_v44  }
  0xa3   :  { %613 = vst.msk [vmem:[%s1237_s1 + $0x50] sm:$0xff] %vm324_vm6, %v367_v45  }
  0xa5   :  { %v356_v46 = vpop.permute.xlu0 %355  }
  0xa6   :  { %610 = vst.msk [vmem:[%s1237_s1 + $0x68] sm:$0xff] %vm324_vm6, %v356_v46  }
  0xa9   :  { %v443_v47 = vpop.permute.xlu2 %442   ;;  %v399_v48 = vpop.permute.xlu1 %398  }
  0xaa   :  { %633 = vst.msk [vmem:[%s1237_s1 + $0x78] sm:$0xff] %vm390_vm7, %v443_v47  }
  0xab   :  { %621 = vst.msk [vmem:[%s1237_s1 + $0x60] sm:$0xff] %vm390_vm7, %v399_v48  }
  0xad   :  { %v389_v49 = vpop.permute.xlu0 %388  }
  0xae   :  { %391 = vst.msk [vmem:[%s1237_s1] sm:$0xff] %vm390_vm7, %v389_v49  }
  0xb1   :  { %v476_v50 = vpop.permute.xlu2 %475   ;;  %v432_v51 = vpop.permute.xlu1 %431  }
  0xb2   :  { %642 = vst.msk [vmem:[%s1237_s1 + $0x8] sm:$0xff] %vm455_vm8, %v476_v50  }
  0xb3   :  { %630 = vst.msk [vmem:[%s1237_s1 + $0x18] sm:$0xff] %vm390_vm7, %v432_v51  }
  0xb5   :  { %v421_v52 = vpop.permute.xlu0 %420  }
  0xb6   :  { %627 = vst.msk [vmem:[%s1237_s1 + $0x30] sm:$0xff] %vm390_vm7, %v421_v52  }
  0xb9   :  { %v509_v53 = vpop.permute.xlu2 %508   ;;  %v465_v54 = vpop.permute.xlu1 %464  }
  0xba   :  { %651 = vst.msk [vmem:[%s1237_s1 + $0x38] sm:$0xff] %vm455_vm8, %v509_v53  }
  0xbb   :  { %639 = vst.msk [vmem:[%s1237_s1 + $0x80] sm:$0xff] %vm455_vm8, %v465_v54  }
  0xbd   :  { %v454_v55 = vpop.permute.xlu0 %453  }
  0xbe   :  { %636 = vst.msk [vmem:[%s1237_s1 + $0x20] sm:$0xff] %vm455_vm8, %v454_v55  }
  0xc1   :  { %v498_v56 = vpop.permute.xlu1 %497  }
  0xc2   :  { %648 = vst.msk [vmem:[%s1237_s1 + $0x50] sm:$0xff] %vm455_vm8, %v498_v56  }
  0xc5   :  { %v487_v57 = vpop.permute.xlu0 %486  }
  0xc6   :  { %645 = vst.msk [vmem:[%s1237_s1 + $0x68] sm:$0xff] %vm455_vm8, %v487_v57  }

// kernel: re_vision_eresnet_forward.5
= control target key start
LH: loop header
LB: loop body
LE: loop exit
PB: predicated region body
PF: predicated region fallthrough
CT: control target
= control target key end

     0   :  { %vm269_vm0 = vcmask 392192   ;;  %vm516_vm1 = vcmask 261120   ;;  %s7512_s0 = inlined_call_operand.vmem [shape: f32[48,288], index: 0, kind: input, shape index: {}]   ;;  %s7513_s1 = inlined_call_operand.vmem [shape: f32[48,48], index: 1, kind: input, shape index: {}]   ;;  %s7514_s2 = inlined_call_operand.vmem [shape: f32[48,48], index: 2, kind: input, shape index: {}]   ;;  %s7515_s3 = inlined_call_operand.vmem [shape: f32[288,288], index: 3, kind: input, shape index: {}]   ;;  %s7516_s4 = inlined_call_operand.vmem [shape: f32[288,288], index: 4, kind: input, shape index: {}]   ;;  %s7517_s5 = inlined_call_operand.vmem [shape: f32[48,288], index: 5, kind: input, shape index: {}]   ;;  %s7518_s6 = inlined_call_operand.vmem [shape: f32[48,288], index: 6, kind: output, shape index: {}]  }
   0x1   :  { %v38_v0 = vld [vmem:[%s7512_s0 + $0x78] sm:$0xff]  ;;  %v39_v1 = vld [vmem:[%s7512_s0 + $0x80] sm:$0xff]  ;;  %v40_v2 = vld [vmem:[%s7512_s0 + $0x88] sm:$0xff] }
   0x2   :  { %298 = vmatpush.msra.mxu0 %v38_v0  ;;  %333 = vmatpush.msra.mxu1 %v39_v1  ;;  %v35_v3 = vld [vmem:[%s7512_s0 + $0x60] sm:$0xff]  ;;  %v36_v4 = vld [vmem:[%s7512_s0 + $0x68] sm:$0xff]  ;;  %v37_v5 = vld [vmem:[%s7512_s0 + $0x70] sm:$0xff] }
   0x3   :  { %368 = vmatpush.msra.mxu2 %v40_v2  ;;  %v32_v6 = vld [vmem:[%s7512_s0 + $0x48] sm:$0xff]  ;;  %v33_v7 = vld [vmem:[%s7512_s0 + $0x50] sm:$0xff]  ;;  %421 = vmatpush.msra.mxu3 %v38_v0  ;;  %v34_v8 = vld [vmem:[%s7512_s0 + $0x58] sm:$0xff] }
   0x4   :  { %299 = vmatpush.msra.mxu0 %v35_v3  ;;  %334 = vmatpush.msra.mxu1 %v36_v4  ;;  %v29_v9 = vld [vmem:[%s7512_s0 + $0x30] sm:$0xff]  ;;  %v30_v10 = vld [vmem:[%s7512_s0 + $0x38] sm:$0xff]  ;;  %v31_v11 = vld [vmem:[%s7512_s0 + $0x40] sm:$0xff] }
   0x5   :  { %369 = vmatpush.msra.mxu2 %v37_v5  ;;  %422 = vmatpush.msra.mxu3 %v35_v3  ;;  %v26_v12 = vld [vmem:[%s7512_s0 + $0x18] sm:$0xff]  ;;  %v27_v13 = vld [vmem:[%s7512_s0 + $0x20] sm:$0xff]  ;;  %v28_v14 = vld [vmem:[%s7512_s0 + $0x28] sm:$0xff] }
   0x6   :  { %300 = vmatpush.msra.mxu0 %v32_v6  ;;  %335 = vmatpush.msra.mxu1 %v33_v7  ;;  %v23_v15 = vld [vmem:[%s7512_s0] sm:$0xff]  ;;  %v24_v16 = vld [vmem:[%s7512_s0 + $0x8] sm:$0xff]  ;;  %v25_v17 = vld [vmem:[%s7512_s0 + $0x10] sm:$0xff] }
   0x7   :  { %370 = vmatpush.msra.mxu2 %v34_v8  ;;  %423 = vmatpush.msra.mxu3 %v32_v6  ;;  %v41_v18 = vld [vmem:[%s7513_s1] sm:$0xff]  ;;  %v42_v19 = vld [vmem:[%s7513_s1 + $0x8] sm:$0xff]  ;;  %v43_v21 = vld [vmem:[%s7513_s1 + $0x10] sm:$0xff] }
   0x8   :  { %301 = vmatpush.msra.mxu0 %v29_v9  ;;  %336 = vmatpush.msra.mxu1 %v30_v10  ;;  %v3695_v20 = vld [vmem:[%s7514_s2] sm:$0xff]  ;;  %v3708_v22 = vld [vmem:[%s7514_s2 + $0x8] sm:$0xff]  ;;  %v44_v23 = vld [vmem:[%s7513_s1 + $0x18] sm:$0xff] }
   0x9   :  { %371 = vmatpush.msra.mxu2 %v31_v11  ;;  %424 = vmatpush.msra.mxu3 %v29_v9  ;;  %v3721_v24 = vld [vmem:[%s7514_s2 + $0x10] sm:$0xff]  ;;  %v45_v25 = vld [vmem:[%s7513_s1 + $0x20] sm:$0xff]  ;;  %v98_v26 = vld [vmem:[%s7515_s3 + $0x168] sm:$0xff] }
   0xa   :  { %302 = vmatpush.msra.mxu0 %v26_v12  ;;  %337 = vmatpush.msra.mxu1 %v27_v13  ;;  %v3737_v27 = vld [vmem:[%s7515_s3 + $0x2e8] sm:$0xff]  ;;  %v99_v28 = vld [vmem:[%s7515_s3 + $0x170] sm:$0xff]  ;;  %v96_v31 = vld [vmem:[%s7515_s3 + $0x158] sm:$0xff] }
   0xb   :  { %372 = vmatpush.msra.mxu2 %v28_v14  ;;  %425 = vmatpush.msra.mxu3 %v26_v12  ;;  %v95_v29 = vld [vmem:[%s7515_s3 + $0x150] sm:$0xff]  ;;  %v92_v32 = vld [vmem:[%s7515_s3 + $0x138] sm:$0xff]  ;;  %v93_v34 = vld [vmem:[%s7515_s3 + $0x140] sm:$0xff] }
   0xc   :  { %303 = vmatpush.msra.mxu0 %v23_v15  ;;  %338 = vmatpush.msra.mxu1 %v24_v16  ;;  %v3749_v30 = vld [vmem:[%s7515_s3 + $0x2d0] sm:$0xff]  ;;  %v3760_v33 = vld [vmem:[%s7515_s3 + $0x2b8] sm:$0xff]  ;;  %v46_v35 = vld [vmem:[%s7513_s1 + $0x28] sm:$0xff] }
   0xd   :  { %373 = vmatpush.msra.mxu2 %v25_v17  ;;  %3029 = vmatmul.msk.f32.vlgmr.msra.gmra.mxu0 %vm269_vm0, %v41_v18  ;;  %v89_v36 = vld [vmem:[%s7515_s3 + $0x120] sm:$0xff]  ;;  %v3775_v37 = vld [vmem:[%s7514_s2 + $0x18] sm:$0xff]  ;;  %v90_v39 = vld [vmem:[%s7515_s3 + $0x128] sm:$0xff] }
   0xe   :  { %3035 = vmatmul.msk.f32.vlgmr.msra.gmra.mxu1 %vm269_vm0, %v41_v18  ;;  %3041 = vmatmul.msk.f32.vlgmr.msra.gmra.mxu2 %vm269_vm0, %v41_v18  ;;  %v3781_v38 = vld [vmem:[%s7515_s3 + $0x2a0] sm:$0xff]  ;;  %v86_v40 = vld [vmem:[%s7515_s3 + $0x108] sm:$0xff]  ;;  %v87_v42 = vld [vmem:[%s7515_s3 + $0x110] sm:$0xff] }
   0xf   :  { %491 = vmatpush.msrb.mxu1 %v40_v2  ;;  %456 = vmatpush.msrb.mxu0 %v39_v1  ;;  %v3797_v41 = vld [vmem:[%s7515_s3 + $0x288] sm:$0xff]  ;;  %v83_v43 = vld [vmem:[%s7515_s3 + $0xf0] sm:$0xff]  ;;  %v84_v45 = vld [vmem:[%s7515_s3 + $0xf8] sm:$0xff] }
  0x10   :  { %426 = vmatpush.msra.mxu3 %v23_v15  ;;  %535 = vmatpush.msrb.mxu2 %v98_v26  ;;  %v3809_v44 = vld [vmem:[%s7515_s3 + $0x270] sm:$0xff]  ;;  %v80_v46 = vld [vmem:[%s7515_s3 + $0xd8] sm:$0xff]  ;;  %v3826_v48 = vld [vmem:[%s7514_s2 + $0x20] sm:$0xff] }
  0x11   :  { %492 = vmatpush.msrb.mxu1 %v37_v5  ;;  %457 = vmatpush.msrb.mxu0 %v36_v4  ;;  %v3821_v47 = vld [vmem:[%s7515_s3 + $0x258] sm:$0xff]  ;;  %v77_v49 = vld [vmem:[%s7515_s3 + $0xc0] sm:$0xff]  ;;  %v78_v52 = vld [vmem:[%s7515_s3 + $0xc8] sm:$0xff] }
  0x12   :  { %3047 = vmatmul.msk.f32.vlgmr.msra.gmra.mxu3 %vm269_vm0, %v3695_v20  ;;  %536 = vmatpush.msrb.mxu2 %v95_v29  ;;  %v81_v50 = vld [vmem:[%s7515_s3 + $0xe0] sm:$0xff]  ;;  %v74_v53 = vld [vmem:[%s7515_s3 + $0xa8] sm:$0xff]  ;;  %v71_v55 = vld [vmem:[%s7515_s3 + $0x90] sm:$0xff] }
  0x13   :  { %493 = vmatpush.msrb.mxu1 %v34_v8  ;;  %458 = vmatpush.msrb.mxu0 %v33_v7  ;;  %v3838_v51 = vld [vmem:[%s7515_s3 + $0x240] sm:$0xff]  ;;  %v3856_v54 = vld [vmem:[%s7515_s3 + $0x228] sm:$0xff]  ;;  %v75_v56 = vld [vmem:[%s7515_s3 + $0xb0] sm:$0xff] }
  0x14   :  { %570 = vmatpush.msrb.mxu3 %v3737_v27  ;;  %537 = vmatpush.msrb.mxu2 %v92_v32  ;;  %v3868_v57 = vld [vmem:[%s7515_s3 + $0x210] sm:$0xff]  ;;  %v68_v58 = vld [vmem:[%s7515_s3 + $0x78] sm:$0xff]  ;;  %v52_v60 = vld [vmem:[%s7514_s2 + $0x28] sm:$0xff] }
  0x15   :  { %3030 = vmatmul.msk.f32.gmra.mxu0 %vm269_vm0, %v42_v19  ;;  %494 = vmatpush.msrb.mxu1 %v31_v11  ;;  %v72_v59 = vld [vmem:[%s7515_s3 + $0x98] sm:$0xff]  ;;  %v69_v62 = vld [vmem:[%s7515_s3 + $0x80] sm:$0xff]  ;;  %v66_v1 = vld [vmem:[%s7515_s3 + $0x68] sm:$0xff] }
  0x16   :  { %3036 = vmatmul.msk.f32.gmra.mxu1 %vm269_vm0, %v42_v19  ;;  %3042 = vmatmul.msk.f32.gmra.mxu2 %vm269_vm0, %v42_v19  ;;  %v3884_v61 = vld [vmem:[%s7515_s3 + $0x1f8] sm:$0xff]  ;;  %v65_v63 = vld [vmem:[%s7515_s3 + $0x60] sm:$0xff]  ;;  %v62_v2 = vld [vmem:[%s7515_s3 + $0x48] sm:$0xff] }
  0x17   :  { %495 = vmatpush.msrb.mxu1 %v28_v14  ;;  %459 = vmatpush.msrb.mxu0 %v30_v10  ;;  %v3898_v0 = vld [vmem:[%s7515_s3 + $0x1e0] sm:$0xff]  ;;  %v3912_v3 = vld [vmem:[%s7515_s3 + $0x1c8] sm:$0xff]  ;;  %v63_v4 = vld [vmem:[%s7515_s3 + $0x50] sm:$0xff] }
  0x18   :  { %571 = vmatpush.msrb.mxu3 %v3749_v30  ;;  %538 = vmatpush.msrb.mxu2 %v89_v36  ;;  %v59_v5 = vld [vmem:[%s7515_s3 + $0x30] sm:$0xff]  ;;  %v60_v7 = vld [vmem:[%s7515_s3 + $0x38] sm:$0xff]  ;;  %v57_v10 = vld [vmem:[%s7515_s3 + $0x20] sm:$0xff] }
  0x19   :  { %496 = vmatpush.msrb.mxu1 %v25_v17  ;;  %460 = vmatpush.msrb.mxu0 %v27_v13  ;;  %v3924_v6 = vld [vmem:[%s7515_s3 + $0x1b0] sm:$0xff]  ;;  %v56_v8 = vld [vmem:[%s7515_s3 + $0x18] sm:$0xff]  ;;  %v53_v11 = vld [vmem:[%s7515_s3] sm:$0xff] }
  0x1a   :  { %3048 = vmatmul.msk.f32.gmra.mxu3 %vm269_vm0, %v3708_v22  ;;  %539 = vmatpush.msrb.mxu2 %v86_v40  ;;  %v3937_v9 = vld [vmem:[%s7515_s3 + $0x198] sm:$0xff]  ;;  %v3963_v12 = vld [vmem:[%s7515_s3 + $0x180] sm:$0xff]  ;;  %v158_v13 = vld [vmem:[%s7515_s3 + $0x348] sm:$0xff] }
  0x1b   :  { %461 = vmatpush.msrb.mxu0 %v24_v16  ;;  %640 = vmatpush.msra.mxu1 %v99_v28  ;;  %v54_v14 = vld [vmem:[%s7515_s3 + $0x8] sm:$0xff]  ;;  %v155_v15 = vld [vmem:[%s7515_s3 + $0x330] sm:$0xff]  ;;  %v152_v16 = vld [vmem:[%s7515_s3 + $0x318] sm:$0xff] }
  0x1c   :  { %572 = vmatpush.msrb.mxu3 %v3760_v33  ;;  %540 = vmatpush.msrb.mxu2 %v83_v43  ;;  %v149_v17 = vld [vmem:[%s7515_s3 + $0x300] sm:$0xff]  ;;  %v147_v18 = vld [vmem:[%s7515_s3 + $0x2f0] sm:$0xff]  ;;  %v148_v19 = vld [vmem:[%s7515_s3 + $0x2f8] sm:$0xff] }
  0x1d   :  { %3031 = vmatmul.msk.f32.gmra.mxu0 %vm269_vm0, %v43_v21  ;;  %641 = vmatpush.msra.mxu1 %v96_v31  ;;  %v139_v26 = vld [vmem:[%s7515_s3 + $0x2b0] sm:$0xff]  ;;  %v97_v29 = vld [vmem:[%s7515_s3 + $0x160] sm:$0xff]  ;;  %v136_v31 = vld [vmem:[%s7515_s3 + $0x298] sm:$0xff] }
  0x1e   :  { %3037 = vmatmul.msk.f32.gmra.mxu1 %vm269_vm0, %v43_v21  ;;  %3043 = vmatmul.msk.f32.gmra.mxu2 %vm269_vm0, %v43_v21  ;;  %v145_v21 = vld [vmem:[%s7515_s3 + $0x2e0] sm:$0xff]  ;;  %v135_v28 = vld [vmem:[%s7515_s3 + $0x290] sm:$0xff]  ;;  %v132_v32 = vld [vmem:[%s7515_s3 + $0x278] sm:$0xff] }
  0x1f   :  { %642 = vmatpush.msra.mxu1 %v93_v34  ;;  %573 = vmatpush.msrb.mxu3 %v3781_v38  ;;  %v94_v34 = vld [vmem:[%s7515_s3 + $0x148] sm:$0xff]  ;;  %v129_v36 = vld [vmem:[%s7515_s3 + $0x260] sm:$0xff]  ;;  %v88_v43 = vld [vmem:[%s7515_s3 + $0x118] sm:$0xff] }
  0x20   :  { %541 = vmatpush.msrb.mxu2 %v80_v46  ;;  %617 = vmatpush.msra.mxu0 %v158_v13  ;;  %v108_v13 = vld [vmem:[%s7515_s3 + $0x1b8] sm:$0xff] }
  0x21   :  { %643 = vmatpush.msra.mxu1 %v90_v39  ;;  %574 = vmatpush.msrb.mxu3 %v3797_v41  ;;  %v130_v39 = vld [vmem:[%s7515_s3 + $0x268] sm:$0xff] }
  0x22   :  { %3049 = vmatmul.msk.f32.gmra.mxu3 %vm269_vm0, %v3721_v24  ;;  %542 = vmatpush.msrb.mxu2 %v77_v49  ;;  %v85_v49 = vld [vmem:[%s7515_s3 + $0x100] sm:$0xff] }
  0x23   :  { %644 = vmatpush.msra.mxu1 %v87_v42  ;;  %575 = vmatpush.msrb.mxu3 %v3809_v44  ;;  %v126_v42 = vld [vmem:[%s7515_s3 + $0x248] sm:$0xff] }
  0x24   :  { %543 = vmatpush.msrb.mxu2 %v74_v53  ;;  %618 = vmatpush.msra.mxu0 %v155_v15  ;;  %v82_v53 = vld [vmem:[%s7515_s3 + $0xe8] sm:$0xff] }
  0x25   :  { %3032 = vmatmul.msk.f32.gmra.mxu0 %vm269_vm0, %v44_v23  ;;  %645 = vmatpush.msra.mxu1 %v84_v45  ;;  %v127_v45 = vld [vmem:[%s7515_s3 + $0x250] sm:$0xff] }
  0x26   :  { %3038 = vmatmul.msk.f32.gmra.mxu1 %vm269_vm0, %v44_v23  ;;  %3044 = vmatmul.msk.f32.gmra.mxu2 %vm269_vm0, %v44_v23  ;;  %v142_v23 = vld [vmem:[%s7515_s3 + $0x2c8] sm:$0xff] }
  0x27   :  { %576 = vmatpush.msrb.mxu3 %v3821_v47  ;;  %646 = vmatpush.msra.mxu1 %v81_v50  ;;  %v124_v50 = vld [vmem:[%s7515_s3 + $0x238] sm:$0xff] }
  0x28   :  { %544 = vmatpush.msrb.mxu2 %v71_v55  ;;  %619 = vmatpush.msra.mxu0 %v152_v16  ;;  %v121_v55 = vld [vmem:[%s7515_s3 + $0x220] sm:$0xff]  ;;  %v70_v16 = vld [vmem:[%s7515_s3 + $0x88] sm:$0xff] }
  0x29   :  { %577 = vmatpush.msrb.mxu3 %v3838_v51  ;;  %647 = vmatpush.msra.mxu1 %v78_v52  ;;  %v120_v52 = vld [vmem:[%s7515_s3 + $0x218] sm:$0xff] }
  0x2a   :  { %3050 = vmatmul.msk.f32.gmra.mxu3 %vm269_vm0, %v3775_v37  ;;  %545 = vmatpush.msrb.mxu2 %v68_v58 }
  0x2b   :  { %578 = vmatpush.msrb.mxu3 %v3856_v54  ;;  %648 = vmatpush.msra.mxu1 %v75_v56  ;;  %v117_v56 = vld [vmem:[%s7515_s3 + $0x200] sm:$0xff] }
  0x2c   :  { %546 = vmatpush.msrb.mxu2 %v65_v63  ;;  %620 = vmatpush.msra.mxu0 %v149_v17  ;;  %v114_v63 = vld [vmem:[%s7515_s3 + $0x1e8] sm:$0xff] }
  0x2d   :  { %3033 = vmatmul.msk.f32.gmra.mxu0 %vm269_vm0, %v45_v25  ;;  %579 = vmatpush.msrb.mxu3 %v3868_v57 }
  0x2e   :  { %3039 = vmatmul.msk.f32.gmra.mxu1 %vm269_vm0, %v45_v25  ;;  %3045 = vmatmul.msk.f32.gmra.mxu2 %vm269_vm0, %v45_v25  ;;  %v100_v25 = vld [vmem:[%s7515_s3 + $0x178] sm:$0xff] }
  0x2f   :  { %649 = vmatpush.msra.mxu1 %v72_v59  ;;  %580 = vmatpush.msrb.mxu3 %v3884_v61  ;;  %v79_v59 = vld [vmem:[%s7515_s3 + $0xd0] sm:$0xff] }
  0x30   :  { %547 = vmatpush.msrb.mxu2 %v62_v2  ;;  %v76_v2 = vld [vmem:[%s7515_s3 + $0xb8] sm:$0xff] }
  0x31   :  { %650 = vmatpush.msra.mxu1 %v69_v62  ;;  %581 = vmatpush.msrb.mxu3 %v3898_v0  ;;  %v118_v62 = vld [vmem:[%s7515_s3 + $0x208] sm:$0xff] }
  0x32   :  { %3051 = vmatmul.msk.f32.gmra.mxu3 %vm269_vm0, %v3826_v48  ;;  %548 = vmatpush.msrb.mxu2 %v59_v5  ;;  %v111_v5 = vld [vmem:[%s7515_s3 + $0x1d0] sm:$0xff] }
  0x33   :  { %651 = vmatpush.msra.mxu1 %v66_v1  ;;  %582 = vmatpush.msrb.mxu3 %v3912_v3 }
  0x34   :  { %549 = vmatpush.msrb.mxu2 %v56_v8  ;;  %v73_v8 = vld [vmem:[%s7515_s3 + $0xa0] sm:$0xff] }
  0x35   :  { %3034 = vmatmul.msk.f32.gmra.mxu0 %vm269_vm0, %v46_v35  ;;  %652 = vmatpush.msra.mxu1 %v63_v4  ;;  %v115_v4 = vld [vmem:[%s7515_s3 + $0x1f0] sm:$0xff] }
  0x36   :  { %3040 = vmatmul.msk.f32.gmra.mxu1 %vm269_vm0, %v46_v35  ;;  %3046 = vmatmul.msk.f32.gmra.mxu2 %vm269_vm0, %v46_v35  ;;  %v133_v35 = vld [vmem:[%s7515_s3 + $0x280] sm:$0xff] }
  0x37   :  { %583 = vmatpush.msrb.mxu3 %v3924_v6  ;;  %653 = vmatpush.msra.mxu1 %v60_v7  ;;  %v4104_v7 = vld [vmem:[%s7515_s3 + $0x350] sm:$0xff] }
  0x38   :  { %550 = vmatpush.msrb.mxu2 %v53_v11  ;;  %v112_v11 = vld [vmem:[%s7515_s3 + $0x1d8] sm:$0xff] }
  0x39   :  { %584 = vmatpush.msrb.mxu3 %v3937_v9  ;;  %654 = vmatpush.msra.mxu1 %v57_v10  ;;  %v4112_v10 = vld [vmem:[%s7515_s3 + $0x338] sm:$0xff] }
  0x3a   :  { %3052 = vmatmul.msk.f32.gmra.mxu3 %vm269_vm0, %v52_v60  ;;  %675 = vmatpush.msra.mxu2 %v147_v18  ;;  %v109_v18 = vld [vmem:[%s7515_s3 + $0x1c0] sm:$0xff] }
  0x3b   :  { %585 = vmatpush.msrb.mxu3 %v3963_v12  ;;  %655 = vmatpush.msra.mxu1 %v54_v14  ;;  %v4125_v14 = vld [vmem:[%s7515_s3 + $0x320] sm:$0xff] }
  0x3d   :  { %3053 = vmatmul.msk.f32.vlgmr.msrb.gmra.mxu0 %vm269_vm0, %v3695_v20  ;;  %722 = vmatpush.msra.mxu3 %v4104_v7 }
  0x3e   :  { %3059 = vmatmul.msk.f32.vlgmr.msrb.gmra.mxu1 %vm269_vm0, %v3695_v20  ;;  %v144_v20 = vld [vmem:[%s7515_s3 + $0x2d8] sm:$0xff]  ;;  %745 = vmatpush.msrb.mxu0 %v100_v25 }
  0x3f   :  { %780 = vmatpush.msrb.mxu1 %v148_v19  ;;  %676 = vmatpush.msra.mxu2 %v144_v20  ;;  %v4142_v19 = vld [vmem:[%s7515_s3 + $0x1a0] sm:$0xff]  ;;  %v64_v25 = vld [vmem:[%s7515_s3 + $0x58] sm:$0xff] }
  0x40   :  { %746 = vmatpush.msrb.mxu0 %v97_v29  ;;  %723 = vmatpush.msra.mxu3 %v4112_v10  ;;  %v61_v29 = vld [vmem:[%s7515_s3 + $0x40] sm:$0xff] }
  0x41   :  { %781 = vmatpush.msrb.mxu1 %v145_v21  ;;  %v67_v21 = vld [vmem:[%s7515_s3 + $0x70] sm:$0xff] }
  0x42   :  { %747 = vmatpush.msrb.mxu0 %v94_v34  ;;  %724 = vmatpush.msra.mxu3 %v4125_v14  ;;  %v58_v34 = vld [vmem:[%s7515_s3 + $0x28] sm:$0xff] }
  0x43   :  { %782 = vmatpush.msrb.mxu1 %v142_v23  ;;  %v106_v23 = vld [vmem:[%s7515_s3 + $0x1a8] sm:$0xff] }
  0x45   :  { %3054 = vmatmul.msk.f32.gmra.mxu0 %vm269_vm0, %v3708_v22  ;;  %783 = vmatpush.msrb.mxu1 %v139_v26  ;;  %v103_v26 = vld [vmem:[%s7515_s3 + $0x190] sm:$0xff] }
  0x46   :  { %3060 = vmatmul.msk.f32.gmra.mxu1 %vm269_vm0, %v3708_v22  ;;  %v141_v22 = vld [vmem:[%s7515_s3 + $0x2c0] sm:$0xff] }
  0x47   :  { %677 = vmatpush.msra.mxu2 %v141_v22  ;;  %784 = vmatpush.msrb.mxu1 %v136_v31  ;;  %v4155_v22 = vld [vmem:[%s7515_s3 + $0x308] sm:$0xff] }
  0x48   :  { %725 = vmatpush.msra.mxu3 %v4155_v22 }
  0x49   :  { %785 = vmatpush.msrb.mxu1 %v133_v35  ;;  %v55_v35 = vld [vmem:[%s7515_s3 + $0x10] sm:$0xff] }
  0x4b   :  { %786 = vmatpush.msrb.mxu1 %v130_v39 }
  0x4d   :  { %3055 = vmatmul.msk.f32.gmra.mxu0 %vm269_vm0, %v3721_v24  ;;  %787 = vmatpush.msrb.mxu1 %v127_v45  ;;  %v4220_v45 = vld [vmem:[%s7516_s4 + $0x138] sm:$0xff] }
  0x4e   :  { %3061 = vmatmul.msk.f32.gmra.mxu1 %vm269_vm0, %v3721_v24  ;;  %v138_v24 = vld [vmem:[%s7515_s3 + $0x2a8] sm:$0xff] }
  0x4f   :  { %678 = vmatpush.msra.mxu2 %v138_v24  ;;  %788 = vmatpush.msrb.mxu1 %v124_v50  ;;  %v4164_v24 = vld [vmem:[%s7515_s3 + $0x188] sm:$0xff]  ;;  %v4233_v50 = vld [vmem:[%s7516_s4 + $0x120] sm:$0xff] }
  0x51   :  { %679 = vmatpush.msra.mxu2 %v135_v28  ;;  %789 = vmatpush.msrb.mxu1 %v121_v55  ;;  %v4246_v55 = vld [vmem:[%s7516_s4 + $0x108] sm:$0xff] }
  0x53   :  { %680 = vmatpush.msra.mxu2 %v132_v32  ;;  %790 = vmatpush.msrb.mxu1 %v118_v62  ;;  %v4258_v62 = vld [vmem:[%s7516_s4 + $0xf0] sm:$0xff] }
  0x55   :  { %3056 = vmatmul.msk.f32.gmra.mxu0 %vm269_vm0, %v3775_v37  ;;  %681 = vmatpush.msra.mxu2 %v129_v36 }
  0x56   :  { %3062 = vmatmul.msk.f32.gmra.mxu1 %vm269_vm0, %v3775_v37  ;;  %v91_v37 = vld [vmem:[%s7515_s3 + $0x130] sm:$0xff] }
  0x57   :  { %748 = vmatpush.msrb.mxu0 %v91_v37  ;;  %682 = vmatpush.msra.mxu2 %v126_v42  ;;  %v4209_v42 = vld [vmem:[%s7516_s4 + $0x168] sm:$0xff] }
  0x58   :  { %791 = vmatpush.msrb.mxu1 %v115_v4  ;;  %v4272_v4 = vld [vmem:[%s7516_s4 + $0xd8] sm:$0xff] }
  0x59   :  { %749 = vmatpush.msrb.mxu0 %v88_v43  ;;  %v4214_v43 = vld [vmem:[%s7516_s4 + $0x150] sm:$0xff] }
  0x5a   :  { %792 = vmatpush.msrb.mxu1 %v112_v11  ;;  %v239_v11 = vld [vmem:[%s7516_s4 + $0x270] sm:$0xff] }
  0x5b   :  { %750 = vmatpush.msrb.mxu0 %v85_v49 }
  0x5c   :  { %793 = vmatpush.msrb.mxu1 %v109_v18  ;;  %v236_v18 = vld [vmem:[%s7516_s4 + $0x258] sm:$0xff] }
  0x5d   :  { %3057 = vmatmul.msk.f32.gmra.mxu0 %vm269_vm0, %v3826_v48 }
  0x5e   :  { %3063 = vmatmul.msk.f32.gmra.mxu1 %vm269_vm0, %v3826_v48  ;;  %v123_v48 = vld [vmem:[%s7515_s3 + $0x230] sm:$0xff]  ;;  %751 = vmatpush.msrb.mxu0 %v82_v53 }
  0x5f   :  { %683 = vmatpush.msra.mxu2 %v123_v48  ;;  %794 = vmatpush.msrb.mxu1 %v106_v23  ;;  %v233_v23 = vld [vmem:[%s7516_s4 + $0x240] sm:$0xff] }
  0x60   :  { %752 = vmatpush.msrb.mxu0 %v79_v59  ;;  %v248_v59 = vld [vmem:[%s7516_s4 + $0x2b8] sm:$0xff] }
  0x61   :  { %684 = vmatpush.msra.mxu2 %v120_v52  ;;  %795 = vmatpush.msrb.mxu1 %v103_v26  ;;  %v254_v52 = vld [vmem:[%s7516_s4 + $0x2e8] sm:$0xff] }
  0x62   :  { %753 = vmatpush.msrb.mxu0 %v76_v2  ;;  %v245_v2 = vld [vmem:[%s7516_s4 + $0x2a0] sm:$0xff]  ;;  %v266_v26 = vld [vmem:[%s7516_s4 + $0x348] sm:$0xff] }
  0x63   :  { %685 = vmatpush.msra.mxu2 %v117_v56  ;;  %v251_v56 = vld [vmem:[%s7516_s4 + $0x2d0] sm:$0xff] }
  0x64   :  { %754 = vmatpush.msrb.mxu0 %v73_v8  ;;  %v4284_v8 = vld [vmem:[%s7516_s4 + $0xc0] sm:$0xff] }
  0x65   :  { %3058 = vmatmul.msk.f32.gmra.mxu0 %vm269_vm0, %v52_v60  ;;  %686 = vmatpush.msra.mxu2 %v114_v63 }
  0x66   :  { %3064 = vmatmul.msk.f32.gmra.mxu1 %vm269_vm0, %v52_v60  ;;  %755 = vmatpush.msrb.mxu0 %v70_v16  ;;  %v4298_v16 = vld [vmem:[%s7516_s4 + $0xa8] sm:$0xff] }
  0x67   :  { %687 = vmatpush.msra.mxu2 %v111_v5  ;;  %v242_v5 = vld [vmem:[%s7516_s4 + $0x288] sm:$0xff] }
  0x68   :  { %756 = vmatpush.msrb.mxu0 %v67_v21  ;;  %v4310_v21 = vld [vmem:[%s7516_s4 + $0x90] sm:$0xff] }
  0x69   :  { %688 = vmatpush.msra.mxu2 %v108_v13  ;;  %v4293_v13 = vld [vmem:[%s7515_s3 + $0x358] sm:$0xff] }
  0x6a   :  { %757 = vmatpush.msrb.mxu0 %v64_v25  ;;  %v4322_v25 = vld [vmem:[%s7516_s4 + $0x78] sm:$0xff] }
  0x6b   :  { %689 = vmatpush.msra.mxu2 %v4142_v19 }
  0x6c   :  { %758 = vmatpush.msrb.mxu0 %v61_v29  ;;  %v230_v29 = vld [vmem:[%s7516_s4 + $0x228] sm:$0xff] }
  0x6d   :  { %690 = vmatpush.msra.mxu2 %v4164_v24 }
  0x6e   :  { %759 = vmatpush.msrb.mxu0 %v58_v34  ;;  %v4334_v34 = vld [vmem:[%s7515_s3 + $0x340] sm:$0xff] }
  0x70   :  { %760 = vmatpush.msrb.mxu0 %v55_v35  ;;  %v4339_v35 = vld [vmem:[%s7516_s4 + $0x60] sm:$0xff] }
  0x71   :  { %7671 = vst [vmem:[#allocation20_spill] sm:$0xff] %v4339_v35 }
  0x8a   :  { %v4035_v40 = vpop.f32.mrf.mxu0 }
  0x8b   :  { %7653 = vst [vmem:[#allocation2_spill] sm:$0xff] %v4035_v40  ;;  %v4046_v46 = vpop.f32.mrf.mxu1  ;;  %551 = vmatmul.f32.vlgmr.msrb.gmra.mxu2 %v4035_v40  ;;  %656 = vmatmul.f32.vlgmr.msra.gmra.mxu1 %v4035_v40 }
  0x8c   :  { %7654 = vst [vmem:[#allocation3_spill] sm:$0xff] %v4046_v46  ;;  %586 = vmatmul.f32.vlgmr.msrb.gmra.mxu3 %v4046_v46  ;;  %827 = vmatpush.msrb.mxu2 %v4293_v13 }
  0x8d   :  { %868 = vmatpush.msrb.mxu3 %v4209_v42  ;;  %950 = vmatpush.msra.mxu1 %v266_v26 }
  0x8e   :  { %828 = vmatpush.msrb.mxu2 %v4334_v34 }
  0x8f   :  { %869 = vmatpush.msrb.mxu3 %v4214_v43 }
  0x91   :  { %v4072_v58 = vpop.f32.mrf.mxu2  ;;  %870 = vmatpush.msrb.mxu3 %v4220_v45 }
  0x92   :  { %7655 = vst [vmem:[#allocation4_spill] sm:$0xff] %v4072_v58  ;;  %3065 = vmatmul.msk.f32.vlgmr.msra.gmra.mxu0 %vm516_vm1, %v4072_v58  ;;  %v4079_v60 = vpop.f32.mrf.mxu0 }
  0x93   :  { %7656 = vst [vmem:[#allocation5_spill] sm:$0xff] %v4079_v60  ;;  %v4087_v1 = vpop.f32.mrf.mxu1  ;;  %554 = vmatmul.f32.gmra.mxu2 %v4079_v60  ;;  %659 = vmatmul.f32.gmra.mxu1 %v4079_v60 }
  0x94   :  { %7657 = vst [vmem:[#allocation6_spill] sm:$0xff] %v4087_v1  ;;  %589 = vmatmul.f32.gmra.mxu3 %v4087_v1  ;;  %903 = vmatpush.msra.mxu0 %v254_v52  ;;  %v263_v52 = vld [vmem:[%s7516_s4 + $0x330] sm:$0xff] }
  0x95   :  { %871 = vmatpush.msrb.mxu3 %v4233_v50  ;;  %951 = vmatpush.msra.mxu1 %v263_v52  ;;  %v221_v52 = vld [vmem:[%s7516_s4 + $0x1e0] sm:$0xff] }
  0x96   :  { %904 = vmatpush.msra.mxu0 %v251_v56  ;;  %v4348_v56 = vld [vmem:[%s7515_s3 + $0x328] sm:$0xff] }
  0x97   :  { %872 = vmatpush.msrb.mxu3 %v4246_v55  ;;  %829 = vmatpush.msrb.mxu2 %v4348_v56 }
  0x98   :  { %905 = vmatpush.msra.mxu0 %v248_v59  ;;  %v260_v59 = vld [vmem:[%s7516_s4 + $0x318] sm:$0xff] }
  0x99   :  { %v4127_v15 = vpop.f32.mrf.mxu2  ;;  %873 = vmatpush.msrb.mxu3 %v4258_v62  ;;  %952 = vmatpush.msra.mxu1 %v260_v59  ;;  %v4395_v59 = vld [vmem:[%s7516_s4 + $0x18] sm:$0xff] }
  0x9a   :  { %7658 = vst [vmem:[#allocation7_spill] sm:$0xff] %v4127_v15  ;;  %3066 = vmatmul.msk.f32.gmra.mxu0 %vm516_vm1, %v4127_v15  ;;  %v4134_v17 = vpop.f32.mrf.mxu0 }
  0x9b   :  { %7659 = vst [vmem:[#allocation8_spill] sm:$0xff] %v4134_v17  ;;  %v4145_v20 = vpop.f32.mrf.mxu1  ;;  %557 = vmatmul.f32.gmra.mxu2 %v4134_v17  ;;  %662 = vmatmul.f32.gmra.mxu1 %v4134_v17 }
  0x9c   :  { %7660 = vst [vmem:[#allocation9_spill] sm:$0xff] %v4145_v20  ;;  %592 = vmatmul.f32.gmra.mxu3 %v4145_v20  ;;  %906 = vmatpush.msra.mxu0 %v245_v2  ;;  %v227_v2 = vld [vmem:[%s7516_s4 + $0x210] sm:$0xff] }
  0x9d   :  { %874 = vmatpush.msrb.mxu3 %v4272_v4  ;;  %7675 = vst [vmem:[#allocation24_spill] sm:$0xff] %v4395_v59 }
  0x9e   :  { %907 = vmatpush.msra.mxu0 %v242_v5  ;;  %v4363_v5 = vld [vmem:[%s7516_s4 + $0x48] sm:$0xff] }
  0x9f   :  { %875 = vmatpush.msrb.mxu3 %v4284_v8  ;;  %7672 = vst [vmem:[#allocation21_spill] sm:$0xff] %v4363_v5 }
  0xa0   :  { %908 = vmatpush.msra.mxu0 %v239_v11  ;;  %v4368_v11 = vld [vmem:[%s7515_s3 + $0x310] sm:$0xff] }
  0xa1   :  { %v4175_v28 = vpop.f32.mrf.mxu2  ;;  %876 = vmatpush.msrb.mxu3 %v4298_v16  ;;  %7673 = vst [vmem:[#allocation22_spill] sm:$0xff] %v4368_v11  ;;  %830 = vmatpush.msrb.mxu2 %v4368_v11 }
  0xa2   :  { %7661 = vst [vmem:[#allocation10_spill] sm:$0xff] %v4175_v28  ;;  %3067 = vmatmul.msk.f32.gmra.mxu0 %vm516_vm1, %v4175_v28  ;;  %v4182_v31 = vpop.f32.mrf.mxu0 }
  0xa3   :  { %7662 = vst [vmem:[#allocation11_spill] sm:$0xff] %v4182_v31  ;;  %v4184_v32 = vpop.f32.mrf.mxu1  ;;  %560 = vmatmul.f32.gmra.mxu2 %v4182_v31  ;;  %665 = vmatmul.f32.gmra.mxu1 %v4182_v31 }
  0xa4   :  { %7663 = vst [vmem:[#allocation12_spill] sm:$0xff] %v4184_v32  ;;  %595 = vmatmul.f32.gmra.mxu3 %v4184_v32  ;;  %909 = vmatpush.msra.mxu0 %v236_v18  ;;  %v224_v18 = vld [vmem:[%s7516_s4 + $0x1f8] sm:$0xff] }
  0xa5   :  { %877 = vmatpush.msrb.mxu3 %v4310_v21 }
  0xa6   :  { %910 = vmatpush.msra.mxu0 %v233_v23  ;;  %v257_v23 = vld [vmem:[%s7516_s4 + $0x300] sm:$0xff] }
  0xa7   :  { %878 = vmatpush.msrb.mxu3 %v4322_v25  ;;  %953 = vmatpush.msra.mxu1 %v257_v23  ;;  %v4410_v23 = vpop.f32.mrf.mxu3 }
  0xa8   :  { %911 = vmatpush.msra.mxu0 %v230_v29  ;;  %v4385_v29 = vld [vmem:[%s7516_s4 + $0x30] sm:$0xff] }
  0xa9   :  { %v4195_v36 = vpop.f32.mrf.mxu2  ;;  %879 = vmatpush.msrb.mxu3 %v4339_v35  ;;  %7674 = vst [vmem:[#allocation23_spill] sm:$0xff] %v4385_v29  ;;  %v4712_v35 = vld [vmem:[%s7516_s4 + $0x338] sm:$0xff] }
  0xaa   :  { %7664 = vst [vmem:[#allocation13_spill] sm:$0xff] %v4195_v36  ;;  %3068 = vmatmul.msk.f32.gmra.mxu0 %vm516_vm1, %v4195_v36  ;;  %v4199_v37 = vpop.f32.mrf.mxu0 }
  0xab   :  { %7665 = vst [vmem:[#allocation14_spill] sm:$0xff] %v4199_v37  ;;  %v4201_v39 = vpop.f32.mrf.mxu1  ;;  %563 = vmatmul.f32.gmra.mxu2 %v4199_v37  ;;  %668 = vmatmul.f32.gmra.mxu1 %v4199_v37 }
  0xac   :  { %7666 = vst [vmem:[#allocation15_spill] sm:$0xff] %v4201_v39  ;;  %598 = vmatmul.f32.gmra.mxu3 %v4201_v39  ;;  %912 = vmatpush.msra.mxu0 %v227_v2  ;;  %v218_v2 = vld [vmem:[%s7516_s4 + $0x1c8] sm:$0xff] }
  0xad   :  { %880 = vmatpush.msrb.mxu3 %v4363_v5  ;;  %v163_v5 = vld [vmem:[%s7516_s4 + $0x10] sm:$0xff]  ;;  %7705 = vst [vmem:[#allocation54_spill] sm:$0xff] %v4712_v35 }
  0xae   :  { %913 = vmatpush.msra.mxu0 %v224_v18  ;;  %v4406_v18 = vld [vmem:[%s7516_s4] sm:$0xff] }
  0xaf   :  { %881 = vmatpush.msrb.mxu3 %v4385_v29  ;;  %7676 = vst [vmem:[#allocation25_spill] sm:$0xff] %v4406_v18  ;;  %v172_v29 = vld [vmem:[%s7516_s4 + $0x58] sm:$0xff] }
  0xb0   :  { %914 = vmatpush.msra.mxu0 %v221_v52 }
  0xb1   :  { %v4223_v48 = vpop.f32.mrf.mxu2  ;;  %882 = vmatpush.msrb.mxu3 %v4395_v59 }
  0xb2   :  { %7667 = vst [vmem:[#allocation16_spill] sm:$0xff] %v4223_v48  ;;  %3069 = vmatmul.msk.f32.gmra.mxu0 %vm516_vm1, %v4223_v48  ;;  %v4228_v49 = vpop.f32.mrf.mxu0 }
  0xb3   :  { %7668 = vst [vmem:[#allocation17_spill] sm:$0xff] %v4228_v49  ;;  %v4238_v53 = vpop.f32.mrf.mxu1  ;;  %566 = vmatmul.f32.gmra.mxu2 %v4228_v49  ;;  %671 = vmatmul.f32.gmra.mxu1 %v4228_v49 }
  0xb4   :  { %7669 = vst [vmem:[#allocation18_spill] sm:$0xff] %v4238_v53  ;;  %601 = vmatmul.f32.gmra.mxu3 %v4238_v53  ;;  %915 = vmatpush.msra.mxu0 %v218_v2  ;;  %v4436_v2 = vld [vmem:[%s7516_s4 + $0x170] sm:$0xff] }
  0xb5   :  { %883 = vmatpush.msrb.mxu3 %v4406_v18  ;;  %7677 = vst [vmem:[#allocation26_spill] sm:$0xff] %v4436_v2 }
  0xb9   :  { %v4261_v63 = vpop.f32.mrf.mxu2 }
  0xba   :  { %7670 = vst [vmem:[#allocation19_spill] sm:$0xff] %v4261_v63  ;;  %3070 = vmatmul.msk.f32.gmra.mxu0 %vm516_vm1, %v4261_v63  ;;  %v4412_v52 = vpop.f32.mrf.mxu0 }
  0xbb   :  { %691 = vmatmul.f32.vlgmr.msra.gmra.mxu2 %v4046_v46  ;;  %796 = vmatmul.f32.vlgmr.msrb.gmra.mxu1 %v4046_v46  ;;  %v4380_v26 = vpop.f32.mrf.mxu1 }
  0xbc   :  { %3071 = vmatmul.msk.f32.vlgmr.msra.gmra.mxu3 %vm516_vm1, %v4072_v58  ;;  %973 = vmatpush.msra.mxu2 %v4436_v2  ;;  %v4473_v2 = vld [vmem:[%s7516_s4 + $0x2c0] sm:$0xff] }
  0xbd   :  { %7682 = vst [vmem:[#allocation31_spill] sm:$0xff] %v4473_v2 }
  0xc2   :  { %761 = vmatmul.f32.vlgmr.msrb.gmra.mxu0 %v4035_v40  ;;  %v4468_v40 = vld [vmem:[%s7516_s4 + $0x140] sm:$0xff] }
  0xc3   :  { %694 = vmatmul.f32.gmra.mxu2 %v4087_v1  ;;  %799 = vmatmul.f32.gmra.mxu1 %v4087_v1  ;;  %v212_v1 = vld [vmem:[%s7516_s4 + $0x198] sm:$0xff]  ;;  %v4423_v46 = vpop.f32.mrf.mxu1  ;;  %7681 = vst [vmem:[#allocation30_spill] sm:$0xff] %v4468_v40 }
  0xc4   :  { %3072 = vmatmul.msk.f32.gmra.mxu3 %vm516_vm1, %v4127_v15 }
  0xca   :  { %764 = vmatmul.f32.gmra.mxu0 %v4079_v60  ;;  %v205_v60 = vld [vmem:[%s7516_s4 + $0x160] sm:$0xff] }
  0xcb   :  { %697 = vmatmul.f32.gmra.mxu2 %v4145_v20  ;;  %802 = vmatmul.f32.gmra.mxu1 %v4145_v20  ;;  %v215_v20 = vld [vmem:[%s7516_s4 + $0x1b0] sm:$0xff]  ;;  %v4480_v18 = vpop.f32.mrf.mxu1 }
  0xcc   :  { %3073 = vmatmul.msk.f32.gmra.mxu3 %vm516_vm1, %v4175_v28  ;;  %916 = vmatpush.msra.mxu0 %v215_v20  ;;  %v208_v20 = vld [vmem:[%s7516_s4 + $0x178] sm:$0xff] }
  0xcd   :  { %1078 = vmatpush.msrb.mxu1 %v208_v20  ;;  %v4488_v20 = vld [vmem:[%s7516_s4 + $0x128] sm:$0xff] }
  0xce   :  { %917 = vmatpush.msra.mxu0 %v212_v1  ;;  %v4441_v1 = vld [vmem:[%s7516_s4 + $0x2f0] sm:$0xff]  ;;  %7683 = vst [vmem:[#allocation32_spill] sm:$0xff] %v4488_v20 }
  0xcf   :  { %7678 = vst [vmem:[#allocation27_spill] sm:$0xff] %v4441_v1  ;;  %1008 = vmatpush.msra.mxu3 %v4441_v1  ;;  %v202_v1 = vld [vmem:[%s7516_s4 + $0x148] sm:$0xff]  ;;  %1079 = vmatpush.msrb.mxu1 %v205_v60  ;;  %v199_v60 = vld [vmem:[%s7516_s4 + $0x130] sm:$0xff] }
  0xd1   :  { %1080 = vmatpush.msrb.mxu1 %v202_v1  ;;  %v4506_v1 = vld [vmem:[%s7516_s4 + $0x110] sm:$0xff] }
  0xd2   :  { %767 = vmatmul.f32.gmra.mxu0 %v4134_v17  ;;  %v4460_v17 = vld [vmem:[%s7516_s4 + $0x2d8] sm:$0xff]  ;;  %7685 = vst [vmem:[#allocation34_spill] sm:$0xff] %v4506_v1 }
  0xd3   :  { %700 = vmatmul.f32.gmra.mxu2 %v4184_v32  ;;  %805 = vmatmul.f32.gmra.mxu1 %v4184_v32  ;;  %v209_v32 = vld [vmem:[%s7516_s4 + $0x180] sm:$0xff]  ;;  %7680 = vst [vmem:[#allocation29_spill] sm:$0xff] %v4460_v17  ;;  %v4547_v59 = vpop.f32.mrf.mxu1 }
  0xd4   :  { %3074 = vmatmul.msk.f32.gmra.mxu3 %vm516_vm1, %v4195_v36  ;;  %918 = vmatpush.msra.mxu0 %v209_v32  ;;  %v4455_v32 = vld [vmem:[%s7516_s4 + $0x158] sm:$0xff] }
  0xd5   :  { %7679 = vst [vmem:[#allocation28_spill] sm:$0xff] %v4455_v32  ;;  %974 = vmatpush.msra.mxu2 %v4455_v32  ;;  %1009 = vmatpush.msra.mxu3 %v4460_v17  ;;  %v4493_v32 = vld [vmem:[%s7516_s4 + $0x2a8] sm:$0xff] }
  0xd6   :  { %7684 = vst [vmem:[#allocation33_spill] sm:$0xff] %v4493_v32  ;;  %1081 = vmatpush.msrb.mxu1 %v199_v60  ;;  %v4540_v60 = vld [vmem:[%s7516_s4 + $0xe0] sm:$0xff] }
  0xd7   :  { %975 = vmatpush.msra.mxu2 %v4468_v40  ;;  %1010 = vmatpush.msra.mxu3 %v4473_v2  ;;  %v196_v40 = vld [vmem:[%s7516_s4 + $0x118] sm:$0xff]  ;;  %v193_v2 = vld [vmem:[%s7516_s4 + $0x100] sm:$0xff]  ;;  %7689 = vst [vmem:[#allocation38_spill] sm:$0xff] %v4540_v60 }
  0xd8   :  { %1082 = vmatpush.msrb.mxu1 %v196_v40  ;;  %v4553_v40 = vld [vmem:[%s7516_s4 + $0x260] sm:$0xff] }
  0xd9   :  { %976 = vmatpush.msra.mxu2 %v4488_v20  ;;  %1011 = vmatpush.msra.mxu3 %v4493_v32  ;;  %v4526_v20 = vld [vmem:[%s7516_s4 + $0x278] sm:$0xff]  ;;  %7690 = vst [vmem:[#allocation39_spill] sm:$0xff] %v4553_v40 }
  0xda   :  { %770 = vmatmul.f32.gmra.mxu0 %v4182_v31  ;;  %v4446_v31 = vpop.f32.mrf.mxu3  ;;  %7688 = vst [vmem:[#allocation37_spill] sm:$0xff] %v4526_v20  ;;  %1083 = vmatpush.msrb.mxu1 %v193_v2  ;;  %v187_v2 = vld [vmem:[%s7516_s4 + $0xd0] sm:$0xff] }
  0xdb   :  { %703 = vmatmul.f32.gmra.mxu2 %v4201_v39  ;;  %808 = vmatmul.f32.gmra.mxu1 %v4201_v39  ;;  %v4448_v39 = vpop.f32.mrf.mxu0 }
  0xdc   :  { %3075 = vmatmul.msk.f32.gmra.mxu3 %vm516_vm1, %v4223_v48  ;;  %977 = vmatpush.msra.mxu2 %v4506_v1  ;;  %v190_v1 = vld [vmem:[%s7516_s4 + $0xe8] sm:$0xff] }
  0xdd   :  { %1084 = vmatpush.msrb.mxu1 %v190_v1  ;;  %v4586_v1 = vld [vmem:[%s7516_s4 + $0x230] sm:$0xff] }
  0xde   :  { %7694 = vst [vmem:[#allocation43_spill] sm:$0xff] %v4586_v1 }
  0xdf   :  { %1085 = vmatpush.msrb.mxu1 %v187_v2 }
  0xe2   :  { %773 = vmatmul.f32.gmra.mxu0 %v4199_v37  ;;  %v4511_v37 = vld [vmem:[%s7516_s4 + $0x290] sm:$0xff]  ;;  %v4531_v17 = vpop.f32.mrf.mxu3 }
  0xe3   :  { %706 = vmatmul.f32.gmra.mxu2 %v4238_v53  ;;  %811 = vmatmul.f32.gmra.mxu1 %v4238_v53  ;;  %7686 = vst [vmem:[#allocation35_spill] sm:$0xff] %v4511_v37  ;;  %v4520_v53 = vld [vmem:[%s7516_s4 + $0xf8] sm:$0xff]  ;;  %v4533_v32 = vpop.f32.mrf.mxu0 }
  0xe4   :  { %3076 = vmatmul.msk.f32.gmra.mxu3 %vm516_vm1, %v4261_v63  ;;  %7687 = vst [vmem:[#allocation36_spill] sm:$0xff] %v4520_v53  ;;  %978 = vmatpush.msra.mxu2 %v4520_v53  ;;  %v4558_v53 = vld [vmem:[%s7516_s4 + $0xc8] sm:$0xff] }
  0xe5   :  { %1012 = vmatpush.msra.mxu3 %v4511_v37  ;;  %7691 = vst [vmem:[#allocation40_spill] sm:$0xff] %v4558_v53  ;;  %v4607_v37 = vld [vmem:[%s7516_s4 + $0x80] sm:$0xff] }
  0xe6   :  { %979 = vmatpush.msra.mxu2 %v4540_v60  ;;  %v4576_v60 = vld [vmem:[%s7516_s4 + $0xb0] sm:$0xff]  ;;  %7696 = vst [vmem:[#allocation45_spill] sm:$0xff] %v4607_v37 }
  0xe7   :  { %1013 = vmatpush.msra.mxu3 %v4526_v20  ;;  %7693 = vst [vmem:[#allocation42_spill] sm:$0xff] %v4576_v60  ;;  %v4591_v20 = vld [vmem:[%s7516_s4 + $0x98] sm:$0xff] }
  0xe8   :  { %980 = vmatpush.msra.mxu2 %v4558_v53  ;;  %7695 = vst [vmem:[#allocation44_spill] sm:$0xff] %v4591_v20  ;;  %v181_v53 = vld [vmem:[%s7516_s4 + $0xa0] sm:$0xff] }
  0xe9   :  { %1014 = vmatpush.msra.mxu3 %v4553_v40 }
  0xea   :  { %776 = vmatmul.f32.gmra.mxu0 %v4228_v49  ;;  %v4571_v49 = vld [vmem:[%s7516_s4 + $0x248] sm:$0xff]  ;;  %981 = vmatpush.msra.mxu2 %v4576_v60  ;;  %v4598_v2 = vpop.f32.mrf.mxu3  ;;  %v4613_v60 = vld [vmem:[%s7516_s4 + $0x218] sm:$0xff] }
  0xeb   :  { %3077 = vmatmul.msk.f32.vlgmr.msrb.gmra.mxu2 %vm516_vm1, %v4072_v58  ;;  %3083 = vmatmul.msk.f32.vlgmr.msra.gmra.mxu1 %vm516_vm1, %v4380_v26  ;;  %7692 = vst [vmem:[#allocation41_spill] sm:$0xff] %v4571_v49  ;;  %v184_v58 = vld [vmem:[%s7516_s4 + $0xb8] sm:$0xff]  ;;  %v4600_v40 = vpop.f32.mrf.mxu0 }
  0xec   :  { %884 = vmatmul.f32.vlgmr.msrb.gmra.mxu3 %v4410_v23  ;;  %1086 = vmatpush.msrb.mxu1 %v184_v58  ;;  %7697 = vst [vmem:[#allocation46_spill] sm:$0xff] %v4613_v60  ;;  %v178_v58 = vld [vmem:[%s7516_s4 + $0x88] sm:$0xff] }
  0xed   :  { %1015 = vmatpush.msra.mxu3 %v4571_v49  ;;  %982 = vmatpush.msra.mxu2 %v4591_v20  ;;  %v4625_v20 = vld [vmem:[%s7516_s4 + $0x68] sm:$0xff]  ;;  %v4643_v49 = vld [vmem:[%s7516_s4 + $0x50] sm:$0xff] }
  0xee   :  { %1087 = vmatpush.msrb.mxu1 %v181_v53  ;;  %7698 = vst [vmem:[#allocation47_spill] sm:$0xff] %v4625_v20  ;;  %v4634_v53 = vld [vmem:[%s7516_s4 + $0x200] sm:$0xff] }
  0xef   :  { %1016 = vmatpush.msra.mxu3 %v4586_v1  ;;  %v4628_v1 = vpop.f32.mrf.mxu1  ;;  %983 = vmatpush.msra.mxu2 %v4607_v37  ;;  %7699 = vst [vmem:[#allocation48_spill] sm:$0xff] %v4634_v53  ;;  %v4649_v37 = vld [vmem:[%s7516_s4 + $0x1e8] sm:$0xff] }
  0xf0   :  { %1088 = vmatpush.msrb.mxu1 %v178_v58  ;;  %7700 = vst [vmem:[#allocation49_spill] sm:$0xff] %v4643_v49  ;;  %v4658_v58 = vld [vmem:[%s7516_s4 + $0x38] sm:$0xff] }
  0xf1   :  { %1017 = vmatpush.msra.mxu3 %v4613_v60  ;;  %984 = vmatpush.msra.mxu2 %v4625_v20  ;;  %7701 = vst [vmem:[#allocation50_spill] sm:$0xff] %v4649_v37  ;;  %v169_v20 = vld [vmem:[%s7516_s4 + $0x40] sm:$0xff]  ;;  %v4702_v60 = vld [vmem:[%s7516_s4 + $0x8] sm:$0xff] }
  0xf2   :  { %919 = vmatmul.f32.vlgmr.msra.gmra.mxu0 %v4412_v52  ;;  %7702 = vst [vmem:[#allocation51_spill] sm:$0xff] %v4658_v58 }
  0xf3   :  { %3078 = vmatmul.msk.f32.gmra.mxu2 %vm516_vm1, %v4127_v15  ;;  %3084 = vmatmul.msk.f32.gmra.mxu1 %vm516_vm1, %v4423_v46  ;;  %v175_v15 = vld [vmem:[%s7516_s4 + $0x70] sm:$0xff] }
  0xf4   :  { %887 = vmatmul.f32.gmra.mxu3 %v4446_v31  ;;  %1089 = vmatpush.msrb.mxu1 %v175_v15  ;;  %v4669_v15 = vld [vmem:[%s7516_s4 + $0x1d0] sm:$0xff] }
  0xf5   :  { %1018 = vmatpush.msra.mxu3 %v4634_v53  ;;  %985 = vmatpush.msra.mxu2 %v4643_v49  ;;  %v4675_v49 = vld [vmem:[%s7516_s4 + $0x20] sm:$0xff]  ;;  %v166_v53 = vld [vmem:[%s7516_s4 + $0x28] sm:$0xff] }
  0xf6   :  { %1090 = vmatpush.msrb.mxu1 %v172_v29  ;;  %7703 = vst [vmem:[#allocation52_spill] sm:$0xff] %v4675_v49  ;;  %v4681_v29 = vpop.f32.mrf.mxu3 }
  0xf7   :  { %1019 = vmatpush.msra.mxu3 %v4649_v37  ;;  %986 = vmatpush.msra.mxu2 %v4658_v58  ;;  %v4683_v37 = vpop.f32.mrf.mxu0  ;;  %v4691_v58 = vld [vmem:[%s7516_s4 + $0x350] sm:$0xff]  ;;  %v4714_v11 = vpop.f32.mrf.mxu1 }
  0xf8   :  { %7704 = vst [vmem:[#allocation53_spill] sm:$0xff] %v4691_v58  ;;  %1091 = vmatpush.msrb.mxu1 %v169_v20  ;;  %v4719_v20 = vld [vmem:[%s7516_s4 + $0x1a0] sm:$0xff]  ;;  %1055 = vmatpush.msrb.mxu0 %v4691_v58 }
  0xf9   :  { %1020 = vmatpush.msra.mxu3 %v4669_v15  ;;  %987 = vmatpush.msra.mxu2 %v4675_v49  ;;  %v4729_v49 = vld [vmem:[%s7516_s4 + $0x320] sm:$0xff] }
  0xfa   :  { %922 = vmatmul.f32.gmra.mxu0 %v4448_v39  ;;  %1092 = vmatpush.msrb.mxu1 %v166_v53  ;;  %7706 = vst [vmem:[#allocation55_spill] sm:$0xff] %v4729_v49  ;;  %v4736_v53 = vld [vmem:[%s7516_s4 + $0x188] sm:$0xff] }
  0xfb   :  { %3079 = vmatmul.msk.f32.gmra.mxu2 %vm516_vm1, %v4175_v28  ;;  %3085 = vmatmul.msk.f32.gmra.mxu1 %vm516_vm1, %v4480_v18  ;;  %v4697_v28 = vld [vmem:[%s7516_s4 + $0x1b8] sm:$0xff] }
  0xfc   :  { %890 = vmatmul.f32.gmra.mxu3 %v4531_v17  ;;  %988 = vmatpush.msra.mxu2 %v4702_v60 }
  0xfd   :  { %1021 = vmatpush.msra.mxu3 %v4697_v28  ;;  %1093 = vmatpush.msrb.mxu1 %v163_v5  ;;  %v4745_v5 = vld [vmem:[%s7516_s4 + $0x308] sm:$0xff] }
  0xfe   :  { %1056 = vmatpush.msrb.mxu0 %v4712_v35  ;;  %7707 = vst [vmem:[#allocation56_spill] sm:$0xff] %v4745_v5 }
  0xff   :  { %1022 = vmatpush.msra.mxu3 %v4719_v20  ;;  %1236 = vmatpush.msra.mxu1 %v3737_v27  ;;  %v4749_v27 = vpop.f32.mrf.mxu3  ;;  %v4751_v35 = vpop.f32.mrf.mxu0 }
 0x100   :  { %1057 = vmatpush.msrb.mxu0 %v4729_v49  ;;  %v3246_v49 = vld [vmem:[%s7515_s3 + $0x150] sm:$0xff] }
 0x101   :  { %1023 = vmatpush.msra.mxu3 %v4736_v53  ;;  %1237 = vmatpush.msra.mxu1 %v3749_v30  ;;  %v4775_v30 = vld [vmem:[%s7516_s4 + $0x2f8] sm:$0xff] }
 0x102   :  { %925 = vmatmul.f32.gmra.mxu0 %v4533_v32  ;;  %7708 = vst [vmem:[#allocation57_spill] sm:$0xff] %v4775_v30  ;;  %1113 = vmatpush.msrb.mxu2 %v4775_v30 }
 0x103   :  { %3080 = vmatmul.msk.f32.gmra.mxu2 %vm516_vm1, %v4195_v36  ;;  %3086 = vmatmul.msk.f32.gmra.mxu1 %vm516_vm1, %v4547_v59  ;;  %v3245_v36 = vld [vmem:[%s7515_s3 + $0x168] sm:$0xff] }
 0x104   :  { %893 = vmatmul.f32.gmra.mxu3 %v4598_v2  ;;  %1058 = vmatpush.msrb.mxu0 %v4745_v5 }
 0x105   :  { %1238 = vmatpush.msra.mxu1 %v3760_v33  ;;  %v3247_v33 = vld [vmem:[%s7515_s3 + $0x138] sm:$0xff] }
 0x106   :  { %1201 = vmatpush.msra.mxu0 %v3245_v36  ;;  %v4785_v36 = vld [vmem:[%s7516_s4 + $0x2e0] sm:$0xff] }
 0x107   :  { %1239 = vmatpush.msra.mxu1 %v3781_v38  ;;  %7709 = vst [vmem:[#allocation58_spill] sm:$0xff] %v4785_v36  ;;  %1114 = vmatpush.msrb.mxu2 %v4785_v36 }
 0x108   :  { %v4760_v58 = vpop.f32.mrf.mxu1  ;;  %1202 = vmatpush.msra.mxu0 %v3246_v49 }
 0x109   :  { %1240 = vmatpush.msra.mxu1 %v3797_v41  ;;  %v3248_v41 = vld [vmem:[%s7515_s3 + $0x120] sm:$0xff] }
 0x10a   :  { %928 = vmatmul.f32.gmra.mxu0 %v4600_v40 }
 0x10b   :  { %3081 = vmatmul.msk.f32.gmra.mxu2 %vm516_vm1, %v4223_v48  ;;  %3087 = vmatmul.msk.f32.gmra.mxu1 %vm516_vm1, %v4628_v1 }
 0x10c   :  { %896 = vmatmul.f32.gmra.mxu3 %v4681_v29  ;;  %1203 = vmatpush.msra.mxu0 %v3247_v33  ;;  %v4797_v33 = vld [vmem:[%s7516_s4 + $0x2c8] sm:$0xff] }
 0x10d   :  { %1241 = vmatpush.msra.mxu1 %v3809_v44  ;;  %7710 = vst [vmem:[#allocation59_spill] sm:$0xff] %v4797_v33  ;;  %1115 = vmatpush.msrb.mxu2 %v4797_v33  ;;  %v3249_v44 = vld [vmem:[%s7515_s3 + $0x108] sm:$0xff] }
 0x10e   :  { %v552_v38 = vpop.f32.mrf.mxu2  ;;  %1204 = vmatpush.msra.mxu0 %v3248_v41 }
 0x10f   :  { %v587_v49 = vpop.f32.mrf.mxu3  ;;  %v622_v48 = vpop.f32.mrf.mxu0  ;;  %1242 = vmatpush.msra.mxu1 %v3821_v47  ;;  %v4822_v47 = vld [vmem:[%s7516_s4 + $0x298] sm:$0xff] }
 0x110   :  { %v588_v5 = vadd.f32 %v587_v49, %v552_v38  ;;  %v4792_v30 = vpop.f32.mrf.mxu1  ;;  %1205 = vmatpush.msra.mxu0 %v3249_v44  ;;  %v4810_v38 = vld [vmem:[%s7516_s4 + $0x2b0] sm:$0xff]  ;;  %7712 = vst [vmem:[#allocation61_spill] sm:$0xff] %v4822_v47  ;;  %v3251_v44 = vld [vmem:[%s7515_s3 + $0xd8] sm:$0xff] }
 0x111   :  { %7711 = vst [vmem:[#allocation60_spill] sm:$0xff] %v4810_v38  ;;  %1243 = vmatpush.msra.mxu1 %v3838_v51  ;;  %1116 = vmatpush.msrb.mxu2 %v4810_v38  ;;  %v3262_v38 = vld [vmem:[%s7515_s3] sm:$0xff] }
 0x112   :  { %v4804_v36 = vadd.f32 %v622_v48, %v588_v5  ;;  %931 = vmatmul.f32.gmra.mxu0 %v4683_v37  ;;  %v3250_v48 = vld [vmem:[%s7515_s3 + $0xf0] sm:$0xff]  ;;  %v4832_v5 = vld [vmem:[%s7516_s4 + $0x280] sm:$0xff] }
 0x113   :  { %3082 = vmatmul.msk.f32.gmra.mxu2 %vm516_vm1, %v4261_v63  ;;  %3088 = vmatmul.msk.f32.gmra.mxu1 %vm516_vm1, %v4714_v11  ;;  %7713 = vst [vmem:[#allocation62_spill] sm:$0xff] %v4832_v5 }
 0x114   :  { %899 = vmatmul.f32.gmra.mxu3 %v4749_v27  ;;  %1206 = vmatpush.msra.mxu0 %v3250_v48 }
 0x115   :  { %1244 = vmatpush.msra.mxu1 %v3856_v54  ;;  %1117 = vmatpush.msrb.mxu2 %v4822_v47  ;;  %v4844_v54 = vld [vmem:[%s7516_s4 + $0x268] sm:$0xff]  ;;  %v3252_v47 = vld [vmem:[%s7515_s3 + $0xc0] sm:$0xff] }
 0x116   :  { %v555_v51 = vpop.f32.mrf.mxu2  ;;  %1207 = vmatpush.msra.mxu0 %v3251_v44  ;;  %7714 = vst [vmem:[#allocation63_spill] sm:$0xff] %v4844_v54 }
 0x117   :  { %v590_v49 = vpop.f32.mrf.mxu3  ;;  %v625_v41 = vpop.f32.mrf.mxu0  ;;  %1245 = vmatpush.msra.mxu1 %v3868_v57  ;;  %1118 = vmatpush.msrb.mxu2 %v4832_v5  ;;  %v4857_v57 = vld [vmem:[%s7516_s4 + $0x250] sm:$0xff]  ;;  %v4944_v5 = vld [vmem:[%s7516_s4 + $0x1a8] sm:$0xff] }
 0x118   :  { %v591_v48 = vadd.f32 %v590_v49, %v555_v51  ;;  %v4838_v63 = vpop.f32.mrf.mxu1  ;;  %1208 = vmatpush.msra.mxu0 %v3252_v47  ;;  %7715 = vst [vmem:[#allocation64_spill] sm:$0xff] %v4857_v57  ;;  %v3253_v47 = vld [vmem:[%s7515_s3 + $0xa8] sm:$0xff]  ;;  %v4876_v49 = vld [vmem:[%s7516_s4 + $0x220] sm:$0xff] }
 0x119   :  { %1246 = vmatpush.msra.mxu1 %v3884_v61  ;;  %1119 = vmatpush.msrb.mxu2 %v4844_v54  ;;  %v4866_v61 = vld [vmem:[%s7516_s4 + $0x238] sm:$0xff]  ;;  %7717 = vst [vmem:[#allocation66_spill] sm:$0xff] %v4876_v49 }
 0x11a   :  { %v4850_v44 = vadd.f32 %v625_v41, %v591_v48  ;;  %934 = vmatmul.f32.gmra.mxu0 %v4751_v35  ;;  %7716 = vst [vmem:[#allocation65_spill] sm:$0xff] %v4866_v61 }
 0x11b   :  { %989 = vmatmul.f32.vlgmr.msra.gmra.mxu2 %v4410_v23  ;;  %1094 = vmatmul.f32.vlgmr.msrb.gmra.mxu1 %v4410_v23  ;;  %7723 = vst [vmem:[#allocation72_spill] sm:$0xff] %v4944_v5 }
 0x11c   :  { %1024 = vmatmul.f32.vlgmr.msra.gmra.mxu3 %v4412_v52  ;;  %1120 = vmatpush.msrb.mxu2 %v4857_v57  ;;  %v3254_v57 = vld [vmem:[%s7515_s3 + $0x90] sm:$0xff] }
 0x11d   :  { %1209 = vmatpush.msra.mxu0 %v3253_v47  ;;  %1247 = vmatpush.msra.mxu1 %v3898_v0  ;;  %v4888_v0 = vld [vmem:[%s7516_s4 + $0x208] sm:$0xff] }
 0x11e   :  { %v558_v51 = vpop.f32.mrf.mxu2  ;;  %1121 = vmatpush.msrb.mxu2 %v4866_v61  ;;  %7718 = vst [vmem:[#allocation67_spill] sm:$0xff] %v4888_v0  ;;  %v3255_v61 = vld [vmem:[%s7515_s3 + $0x78] sm:$0xff] }
 0x11f   :  { %v593_v41 = vpop.f32.mrf.mxu3  ;;  %v628_v48 = vpop.f32.mrf.mxu0  ;;  %1210 = vmatpush.msra.mxu0 %v3254_v57  ;;  %1248 = vmatpush.msra.mxu1 %v3912_v3  ;;  %v4902_v3 = vld [vmem:[%s7516_s4 + $0x1f0] sm:$0xff] }
 0x120   :  { %v594_v47 = vadd.f32 %v593_v41, %v558_v51  ;;  %v4882_v54 = vpop.f32.mrf.mxu1  ;;  %1122 = vmatpush.msrb.mxu2 %v4876_v49  ;;  %7719 = vst [vmem:[#allocation68_spill] sm:$0xff] %v4902_v3  ;;  %v3256_v51 = vld [vmem:[%s7515_s3 + $0x60] sm:$0xff] }
 0x121   :  { %1211 = vmatpush.msra.mxu0 %v3255_v61  ;;  %1249 = vmatpush.msra.mxu1 %v3924_v6  ;;  %v4911_v6 = vld [vmem:[%s7516_s4 + $0x1d8] sm:$0xff] }
 0x122   :  { %v4894_v57 = vadd.f32 %v628_v48, %v594_v47  ;;  %3089 = vmatmul.msk.f32.vlgmr.msrb.gmra.mxu0 %vm516_vm1, %v4380_v26  ;;  %1123 = vmatpush.msrb.mxu2 %v4888_v0  ;;  %7720 = vst [vmem:[#allocation69_spill] sm:$0xff] %v4911_v6  ;;  %v4916_v61 = vld [vmem:[%s7516_s4 + $0x358] sm:$0xff]  ;;  %v4926_v48 = vld [vmem:[%s7516_s4 + $0x1c0] sm:$0xff] }
 0x123   :  { %992 = vmatmul.f32.gmra.mxu2 %v4446_v31  ;;  %1097 = vmatmul.f32.gmra.mxu1 %v4446_v31  ;;  %7721 = vst [vmem:[#allocation70_spill] sm:$0xff] %v4926_v48  ;;  %v4931_v47 = vld [vmem:[%s7516_s4 + $0x340] sm:$0xff] }
 0x124   :  { %1027 = vmatmul.f32.gmra.mxu3 %v4448_v39  ;;  %1124 = vmatpush.msrb.mxu2 %v4902_v3  ;;  %7722 = vst [vmem:[#allocation71_spill] sm:$0xff] %v4931_v47 }
 0x125   :  { %1160 = vmatpush.msrb.mxu3 %v4916_v61  ;;  %1212 = vmatpush.msra.mxu0 %v3256_v51  ;;  %v3257_v51 = vld [vmem:[%s7515_s3 + $0x48] sm:$0xff] }
 0x126   :  { %v561_v41 = vpop.f32.mrf.mxu2  ;;  %1125 = vmatpush.msrb.mxu2 %v4911_v6  ;;  %1250 = vmatpush.msra.mxu1 %v3937_v9  ;;  %v4949_v9 = vld [vmem:[%s7516_s4 + $0x328] sm:$0xff] }
 0x127   :  { %v596_v3 = vpop.f32.mrf.mxu3  ;;  %v631_v0 = vpop.f32.mrf.mxu0  ;;  %1161 = vmatpush.msrb.mxu3 %v4931_v47  ;;  %1213 = vmatpush.msra.mxu0 %v3257_v51  ;;  %7724 = vst [vmem:[#allocation73_spill] sm:$0xff] %v4949_v9  ;;  %v4964_v51 = vld [vmem:[%s7516_s4 + $0x190] sm:$0xff] }
 0x128   :  { %v597_v6 = vadd.f32 %v596_v3, %v561_v41  ;;  %v4938_v49 = vpop.f32.mrf.mxu1  ;;  %1126 = vmatpush.msrb.mxu2 %v4926_v48  ;;  %1251 = vmatpush.msra.mxu1 %v3963_v12  ;;  %v3258_v3 = vld [vmem:[%s7515_s3 + $0x30] sm:$0xff]  ;;  %7725 = vst [vmem:[#allocation74_spill] sm:$0xff] %v4964_v51 }
 0x129   :  { %1162 = vmatpush.msrb.mxu3 %v4949_v9  ;;  %1214 = vmatpush.msra.mxu0 %v3258_v3  ;;  %v4969_v12 = vld [vmem:[%s7516_s4 + $0x310] sm:$0xff] }
 0x12a   :  { %v4956_v41 = vadd.f32 %v631_v0, %v597_v6  ;;  %3090 = vmatmul.msk.f32.gmra.mxu0 %vm516_vm1, %v4423_v46  ;;  %1127 = vmatpush.msrb.mxu2 %v4944_v5  ;;  %7726 = vst [vmem:[#allocation75_spill] sm:$0xff] %v4969_v12  ;;  %v3259_v0 = vld [vmem:[%s7515_s3 + $0x18] sm:$0xff]  ;;  %v3260_v3 = vld [vmem:[%s7515_s3 + $0x170] sm:$0xff]  ;;  %v3261_v5 = vld [vmem:[%s7515_s3 + $0x348] sm:$0xff] }
 0x12b   :  { %995 = vmatmul.f32.gmra.mxu2 %v4531_v17  ;;  %1100 = vmatmul.f32.gmra.mxu1 %v4531_v17 }
 0x12c   :  { %1030 = vmatmul.f32.gmra.mxu3 %v4533_v32  ;;  %1128 = vmatpush.msrb.mxu2 %v4964_v51 }
 0x12d   :  { %1163 = vmatpush.msrb.mxu3 %v4969_v12  ;;  %1215 = vmatpush.msra.mxu0 %v3259_v0  ;;  %v3265_v12 = vld [vmem:[%s7515_s3 + $0x330] sm:$0xff] }
 0x12e   :  { %v564_v6 = vpop.f32.mrf.mxu2  ;;  %1283 = vmatpush.msra.mxu2 %v3261_v5  ;;  %1388 = vmatpush.msrb.mxu1 %v4104_v7  ;;  %v3264_v5 = vld [vmem:[%s7515_s3 + $0x2f0] sm:$0xff] }
 0x12f   :  { %1306 = vmatpush.msra.mxu3 %v3260_v3  ;;  %v599_v48 = vpop.f32.mrf.mxu3  ;;  %v634_v51 = vpop.f32.mrf.mxu0  ;;  %1216 = vmatpush.msra.mxu0 %v3262_v38  ;;  %v3263_v3 = vld [vmem:[%s7515_s3 + $0x158] sm:$0xff]  ;;  %v3266_v38 = vld [vmem:[%s7515_s3 + $0x140] sm:$0xff] }
 0x130   :  { %v600_v0 = vadd.f32 %v599_v48, %v564_v6  ;;  %v4989_v33 = vpop.f32.mrf.mxu1  ;;  %1284 = vmatpush.msra.mxu2 %v3265_v12  ;;  %1389 = vmatpush.msrb.mxu1 %v4112_v10  ;;  %v3267_v10 = vld [vmem:[%s7515_s3 + $0x2d8] sm:$0xff]  ;;  %v3268_v48 = vld [vmem:[%s7515_s3 + $0x128] sm:$0xff]  ;;  %v3270_v6 = vld [vmem:[%s7515_s3 + $0x2c0] sm:$0xff] }
 0x131   :  { %1307 = vmatpush.msra.mxu3 %v3263_v3  ;;  %1341 = vmatpush.msrb.mxu0 %v3264_v5  ;;  %v3271_v5 = vld [vmem:[%s7515_s3 + $0x110] sm:$0xff] }
 0x132   :  { %v5001_v7 = vadd.f32 %v634_v51, %v600_v0  ;;  %3091 = vmatmul.msk.f32.gmra.mxu0 %vm516_vm1, %v4480_v18  ;;  %v3269_v51 = vld [vmem:[%s7515_s3 + $0x318] sm:$0xff]  ;;  %1390 = vmatpush.msrb.mxu1 %v4125_v14 }
 0x133   :  { %1308 = vmatpush.msra.mxu3 %v3266_v38  ;;  %998 = vmatmul.f32.gmra.mxu2 %v4598_v2  ;;  %v3272_v38 = vld [vmem:[%s7515_s3 + $0x300] sm:$0xff]  ;;  %v3274_v14 = vld [vmem:[%s7515_s3 + $0xf8] sm:$0xff] }
 0x134   :  { %1103 = vmatmul.f32.gmra.mxu1 %v4598_v2  ;;  %1033 = vmatmul.f32.gmra.mxu3 %v4600_v40 }
 0x135   :  { %1342 = vmatpush.msrb.mxu0 %v3267_v10  ;;  %1309 = vmatpush.msra.mxu3 %v3268_v48 }
 0x136   :  { %1285 = vmatpush.msra.mxu2 %v3269_v51  ;;  %v567_v12 = vpop.f32.mrf.mxu2  ;;  %v3273_v51 = vld [vmem:[%s7515_s3 + $0x2a8] sm:$0xff]  ;;  %1391 = vmatpush.msrb.mxu1 %v4155_v22  ;;  %v3275_v22 = vld [vmem:[%s7515_s3 + $0x290] sm:$0xff] }
 0x137   :  { %1343 = vmatpush.msrb.mxu0 %v3270_v6  ;;  %v602_v0 = vpop.f32.mrf.mxu3  ;;  %v637_v3 = vpop.f32.mrf.mxu0  ;;  %1310 = vmatpush.msra.mxu3 %v3271_v5 }
 0x138   :  { %1286 = vmatpush.msra.mxu2 %v3272_v38  ;;  %v603_v10 = vadd.f32 %v602_v0, %v567_v12  ;;  %v5030_v48 = vpop.f32.mrf.mxu1  ;;  %v3276_v12 = vld [vmem:[%s7515_s3 + $0xe0] sm:$0xff] }
 0x139   :  { %1344 = vmatpush.msrb.mxu0 %v3273_v51  ;;  %1311 = vmatpush.msra.mxu3 %v3274_v14  ;;  %v3278_v51 = vld [vmem:[%s7515_s3 + $0xc8] sm:$0xff] }
 0x13a   :  { %v5039_v6 = vadd.f32 %v637_v3, %v603_v10  ;;  %3092 = vmatmul.msk.f32.gmra.mxu0 %vm516_vm1, %v4547_v59  ;;  %v3277_v3 = vld [vmem:[%s7515_s3 + $0x278] sm:$0xff] }
 0x13b   :  { %1001 = vmatmul.f32.gmra.mxu2 %v4681_v29  ;;  %1345 = vmatpush.msrb.mxu0 %v3275_v22  ;;  %v3279_v22 = vld [vmem:[%s7515_s3 + $0x260] sm:$0xff] }
 0x13c   :  { %7727 = vst [vmem:[#allocation76_spill] sm:$0xff] %v5039_v6  ;;  %1106 = vmatmul.f32.gmra.mxu1 %v4681_v29  ;;  %1036 = vmatmul.f32.gmra.mxu3 %v4683_v37 }
 0x13d   :  { %1312 = vmatpush.msra.mxu3 %v3276_v12  ;;  %1346 = vmatpush.msrb.mxu0 %v3277_v3  ;;  %v3282_v3 = vld [vmem:[%s7515_s3 + $0x98] sm:$0xff] }
 0x13e   :  { %v692_v0 = vpop.f32.mrf.mxu2 }
 0x13f   :  { %v693_v5 = vadd.f32 %v692_v0, %v4760_v58  ;;  %v727_v38 = vpop.f32.mrf.mxu3  ;;  %v5056_v10 = vpop.f32.mrf.mxu0  ;;  %1313 = vmatpush.msra.mxu3 %v3278_v51  ;;  %1347 = vmatpush.msrb.mxu0 %v3279_v22  ;;  %v3280_v58 = vld [vmem:[%s7515_s3 + $0xb0] sm:$0xff]  ;;  %v3281_v0 = vld [vmem:[%s7515_s3 + $0x248] sm:$0xff] }
 0x140   :  { %v5061_v14 = vpop.f32.mrf.mxu1 }
 0x141   :  { %v5066_v12 = vadd.f32 %v727_v38, %v693_v5  ;;  %1314 = vmatpush.msra.mxu3 %v3280_v58  ;;  %1348 = vmatpush.msrb.mxu0 %v3281_v0  ;;  %v3283_v38 = vld [vmem:[%s7515_s3 + $0x230] sm:$0xff]  ;;  %v3284_v0 = vld [vmem:[%s7515_s3 + $0x80] sm:$0xff] }
 0x142   :  { %3093 = vmatmul.msk.f32.gmra.mxu0 %vm516_vm1, %v4628_v1 }
 0x143   :  { %1004 = vmatmul.f32.gmra.mxu2 %v4749_v27  ;;  %1315 = vmatpush.msra.mxu3 %v3282_v3  ;;  %v3285_v3 = vld [vmem:[%s7515_s3 + $0x218] sm:$0xff] }
 0x144   :  { %1109 = vmatmul.f32.gmra.mxu1 %v4749_v27  ;;  %1039 = vmatmul.f32.gmra.mxu3 %v4751_v35 }
 0x145   :  { %1349 = vmatpush.msrb.mxu0 %v3283_v38  ;;  %1316 = vmatpush.msra.mxu3 %v3284_v0  ;;  %v3288_v38 = vld [vmem:[%s7515_s3 + $0x50] sm:$0xff]  ;;  %v3290_v0 = vld [vmem:[%s7515_s3 + $0x1e8] sm:$0xff] }
 0x146   :  { %v695_v5 = vpop.f32.mrf.mxu2 }
 0x147   :  { %v696_v51 = vadd.f32 %v695_v5, %v4792_v30  ;;  %v730_v22 = vpop.f32.mrf.mxu3  ;;  %v5086_v58 = vpop.f32.mrf.mxu0  ;;  %1350 = vmatpush.msrb.mxu0 %v3285_v3  ;;  %v3286_v30 = vld [vmem:[%s7515_s3 + $0x68] sm:$0xff]  ;;  %v3287_v5 = vld [vmem:[%s7515_s3 + $0x200] sm:$0xff] }
 0x148   :  { %v5091_v6 = vpop.f32.mrf.mxu1  ;;  %1317 = vmatpush.msra.mxu3 %v3286_v30 }
 0x149   :  { %v5096_v9 = vadd.f32 %v730_v22, %v696_v51  ;;  %1351 = vmatpush.msrb.mxu0 %v3287_v5  ;;  %v3289_v51 = vld [vmem:[%s7515_s3 + $0x178] sm:$0xff] }
 0x14a   :  { %3094 = vmatmul.msk.f32.gmra.mxu0 %vm516_vm1, %v4714_v11  ;;  %1318 = vmatpush.msra.mxu3 %v3288_v38  ;;  %v3291_v38 = vld [vmem:[%s7515_s3 + $0x38] sm:$0xff] }
 0x14b   :  { %1129 = vmatmul.f32.vlgmr.msrb.gmra.mxu2 %v4412_v52  ;;  %1352 = vmatpush.msrb.mxu0 %v3290_v0  ;;  %v3295_v0 = vld [vmem:[%s7515_s3 + $0x148] sm:$0xff] }
 0x14c   :  { %1252 = vmatmul.f32.vlgmr.msra.gmra.mxu1 %v4412_v52  ;;  %3095 = vmatmul.msk.f32.vlgmr.msrb.gmra.mxu3 %vm516_vm1, %v4380_v26 }
 0x14d   :  { %1411 = vmatpush.msrb.mxu2 %v3289_v51  ;;  %1516 = vmatpush.msra.mxu1 %v4209_v42  ;;  %v3292_v51 = vld [vmem:[%s7515_s3 + $0x160] sm:$0xff]  ;;  %v3293_v42 = vld [vmem:[%s7515_s3 + $0x1d0] sm:$0xff] }
 0x14e   :  { %v698_v22 = vpop.f32.mrf.mxu2  ;;  %1319 = vmatpush.msra.mxu3 %v3291_v38  ;;  %1353 = vmatpush.msrb.mxu0 %v3293_v42  ;;  %v3299_v38 = vld [vmem:[%s7515_s3 + $0x2f8] sm:$0xff] }
 0x14f   :  { %v699_v3 = vadd.f32 %v698_v22, %v4838_v63  ;;  %v733_v30 = vpop.f32.mrf.mxu3  ;;  %v5121_v5 = vpop.f32.mrf.mxu0  ;;  %1412 = vmatpush.msrb.mxu2 %v3292_v51  ;;  %1517 = vmatpush.msra.mxu1 %v4214_v43  ;;  %v3294_v22 = vld [vmem:[%s7515_s3 + $0x20] sm:$0xff]  ;;  %v3296_v43 = vld [vmem:[%s7515_s3 + $0x1b8] sm:$0xff] }
 0x150   :  { %v5129_v47 = vpop.f32.mrf.mxu1  ;;  %1320 = vmatpush.msra.mxu3 %v3294_v22  ;;  %1354 = vmatpush.msrb.mxu0 %v3296_v43 }
 0x151   :  { %v5135_v63 = vadd.f32 %v733_v30, %v699_v3  ;;  %1413 = vmatpush.msrb.mxu2 %v3295_v0  ;;  %1518 = vmatpush.msra.mxu1 %v4220_v45  ;;  %v3297_v3 = vld [vmem:[%s7515_s3 + $0x8] sm:$0xff]  ;;  %v3298_v45 = vld [vmem:[%s7515_s3 + $0x130] sm:$0xff]  ;;  %v3300_v0 = vld [vmem:[%s7515_s3 + $0x118] sm:$0xff] }
 0x152   :  { %1217 = vmatmul.f32.vlgmr.msra.gmra.mxu0 %v4410_v23  ;;  %1321 = vmatpush.msra.mxu3 %v3297_v3  ;;  %v3305_v3 = vld [vmem:[%s7515_s3 + $0xe8] sm:$0xff] }
 0x153   :  { %1132 = vmatmul.f32.gmra.mxu2 %v4448_v39  ;;  %1355 = vmatpush.msrb.mxu0 %v4142_v19  ;;  %v3301_v19 = vld [vmem:[%s7515_s3 + $0x2e0] sm:$0xff] }
 0x154   :  { %1255 = vmatmul.f32.gmra.mxu1 %v4448_v39  ;;  %3096 = vmatmul.msk.f32.gmra.mxu3 %vm516_vm1, %v4423_v46 }
 0x155   :  { %1414 = vmatpush.msrb.mxu2 %v3298_v45  ;;  %1446 = vmatpush.msrb.mxu3 %v3299_v38 }
 0x156   :  { %v701_v30 = vpop.f32.mrf.mxu2  ;;  %1519 = vmatpush.msra.mxu1 %v4233_v50  ;;  %1356 = vmatpush.msrb.mxu0 %v4164_v24  ;;  %v3302_v50 = vld [vmem:[%s7515_s3 + $0x100] sm:$0xff]  ;;  %v3303_v24 = vld [vmem:[%s7515_s3 + $0x2c8] sm:$0xff] }
 0x157   :  { %v702_v51 = vadd.f32 %v701_v30, %v4882_v54  ;;  %v736_v42 = vpop.f32.mrf.mxu3  ;;  %v5163_v22 = vpop.f32.mrf.mxu0  ;;  %1415 = vmatpush.msrb.mxu2 %v3300_v0  ;;  %1447 = vmatpush.msrb.mxu3 %v3301_v19  ;;  %v3312_v19 = vld [vmem:[%s7515_s3 + $0x88] sm:$0xff] }
 0x158   :  { %v5169_v43 = vpop.f32.mrf.mxu1  ;;  %1520 = vmatpush.msra.mxu1 %v4246_v55  ;;  %v3304_v55 = vld [vmem:[%s7515_s3 + $0x2b0] sm:$0xff]  ;;  %1493 = vmatpush.msra.mxu0 %v4293_v13  ;;  %v3308_v13 = vld [vmem:[%s7515_s3 + $0x280] sm:$0xff] }
 0x159   :  { %v5175_v54 = vadd.f32 %v736_v42, %v702_v51  ;;  %1416 = vmatpush.msrb.mxu2 %v3302_v50  ;;  %1448 = vmatpush.msrb.mxu3 %v3303_v24  ;;  %v3307_v42 = vld [vmem:[%s7515_s3 + $0xd0] sm:$0xff] }
 0x15a   :  { %1220 = vmatmul.f32.gmra.mxu0 %v4446_v31  ;;  %1521 = vmatpush.msra.mxu1 %v4258_v62  ;;  %v3306_v62 = vld [vmem:[%s7515_s3 + $0x298] sm:$0xff] }
 0x15b   :  { %1135 = vmatmul.f32.gmra.mxu2 %v4533_v32  ;;  %1449 = vmatpush.msrb.mxu3 %v3304_v55 }
 0x15c   :  { %1258 = vmatmul.f32.gmra.mxu1 %v4533_v32  ;;  %3097 = vmatmul.msk.f32.gmra.mxu3 %vm516_vm1, %v4480_v18 }
 0x15d   :  { %1417 = vmatpush.msrb.mxu2 %v3305_v3  ;;  %1522 = vmatpush.msra.mxu1 %v4272_v4  ;;  %v3313_v3 = vld [vmem:[%s7515_s3 + $0x250] sm:$0xff] }
 0x15e   :  { %v704_v45 = vpop.f32.mrf.mxu2  ;;  %1450 = vmatpush.msrb.mxu3 %v3306_v62  ;;  %1494 = vmatpush.msra.mxu0 %v4334_v34  ;;  %v3311_v34 = vld [vmem:[%s7515_s3 + $0x268] sm:$0xff]  ;;  %v7730_v62 = vld [vmem:[#allocation21_spill] sm:$0xff] }
 0x15f   :  { %v705_v30 = vadd.f32 %v704_v45, %v4938_v49  ;;  %v739_v38 = vpop.f32.mrf.mxu3  ;;  %v5199_v51 = vpop.f32.mrf.mxu0  ;;  %1418 = vmatpush.msrb.mxu2 %v3307_v42  ;;  %1523 = vmatpush.msra.mxu1 %v4284_v8  ;;  %v3309_v49 = vld [vmem:[%s7515_s3 + $0xb8] sm:$0xff]  ;;  %v3310_v8 = vld [vmem:[%s7515_s3 + $0xa0] sm:$0xff]  ;;  %v3314_v45 = vld [vmem:[%s7515_s3 + $0x70] sm:$0xff]  ;;  %v798_v42 = vadd.f32 %v5030_v48, %v5056_v10 }
 0x160   :  { %v5207_v0 = vpop.f32.mrf.mxu1  ;;  %1451 = vmatpush.msrb.mxu3 %v3308_v13  ;;  %1495 = vmatpush.msra.mxu0 %v4348_v56  ;;  %v3317_v13 = vld [vmem:[%s7515_s3 + $0x220] sm:$0xff]  ;;  %v3319_v48 = vld [vmem:[%s7515_s3 + $0x208] sm:$0xff] }
 0x161   :  { %v5211_v4 = vadd.f32 %v739_v38, %v705_v30  ;;  %1419 = vmatpush.msrb.mxu2 %v3309_v49  ;;  %1524 = vmatpush.msra.mxu1 %v4298_v16  ;;  %v7728_v30 = vld [vmem:[#allocation22_spill] sm:$0xff]  ;;  %v7729_v38 = vld [vmem:[#allocation20_spill] sm:$0xff]  ;;  %v3320_v10 = vld [vmem:[%s7515_s3 + $0x28] sm:$0xff] }
 0x162   :  { %1223 = vmatmul.f32.gmra.mxu0 %v4531_v17  ;;  %1452 = vmatpush.msrb.mxu3 %v3311_v34  ;;  %v3318_v49 = vld [vmem:[%s7515_s3 + $0x40] sm:$0xff]  ;;  %v7731_v34 = vld [vmem:[#allocation23_spill] sm:$0xff] }
 0x163   :  { %1138 = vmatmul.f32.gmra.mxu2 %v4600_v40  ;;  %1525 = vmatpush.msra.mxu1 %v4310_v21 }
 0x164   :  { %1261 = vmatmul.f32.gmra.mxu1 %v4600_v40  ;;  %3098 = vmatmul.msk.f32.gmra.mxu3 %vm516_vm1, %v4547_v59 }
 0x165   :  { %1420 = vmatpush.msrb.mxu2 %v3310_v8  ;;  %1453 = vmatpush.msrb.mxu3 %v3313_v3 }
 0x166   :  { %v707_v16 = vpop.f32.mrf.mxu2  ;;  %1526 = vmatpush.msra.mxu1 %v4322_v25  ;;  %1496 = vmatpush.msra.mxu0 %v7728_v30  ;;  %v3316_v25 = vld [vmem:[%s7515_s3 + $0x58] sm:$0xff]  ;;  %v3321_v30 = vld [vmem:[%s7515_s3 + $0x1f0] sm:$0xff] }
 0x167   :  { %1421 = vmatpush.msrb.mxu2 %v3312_v19  ;;  %v708_v50 = vadd.f32 %v707_v16, %v4989_v33  ;;  %v742_v24 = vpop.f32.mrf.mxu3  ;;  %v5237_v55 = vpop.f32.mrf.mxu0  ;;  %v3315_v33 = vld [vmem:[%s7515_s3 + $0x238] sm:$0xff] }
 0x168   :  { %v955_v21 = vpop.f32.mrf.mxu1  ;;  %1454 = vmatpush.msrb.mxu3 %v3315_v33  ;;  %1527 = vmatpush.msra.mxu1 %v7729_v38  ;;  %v3322_v33 = vld [vmem:[%s7515_s3 + $0x10] sm:$0xff] }
 0x169   :  { %1422 = vmatpush.msrb.mxu2 %v3314_v45  ;;  %v5247_v56 = vadd.f32 %v742_v24, %v708_v50  ;;  %v7733_v45 = vld [vmem:[#allocation24_spill] sm:$0xff] }
 0x16a   :  { %1226 = vmatmul.f32.gmra.mxu0 %v4598_v2  ;;  %1528 = vmatpush.msra.mxu1 %v7730_v62 }
 0x16b   :  { %1423 = vmatpush.msrb.mxu2 %v3316_v25  ;;  %1455 = vmatpush.msrb.mxu3 %v3317_v13  ;;  %v7734_v25 = vld [vmem:[#allocation25_spill] sm:$0xff] }
 0x16c   :  { %1141 = vmatmul.f32.gmra.mxu2 %v4683_v37  ;;  %1264 = vmatmul.f32.gmra.mxu1 %v4683_v37 }
 0x16d   :  { %3099 = vmatmul.msk.f32.gmra.mxu3 %vm516_vm1, %v4628_v1  ;;  %1424 = vmatpush.msrb.mxu2 %v3318_v49 }
 0x16e   :  { %v832_v8 = vpop.f32.mrf.mxu2  ;;  %1529 = vmatpush.msra.mxu1 %v7731_v34  ;;  %1456 = vmatpush.msrb.mxu3 %v3319_v48 }
 0x16f   :  { %v5271_v16 = vadd.f32 %v832_v8, %v798_v42  ;;  %v885_v19 = vpop.f32.mrf.mxu3  ;;  %v920_v50 = vpop.f32.mrf.mxu0  ;;  %1425 = vmatpush.msrb.mxu2 %v3320_v10  ;;  %v801_v42 = vadd.f32 %v5061_v14, %v5086_v58  ;;  %v3325_v14 = vld [vmem:[%s7515_s3 + $0x1a8] sm:$0xff] }
 0x170   :  { %v921_v24 = vadd.f32 %v920_v50, %v885_v19  ;;  %v958_v3 = vpop.f32.mrf.mxu1  ;;  %1530 = vmatpush.msra.mxu1 %v7733_v45  ;;  %1457 = vmatpush.msrb.mxu3 %v3321_v30  ;;  %v3324_v19 = vld [vmem:[%s7515_s3 + $0x1c0] sm:$0xff]  ;;  %v804_v45 = vadd.f32 %v5091_v6, %v5121_v5  ;;  %v3327_v30 = vld [vmem:[%s7516_s4 + $0x2e8] sm:$0xff] }
 0x171   :  { %7732 = vst [vmem:[#allocation22_spill] sm:$0xff] %v5271_v16  ;;  %1426 = vmatpush.msrb.mxu2 %v3322_v33 }
 0x172   :  { %v5286_v38 = vadd.f32 %v955_v21, %v921_v24  ;;  %1229 = vmatmul.f32.gmra.mxu0 %v4681_v29  ;;  %1531 = vmatpush.msra.mxu1 %v7734_v25  ;;  %v3323_v21 = vld [vmem:[%s7515_s3 + $0x1d8] sm:$0xff]  ;;  %v7736_v24 = vld [vmem:[#allocation27_spill] sm:$0xff] }
 0x173   :  { %1458 = vmatpush.msrb.mxu3 %v3323_v21  ;;  %v7737_v25 = vld [vmem:[#allocation29_spill] sm:$0xff] }
 0x174   :  { %1144 = vmatmul.f32.gmra.mxu2 %v4751_v35  ;;  %1267 = vmatmul.f32.gmra.mxu1 %v4751_v35  ;;  %v1183_v62 = vsub.f32 %v4804_v36, %v5286_v38  ;;  %v7811_v38 = vld [vmem:[#allocation9_spill] sm:$0xff]  ;;  %v7824_v36 = vld [vmem:[#allocation19_spill] sm:$0xff] }
 0x175   :  { %3100 = vmatmul.msk.f32.gmra.mxu3 %vm516_vm1, %v4714_v11 }
 0x176   :  { %v835_v13 = vpop.f32.mrf.mxu2  ;;  %1459 = vmatpush.msrb.mxu3 %v3324_v19  ;;  %v7739_v19 = vld [vmem:[#allocation31_spill] sm:$0xff] }
 0x177   :  { %v5301_v49 = vadd.f32 %v835_v13, %v801_v42  ;;  %v888_v8 = vpop.f32.mrf.mxu3  ;;  %v923_v34 = vpop.f32.mrf.mxu0  ;;  %v3328_v42 = vld [vmem:[%s7516_s4 + $0x348] sm:$0xff]  ;;  %v3329_v13 = vld [vmem:[%s7516_s4 + $0x2d0] sm:$0xff] }
 0x178   :  { %v924_v50 = vadd.f32 %v923_v34, %v888_v8  ;;  %v961_v48 = vpop.f32.mrf.mxu1  ;;  %1460 = vmatpush.msrb.mxu3 %v3325_v14  ;;  %v3331_v14 = vld [vmem:[%s7516_s4 + $0x2b8] sm:$0xff] }
 0x179   :  { %7735 = vst [vmem:[#allocation20_spill] sm:$0xff] %v5301_v49 }
 0x17a   :  { %v5309_v58 = vadd.f32 %v958_v3, %v924_v50  ;;  %1232 = vmatmul.f32.gmra.mxu0 %v4749_v27  ;;  %v3326_v3 = vld [vmem:[%s7515_s3 + $0x190] sm:$0xff] }
 0x17b   :  { %1461 = vmatpush.msrb.mxu3 %v3326_v3  ;;  %v3330_v50 = vld [vmem:[%s7516_s4 + $0x330] sm:$0xff] }
 0x17c   :  { %3101 = vmatmul.msk.f32.vlgmr.msra.gmra.mxu2 %vm516_vm1, %v4380_v26  ;;  %3107 = vmatmul.msk.f32.vlgmr.msrb.gmra.mxu1 %vm516_vm1, %v4380_v26  ;;  %v1186_v10 = vsub.f32 %v4850_v44, %v5309_v58 }
 0x17d   :  { %1322 = vmatmul.f32.vlgmr.msra.gmra.mxu3 %v4410_v23  ;;  %1656 = vmatpush.msrb.mxu1 %v7736_v24 }
 0x17e   :  { %1551 = vmatpush.msra.mxu2 %v3327_v30  ;;  %v838_v33 = vpop.f32.mrf.mxu2  ;;  %1598 = vmatpush.msra.mxu3 %v3328_v42  ;;  %v7741_v30 = vld [vmem:[#allocation35_spill] sm:$0xff] }
 0x17f   :  { %1657 = vmatpush.msrb.mxu1 %v7737_v25  ;;  %v5332_v21 = vadd.f32 %v838_v33, %v804_v45  ;;  %v891_v6 = vpop.f32.mrf.mxu3  ;;  %v926_v5 = vpop.f32.mrf.mxu0  ;;  %v7740_v45 = vld [vmem:[#allocation33_spill] sm:$0xff]  ;;  %v3332_v33 = vld [vmem:[%s7516_s4 + $0x2a0] sm:$0xff] }
 0x180   :  { %1552 = vmatpush.msra.mxu2 %v3329_v13  ;;  %v927_v8 = vadd.f32 %v926_v5, %v891_v6  ;;  %v964_v34 = vpop.f32.mrf.mxu1  ;;  %1599 = vmatpush.msra.mxu3 %v3330_v50  ;;  %v7742_v25 = vld [vmem:[#allocation26_spill] sm:$0xff]  ;;  %v7743_v6 = vld [vmem:[#allocation37_spill] sm:$0xff] }
 0x181   :  { %7738 = vst [vmem:[#allocation21_spill] sm:$0xff] %v5332_v21  ;;  %1658 = vmatpush.msrb.mxu1 %v7739_v19  ;;  %v3333_v5 = vld [vmem:[%s7516_s4 + $0x318] sm:$0xff] }
 0x182   :  { %1553 = vmatpush.msra.mxu2 %v3331_v14  ;;  %v5344_v24 = vadd.f32 %v961_v48, %v927_v8  ;;  %1357 = vmatmul.f32.vlgmr.msrb.gmra.mxu0 %v4412_v52  ;;  %v807_v48 = vadd.f32 %v5129_v47, %v5163_v22  ;;  %v3334_v47 = vld [vmem:[%s7516_s4 + $0x288] sm:$0xff]  ;;  %v7745_v22 = vld [vmem:[#allocation28_spill] sm:$0xff] }
 0x183   :  { %1659 = vmatpush.msrb.mxu1 %v7740_v45  ;;  %1621 = vmatpush.msrb.mxu0 %v7742_v25  ;;  %v7746_v45 = vld [vmem:[#allocation39_spill] sm:$0xff] }
 0x184   :  { %3102 = vmatmul.msk.f32.gmra.mxu2 %vm516_vm1, %v4423_v46  ;;  %3108 = vmatmul.msk.f32.gmra.mxu1 %vm516_vm1, %v4423_v46  ;;  %v1189_v3 = vsub.f32 %v4894_v57, %v5344_v24  ;;  %v7807_v24 = vld [vmem:[#allocation6_spill] sm:$0xff] }
 0x185   :  { %1325 = vmatmul.f32.gmra.mxu3 %v4446_v31  ;;  %1660 = vmatpush.msrb.mxu1 %v7741_v30  ;;  %v3335_v30 = vld [vmem:[%s7516_s4 + $0x300] sm:$0xff] }
 0x186   :  { %1554 = vmatpush.msra.mxu2 %v3332_v33  ;;  %v841_v42 = vpop.f32.mrf.mxu2  ;;  %1600 = vmatpush.msra.mxu3 %v3333_v5  ;;  %v7747_v33 = vld [vmem:[#allocation30_spill] sm:$0xff]  ;;  %v7749_v5 = vld [vmem:[#allocation43_spill] sm:$0xff] }
 0x187   :  { %1661 = vmatpush.msrb.mxu1 %v7743_v6  ;;  %v5366_v13 = vadd.f32 %v841_v42, %v807_v48  ;;  %v894_v8 = vpop.f32.mrf.mxu3  ;;  %v929_v19 = vpop.f32.mrf.mxu0  ;;  %1622 = vmatpush.msrb.mxu0 %v7745_v22  ;;  %v3336_v48 = vld [vmem:[%s7516_s4 + $0x270] sm:$0xff]  ;;  %v7748_v42 = vld [vmem:[#allocation41_spill] sm:$0xff]  ;;  %v7751_v22 = vld [vmem:[#allocation46_spill] sm:$0xff] }
 0x188   :  { %1555 = vmatpush.msra.mxu2 %v3334_v47  ;;  %v930_v50 = vadd.f32 %v929_v19, %v894_v8  ;;  %v967_v14 = vpop.f32.mrf.mxu1  ;;  %1601 = vmatpush.msra.mxu3 %v3335_v30  ;;  %v3337_v8 = vld [vmem:[%s7516_s4 + $0x258] sm:$0xff]  ;;  %v7750_v19 = vld [vmem:[#allocation32_spill] sm:$0xff] }
 0x189   :  { %7744 = vst [vmem:[#allocation23_spill] sm:$0xff] %v5366_v13  ;;  %1662 = vmatpush.msrb.mxu1 %v7746_v45  ;;  %1623 = vmatpush.msrb.mxu0 %v7747_v33 }
 0x18a   :  { %1556 = vmatpush.msra.mxu2 %v3336_v48  ;;  %v5380_v25 = vadd.f32 %v964_v34, %v930_v50  ;;  %1360 = vmatmul.f32.gmra.mxu0 %v4448_v39  ;;  %v810_v34 = vadd.f32 %v5169_v43, %v5199_v51  ;;  %v3338_v48 = vld [vmem:[%s7516_s4 + $0x240] sm:$0xff] }
 0x18b   :  { %1663 = vmatpush.msrb.mxu1 %v7748_v42  ;;  %1624 = vmatpush.msrb.mxu0 %v7750_v19  ;;  %v7753_v43 = vld [vmem:[#allocation34_spill] sm:$0xff]  ;;  %v7754_v42 = vld [vmem:[#allocation48_spill] sm:$0xff] }
 0x18c   :  { %3103 = vmatmul.msk.f32.gmra.mxu2 %vm516_vm1, %v4480_v18  ;;  %3109 = vmatmul.msk.f32.gmra.mxu1 %vm516_vm1, %v4480_v18  ;;  %v1192_v6 = vsub.f32 %v4956_v41, %v5380_v25  ;;  %v7756_v19 = vld [vmem:[#allocation50_spill] sm:$0xff] }
 0x18d   :  { %1328 = vmatmul.f32.gmra.mxu3 %v4531_v17  ;;  %1664 = vmatpush.msrb.mxu1 %v7749_v5  ;;  %v3339_v5 = vld [vmem:[%s7516_s4 + $0x228] sm:$0xff] }
 0x18e   :  { %1557 = vmatpush.msra.mxu2 %v3337_v8  ;;  %v844_v47 = vpop.f32.mrf.mxu2  ;;  %1625 = vmatpush.msrb.mxu0 %v7753_v43 }
 0x18f   :  { %1665 = vmatpush.msrb.mxu1 %v7751_v22  ;;  %v5399_v50 = vadd.f32 %v844_v47, %v810_v34  ;;  %v897_v45 = vpop.f32.mrf.mxu3  ;;  %v932_v30 = vpop.f32.mrf.mxu0  ;;  %v7755_v34 = vld [vmem:[#allocation36_spill] sm:$0xff] }
 0x190   :  { %1558 = vmatpush.msra.mxu2 %v3338_v48  ;;  %v933_v51 = vadd.f32 %v932_v30, %v897_v45  ;;  %v5405_v33 = vpop.f32.mrf.mxu1  ;;  %1626 = vmatpush.msrb.mxu0 %v7755_v34  ;;  %v3340_v22 = vld [vmem:[%s7516_s4 + $0x210] sm:$0xff]  ;;  %v7757_v45 = vld [vmem:[#allocation38_spill] sm:$0xff] }
 0x191   :  { %7752 = vst [vmem:[#allocation24_spill] sm:$0xff] %v5399_v50  ;;  %1666 = vmatpush.msrb.mxu1 %v7754_v42  ;;  %v7760_v42 = vld [vmem:[#allocation42_spill] sm:$0xff] }
 0x192   :  { %1559 = vmatpush.msra.mxu2 %v3339_v5  ;;  %v5412_v8 = vadd.f32 %v967_v14, %v933_v51  ;;  %1363 = vmatmul.f32.gmra.mxu0 %v4533_v32  ;;  %v813_v14 = vadd.f32 %v5207_v0, %v5237_v55  ;;  %v7759_v0 = vld [vmem:[#allocation40_spill] sm:$0xff] }
 0x193   :  { %1667 = vmatpush.msrb.mxu1 %v7756_v19  ;;  %1627 = vmatpush.msrb.mxu0 %v7757_v45  ;;  %v7761_v5 = vld [vmem:[#allocation44_spill] sm:$0xff] }
 0x194   :  { %3104 = vmatmul.msk.f32.gmra.mxu2 %vm516_vm1, %v4547_v59  ;;  %3110 = vmatmul.msk.f32.gmra.mxu1 %vm516_vm1, %v4547_v59  ;;  %v1195_v47 = vsub.f32 %v5001_v7, %v5412_v8 }
 0x195   :  { %1331 = vmatmul.f32.gmra.mxu3 %v4598_v2  ;;  %1668 = vmatpush.msrb.mxu1 %v4669_v15  ;;  %v3341_v15 = vld [vmem:[%s7516_s4 + $0x1f8] sm:$0xff] }
 0x196   :  { %1560 = vmatpush.msra.mxu2 %v3340_v22  ;;  %v847_v30 = vpop.f32.mrf.mxu2  ;;  %1628 = vmatpush.msrb.mxu0 %v7759_v0  ;;  %v7762_v22 = vld [vmem:[#allocation45_spill] sm:$0xff]  ;;  %v7763_v0 = vld [vmem:[#allocation47_spill] sm:$0xff] }
 0x197   :  { %1669 = vmatpush.msrb.mxu1 %v4697_v28  ;;  %v5431_v48 = vadd.f32 %v847_v30, %v813_v14  ;;  %v5433_v43 = vpop.f32.mrf.mxu3  ;;  %v5435_v51 = vpop.f32.mrf.mxu0  ;;  %v3342_v28 = vld [vmem:[%s7516_s4 + $0x1e0] sm:$0xff] }
 0x198   :  { %1561 = vmatpush.msra.mxu2 %v3341_v15  ;;  %v5441_v55 = vpop.f32.mrf.mxu1  ;;  %1629 = vmatpush.msrb.mxu0 %v7760_v42  ;;  %v3345_v15 = vld [vmem:[%s7516_s4 + $0x198] sm:$0xff]  ;;  %v3346_v42 = vld [vmem:[%s7516_s4 + $0x180] sm:$0xff] }
 0x199   :  { %7758 = vst [vmem:[#allocation25_spill] sm:$0xff] %v5431_v48  ;;  %1670 = vmatpush.msrb.mxu1 %v4719_v20  ;;  %v3343_v20 = vld [vmem:[%s7516_s4 + $0x1c8] sm:$0xff] }
 0x19a   :  { %1562 = vmatpush.msra.mxu2 %v3342_v28  ;;  %1366 = vmatmul.f32.gmra.mxu0 %v4600_v40 }
 0x19b   :  { %1671 = vmatpush.msrb.mxu1 %v4736_v53  ;;  %1630 = vmatpush.msrb.mxu0 %v7761_v5  ;;  %v3344_v53 = vld [vmem:[%s7516_s4 + $0x1b0] sm:$0xff]  ;;  %v7764_v5 = vld [vmem:[#allocation49_spill] sm:$0xff] }
 0x19c   :  { %3105 = vmatmul.msk.f32.gmra.mxu2 %vm516_vm1, %v4628_v1  ;;  %3111 = vmatmul.msk.f32.gmra.mxu1 %vm516_vm1, %v4628_v1 }
 0x19d   :  { %1334 = vmatmul.f32.gmra.mxu3 %v4681_v29  ;;  %1563 = vmatpush.msra.mxu2 %v3343_v20  ;;  %v7771_v20 = vld [vmem:[#allocation54_spill] sm:$0xff] }
 0x19e   :  { %v990_v34 = vpop.f32.mrf.mxu2  ;;  %1631 = vmatpush.msrb.mxu0 %v7762_v22 }
 0x19f   :  { %1564 = vmatpush.msra.mxu2 %v3344_v53  ;;  %v1025_v19 = vpop.f32.mrf.mxu3  ;;  %v1060_v14 = vpop.f32.mrf.mxu0  ;;  %v7765_v53 = vld [vmem:[#allocation51_spill] sm:$0xff] }
 0x1a0   :  { %v1026_v45 = vadd.f32 %v1025_v19, %v990_v34  ;;  %v5463_v30 = vpop.f32.mrf.mxu1  ;;  %1632 = vmatpush.msrb.mxu0 %v7763_v0 }
 0x1a1   :  { %1565 = vmatpush.msra.mxu2 %v3345_v15  ;;  %v7766_v15 = vld [vmem:[#allocation52_spill] sm:$0xff] }
 0x1a2   :  { %v5469_v28 = vadd.f32 %v1060_v14, %v1026_v45  ;;  %1369 = vmatmul.f32.gmra.mxu0 %v4683_v37 }
 0x1a3   :  { %1566 = vmatpush.msra.mxu2 %v3346_v42  ;;  %1633 = vmatpush.msrb.mxu0 %v7764_v5  ;;  %v7767_v42 = vld [vmem:[#allocation2_spill] sm:$0xff]  ;;  %v7778_v5 = vld [vmem:[#allocation59_spill] sm:$0xff] }
 0x1a4   :  { %3106 = vmatmul.msk.f32.gmra.mxu2 %vm516_vm1, %v4714_v11  ;;  %3112 = vmatmul.msk.f32.gmra.mxu1 %vm516_vm1, %v4714_v11 }
 0x1a5   :  { %1337 = vmatmul.f32.gmra.mxu3 %v4749_v27  ;;  %1634 = vmatpush.msrb.mxu0 %v7765_v53 }
 0x1a6   :  { %v993_v34 = vpop.f32.mrf.mxu2 }
 0x1a7   :  { %v1028_v19 = vpop.f32.mrf.mxu3  ;;  %v1063_v14 = vpop.f32.mrf.mxu0  ;;  %1635 = vmatpush.msrb.mxu0 %v7766_v15 }
 0x1a8   :  { %v1029_v22 = vadd.f32 %v1028_v19, %v993_v34  ;;  %v5484_v45 = vpop.f32.mrf.mxu1  ;;  %v3347_v34 = vld [vmem:[%s7516_s4 + $0x178] sm:$0xff]  ;;  %v7768_v19 = vld [vmem:[#allocation71_spill] sm:$0xff] }
 0x1a9   :  { %1636 = vmatpush.msrb.mxu0 %v4702_v60  ;;  %v7770_v60 = vld [vmem:[#allocation73_spill] sm:$0xff] }
 0x1aa   :  { %v5487_v0 = vadd.f32 %v1063_v14, %v1029_v22  ;;  %1372 = vmatmul.f32.gmra.mxu0 %v4751_v35 }
 0x1ac   :  { %1427 = vmatmul.f32.vlgmr.msrb.gmra.mxu2 %v4410_v23  ;;  %1532 = vmatmul.f32.vlgmr.msra.gmra.mxu1 %v7767_v42  ;;  %v7769_v23 = vld [vmem:[#allocation53_spill] sm:$0xff] }
 0x1ad   :  { %1462 = vmatmul.f32.vlgmr.msrb.gmra.mxu3 %v4412_v52  ;;  %1808 = vmatpush.msra.mxu1 %v4916_v61  ;;  %v3348_v52 = vld [vmem:[%s7516_s4 + $0x160] sm:$0xff] }
 0x1ae   :  { %1726 = vmatpush.msrb.mxu3 %v3347_v34  ;;  %v996_v53 = vpop.f32.mrf.mxu2  ;;  %1703 = vmatpush.msrb.mxu2 %v7769_v23  ;;  %v3349_v34 = vld [vmem:[%s7516_s4 + $0x148] sm:$0xff] }
 0x1af   :  { %1809 = vmatpush.msra.mxu1 %v7768_v19  ;;  %v1031_v14 = vpop.f32.mrf.mxu3  ;;  %v1066_v22 = vpop.f32.mrf.mxu0  ;;  %v7772_v23 = vld [vmem:[#allocation75_spill] sm:$0xff] }
 0x1b0   :  { %1727 = vmatpush.msrb.mxu3 %v3348_v52  ;;  %v1032_v61 = vadd.f32 %v1031_v14, %v996_v53  ;;  %1704 = vmatpush.msrb.mxu2 %v7771_v20  ;;  %v7773_v53 = vld [vmem:[#allocation5_spill] sm:$0xff]  ;;  %v7775_v52 = vld [vmem:[#allocation55_spill] sm:$0xff] }
 0x1b1   :  { %v5505_v15 = vpop.f32.mrf.mxu1  ;;  %1810 = vmatpush.msra.mxu1 %v7770_v60  ;;  %v7774_v20 = vld [vmem:[#allocation57_spill] sm:$0xff] }
 0x1b2   :  { %1728 = vmatpush.msrb.mxu3 %v3349_v34  ;;  %v5512_v19 = vadd.f32 %v1066_v22, %v1032_v61  ;;  %3113 = vmatmul.msk.f32.vlgmr.msra.gmra.mxu0 %vm516_vm1, %v4380_v26  ;;  %v3350_v22 = vld [vmem:[%s7516_s4 + $0x130] sm:$0xff]  ;;  %v7776_v61 = vld [vmem:[#allocation58_spill] sm:$0xff]  ;;  %v3351_v34 = vld [vmem:[%s7516_s4 + $0x118] sm:$0xff] }
 0x1b3   :  { %1811 = vmatpush.msra.mxu1 %v7772_v23  ;;  %1761 = vmatpush.msra.mxu0 %v7774_v20 }
 0x1b4   :  { %1430 = vmatmul.f32.gmra.mxu2 %v4446_v31  ;;  %1535 = vmatmul.f32.gmra.mxu1 %v7773_v53 }
 0x1b5   :  { %1465 = vmatmul.f32.gmra.mxu3 %v4448_v39  ;;  %1705 = vmatpush.msrb.mxu2 %v7775_v52  ;;  %v7777_v39 = vld [vmem:[#allocation56_spill] sm:$0xff] }
 0x1b6   :  { %1729 = vmatpush.msrb.mxu3 %v3350_v22  ;;  %v999_v26 = vpop.f32.mrf.mxu2  ;;  %1762 = vmatpush.msra.mxu0 %v7776_v61  ;;  %v3352_v22 = vld [vmem:[%s7516_s4 + $0x100] sm:$0xff]  ;;  %v7779_v61 = vld [vmem:[#allocation8_spill] sm:$0xff] }
 0x1b7   :  { %v1034_v31 = vpop.f32.mrf.mxu3  ;;  %v1069_v60 = vpop.f32.mrf.mxu0  ;;  %1706 = vmatpush.msrb.mxu2 %v7777_v39 }
 0x1b8   :  { %1730 = vmatpush.msrb.mxu3 %v3351_v34  ;;  %v1035_v23 = vadd.f32 %v1034_v31, %v999_v26  ;;  %1763 = vmatpush.msra.mxu0 %v7778_v5  ;;  %v7780_v5 = vld [vmem:[#allocation60_spill] sm:$0xff]  ;;  %v3353_v31 = vld [vmem:[%s7516_s4 + $0xe8] sm:$0xff]  ;;  %v7781_v34 = vld [vmem:[#allocation61_spill] sm:$0xff] }
 0x1b9   :  { %v5532_v20 = vpop.f32.mrf.mxu1  ;;  %v7790_v26 = vld [vmem:[#allocation68_spill] sm:$0xff] }
 0x1ba   :  { %1731 = vmatpush.msrb.mxu3 %v3352_v22  ;;  %v5538_v52 = vadd.f32 %v1069_v60, %v1035_v23  ;;  %3114 = vmatmul.msk.f32.gmra.mxu0 %vm516_vm1, %v4423_v46 }
 0x1bb   :  { %1764 = vmatpush.msra.mxu0 %v7780_v5  ;;  %v3355_v5 = vld [vmem:[%s7516_s4 + $0xb8] sm:$0xff] }
 0x1bc   :  { %1433 = vmatmul.f32.gmra.mxu2 %v4531_v17  ;;  %1538 = vmatmul.f32.gmra.mxu1 %v7779_v61  ;;  %v3354_v17 = vld [vmem:[%s7516_s4 + $0xd0] sm:$0xff] }
 0x1bd   :  { %1468 = vmatmul.f32.gmra.mxu3 %v4533_v32  ;;  %1765 = vmatpush.msra.mxu0 %v7781_v34  ;;  %v7782_v32 = vld [vmem:[#allocation62_spill] sm:$0xff]  ;;  %v7783_v34 = vld [vmem:[#allocation11_spill] sm:$0xff] }
 0x1be   :  { %1732 = vmatpush.msrb.mxu3 %v3353_v31  ;;  %v1002_v60 = vpop.f32.mrf.mxu2 }
 0x1bf   :  { %v1037_v46 = vpop.f32.mrf.mxu3  ;;  %v1072_v39 = vpop.f32.mrf.mxu0  ;;  %1766 = vmatpush.msra.mxu0 %v7782_v32 }
 0x1c0   :  { %1733 = vmatpush.msrb.mxu3 %v3354_v17  ;;  %v1038_v23 = vadd.f32 %v1037_v46, %v1002_v60  ;;  %v7784_v46 = vld [vmem:[#allocation63_spill] sm:$0xff]  ;;  %v3356_v17 = vld [vmem:[%s7516_s4 + $0xa0] sm:$0xff] }
 0x1c1   :  { %v5555_v22 = vpop.f32.mrf.mxu1  ;;  %1767 = vmatpush.msra.mxu0 %v7784_v46  ;;  %v3358_v46 = vld [vmem:[%s7516_s4 + $0x70] sm:$0xff] }
 0x1c2   :  { %1734 = vmatpush.msrb.mxu3 %v3355_v5  ;;  %v5561_v31 = vadd.f32 %v1072_v39, %v1038_v23  ;;  %3115 = vmatmul.msk.f32.gmra.mxu0 %vm516_vm1, %v4480_v18  ;;  %v7785_v23 = vld [vmem:[#allocation64_spill] sm:$0xff] }
 0x1c3   :  { %1768 = vmatpush.msra.mxu0 %v7785_v23  ;;  %v7787_v23 = vld [vmem:[#allocation14_spill] sm:$0xff] }
 0x1c4   :  { %1436 = vmatmul.f32.gmra.mxu2 %v4598_v2  ;;  %1541 = vmatmul.f32.gmra.mxu1 %v7783_v34  ;;  %v3357_v2 = vld [vmem:[%s7516_s4 + $0x88] sm:$0xff] }
 0x1c5   :  { %1471 = vmatmul.f32.gmra.mxu3 %v4600_v40  ;;  %v7786_v40 = vld [vmem:[#allocation65_spill] sm:$0xff] }
 0x1c6   :  { %1735 = vmatpush.msrb.mxu3 %v3356_v17  ;;  %v1005_v39 = vpop.f32.mrf.mxu2  ;;  %1769 = vmatpush.msra.mxu0 %v7786_v40 }
 0x1c7   :  { %v1040_v18 = vpop.f32.mrf.mxu3  ;;  %v1075_v32 = vpop.f32.mrf.mxu0 }
 0x1c8   :  { %1736 = vmatpush.msrb.mxu3 %v3357_v2  ;;  %v1041_v5 = vadd.f32 %v1040_v18, %v1005_v39  ;;  %v7788_v18 = vld [vmem:[#allocation66_spill] sm:$0xff]  ;;  %v3359_v2 = vld [vmem:[%s7516_s4 + $0x58] sm:$0xff] }
 0x1c9   :  { %v5578_v14 = vpop.f32.mrf.mxu1  ;;  %1770 = vmatpush.msra.mxu0 %v7788_v18 }
 0x1ca   :  { %1737 = vmatpush.msrb.mxu3 %v3358_v46  ;;  %v5584_v17 = vadd.f32 %v1075_v32, %v1041_v5  ;;  %3116 = vmatmul.msk.f32.gmra.mxu0 %vm516_vm1, %v4547_v59  ;;  %v936_v32 = vadd.f32 %v5435_v51, %v5433_v43  ;;  %v7789_v5 = vld [vmem:[#allocation67_spill] sm:$0xff] }
 0x1cb   :  { %1771 = vmatpush.msra.mxu0 %v7789_v5  ;;  %v3361_v43 = vld [vmem:[%s7516_s4 + $0x28] sm:$0xff]  ;;  %v3362_v5 = vld [vmem:[%s7516_s4 + $0x10] sm:$0xff] }
 0x1cc   :  { %1439 = vmatmul.f32.gmra.mxu2 %v4681_v29  ;;  %1544 = vmatmul.f32.gmra.mxu1 %v7787_v23  ;;  %v971_v51 = vadd.f32 %v5405_v33, %v936_v32  ;;  %v7794_v33 = vld [vmem:[#allocation76_spill] sm:$0xff] }
 0x1cd   :  { %1474 = vmatmul.f32.gmra.mxu3 %v4683_v37  ;;  %v3360_v37 = vld [vmem:[%s7516_s4 + $0x40] sm:$0xff]  ;;  %1772 = vmatpush.msra.mxu0 %v7790_v26  ;;  %v7793_v26 = vld [vmem:[#allocation69_spill] sm:$0xff] }
 0x1ce   :  { %1738 = vmatpush.msrb.mxu3 %v3359_v2  ;;  %v1130_v59 = vpop.f32.mrf.mxu2  ;;  %v1198_v32 = vsub.f32 %v7794_v33, %v971_v51  ;;  %v5644_v51 = vld [vmem:[%s7517_s5 + $0x60] sm:$0xff]  ;;  %v5688_v33 = vld [vmem:[%s7517_s5 + $0x18] sm:$0xff] }
 0x1cf   :  { %v1131_v29 = vadd.f32 %v1130_v59, %v5441_v55  ;;  %v1165_v40 = vpop.f32.mrf.mxu3  ;;  %v5601_v46 = vpop.f32.mrf.mxu0  ;;  %v7792_v59 = vld [vmem:[#allocation17_spill] sm:$0xff]  ;;  %1773 = vmatpush.msra.mxu0 %v7793_v26  ;;  %v7796_v26 = vld [vmem:[#allocation72_spill] sm:$0xff] }
 0x1d0   :  { %1739 = vmatpush.msrb.mxu3 %v3360_v37 }
 0x1d1   :  { %v5606_v18 = vpop.f32.mrf.mxu1  ;;  %v5609_v2 = vadd.f32 %v1165_v40, %v1131_v29 }
 0x1d2   :  { %1740 = vmatpush.msrb.mxu3 %v3361_v43  ;;  %3117 = vmatmul.msk.f32.gmra.mxu0 %vm516_vm1, %v4628_v1  ;;  %v7795_v1 = vld [vmem:[#allocation70_spill] sm:$0xff] }
 0x1d3   :  { %7791 = vst [vmem:[#allocation27_spill] sm:$0xff] %v5609_v2  ;;  %1774 = vmatpush.msra.mxu0 %v7795_v1  ;;  %v5658_v1 = vld [vmem:[%s7517_s5 + $0x48] sm:$0xff] }
 0x1d4   :  { %1442 = vmatmul.f32.gmra.mxu2 %v4749_v27  ;;  %1547 = vmatmul.f32.gmra.mxu1 %v7792_v59  ;;  %v5680_v55 = vmul.f32 %v5658_v1, %v1192_v6  ;;  %v5704_v6 = vld [vmem:[%s7517_s5] sm:$0xff] }
 0x1d5   :  { %1477 = vmatmul.f32.gmra.mxu3 %v4751_v35  ;;  %v5634_v35 = vld [vmem:[%s7517_s5 + $0x78] sm:$0xff]  ;;  %1775 = vmatpush.msra.mxu0 %v7796_v26  ;;  %v5725_v44 = vmul.f32 %v5704_v6, %v1183_v62  ;;  %v7812_v62 = vld [vmem:[#allocation10_spill] sm:$0xff] }
 0x1d6   :  { %1741 = vmatpush.msrb.mxu3 %v3362_v5  ;;  %v1133_v29 = vpop.f32.mrf.mxu2  ;;  %7803 = vst [vmem:[#allocation35_spill] sm:$0xff] %v5680_v55 }
 0x1d7   :  { %v1134_v40 = vadd.f32 %v1133_v29, %v5463_v30  ;;  %v1168_v37 = vpop.f32.mrf.mxu3  ;;  %v5629_v27 = vpop.f32.mrf.mxu0  ;;  %v5649_v30 = vmul.f32 %v5634_v35, %v1198_v32  ;;  %v7799_v29 = vld [vmem:[#allocation3_spill] sm:$0xff]  ;;  %v5672_v32 = vld [vmem:[%s7517_s5 + $0x30] sm:$0xff]  ;;  %7809 = vst [vmem:[#allocation39_spill] sm:$0xff] %v5725_v44 }
 0x1d8   :  { %v5697_v41 = vmul.f32 %v5672_v32, %v1189_v3  ;;  %v7808_v3 = vld [vmem:[#allocation7_spill] sm:$0xff] }
 0x1d9   :  { %v5636_v43 = vpop.f32.mrf.mxu1  ;;  %v5639_v5 = vadd.f32 %v1168_v37, %v1134_v40  ;;  %7798 = vst [vmem:[#allocation31_spill] sm:$0xff] %v5649_v30  ;;  %v7800_v40 = vld [vmem:[#allocation4_spill] sm:$0xff]  ;;  %v7802_v37 = vld [vmem:[#allocation74_spill] sm:$0xff] }
 0x1da   :  { %3118 = vmatmul.msk.f32.gmra.mxu0 %vm516_vm1, %v4714_v11  ;;  %v5667_v11 = vmul.f32 %v5644_v51, %v1195_v47  ;;  %7804 = vst [vmem:[#allocation26_spill] sm:$0xff] %v5697_v41 }
 0x1db   :  { %7797 = vst [vmem:[#allocation29_spill] sm:$0xff] %v5639_v5  ;;  %1776 = vmatpush.msra.mxu0 %v7802_v37 }
 0x1dc   :  { %1567 = vmatmul.f32.vlgmr.msra.gmra.mxu2 %v7799_v29  ;;  %1672 = vmatmul.f32.vlgmr.msrb.gmra.mxu1 %v7799_v29  ;;  %7801 = vst [vmem:[#allocation33_spill] sm:$0xff] %v5667_v11 }
 0x1dd   :  { %3119 = vmatmul.msk.f32.vlgmr.msra.gmra.mxu3 %vm516_vm1, %v7800_v40  ;;  %2000 = vmatpush.msrb.mxu1 %v5649_v30  ;;  %v7819_v30 = vld [vmem:[#allocation16_spill] sm:$0xff] }
 0x1de   :  { %v1136_v26 = vpop.f32.mrf.mxu2 }
 0x1df   :  { %2001 = vmatpush.msrb.mxu1 %v5667_v11  ;;  %v1137_v7 = vadd.f32 %v1136_v26, %v5484_v45  ;;  %v1171_v8 = vpop.f32.mrf.mxu3  ;;  %v5683_v47 = vpop.f32.mrf.mxu0  ;;  %v5712_v45 = vmul.f32 %v5688_v33, %v1186_v10  ;;  %v7818_v11 = vld [vmem:[#allocation15_spill] sm:$0xff] }
 0x1e1   :  { %2002 = vmatpush.msrb.mxu1 %v5680_v55  ;;  %v5691_v37 = vpop.f32.mrf.mxu1  ;;  %v5699_v25 = vadd.f32 %v1171_v8, %v1137_v7  ;;  %7806 = vst [vmem:[#allocation28_spill] sm:$0xff] %v5712_v45 }
 0x1e2   :  { %1637 = vmatmul.f32.vlgmr.msrb.gmra.mxu0 %v7767_v42 }
 0x1e3   :  { %7805 = vst [vmem:[#allocation37_spill] sm:$0xff] %v5699_v25  ;;  %2003 = vmatpush.msrb.mxu1 %v5697_v41 }
 0x1e4   :  { %1570 = vmatmul.f32.gmra.mxu2 %v7807_v24  ;;  %1675 = vmatmul.f32.gmra.mxu1 %v7807_v24 }
 0x1e5   :  { %3120 = vmatmul.msk.f32.gmra.mxu3 %vm516_vm1, %v7808_v3  ;;  %2004 = vmatpush.msrb.mxu1 %v5712_v45  ;;  %v7815_v45 = vld [vmem:[#allocation13_spill] sm:$0xff] }
 0x1e6   :  { %v1139_v58 = vpop.f32.mrf.mxu2 }
 0x1e7   :  { %2005 = vmatpush.msrb.mxu1 %v5725_v44  ;;  %v1140_v10 = vadd.f32 %v1139_v58, %v5505_v15  ;;  %v1174_v26 = vpop.f32.mrf.mxu3  ;;  %v5729_v7 = vpop.f32.mrf.mxu0  ;;  %v7814_v44 = vld [vmem:[#allocation12_spill] sm:$0xff] }
 0x1e9   :  { %v5731_v8 = vpop.f32.mrf.mxu1  ;;  %v5733_v57 = vadd.f32 %v1174_v26, %v1140_v10 }
 0x1ea   :  { %1640 = vmatmul.f32.gmra.mxu0 %v7773_v53 }
 0x1eb   :  { %7810 = vst [vmem:[#allocation30_spill] sm:$0xff] %v5733_v57 }
 0x1ec   :  { %1573 = vmatmul.f32.gmra.mxu2 %v7811_v38  ;;  %1678 = vmatmul.f32.gmra.mxu1 %v7811_v38 }
 0x1ed   :  { %3121 = vmatmul.msk.f32.gmra.mxu3 %vm516_vm1, %v7812_v62 }
 0x1ef   :  { %v1142_v15 = vpop.f32.mrf.mxu2  ;;  %v5743_v39 = vpop.f32.mrf.mxu0 }
 0x1f0   :  { %v1143_v58 = vadd.f32 %v1142_v15, %v5532_v20  ;;  %v1177_v60 = vpop.f32.mrf.mxu3 }
 0x1f1   :  { %v5745_v10 = vpop.f32.mrf.mxu1 }
 0x1f2   :  { %v5747_v26 = vadd.f32 %v1177_v60, %v1143_v58  ;;  %1643 = vmatmul.f32.gmra.mxu0 %v7779_v61 }
 0x1f4   :  { %7813 = vst [vmem:[#allocation41_spill] sm:$0xff] %v5747_v26  ;;  %1576 = vmatmul.f32.gmra.mxu2 %v7814_v44  ;;  %1681 = vmatmul.f32.gmra.mxu1 %v7814_v44 }
 0x1f5   :  { %3122 = vmatmul.msk.f32.gmra.mxu3 %vm516_vm1, %v7815_v45 }
 0x1f7   :  { %v1145_v20 = vpop.f32.mrf.mxu2  ;;  %v5757_v55 = vpop.f32.mrf.mxu0 }
 0x1f8   :  { %v1146_v15 = vadd.f32 %v1145_v20, %v5555_v22  ;;  %v1180_v41 = vpop.f32.mrf.mxu3 }
 0x1f9   :  { %v5759_v60 = vpop.f32.mrf.mxu1 }
 0x1fa   :  { %7816 = vst [vmem:[#allocation43_spill] sm:$0xff] %v5759_v60  ;;  %v5761_v58 = vadd.f32 %v1180_v41, %v1146_v15  ;;  %1646 = vmatmul.f32.gmra.mxu0 %v7783_v34  ;;  %v7823_v15 = vld [vmem:[#allocation18_spill] sm:$0xff] }
 0x1fc   :  { %7817 = vst [vmem:[#allocation32_spill] sm:$0xff] %v5761_v58  ;;  %1579 = vmatmul.f32.gmra.mxu2 %v7818_v11  ;;  %1684 = vmatmul.f32.gmra.mxu1 %v7818_v11 }
 0x1fd   :  { %3123 = vmatmul.msk.f32.gmra.mxu3 %vm516_vm1, %v7819_v30 }
 0x1ff   :  { %v5770_v22 = vpop.f32.mrf.mxu2  ;;  %v5774_v2 = vpop.f32.mrf.mxu0 }
 0x200   :  { %v5772_v20 = vpop.f32.mrf.mxu3  ;;  %7821 = vst [vmem:[#allocation34_spill] sm:$0xff] %v5774_v2 }
 0x201   :  { %7820 = vst [vmem:[#allocation46_spill] sm:$0xff] %v5772_v20  ;;  %v5776_v41 = vpop.f32.mrf.mxu1 }
 0x202   :  { %7822 = vst [vmem:[#allocation48_spill] sm:$0xff] %v5776_v41  ;;  %1649 = vmatmul.f32.gmra.mxu0 %v7787_v23 }
 0x204   :  { %1582 = vmatmul.f32.gmra.mxu2 %v7823_v15  ;;  %1687 = vmatmul.f32.gmra.mxu1 %v7823_v15 }
 0x205   :  { %3124 = vmatmul.msk.f32.gmra.mxu3 %vm516_vm1, %v7824_v36 }
 0x207   :  { %v5783_v16 = vpop.f32.mrf.mxu2  ;;  %v5787_v49 = vpop.f32.mrf.mxu0 }
 0x208   :  { %v5785_v5 = vpop.f32.mrf.mxu3  ;;  %7826 = vst [vmem:[#allocation50_spill] sm:$0xff] %v5787_v49 }
 0x209   :  { %7825 = vst [vmem:[#allocation36_spill] sm:$0xff] %v5785_v5  ;;  %v5789_v25 = vpop.f32.mrf.mxu1 }
 0x20a   :  { %7827 = vst [vmem:[#allocation38_spill] sm:$0xff] %v5789_v25  ;;  %1652 = vmatmul.f32.gmra.mxu0 %v7792_v59 }
 0x20c   :  { %3125 = vmatmul.msk.f32.vlgmr.msrb.gmra.mxu2 %vm516_vm1, %v7800_v40  ;;  %3131 = vmatmul.msk.f32.vlgmr.msra.gmra.mxu1 %vm516_vm1, %v7800_v40 }
 0x20d   :  { %1742 = vmatmul.f32.vlgmr.msrb.gmra.mxu3 %v7767_v42 }
 0x20f   :  { %v5797_v21 = vpop.f32.mrf.mxu2  ;;  %v5801_v13 = vpop.f32.mrf.mxu0 }
 0x210   :  { %v5799_v57 = vpop.f32.mrf.mxu3  ;;  %7829 = vst [vmem:[#allocation42_spill] sm:$0xff] %v5801_v13 }
 0x211   :  { %7828 = vst [vmem:[#allocation40_spill] sm:$0xff] %v5799_v57  ;;  %v5803_v26 = vpop.f32.mrf.mxu1 }
 0x212   :  { %7830 = vst [vmem:[#allocation44_spill] sm:$0xff] %v5803_v26  ;;  %1777 = vmatmul.f32.vlgmr.msra.gmra.mxu0 %v7799_v29 }
 0x214   :  { %3126 = vmatmul.msk.f32.gmra.mxu2 %vm516_vm1, %v7808_v3  ;;  %3132 = vmatmul.msk.f32.gmra.mxu1 %vm516_vm1, %v7808_v3 }
 0x215   :  { %1745 = vmatmul.f32.gmra.mxu3 %v7773_v53 }
 0x217   :  { %v5811_v40 = vpop.f32.mrf.mxu2  ;;  %v5815_v50 = vpop.f32.mrf.mxu0 }
 0x218   :  { %v5813_v42 = vpop.f32.mrf.mxu3  ;;  %7832 = vst [vmem:[#allocation47_spill] sm:$0xff] %v5815_v50 }
 0x219   :  { %7831 = vst [vmem:[#allocation45_spill] sm:$0xff] %v5813_v42  ;;  %v5817_v58 = vpop.f32.mrf.mxu1 }
 0x21a   :  { %7833 = vst [vmem:[#allocation49_spill] sm:$0xff] %v5817_v58  ;;  %1780 = vmatmul.f32.gmra.mxu0 %v7807_v24 }
 0x21c   :  { %3127 = vmatmul.msk.f32.gmra.mxu2 %vm516_vm1, %v7812_v62  ;;  %3133 = vmatmul.msk.f32.gmra.mxu1 %vm516_vm1, %v7812_v62 }
 0x21d   :  { %1748 = vmatmul.f32.gmra.mxu3 %v7779_v61 }
 0x21f   :  { %v5825_v29 = vpop.f32.mrf.mxu2  ;;  %v5829_v3 = vpop.f32.mrf.mxu0 }
 0x220   :  { %v5827_v53 = vpop.f32.mrf.mxu3 }
 0x221   :  { %v5831_v48 = vpop.f32.mrf.mxu1 }
 0x222   :  { %7834 = vst [vmem:[#allocation51_spill] sm:$0xff] %v5831_v48  ;;  %1783 = vmatmul.f32.gmra.mxu0 %v7811_v38 }
 0x224   :  { %3128 = vmatmul.msk.f32.gmra.mxu2 %vm516_vm1, %v7815_v45  ;;  %3134 = vmatmul.msk.f32.gmra.mxu1 %vm516_vm1, %v7815_v45 }
 0x225   :  { %1751 = vmatmul.f32.gmra.mxu3 %v7783_v34 }
 0x227   :  { %v5839_v24 = vpop.f32.mrf.mxu2  ;;  %v5843_v62 = vpop.f32.mrf.mxu0 }
 0x228   :  { %v5841_v61 = vpop.f32.mrf.mxu3  ;;  %7835 = vst [vmem:[#allocation52_spill] sm:$0xff] %v5843_v62 }
 0x229   :  { %v5845_v41 = vpop.f32.mrf.mxu1 }
 0x22a   :  { %1786 = vmatmul.f32.gmra.mxu0 %v7814_v44 }
 0x22c   :  { %3129 = vmatmul.msk.f32.gmra.mxu2 %vm516_vm1, %v7819_v30  ;;  %3135 = vmatmul.msk.f32.gmra.mxu1 %vm516_vm1, %v7819_v30 }
 0x22d   :  { %1754 = vmatmul.f32.gmra.mxu3 %v7787_v23 }
 0x22f   :  { %v5853_v45 = vpop.f32.mrf.mxu2  ;;  %v5857_v38 = vpop.f32.mrf.mxu0 }
 0x230   :  { %7836 = vst [vmem:[#allocation2_spill] sm:$0xff] %v5853_v45  ;;  %v5855_v34 = vpop.f32.mrf.mxu3 }
 0x231   :  { %7837 = vst [vmem:[#allocation71_spill] sm:$0xff] %v5855_v34  ;;  %v5859_v25 = vpop.f32.mrf.mxu1 }
 0x232   :  { %7838 = vst [vmem:[#allocation53_spill] sm:$0xff] %v5857_v38  ;;  %1789 = vmatmul.f32.gmra.mxu0 %v7818_v11  ;;  %v5879_v11 = vld [vmem:[%s7513_s1] sm:$0xff] }
 0x233   :  { %7842 = vst [vmem:[#allocation5_spill] sm:$0xff] %v5879_v11 }
 0x234   :  { %3130 = vmatmul.msk.f32.gmra.mxu2 %vm516_vm1, %v7824_v36  ;;  %3136 = vmatmul.msk.f32.gmra.mxu1 %vm516_vm1, %v7824_v36 }
 0x235   :  { %1757 = vmatmul.f32.gmra.mxu3 %v7792_v59 }
 0x237   :  { %v5867_v30 = vpop.f32.mrf.mxu2  ;;  %v5871_v44 = vpop.f32.mrf.mxu0 }
 0x238   :  { %7839 = vst [vmem:[#allocation73_spill] sm:$0xff] %v5867_v30  ;;  %v5869_v23 = vpop.f32.mrf.mxu3 }
 0x239   :  { %7840 = vst [vmem:[#allocation54_spill] sm:$0xff] %v5869_v23  ;;  %v5873_v34 = vpop.f32.mrf.mxu1 }
 0x23a   :  { %7841 = vst [vmem:[#allocation75_spill] sm:$0xff] %v5871_v44  ;;  %1792 = vmatmul.f32.gmra.mxu0 %v7823_v15  ;;  %v5892_v44 = vld [vmem:[%s7513_s1 + $0x8] sm:$0xff] }
 0x23b   :  { %7846 = vst [vmem:[#allocation56_spill] sm:$0xff] %v5892_v44 }
 0x23c   :  { %3155 = vmatmul.msk.f32.vlgmr.msrb.gmra.mxu1 %vm269_vm0, %v5879_v11 }
 0x23f   :  { %v5883_v36 = vpop.f32.mrf.mxu2  ;;  %v5887_v38 = vpop.f32.mrf.mxu0 }
 0x240   :  { %7843 = vst [vmem:[#allocation57_spill] sm:$0xff] %v5883_v36  ;;  %v5885_v59 = vpop.f32.mrf.mxu3 }
 0x241   :  { %7844 = vst [vmem:[#allocation55_spill] sm:$0xff] %v5885_v59  ;;  %v1542_v23 = vpop.f32.mrf.mxu1 }
 0x242   :  { %7845 = vst [vmem:[#allocation58_spill] sm:$0xff] %v5887_v38  ;;  %v5905_v38 = vld [vmem:[%s7513_s1 + $0x10] sm:$0xff] }
 0x243   :  { %7850 = vst [vmem:[#allocation61_spill] sm:$0xff] %v5905_v38 }
 0x244   :  { %3156 = vmatmul.msk.f32.gmra.mxu1 %vm269_vm0, %v5892_v44 }
 0x247   :  { %v5896_v15 = vpop.f32.mrf.mxu2  ;;  %v5900_v11 = vpop.f32.mrf.mxu0 }
 0x248   :  { %7847 = vst [vmem:[#allocation59_spill] sm:$0xff] %v5896_v15  ;;  %v5898_v30 = vpop.f32.mrf.mxu3 }
 0x249   :  { %7848 = vst [vmem:[#allocation8_spill] sm:$0xff] %v5898_v30  ;;  %v1545_v45 = vpop.f32.mrf.mxu1 }
 0x24a   :  { %7849 = vst [vmem:[#allocation60_spill] sm:$0xff] %v5900_v11  ;;  %v5918_v11 = vld [vmem:[%s7513_s1 + $0x18] sm:$0xff] }
 0x24b   :  { %7854 = vst [vmem:[#allocation64_spill] sm:$0xff] %v5918_v11 }
 0x24c   :  { %3157 = vmatmul.msk.f32.gmra.mxu1 %vm269_vm0, %v5905_v38 }
 0x24f   :  { %v5909_v60 = vpop.f32.mrf.mxu2  ;;  %v5913_v44 = vpop.f32.mrf.mxu0 }
 0x250   :  { %7851 = vst [vmem:[#allocation62_spill] sm:$0xff] %v5909_v60  ;;  %v5911_v59 = vpop.f32.mrf.mxu3 }
 0x251   :  { %7852 = vst [vmem:[#allocation11_spill] sm:$0xff] %v5911_v59  ;;  %v1548_v36 = vpop.f32.mrf.mxu1 }
 0x252   :  { %7853 = vst [vmem:[#allocation63_spill] sm:$0xff] %v5913_v44  ;;  %v5933_v44 = vld [vmem:[%s7513_s1 + $0x20] sm:$0xff] }
 0x253   :  { %7859 = vst [vmem:[#allocation68_spill] sm:$0xff] %v5933_v44 }
 0x254   :  { %3158 = vmatmul.msk.f32.gmra.mxu1 %vm269_vm0, %v5918_v11 }
 0x257   :  { %v5922_v26 = vpop.f32.mrf.mxu2  ;;  %v5926_v38 = vpop.f32.mrf.mxu0 }
 0x258   :  { %7855 = vst [vmem:[#allocation65_spill] sm:$0xff] %v5922_v26  ;;  %v5924_v30 = vpop.f32.mrf.mxu3 }
 0x259   :  { %7856 = vst [vmem:[#allocation14_spill] sm:$0xff] %v5924_v30  ;;  %v5928_v15 = vpop.f32.mrf.mxu1 }
 0x25a   :  { %7857 = vst [vmem:[#allocation66_spill] sm:$0xff] %v5926_v38  ;;  %v5944_v38 = vld [vmem:[%s7513_s1 + $0x28] sm:$0xff] }
 0x25b   :  { %7858 = vst [vmem:[#allocation67_spill] sm:$0xff] %v5928_v15 }
 0x25c   :  { %3159 = vmatmul.msk.f32.gmra.mxu1 %vm269_vm0, %v5933_v44  ;;  %7862 = vst [vmem:[#allocation76_spill] sm:$0xff] %v5944_v38 }
 0x25f   :  { %v1568_v49 = vpop.f32.mrf.mxu2  ;;  %v5937_v48 = vpop.f32.mrf.mxu0 }
 0x260   :  { %v1603_v5 = vpop.f32.mrf.mxu3  ;;  %7860 = vst [vmem:[#allocation17_spill] sm:$0xff] %v5937_v48 }
 0x261   :  { %v5939_v11 = vpop.f32.mrf.mxu1 }
 0x262   :  { %7861 = vst [vmem:[#allocation69_spill] sm:$0xff] %v5939_v11 }
 0x264   :  { %3160 = vmatmul.msk.f32.gmra.mxu1 %vm269_vm0, %v5944_v38  ;;  %v1266_v38 = vadd.f32 %v5731_v8, %v5743_v39 }
 0x266   :  { %v1301_v42 = vadd.f32 %v5825_v29, %v1266_v38 }
 0x267   :  { %v1571_v15 = vpop.f32.mrf.mxu2  ;;  %v5948_v26 = vpop.f32.mrf.mxu0 }
 0x268   :  { %v1606_v30 = vpop.f32.mrf.mxu3  ;;  %7863 = vst [vmem:[#allocation70_spill] sm:$0xff] %v5948_v26  ;;  %v1546_v8 = vadd.f32 %v1545_v45, %v1301_v42 }
 0x269   :  { %v5950_v58 = vpop.f32.mrf.mxu1 }
 0x26a   :  { %7864 = vst [vmem:[#allocation72_spill] sm:$0xff] %v5950_v58 }
 0x26f   :  { %v1574_v44 = vpop.f32.mrf.mxu2  ;;  %v5952_v57 = vpop.f32.mrf.mxu0 }
 0x270   :  { %v1609_v13 = vpop.f32.mrf.mxu3  ;;  %7865 = vst [vmem:[#allocation3_spill] sm:$0xff] %v5952_v57  ;;  %v1263_v57 = vadd.f32 %v5691_v37, %v5729_v7 }
 0x271   :  { %v5954_v48 = vpop.f32.mrf.mxu1 }
 0x272   :  { %7866 = vst [vmem:[#allocation4_spill] sm:$0xff] %v5954_v48  ;;  %v1269_v48 = vadd.f32 %v5745_v10, %v5757_v55  ;;  %v1254_v55 = vadd.f32 %v5578_v14, %v5601_v46 }
 0x274   :  { %v1304_v39 = vadd.f32 %v5839_v24, %v1269_v48 }
 0x276   :  { %v1549_v37 = vadd.f32 %v1548_v36, %v1304_v39 }
 0x277   :  { %v1577_v11 = vpop.f32.mrf.mxu2  ;;  %v5956_v20 = vpop.f32.mrf.mxu0 }
 0x278   :  { %v1612_v2 = vpop.f32.mrf.mxu3  ;;  %7867 = vst [vmem:[#allocation74_spill] sm:$0xff] %v5956_v20  ;;  %v1298_v20 = vadd.f32 %v5811_v40, %v1263_v57 }
 0x279   :  { %v5958_v59 = vpop.f32.mrf.mxu1 }
 0x27a   :  { %7868 = vst [vmem:[#allocation6_spill] sm:$0xff] %v5958_v59  ;;  %v1260_v59 = vadd.f32 %v5636_v43, %v5683_v47  ;;  %v1543_v62 = vadd.f32 %v1542_v23, %v1298_v20 }
 0x27c   :  { %v1578_v47 = vadd.f32 %v1577_v11, %v1543_v62  ;;  %v7877_v11 = vsub.f32 %v5175_v54, %v5538_v52  ;;  %v6091_v54 = vld [vmem:[%s7517_s5 + $0x8] sm:$0xff] }
 0x27f   :  { %v1580_v60 = vpop.f32.mrf.mxu2  ;;  %v5962_v26 = vpop.f32.mrf.mxu0 }
 0x280   :  { %v1615_v50 = vpop.f32.mrf.mxu3  ;;  %7869 = vst [vmem:[#allocation7_spill] sm:$0xff] %v5962_v26  ;;  %v1257_v26 = vadd.f32 %v5606_v18, %v5629_v27  ;;  %v1581_v7 = vadd.f32 %v1580_v60, %v1546_v8  ;;  %v1289_v18 = vadd.f32 %v5770_v22, %v1254_v55 }
 0x281   :  { %v5964_v58 = vpop.f32.mrf.mxu1 }
 0x282   :  { %7870 = vst [vmem:[#allocation9_spill] sm:$0xff] %v5964_v58  ;;  %v1295_v58 = vadd.f32 %v5797_v21, %v1260_v59  ;;  %v1292_v29 = vadd.f32 %v5783_v16, %v1257_v26  ;;  %v1616_v20 = vadd.f32 %v1615_v50, %v1581_v7  ;;  %v1534_v14 = vadd.f32 %v5845_v41, %v1289_v18 }
 0x283   :  { %v1613_v16 = vadd.f32 %v1612_v2, %v1578_v47  ;;  %v7879_v59 = vsub.f32 %v5135_v63, %v5512_v19  ;;  %v6107_v19 = vld [vmem:[%s7514_s2 + $0x8] sm:$0xff]  ;;  %v7883_v7 = vsub.f32 %v5066_v12, %v5469_v28  ;;  %v1371_v12 = vadd.f32 %v5829_v3, %v5827_v53  ;;  %v7886_v28 = vld [vmem:[#allocation52_spill] sm:$0xff] }
 0x284   :  { %v1540_v43 = vadd.f32 %v5873_v34, %v1295_v58  ;;  %v1537_v21 = vadd.f32 %v5859_v25, %v1292_v29  ;;  %v1569_v58 = vadd.f32 %v1568_v49, %v1534_v14  ;;  %v5993_v62 = vmul.f32 %v5644_v51, %v1616_v20  ;;  %v6019_v51 = vld [vmem:[%s7517_s5 + $0x80] sm:$0xff] }
 0x285   :  { %v5999_v50 = vmul.f32 %v5658_v1, %v1613_v16  ;;  %v6116_v55 = vmul.f32 %v6091_v54, %v7883_v7  ;;  %v1374_v47 = vadd.f32 %v7886_v28, %v5841_v61  ;;  %v7891_v14 = vld [vmem:[#allocation46_spill] sm:$0xff]  ;;  %v7897_v61 = vld [vmem:[#allocation36_spill] sm:$0xff]  ;;  %v7899_v7 = vld [vmem:[#allocation59_spill] sm:$0xff] }
 0x286   :  { %v1575_v60 = vadd.f32 %v1574_v44, %v1540_v43  ;;  %v1572_v46 = vadd.f32 %v1571_v15, %v1537_v21  ;;  %v1604_v2 = vadd.f32 %v1603_v5, %v1569_v58  ;;  %v6065_v44 = vld [vmem:[%s7517_s5 + $0x38] sm:$0xff]  ;;  %v6124_v43 = vld [vmem:[%s7514_s2 + $0x10] sm:$0xff]  ;;  %v7889_v21 = vld [vmem:[#allocation62_spill] sm:$0xff] }
 0x287   :  { %v1583_v10 = vpop.f32.mrf.mxu2  ;;  %v5982_v40 = vpop.f32.mrf.mxu0  ;;  %v6086_v15 = vmul.f32 %v6065_v44, %v7879_v59  ;;  %7884 = vst [vmem:[#allocation77_spill] sm:$0xff] %v6116_v55  ;;  %v7893_v58 = vld [vmem:[#allocation40_spill] sm:$0xff]  ;;  %v7898_v59 = vld [vmem:[#allocation50_spill] sm:$0xff] }
 0x288   :  { %v1584_v57 = vadd.f32 %v1583_v10, %v1549_v37  ;;  %v1618_v48 = vpop.f32.mrf.mxu3  ;;  %v1610_v24 = vadd.f32 %v1609_v13, %v1575_v60  ;;  %v1607_v25 = vadd.f32 %v1606_v30, %v1572_v46  ;;  %v6022_v1 = vmul.f32 %v5704_v6, %v1604_v2  ;;  %v6046_v6 = vld [vmem:[%s7514_s2] sm:$0xff]  ;;  %7885 = vst [vmem:[#allocation78_spill] sm:$0xff] %v6124_v43  ;;  %v7890_v60 = vld [vmem:[#allocation11_spill] sm:$0xff]  ;;  %v7895_v2 = vld [vmem:[#allocation49_spill] sm:$0xff] }
 0x289   :  { %v5985_v27 = vpop.f32.mrf.mxu1  ;;  %7880 = vst [vmem:[#allocation18_spill] sm:$0xff] %v6086_v15  ;;  %v7881_v37 = vsub.f32 %v5096_v9, %v5487_v0  ;;  %v1476_v20 = vadd.f32 %v7890_v60, %v7889_v21  ;;  %v7892_v46 = vld [vmem:[#allocation34_spill] sm:$0xff]  ;;  %v7900_v28 = vld [vmem:[#allocation8_spill] sm:$0xff]  ;;  %v7903_v60 = vld [vmem:[#allocation7_spill] sm:$0xff] }
 0x28a   :  { %v1619_v42 = vadd.f32 %v1618_v48, %v1584_v57  ;;  %v6007_v49 = vmul.f32 %v5672_v32, %v1610_v24  ;;  %7872 = vst [vmem:[#allocation12_spill] sm:$0xff] %v6022_v1  ;;  %v6030_v32 = vld [vmem:[%s7517_s5 + $0x68] sm:$0xff]  ;;  %v7887_v57 = vld [vmem:[#allocation45_spill] sm:$0xff]  ;;  %v1359_v16 = vadd.f32 %v7892_v46, %v7891_v14  ;;  %v7894_v24 = vld [vmem:[#allocation42_spill] sm:$0xff] }
 0x28b   :  { %v7888_v48 = vld [vmem:[#allocation47_spill] sm:$0xff]  ;;  %v7902_v21 = vld [vmem:[#allocation44_spill] sm:$0xff] }
 0x28c   :  { %v5990_v26 = vmul.f32 %v5634_v35, %v1619_v42  ;;  %v6013_v35 = vmul.f32 %v5688_v33, %v1607_v25  ;;  %v7873_v33 = vsub.f32 %v5247_v56, %v5584_v17  ;;  %v6053_v56 = vld [vmem:[%s7517_s5 + $0x50] sm:$0xff]  ;;  %v7875_v17 = vsub.f32 %v5211_v4, %v5561_v31  ;;  %v6077_v4 = vld [vmem:[%s7517_s5 + $0x20] sm:$0xff] }
 0x28d   :  { %v6072_v36 = vmul.f32 %v6053_v56, %v7877_v11  ;;  %v6102_v63 = vmul.f32 %v6077_v4, %v7881_v37  ;;  %v1368_v18 = vadd.f32 %v7888_v48, %v7887_v57  ;;  %v1365_v25 = vadd.f32 %v7894_v24, %v7893_v58  ;;  %v6149_v48 = vld [vmem:[%s7514_s2 + $0x18] sm:$0xff]  ;;  %v7905_v24 = vld [vmem:[#allocation55_spill] sm:$0xff] }
 0x28e   :  { %1895 = vmatpush.msra.mxu2 %v5990_v26  ;;  %7871 = vst [vmem:[#allocation10_spill] sm:$0xff] %v6013_v35  ;;  %v6036_v34 = vmul.f32 %v6019_v51, %v7873_v33  ;;  %v6060_v23 = vmul.f32 %v6030_v32, %v7875_v17  ;;  %v1406_v33 = vadd.f32 %v7895_v2, %v1371_v12  ;;  %v7896_v17 = vld [vmem:[#allocation51_spill] sm:$0xff]  ;;  %v7904_v58 = vld [vmem:[#allocation57_spill] sm:$0xff] }
 0x28f   :  { %v5996_v22 = vpop.f32.mrf.mxu2  ;;  %v6003_v41 = vpop.f32.mrf.mxu0  ;;  %7878 = vst [vmem:[#allocation16_spill] sm:$0xff] %v6072_v36  ;;  %v1409_v53 = vadd.f32 %v7896_v17, %v1374_v47  ;;  %v1362_v37 = vadd.f32 %v7898_v59, %v7897_v61  ;;  %v1473_v57 = vadd.f32 %v7900_v28, %v7899_v7  ;;  %v1403_v12 = vadd.f32 %v7902_v21, %v1368_v18  ;;  %v7906_v17 = vld [vmem:[#allocation63_spill] sm:$0xff]  ;;  %v7907_v59 = vld [vmem:[#allocation65_spill] sm:$0xff]  ;;  %v7908_v7 = vld [vmem:[#allocation14_spill] sm:$0xff] }
 0x290   :  { %v6001_v45 = vpop.f32.mrf.mxu3  ;;  %1896 = vmatpush.msra.mxu2 %v5993_v62  ;;  %7874 = vst [vmem:[#allocation13_spill] sm:$0xff] %v6036_v34  ;;  %v1651_v47 = vadd.f32 %v7903_v60, %v1406_v33  ;;  %v1470_v2 = vadd.f32 %v7905_v24, %v7904_v58  ;;  %v1511_v61 = vadd.f32 %v7906_v17, %v1476_v20  ;;  %v7912_v18 = vld [vmem:[#allocation2_spill] sm:$0xff]  ;;  %v7913_v21 = vld [vmem:[#allocation71_spill] sm:$0xff]  ;;  %v7914_v60 = vld [vmem:[#allocation60_spill] sm:$0xff] }
 0x291   :  { %v6010_v13 = vpop.f32.mrf.mxu1  ;;  %7876 = vst [vmem:[#allocation15_spill] sm:$0xff] %v6060_v23  ;;  %v1654_v14 = vadd.f32 %v5982_v40, %v1409_v53  ;;  %v1479_v28 = vadd.f32 %v7908_v7, %v7907_v59  ;;  %v1464_v33 = vadd.f32 %v7913_v21, %v7912_v18  ;;  %v1508_v40 = vadd.f32 %v7914_v60, %v1473_v57  ;;  %v7915_v53 = vld [vmem:[#allocation48_spill] sm:$0xff]  ;;  %v7916_v58 = vld [vmem:[#allocation73_spill] sm:$0xff]  ;;  %v7917_v24 = vld [vmem:[#allocation54_spill] sm:$0xff] }
 0x292   :  { %1897 = vmatpush.msra.mxu2 %v5999_v50  ;;  %7882 = vst [vmem:[#allocation19_spill] sm:$0xff] %v6102_v63  ;;  %v1467_v20 = vadd.f32 %v7917_v24, %v7916_v58  ;;  %v7918_v17 = vld [vmem:[#allocation3_spill] sm:$0xff]  ;;  %v7919_v59 = vld [vmem:[#allocation6_spill] sm:$0xff]  ;;  %v7924_v60 = vld [vmem:[#allocation4_spill] sm:$0xff] }
 0x293   :  { %7901 = vst [vmem:[#allocation52_spill] sm:$0xff] %v6149_v48  ;;  %v1686_v7 = vadd.f32 %v7919_v59, %v1651_v47  ;;  %v7925_v58 = vld [vmem:[#allocation17_spill] sm:$0xff] }
 0x294   :  { %1898 = vmatpush.msra.mxu2 %v6007_v49 }
 0x296   :  { %1899 = vmatpush.msra.mxu2 %v6013_v35  ;;  %v7923_v35 = vld [vmem:[#allocation70_spill] sm:$0xff] }
 0x297   :  { %v6025_v5 = vpop.f32.mrf.mxu2  ;;  %v6040_v30 = vpop.f32.mrf.mxu0 }
 0x298   :  { %v6038_v38 = vpop.f32.mrf.mxu3  ;;  %1900 = vmatpush.msra.mxu2 %v6022_v1 }
 0x299   :  { %3137 = vmatmul.msk.f32.vlgmr.msra.gmra.mxu2 %vm269_vm0, %v6046_v6  ;;  %v6079_v31 = vpop.f32.mrf.mxu1 }
 0x29a   :  { %2035 = vmatpush.msrb.mxu2 %v6036_v34 }
 0x29c   :  { %2036 = vmatpush.msrb.mxu2 %v6060_v23 }
 0x29e   :  { %2037 = vmatpush.msrb.mxu2 %v6072_v36 }
 0x29f   :  { %v6093_v52 = vpop.f32.mrf.mxu2  ;;  %v6095_v8 = vpop.f32.mrf.mxu0 }
 0x2a0   :  { %v1749_v39 = vpop.f32.mrf.mxu3  ;;  %2038 = vmatpush.msrb.mxu2 %v6086_v15  ;;  %v7910_v15 = vld [vmem:[#allocation38_spill] sm:$0xff] }
 0x2a1   :  { %3138 = vmatmul.msk.f32.gmra.mxu2 %vm269_vm0, %v6107_v19  ;;  %v6119_v9 = vpop.f32.mrf.mxu1  ;;  %v1400_v36 = vadd.f32 %v7910_v15, %v1365_v25  ;;  %v7921_v15 = vld [vmem:[#allocation58_spill] sm:$0xff] }
 0x2a2   :  { %2039 = vmatpush.msrb.mxu2 %v6102_v63  ;;  %v1505_v25 = vadd.f32 %v7921_v15, %v1470_v2 }
 0x2a3   :  { %v1645_v1 = vadd.f32 %v7918_v17, %v1400_v36 }
 0x2a4   :  { %2040 = vmatpush.msrb.mxu2 %v6116_v55  ;;  %v7909_v55 = vld [vmem:[#allocation43_spill] sm:$0xff]  ;;  %v1750_v36 = vadd.f32 %v1749_v39, %v1505_v25 }
 0x2a5   :  { %v1394_v63 = vadd.f32 %v7909_v55, %v1359_v16  ;;  %v7920_v55 = vld [vmem:[#allocation9_spill] sm:$0xff] }
 0x2a6   :  { %v1689_v16 = vadd.f32 %v7920_v55, %v1654_v14  ;;  %v6181_v14 = vld [vmem:[%s7514_s2 + $0x20] sm:$0xff] }
 0x2a7   :  { %v1717_v0 = vpop.f32.mrf.mxu2  ;;  %v1787_v29 = vpop.f32.mrf.mxu0  ;;  %v1639_v24 = vadd.f32 %v7925_v58, %v1394_v63  ;;  %v7928_v63 = vld [vmem:[#allocation53_spill] sm:$0xff] }
 0x2a8   :  { %v1752_v10 = vpop.f32.mrf.mxu3  ;;  %v1499_v39 = vadd.f32 %v7928_v63, %v1464_v33 }
 0x2a9   :  { %3139 = vmatmul.msk.f32.gmra.mxu2 %vm269_vm0, %v6124_v43  ;;  %v1825_v46 = vpop.f32.mrf.mxu1  ;;  %v1397_v43 = vadd.f32 %v7915_v53, %v1362_v37  ;;  %v1753_v21 = vadd.f32 %v1752_v10, %v1508_v40 }
 0x2aa   :  { %v1744_v33 = vadd.f32 %v6001_v45, %v1499_v39  ;;  %v1845_v45 = vld [vmem:[%s7517_s5 + $0x70] sm:$0xff]  ;;  %v3375_v39 = vld [vmem:[%s7516_s4 + $0x168] sm:$0xff] }
 0x2ab   :  { %v1642_v18 = vadd.f32 %v7923_v35, %v1397_v43  ;;  %v7926_v35 = vld [vmem:[#allocation75_spill] sm:$0xff]  ;;  %v7927_v43 = vld [vmem:[#allocation72_spill] sm:$0xff]  ;;  %v1788_v40 = vadd.f32 %v1787_v29, %v1753_v21 }
 0x2ac   :  { %v1502_v10 = vadd.f32 %v7926_v35, %v1467_v20  ;;  %v1848_v29 = vld [vmem:[%s7517_s5 + $0x88] sm:$0xff] }
 0x2ad   :  { %v7938_v35 = vld [vmem:[#allocation23_spill] sm:$0xff] }
 0x2af   :  { %v1720_v42 = vpop.f32.mrf.mxu2  ;;  %v1790_v11 = vpop.f32.mrf.mxu0 }
 0x2b0   :  { %v1755_v3 = vpop.f32.mrf.mxu3 }
 0x2b1   :  { %3140 = vmatmul.msk.f32.gmra.mxu2 %vm269_vm0, %v6149_v48  ;;  %v7911_v48 = vld [vmem:[#allocation74_spill] sm:$0xff]  ;;  %v1756_v34 = vadd.f32 %v1755_v3, %v1511_v61  ;;  %v1721_v3 = vadd.f32 %v1720_v42, %v1686_v7  ;;  %v1747_v7 = vadd.f32 %v6038_v38, %v1502_v10  ;;  %v1828_v15 = vpop.f32.mrf.mxu1 }
 0x2b2   :  { %v1648_v23 = vadd.f32 %v7911_v48, %v1403_v12  ;;  %v7922_v48 = vld [vmem:[#allocation66_spill] sm:$0xff] }
 0x2b3   :  { %v1514_v12 = vadd.f32 %v7922_v48, %v1479_v28  ;;  %v1791_v17 = vadd.f32 %v1790_v11, %v1756_v34  ;;  %v7929_v34 = vld [vmem:[#allocation69_spill] sm:$0xff]  ;;  %v7939_v10 = vld [vmem:[#allocation30_spill] sm:$0xff] }
 0x2b4   :  { %v1683_v37 = vadd.f32 %v7924_v60, %v1648_v23  ;;  %v1680_v23 = vadd.f32 %v7927_v43, %v1645_v1  ;;  %v1677_v11 = vadd.f32 %v7929_v34, %v1642_v18  ;;  %v7930_v1 = vld [vmem:[#allocation67_spill] sm:$0xff]  ;;  %v7931_v60 = vld [vmem:[#allocation25_spill] sm:$0xff]  ;;  %v7940_v43 = vsub.f32 %v7938_v35, %v7939_v10  ;;  %v7944_v34 = vld [vmem:[#allocation20_spill] sm:$0xff] }
 0x2b5   :  { %v1826_v20 = vadd.f32 %v1825_v46, %v1791_v17  ;;  %v3397_v35 = vld [vmem:[%s7516_s4 + $0x80] sm:$0xff]  ;;  %v3398_v10 = vld [vmem:[%s7516_s4 + $0x48] sm:$0xff] }
 0x2b6   :  { %v1718_v42 = vadd.f32 %v1717_v0, %v1683_v37  ;;  %v1715_v55 = vadd.f32 %v6093_v52, %v1680_v23  ;;  %v1674_v0 = vadd.f32 %v7930_v1, %v1639_v24  ;;  %v1712_v38 = vadd.f32 %v6025_v5, %v1677_v11  ;;  %v7932_v37 = vld [vmem:[#allocation32_spill] sm:$0xff]  ;;  %v7945_v11 = vld [vmem:[#allocation29_spill] sm:$0xff] }
 0x2b7   :  { %v1723_v57 = vpop.f32.mrf.mxu2  ;;  %v1793_v28 = vpop.f32.mrf.mxu0  ;;  %v7953_v1 = vld [vmem:[#allocation33_spill] sm:$0xff] }
 0x2b8   :  { %v1724_v61 = vadd.f32 %v1723_v57, %v1689_v16  ;;  %v1758_v53 = vpop.f32.mrf.mxu3  ;;  %v1880_v16 = vmul.f32 %v6030_v32, %v1721_v3  ;;  %v1877_v52 = vmul.f32 %v6053_v56, %v1718_v42  ;;  %v1823_v32 = vadd.f32 %v6119_v9, %v1788_v40  ;;  %v7941_v42 = vld [vmem:[#allocation21_spill] sm:$0xff] }
 0x2b9   :  { %v1759_v47 = vadd.f32 %v1758_v53, %v1514_v12  ;;  %3141 = vmatmul.msk.f32.gmra.mxu2 %vm269_vm0, %v6181_v14  ;;  %v1709_v12 = vadd.f32 %v5996_v22, %v1674_v0  ;;  %v1874_v46 = vmul.f32 %v6065_v44, %v1715_v55  ;;  %v1881_v56 = vmul.f32 %v1845_v45, %v1826_v20  ;;  %v6214_v22 = vld [vmem:[%s7514_s2 + $0x28] sm:$0xff]  ;;  %v7935_v53 = vld [vmem:[#allocation41_spill] sm:$0xff]  ;;  %v3376_v0 = vld [vmem:[%s7516_s4 + $0x170] sm:$0xff] }
 0x2ba   :  { %v1883_v2 = vmul.f32 %v6019_v51, %v1724_v61  ;;  %v1785_v51 = vadd.f32 %v6095_v8, %v1750_v36  ;;  %v1782_v8 = vadd.f32 %v6040_v30, %v1747_v7  ;;  %v1779_v9 = vadd.f32 %v6003_v41, %v1744_v33  ;;  %v1842_v30 = vld [vmem:[%s7517_s5 + $0x58] sm:$0xff]  ;;  %v1833_v36 = vld [vmem:[%s7517_s5 + $0x10] sm:$0xff]  ;;  %v7948_v7 = vld [vmem:[#allocation27_spill] sm:$0xff] }
 0x2bb   :  { %v1794_v59 = vadd.f32 %v1793_v28, %v1759_v47  ;;  %v1871_v18 = vmul.f32 %v6077_v4, %v1712_v38  ;;  %v1878_v44 = vmul.f32 %v1842_v30, %v1823_v32  ;;  %v1868_v41 = vmul.f32 %v6091_v54, %v1709_v12  ;;  %v7937_v47 = vld [vmem:[#allocation5_spill] sm:$0xff]  ;;  %v7955_v20 = vld [vmem:[#allocation35_spill] sm:$0xff]  ;;  %v7958_v33 = vld [vmem:[#allocation26_spill] sm:$0xff] }
 0x2bc   :  { %1930 = vmatpush.msra.mxu3 %v1883_v2  ;;  %2140 = vmatpush.msra.mxu1 %v1883_v2  ;;  %v1820_v5 = vadd.f32 %v6079_v31, %v1785_v51  ;;  %v1817_v4 = vadd.f32 %v6010_v13, %v1782_v8  ;;  %v1839_v31 = vld [vmem:[%s7517_s5 + $0x40] sm:$0xff]  ;;  %v1814_v57 = vadd.f32 %v5985_v27, %v1779_v9  ;;  %v1836_v13 = vld [vmem:[%s7517_s5 + $0x28] sm:$0xff]  ;;  %v7934_v27 = vld [vmem:[#allocation24_spill] sm:$0xff] }
 0x2bd   :  { %v1829_v25 = vadd.f32 %v1828_v15, %v1794_v59  ;;  %v7933_v3 = vsub.f32 %v7931_v60, %v7932_v37  ;;  %v7936_v58 = vsub.f32 %v7934_v27, %v7935_v53  ;;  %v1860_v23 = vmul.f32 %v1842_v30, %v7940_v43  ;;  %v7942_v2 = vld [vmem:[#allocation37_spill] sm:$0xff]  ;;  %v7950_v15 = vld [vmem:[#allocation56_spill] sm:$0xff]  ;;  %v7959_v38 = vld [vmem:[#allocation15_spill] sm:$0xff] }
 0x2be   :  { %1931 = vmatpush.msra.mxu3 %v1880_v16  ;;  %2141 = vmatpush.msra.mxu1 %v1880_v16  ;;  %v1875_v21 = vmul.f32 %v1839_v31, %v1820_v5  ;;  %v1872_v54 = vmul.f32 %v1836_v13, %v1817_v4  ;;  %v1869_v17 = vmul.f32 %v1833_v36, %v1814_v57  ;;  %v3377_v51 = vld [vmem:[%s7516_s4 + $0x150] sm:$0xff]  ;;  %v3379_v8 = vld [vmem:[%s7516_s4 + $0x138] sm:$0xff]  ;;  %v3380_v5 = vld [vmem:[%s7516_s4 + $0x140] sm:$0xff] }
 0x2bf   :  { %v1884_v48 = vmul.f32 %v1848_v29, %v1829_v25  ;;  %v1866_v61 = vmul.f32 %v1848_v29, %v7933_v3  ;;  %v1863_v24 = vmul.f32 %v1845_v45, %v7936_v58  ;;  %v7943_v28 = vsub.f32 %v7941_v42, %v7942_v2  ;;  %v7956_v25 = vld [vmem:[#allocation13_spill] sm:$0xff]  ;;  %v7957_v29 = vld [vmem:[#allocation78_spill] sm:$0xff]  ;;  %v7961_v32 = vld [vmem:[#allocation28_spill] sm:$0xff] }
 0x2c0   :  { %1932 = vmatpush.msra.mxu3 %v1877_v52  ;;  %2142 = vmatpush.msra.mxu1 %v1877_v52  ;;  %v7946_v40 = vsub.f32 %v7944_v34, %v7945_v11  ;;  %v7960_v52 = vld [vmem:[#allocation61_spill] sm:$0xff]  ;;  %v7962_v12 = vld [vmem:[#allocation16_spill] sm:$0xff]  ;;  %v7964_v45 = vld [vmem:[#allocation18_spill] sm:$0xff] }
 0x2c1   :  { %1965 = vmatpush.msrb.mxu0 %v1884_v48  ;;  %2175 = vmatpush.msra.mxu2 %v1884_v48  ;;  %v1857_v63 = vmul.f32 %v1839_v31, %v7943_v28  ;;  %v3378_v48 = vld [vmem:[%s7516_s4 + $0x158] sm:$0xff]  ;;  %v7965_v9 = vld [vmem:[#allocation19_spill] sm:$0xff]  ;;  %v3384_v31 = vld [vmem:[%s7516_s4 + $0xf0] sm:$0xff] }
 0x2c2   :  { %3142 = vmatmul.msk.f32.gmra.mxu2 %vm269_vm0, %v6214_v22  ;;  %1933 = vmatpush.msra.mxu3 %v1874_v46  ;;  %v1854_v59 = vmul.f32 %v1836_v13, %v7946_v40  ;;  %v3382_v30 = vld [vmem:[%s7516_s4 + $0x108] sm:$0xff]  ;;  %v3386_v57 = vld [vmem:[%s7516_s4 + $0xd8] sm:$0xff]  ;;  %v3388_v37 = vld [vmem:[%s7516_s4 + $0xc0] sm:$0xff] }
 0x2c3   :  { %1966 = vmatpush.msrb.mxu0 %v1881_v56  ;;  %2143 = vmatpush.msra.mxu1 %v1874_v46  ;;  %v7963_v46 = vld [vmem:[#allocation39_spill] sm:$0xff]  ;;  %v3387_v60 = vld [vmem:[%s7516_s4 + $0xf8] sm:$0xff]  ;;  %v7969_v3 = vld [vmem:[#allocation68_spill] sm:$0xff] }
 0x2c4   :  { %2176 = vmatpush.msra.mxu2 %v1881_v56  ;;  %1934 = vmatpush.msra.mxu3 %v1871_v18  ;;  %v3381_v56 = vld [vmem:[%s7516_s4 + $0x120] sm:$0xff]  ;;  %v3383_v4 = vld [vmem:[%s7516_s4 + $0x128] sm:$0xff]  ;;  %v3392_v27 = vld [vmem:[%s7516_s4 + $0x90] sm:$0xff] }
 0x2c5   :  { %1967 = vmatpush.msrb.mxu0 %v1878_v44  ;;  %2144 = vmatpush.msra.mxu1 %v1871_v18  ;;  %v7966_v18 = vld [vmem:[#allocation52_spill] sm:$0xff]  ;;  %v3390_v13 = vld [vmem:[%s7516_s4 + $0xa8] sm:$0xff]  ;;  %v3394_v58 = vld [vmem:[%s7516_s4 + $0x78] sm:$0xff] }
 0x2c6   :  { %2177 = vmatpush.msra.mxu2 %v1878_v44  ;;  %1935 = vmatpush.msra.mxu3 %v1868_v41  ;;  %v7967_v44 = vld [vmem:[#allocation77_spill] sm:$0xff]  ;;  %v3393_v53 = vld [vmem:[%s7516_s4 + $0xb0] sm:$0xff]  ;;  %v3399_v43 = vld [vmem:[%s7516_s4 + $0x68] sm:$0xff] }
 0x2c7   :  { %1968 = vmatpush.msrb.mxu0 %v1875_v21  ;;  %2145 = vmatpush.msra.mxu1 %v1868_v41  ;;  %v7968_v41 = vld [vmem:[#allocation64_spill] sm:$0xff]  ;;  %v3402_v2 = vld [vmem:[%s7516_s4 + $0x18] sm:$0xff]  ;;  %v3407_v11 = vld [vmem:[%s7516_s4] sm:$0xff] }
 0x2c8   :  { %2178 = vmatpush.msra.mxu2 %v1875_v21  ;;  %3143 = vmatmul.msk.f32.vlgmr.msra.gmra.mxu3 %vm269_vm0, %v6046_v6  ;;  %v3385_v21 = vld [vmem:[%s7516_s4 + $0x110] sm:$0xff]  ;;  %v3403_v28 = vld [vmem:[%s7516_s4 + $0x38] sm:$0xff]  ;;  %v3408_v40 = vld [vmem:[%s7516_s4 + $0x8] sm:$0xff] }
 0x2c9   :  { %2070 = vmatpush.msrb.mxu3 %v1866_v61  ;;  %2280 = vmatpush.msrb.mxu1 %v1866_v61  ;;  %v3389_v61 = vld [vmem:[%s7516_s4 + $0xe0] sm:$0xff]  ;;  %v3401_v42 = vld [vmem:[%s7516_s4 + $0x50] sm:$0xff] }
 0x2ca   :  { %1969 = vmatpush.msrb.mxu0 %v1872_v54  ;;  %2179 = vmatpush.msra.mxu2 %v1872_v54  ;;  %v3391_v54 = vld [vmem:[%s7516_s4 + $0xc8] sm:$0xff]  ;;  %v3406_v34 = vld [vmem:[%s7516_s4 + $0x2d0] sm:$0xff] }
 0x2cb   :  { %3161 = vmatmul.msk.f32.vlgmr.msrb.gmra.mxu2 %vm269_vm0, %v7937_v47  ;;  %2071 = vmatpush.msrb.mxu3 %v1863_v24 }
 0x2cc   :  { %2281 = vmatpush.msrb.mxu1 %v1863_v24  ;;  %1970 = vmatpush.msrb.mxu0 %v1869_v17  ;;  %v3395_v24 = vld [vmem:[%s7516_s4 + $0x98] sm:$0xff] }
 0x2cd   :  { %2180 = vmatpush.msra.mxu2 %v1869_v17  ;;  %3149 = vmatmul.msk.f32.vlgmr.msrb.gmra.mxu0 %vm269_vm0, %v6046_v6  ;;  %v7970_v17 = vld [vmem:[#allocation76_spill] sm:$0xff] }
 0x2ce   :  { %2072 = vmatpush.msrb.mxu3 %v1860_v23  ;;  %2105 = vmatpush.msra.mxu0 %v5990_v26  ;;  %v7947_v26 = vld [vmem:[#allocation22_spill] sm:$0xff] }
 0x2cf   :  { %2282 = vmatpush.msrb.mxu1 %v1860_v23  ;;  %2341 = vmatpush.msrb.mxu2 %v3375_v39  ;;  %v7949_v55 = vsub.f32 %v7947_v26, %v7948_v7  ;;  %v3400_v23 = vld [vmem:[%s7516_s4 + $0x30] sm:$0xff]  ;;  %v3405_v39 = vld [vmem:[%s7516_s4 + $0x20] sm:$0xff]  ;;  %v3410_v26 = vld [vmem:[%s7516_s4 + $0x2b8] sm:$0xff] }
 0x2d0   :  { %2073 = vmatpush.msrb.mxu3 %v1857_v63  ;;  %2106 = vmatpush.msra.mxu0 %v5993_v62  ;;  %v7951_v62 = vld [vmem:[#allocation31_spill] sm:$0xff] }
 0x2d1   :  { %2283 = vmatpush.msrb.mxu1 %v1857_v63  ;;  %3144 = vmatmul.msk.f32.gmra.mxu3 %vm269_vm0, %v6107_v19  ;;  %v1851_v16 = vmul.f32 %v1833_v36, %v7949_v55  ;;  %v3396_v36 = vld [vmem:[%s7516_s4 + $0x60] sm:$0xff]  ;;  %v3404_v63 = vld [vmem:[%s7516_s4 + $0x2e8] sm:$0xff]  ;;  %v3412_v55 = vld [vmem:[%s7516_s4 + $0x2d8] sm:$0xff] }
 0x2d2   :  { %2074 = vmatpush.msrb.mxu3 %v1854_v59  ;;  %2107 = vmatpush.msra.mxu0 %v5999_v50  ;;  %v7952_v50 = vld [vmem:[#allocation10_spill] sm:$0xff]  ;;  %v3411_v7 = vld [vmem:[%s7516_s4 + $0x348] sm:$0xff] }
 0x2d3   :  { %3179 = vmatmul.msk.f32.vlgmr.msra.gmra.mxu1 %vm269_vm0, %v7937_v47  ;;  %3162 = vmatmul.msk.f32.gmra.mxu2 %vm269_vm0, %v7950_v15 }
 0x2d4   :  { %2284 = vmatpush.msrb.mxu1 %v1854_v59  ;;  %2075 = vmatpush.msrb.mxu3 %v1851_v16  ;;  %v3409_v59 = vld [vmem:[%s7516_s4 + $0x2f0] sm:$0xff] }
 0x2d5   :  { %2108 = vmatpush.msra.mxu0 %v6007_v49  ;;  %2342 = vmatpush.msrb.mxu2 %v3377_v51  ;;  %v7954_v49 = vld [vmem:[#allocation12_spill] sm:$0xff]  ;;  %v3419_v51 = vld [vmem:[%s7516_s4 + $0x300] sm:$0xff] }
 0x2d6   :  { %2210 = vmatpush.msra.mxu3 %v7951_v62  ;;  %2285 = vmatpush.msrb.mxu1 %v1851_v16  ;;  %v3413_v16 = vld [vmem:[%s7516_s4 + $0x2a0] sm:$0xff]  ;;  %v3415_v62 = vld [vmem:[%s7516_s4 + $0x288] sm:$0xff] }
 0x2d7   :  { %3150 = vmatmul.msk.f32.gmra.mxu0 %vm269_vm0, %v6107_v19  ;;  %2343 = vmatpush.msrb.mxu2 %v3379_v8  ;;  %v3429_v8 = vld [vmem:[%s7516_s4 + $0x290] sm:$0xff] }
 0x2d8   :  { %2109 = vmatpush.msra.mxu0 %v7952_v50  ;;  %2211 = vmatpush.msra.mxu3 %v7953_v1  ;;  %v3416_v50 = vld [vmem:[%s7516_s4 + $0x318] sm:$0xff]  ;;  %v3417_v1 = vld [vmem:[%s7516_s4 + $0x270] sm:$0xff] }
 0x2d9   :  { %2446 = vmatpush.msra.mxu1 %v3376_v0  ;;  %3145 = vmatmul.msk.f32.gmra.mxu3 %vm269_vm0, %v7957_v29  ;;  %v3418_v0 = vld [vmem:[%s7516_s4 + $0x2f8] sm:$0xff] }
 0x2da   :  { %2110 = vmatpush.msra.mxu0 %v7954_v49  ;;  %2212 = vmatpush.msra.mxu3 %v7955_v20  ;;  %v3420_v49 = vld [vmem:[%s7516_s4 + $0x2c0] sm:$0xff]  ;;  %v3421_v20 = vld [vmem:[%s7516_s4 + $0x258] sm:$0xff] }
 0x2db   :  { %3180 = vmatmul.msk.f32.gmra.mxu1 %vm269_vm0, %v7950_v15  ;;  %3163 = vmatmul.msk.f32.gmra.mxu2 %vm269_vm0, %v7960_v52 }
 0x2dc   :  { %2245 = vmatpush.msrb.mxu0 %v7956_v25  ;;  %2213 = vmatpush.msra.mxu3 %v7958_v33  ;;  %v3422_v25 = vld [vmem:[%s7516_s4 + $0x2e0] sm:$0xff]  ;;  %v3423_v33 = vld [vmem:[%s7516_s4 + $0x2a8] sm:$0xff] }
 0x2dd   :  { %2447 = vmatpush.msra.mxu1 %v3378_v48  ;;  %2344 = vmatpush.msrb.mxu2 %v3381_v56  ;;  %v3427_v48 = vld [vmem:[%s7516_s4 + $0x2b0] sm:$0xff]  ;;  %v3433_v56 = vld [vmem:[%s7516_s4 + $0x280] sm:$0xff] }
 0x2de   :  { %2246 = vmatpush.msrb.mxu0 %v7959_v38  ;;  %2214 = vmatpush.msra.mxu3 %v7961_v32  ;;  %v3424_v38 = vld [vmem:[%s7516_s4 + $0x240] sm:$0xff]  ;;  %v3426_v32 = vld [vmem:[%s7516_s4 + $0x228] sm:$0xff] }
 0x2df   :  { %3151 = vmatmul.msk.f32.gmra.mxu0 %vm269_vm0, %v7957_v29  ;;  %2448 = vmatpush.msra.mxu1 %v3380_v5  ;;  %v3432_v5 = vld [vmem:[%s7516_s4 + $0x278] sm:$0xff] }
 0x2e0   :  { %2247 = vmatpush.msrb.mxu0 %v7962_v12  ;;  %2215 = vmatpush.msra.mxu3 %v7963_v46  ;;  %v3428_v12 = vld [vmem:[%s7516_s4 + $0x210] sm:$0xff]  ;;  %v3430_v46 = vld [vmem:[%s7516_s4 + $0x298] sm:$0xff] }
 0x2e1   :  { %3146 = vmatmul.msk.f32.gmra.mxu3 %vm269_vm0, %v7966_v18  ;;  %2345 = vmatpush.msrb.mxu2 %v3382_v30  ;;  %v3436_v30 = vld [vmem:[%s7516_s4 + $0x1c8] sm:$0xff] }
 0x2e2   :  { %2248 = vmatpush.msrb.mxu0 %v7964_v45  ;;  %2449 = vmatpush.msra.mxu1 %v3383_v4  ;;  %v3431_v45 = vld [vmem:[%s7516_s4 + $0x1f8] sm:$0xff]  ;;  %v3437_v4 = vld [vmem:[%s7516_s4 + $0x268] sm:$0xff] }
 0x2e3   :  { %3181 = vmatmul.msk.f32.gmra.mxu1 %vm269_vm0, %v7960_v52  ;;  %3164 = vmatmul.msk.f32.gmra.mxu2 %vm269_vm0, %v7968_v41 }
 0x2e4   :  { %2249 = vmatpush.msrb.mxu0 %v7965_v9  ;;  %2346 = vmatpush.msrb.mxu2 %v3384_v31  ;;  %v3434_v9 = vld [vmem:[%s7516_s4 + $0x1e0] sm:$0xff]  ;;  %v3438_v31 = vld [vmem:[%s7516_s4 + $0x1b0] sm:$0xff] }
 0x2e5   :  { %2450 = vmatpush.msra.mxu1 %v3385_v21  ;;  %v3439_v21 = vld [vmem:[%s7516_s4 + $0x248] sm:$0xff] }
 0x2e6   :  { %2250 = vmatpush.msrb.mxu0 %v7967_v44  ;;  %2347 = vmatpush.msrb.mxu2 %v3386_v57  ;;  %v6531_v44 = vpop.f32.mrf.mxu1  ;;  %v3440_v57 = vld [vmem:[%s7516_s4 + $0x250] sm:$0xff] }
 0x2e7   :  { %3152 = vmatmul.msk.f32.gmra.mxu0 %vm269_vm0, %v7966_v18  ;;  %2451 = vmatpush.msra.mxu1 %v3387_v60  ;;  %v3441_v60 = vld [vmem:[%s7516_s4 + $0x198] sm:$0xff] }
 0x2e8   :  { %2348 = vmatpush.msrb.mxu2 %v3388_v37  ;;  %v3442_v37 = vld [vmem:[%s7516_s4 + $0x230] sm:$0xff] }
 0x2e9   :  { %3147 = vmatmul.msk.f32.gmra.mxu3 %vm269_vm0, %v6181_v14  ;;  %2452 = vmatpush.msra.mxu1 %v3389_v61  ;;  %v3443_v61 = vld [vmem:[%s7516_s4 + $0x238] sm:$0xff] }
 0x2ea   :  { %2349 = vmatpush.msrb.mxu2 %v3390_v13  ;;  %v3444_v13 = vld [vmem:[%s7516_s4 + $0x180] sm:$0xff] }
 0x2eb   :  { %3182 = vmatmul.msk.f32.gmra.mxu1 %vm269_vm0, %v7968_v41  ;;  %3165 = vmatmul.msk.f32.gmra.mxu2 %vm269_vm0, %v7969_v3 }
 0x2ec   :  { %2453 = vmatpush.msra.mxu1 %v3391_v54  ;;  %2350 = vmatpush.msrb.mxu2 %v3392_v27  ;;  %v3446_v27 = vld [vmem:[%s7516_s4 + $0x220] sm:$0xff] }
 0x2ee   :  { %2454 = vmatpush.msra.mxu1 %v3393_v53  ;;  %2351 = vmatpush.msrb.mxu2 %v3394_v58  ;;  %v3447_v53 = vld [vmem:[%s7516_s4 + $0x200] sm:$0xff]  ;;  %v6576_v58 = vpop.f32.mrf.mxu1 }
 0x2ef   :  { %3153 = vmatmul.msk.f32.gmra.mxu0 %vm269_vm0, %v6181_v14 }
 0x2f0   :  { %2455 = vmatpush.msra.mxu1 %v3395_v24  ;;  %2352 = vmatpush.msrb.mxu2 %v3396_v36  ;;  %v3448_v24 = vld [vmem:[%s7516_s4 + $0x208] sm:$0xff] }
 0x2f1   :  { %3148 = vmatmul.msk.f32.gmra.mxu3 %vm269_vm0, %v6214_v22  ;;  %v3449_v36 = vld [vmem:[%s7516_s4 + $0x1e8] sm:$0xff] }
 0x2f2   :  { %2456 = vmatpush.msra.mxu1 %v3397_v35  ;;  %2353 = vmatpush.msrb.mxu2 %v3398_v10  ;;  %v3450_v35 = vld [vmem:[%s7516_s4 + $0x1f0] sm:$0xff] }
 0x2f3   :  { %3183 = vmatmul.msk.f32.gmra.mxu1 %vm269_vm0, %v7969_v3  ;;  %3166 = vmatmul.msk.f32.gmra.mxu2 %vm269_vm0, %v7970_v17  ;;  %v3451_v10 = vld [vmem:[%s7516_s4 + $0x1d0] sm:$0xff] }
 0x2f4   :  { %2457 = vmatpush.msra.mxu1 %v3399_v43  ;;  %2354 = vmatpush.msrb.mxu2 %v3400_v23  ;;  %v3453_v43 = vld [vmem:[%s7516_s4 + $0x1b8] sm:$0xff] }
 0x2f6   :  { %2458 = vmatpush.msra.mxu1 %v3401_v42  ;;  %2355 = vmatpush.msrb.mxu2 %v3402_v2  ;;  %v3454_v42 = vld [vmem:[%s7516_s4 + $0x1c0] sm:$0xff] }
 0x2f7   :  { %3154 = vmatmul.msk.f32.gmra.mxu0 %vm269_vm0, %v6214_v22  ;;  %v3455_v2 = vld [vmem:[%s7516_s4 + $0x1a0] sm:$0xff] }
 0x2f8   :  { %2459 = vmatpush.msra.mxu1 %v3403_v28  ;;  %2356 = vmatpush.msrb.mxu2 %v3407_v11  ;;  %v3456_v28 = vld [vmem:[%s7516_s4 + $0x1a8] sm:$0xff] }
 0x2f9   :  { %3167 = vmatmul.msk.f32.vlgmr.msrb.gmra.mxu3 %vm269_vm0, %v7937_v47 }
 0x2fa   :  { %2376 = vmatpush.msrb.mxu3 %v3404_v63  ;;  %2460 = vmatpush.msra.mxu1 %v3405_v39  ;;  %v3457_v63 = vld [vmem:[%s7516_s4 + $0x188] sm:$0xff]  ;;  %v6620_v39 = vpop.f32.mrf.mxu1 }
 0x2fb   :  { %3184 = vmatmul.msk.f32.gmra.mxu1 %vm269_vm0, %v7970_v17  ;;  %3185 = vmatmul.msk.f32.vlgmr.msra.gmra.mxu2 %vm269_vm0, %v7937_v47 }
 0x2fc   :  { %2377 = vmatpush.msrb.mxu3 %v3406_v34  ;;  %2461 = vmatpush.msra.mxu1 %v3408_v40  ;;  %v3458_v34 = vld [vmem:[%s7516_s4 + $0x190] sm:$0xff]  ;;  %v3460_v40 = vld [vmem:[%s7516_s4 + $0x338] sm:$0xff] }
 0x2fd   :  { %2481 = vmatpush.msra.mxu2 %v3409_v59  ;;  %v3461_v59 = vld [vmem:[%s7516_s4 + $0x320] sm:$0xff] }
 0x2fe   :  { %2378 = vmatpush.msrb.mxu3 %v3410_v26  ;;  %v3462_v26 = vld [vmem:[%s7516_s4 + $0x178] sm:$0xff] }
 0x2ff   :  { %3173 = vmatmul.msk.f32.vlgmr.msra.gmra.mxu0 %vm269_vm0, %v7937_v47  ;;  %2482 = vmatpush.msra.mxu2 %v3412_v55  ;;  %v3414_v47 = vld [vmem:[%s7516_s4 + $0x330] sm:$0xff] }
 0x300   :  { %2423 = vmatpush.msra.mxu0 %v3411_v7  ;;  %2379 = vmatpush.msrb.mxu3 %v3413_v16  ;;  %v3463_v7 = vld [vmem:[%s7516_s4 + $0x308] sm:$0xff] }
 0x301   :  { %3168 = vmatmul.msk.f32.gmra.mxu3 %vm269_vm0, %v7950_v15  ;;  %2483 = vmatpush.msra.mxu2 %v3420_v49  ;;  %v3470_v49 = vld [vmem:[%s7516_s4 + $0xd0] sm:$0xff] }
 0x302   :  { %2424 = vmatpush.msra.mxu0 %v3414_v47  ;;  %2380 = vmatpush.msrb.mxu3 %v3415_v62  ;;  %v6650_v55 = vpop.f32.mrf.mxu1  ;;  %v3465_v47 = vld [vmem:[%s7516_s4 + $0x148] sm:$0xff]  ;;  %v3466_v62 = vld [vmem:[%s7516_s4 + $0x130] sm:$0xff] }
 0x303   :  { %3203 = vmatmul.msk.f32.vlgmr.msrb.gmra.mxu1 %vm269_vm0, %v6046_v6  ;;  %3186 = vmatmul.msk.f32.gmra.mxu2 %vm269_vm0, %v7950_v15 }
 0x304   :  { %2425 = vmatpush.msra.mxu0 %v3416_v50  ;;  %2381 = vmatpush.msrb.mxu3 %v3417_v1  ;;  %v3467_v50 = vld [vmem:[%s7516_s4 + $0x118] sm:$0xff]  ;;  %v3468_v1 = vld [vmem:[%s7516_s4 + $0x100] sm:$0xff] }
 0x305   :  { %2586 = vmatpush.msrb.mxu1 %v3418_v0  ;;  %2484 = vmatpush.msra.mxu2 %v3423_v33  ;;  %v3473_v33 = vld [vmem:[%s7516_s4 + $0x88] sm:$0xff] }
 0x306   :  { %2426 = vmatpush.msra.mxu0 %v3419_v51  ;;  %2382 = vmatpush.msrb.mxu3 %v3421_v20  ;;  %v3471_v20 = vld [vmem:[%s7516_s4 + $0xb8] sm:$0xff] }
 0x307   :  { %3174 = vmatmul.msk.f32.gmra.mxu0 %vm269_vm0, %v7950_v15  ;;  %2587 = vmatpush.msrb.mxu1 %v3422_v25  ;;  %v3425_v15 = vld [vmem:[%s7516_s4 + $0x2c8] sm:$0xff]  ;;  %v3472_v25 = vld [vmem:[%s7516_s4 + $0xa0] sm:$0xff] }
 0x308   :  { %2383 = vmatpush.msrb.mxu3 %v3424_v38  ;;  %2485 = vmatpush.msra.mxu2 %v3429_v8 }
 0x309   :  { %3169 = vmatmul.msk.f32.gmra.mxu3 %vm269_vm0, %v7960_v52  ;;  %2588 = vmatpush.msrb.mxu1 %v3425_v15  ;;  %v3474_v15 = vld [vmem:[%s7516_s4 + $0x70] sm:$0xff] }
 0x30a   :  { %2384 = vmatpush.msrb.mxu3 %v3426_v32  ;;  %2486 = vmatpush.msra.mxu2 %v3432_v5  ;;  %v6675_v51 = vpop.f32.mrf.mxu1  ;;  %v3475_v32 = vld [vmem:[%s7516_s4 + $0x58] sm:$0xff] }
 0x30b   :  { %3204 = vmatmul.msk.f32.gmra.mxu1 %vm269_vm0, %v6107_v19  ;;  %3187 = vmatmul.msk.f32.gmra.mxu2 %vm269_vm0, %v7960_v52 }
 0x30c   :  { %2589 = vmatpush.msrb.mxu1 %v3427_v48  ;;  %2385 = vmatpush.msrb.mxu3 %v3428_v12  ;;  %v3476_v12 = vld [vmem:[%s7516_s4 + $0x40] sm:$0xff] }
 0x30e   :  { %2590 = vmatpush.msrb.mxu1 %v3430_v46  ;;  %2386 = vmatpush.msrb.mxu3 %v3431_v45  ;;  %v3478_v45 = vld [vmem:[%s7516_s4 + $0x10] sm:$0xff] }
 0x30f   :  { %3175 = vmatmul.msk.f32.gmra.mxu0 %vm269_vm0, %v7960_v52  ;;  %v3435_v52 = vld [vmem:[%s7516_s4 + $0x260] sm:$0xff] }
 0x310   :  { %2591 = vmatpush.msrb.mxu1 %v3433_v56  ;;  %2387 = vmatpush.msrb.mxu3 %v3434_v9 }
 0x311   :  { %3170 = vmatmul.msk.f32.gmra.mxu3 %vm269_vm0, %v7968_v41  ;;  %2487 = vmatpush.msra.mxu2 %v3435_v52 }
 0x312   :  { %2388 = vmatpush.msrb.mxu3 %v3436_v30  ;;  %2592 = vmatpush.msrb.mxu1 %v3437_v4 }
 0x313   :  { %3205 = vmatmul.msk.f32.gmra.mxu1 %vm269_vm0, %v7957_v29  ;;  %3188 = vmatmul.msk.f32.gmra.mxu2 %vm269_vm0, %v7968_v41 }
 0x314   :  { %2389 = vmatpush.msrb.mxu3 %v3438_v31  ;;  %2488 = vmatpush.msra.mxu2 %v3439_v21 }
 0x315   :  { %2593 = vmatpush.msrb.mxu1 %v3440_v57 }
 0x316   :  { %2390 = vmatpush.msrb.mxu3 %v3441_v60  ;;  %2489 = vmatpush.msra.mxu2 %v3442_v37 }
 0x317   :  { %3176 = vmatmul.msk.f32.gmra.mxu0 %vm269_vm0, %v7968_v41  ;;  %2594 = vmatpush.msrb.mxu1 %v3443_v61  ;;  %v3445_v41 = vld [vmem:[%s7516_s4 + $0x218] sm:$0xff] }
 0x318   :  { %2391 = vmatpush.msrb.mxu3 %v3444_v13  ;;  %2490 = vmatpush.msra.mxu2 %v3445_v41 }
 0x319   :  { %3171 = vmatmul.msk.f32.gmra.mxu3 %vm269_vm0, %v7969_v3  ;;  %2595 = vmatpush.msrb.mxu1 %v3446_v27 }
 0x31a   :  { %2491 = vmatpush.msra.mxu2 %v3447_v53 }
 0x31b   :  { %3206 = vmatmul.msk.f32.gmra.mxu1 %vm269_vm0, %v7966_v18  ;;  %3189 = vmatmul.msk.f32.gmra.mxu2 %vm269_vm0, %v7969_v3 }
 0x31c   :  { %v6568_v54 = vpop.f32.mrf.mxu2  ;;  %2596 = vmatpush.msrb.mxu1 %v3448_v24  ;;  %2492 = vmatpush.msra.mxu2 %v3449_v36 }
 0x31e   :  { %2597 = vmatpush.msrb.mxu1 %v3450_v35  ;;  %2493 = vmatpush.msra.mxu2 %v3451_v10 }
 0x31f   :  { %3177 = vmatmul.msk.f32.gmra.mxu0 %vm269_vm0, %v7969_v3  ;;  %v3452_v3 = vld [vmem:[%s7516_s4 + $0x1d8] sm:$0xff] }
 0x320   :  { %2598 = vmatpush.msrb.mxu1 %v3452_v3  ;;  %2494 = vmatpush.msra.mxu2 %v3453_v43 }
 0x321   :  { %3172 = vmatmul.msk.f32.gmra.mxu3 %vm269_vm0, %v7970_v17 }
 0x322   :  { %2599 = vmatpush.msrb.mxu1 %v3454_v42  ;;  %2495 = vmatpush.msra.mxu2 %v3455_v2 }
 0x323   :  { %3207 = vmatmul.msk.f32.gmra.mxu1 %vm269_vm0, %v6181_v14  ;;  %3190 = vmatmul.msk.f32.gmra.mxu2 %vm269_vm0, %v7970_v17 }
 0x324   :  { %v6604_v23 = vpop.f32.mrf.mxu2  ;;  %2600 = vmatpush.msrb.mxu1 %v3456_v28  ;;  %2496 = vmatpush.msra.mxu2 %v3457_v63  ;;  %v3479_v63 = vld [vmem:[%s7515_s3 + $0x2e8] sm:$0xff] }
 0x326   :  { %2601 = vmatpush.msrb.mxu1 %v3458_v34 }
 0x327   :  { %3178 = vmatmul.msk.f32.gmra.mxu0 %vm269_vm0, %v7970_v17  ;;  %v3459_v17 = vld [vmem:[%s7516_s4 + $0x350] sm:$0xff] }
 0x329   :  { %3191 = vmatmul.msk.f32.vlgmr.msra.gmra.mxu3 %vm269_vm0, %v6046_v6 }
 0x32a   :  { %2528 = vmatpush.msra.mxu3 %v3459_v17  ;;  %v3480_v17 = vld [vmem:[%s7515_s3 + $0x2d0] sm:$0xff] }
 0x32b   :  { %3208 = vmatmul.msk.f32.gmra.mxu1 %vm269_vm0, %v6214_v22 }
 0x32c   :  { %v6632_v11 = vpop.f32.mrf.mxu2  ;;  %2529 = vmatpush.msra.mxu3 %v3460_v40 }
 0x32e   :  { %2530 = vmatpush.msra.mxu3 %v3461_v59 }
 0x32f   :  { %3197 = vmatmul.msk.f32.vlgmr.msrb.gmra.mxu0 %vm269_vm0, %v6046_v6  ;;  %v3464_v6 = vld [vmem:[%s7516_s4 + $0x160] sm:$0xff] }
 0x330   :  { %2551 = vmatpush.msrb.mxu0 %v3462_v26  ;;  %2531 = vmatpush.msra.mxu3 %v3463_v7  ;;  %v3481_v26 = vld [vmem:[%s7515_s3 + $0x2b8] sm:$0xff] }
 0x331   :  { %3192 = vmatmul.msk.f32.gmra.mxu3 %vm269_vm0, %v6107_v19 }
 0x332   :  { %2552 = vmatpush.msrb.mxu0 %v3464_v6  ;;  %v3482_v6 = vld [vmem:[%s7515_s3 + $0x2a0] sm:$0xff] }
 0x334   :  { %v6655_v16 = vpop.f32.mrf.mxu2  ;;  %2553 = vmatpush.msrb.mxu0 %v3465_v47 }
 0x336   :  { %2554 = vmatpush.msrb.mxu0 %v3466_v62  ;;  %v3483_v62 = vld [vmem:[%s7515_s3 + $0x288] sm:$0xff] }
 0x337   :  { %3198 = vmatmul.msk.f32.gmra.mxu0 %vm269_vm0, %v6107_v19  ;;  %v3469_v19 = vld [vmem:[%s7516_s4 + $0xe8] sm:$0xff] }
 0x338   :  { %2555 = vmatpush.msrb.mxu0 %v3467_v50 }
 0x339   :  { %3193 = vmatmul.msk.f32.gmra.mxu3 %vm269_vm0, %v7957_v29 }
 0x33a   :  { %2556 = vmatpush.msrb.mxu0 %v3468_v1  ;;  %v3484_v1 = vld [vmem:[%s7515_s3 + $0x270] sm:$0xff] }
 0x33c   :  { %v6673_v0 = vpop.f32.mrf.mxu2  ;;  %2557 = vmatpush.msrb.mxu0 %v3469_v19 }
 0x33e   :  { %2558 = vmatpush.msrb.mxu0 %v3470_v49 }
 0x33f   :  { %3199 = vmatmul.msk.f32.gmra.mxu0 %vm269_vm0, %v7957_v29  ;;  %v6698_v29 = vpop.f32.mrf.mxu1 }
 0x340   :  { %2559 = vmatpush.msrb.mxu0 %v3471_v20  ;;  %v3485_v20 = vld [vmem:[%s7515_s3 + $0x258] sm:$0xff] }
 0x341   :  { %3194 = vmatmul.msk.f32.gmra.mxu3 %vm269_vm0, %v7966_v18 }
 0x342   :  { %2560 = vmatpush.msrb.mxu0 %v3472_v25 }
 0x344   :  { %2561 = vmatpush.msrb.mxu0 %v3473_v33  ;;  %v3486_v33 = vld [vmem:[%s7515_s3 + $0x240] sm:$0xff] }
 0x345   :  { %v6696_v38 = vpop.f32.mrf.mxu2 }
 0x346   :  { %2562 = vmatpush.msrb.mxu0 %v3474_v15 }
 0x347   :  { %3200 = vmatmul.msk.f32.gmra.mxu0 %vm269_vm0, %v7966_v18  ;;  %v3477_v18 = vld [vmem:[%s7516_s4 + $0x28] sm:$0xff] }
 0x348   :  { %2563 = vmatpush.msrb.mxu0 %v3475_v32  ;;  %v3487_v32 = vld [vmem:[%s7515_s3 + $0x228] sm:$0xff] }
 0x349   :  { %3195 = vmatmul.msk.f32.gmra.mxu3 %vm269_vm0, %v6181_v14 }
 0x34a   :  { %v6710_v48 = vpop.f32.mrf.mxu0  ;;  %2564 = vmatpush.msrb.mxu0 %v3476_v12 }
 0x34b   :  { %v6715_v8 = vpop.f32.mrf.mxu3 }
 0x34c   :  { %2565 = vmatpush.msrb.mxu0 %v3477_v18  ;;  %v3488_v18 = vld [vmem:[%s7515_s3 + $0x210] sm:$0xff] }
 0x34e   :  { %v6720_v46 = vpop.f32.mrf.mxu2  ;;  %2566 = vmatpush.msrb.mxu0 %v3478_v45 }
 0x34f   :  { %3201 = vmatmul.msk.f32.gmra.mxu0 %vm269_vm0, %v6181_v14 }
 0x350   :  { %v6727_v5 = vpop.f32.mrf.mxu1 }
 0x351   :  { %3196 = vmatmul.msk.f32.gmra.mxu3 %vm269_vm0, %v6214_v22 }
 0x354   :  { %v6731_v56 = vpop.f32.mrf.mxu0  ;;  %v6733_v9 = vpop.f32.mrf.mxu3 }
 0x356   :  { %v6735_v52 = vpop.f32.mrf.mxu2 }
 0x357   :  { %3202 = vmatmul.msk.f32.gmra.mxu0 %vm269_vm0, %v6214_v22 }
 0x358   :  { %v6739_v30 = vpop.f32.mrf.mxu1 }
 0x35c   :  { %v6741_v4 = vpop.f32.mrf.mxu0  ;;  %v6743_v31 = vpop.f32.mrf.mxu3 }
 0x35e   :  { %v6745_v14 = vpop.f32.mrf.mxu2 }
 0x360   :  { %v6747_v21 = vpop.f32.mrf.mxu1 }
 0x364   :  { %v6749_v57 = vpop.f32.mrf.mxu0  ;;  %v6751_v60 = vpop.f32.mrf.mxu3 }
 0x366   :  { %v6753_v37 = vpop.f32.mrf.mxu2 }
 0x368   :  { %v6755_v61 = vpop.f32.mrf.mxu1 }
 0x36c   :  { %v6757_v13 = vpop.f32.mrf.mxu0  ;;  %v6759_v22 = vpop.f32.mrf.mxu3 }
 0x36e   :  { %v6761_v41 = vpop.f32.mrf.mxu2 }
 0x370   :  { %v6763_v27 = vpop.f32.mrf.mxu1 }
 0x374   :  { %v6765_v53 = vpop.f32.mrf.mxu0  ;;  %v6767_v24 = vpop.f32.mrf.mxu3 }
 0x376   :  { %v6769_v36 = vpop.f32.mrf.mxu2 }
 0x378   :  { %v6771_v35 = vpop.f32.mrf.mxu1 }
 0x37c   :  { %v6773_v10 = vpop.f32.mrf.mxu0  ;;  %v6775_v3 = vpop.f32.mrf.mxu3 }
 0x37e   :  { %v2182_v43 = vpop.f32.mrf.mxu2 }
 0x380   :  { %v2287_v42 = vpop.f32.mrf.mxu1 }
 0x381   :  { %v6777_v2 = vsub.f32 %v2182_v43, %v2287_v42  ;;  %v3489_v42 = vld [vmem:[%s7515_s3 + $0x1f8] sm:$0xff] }
 0x383   :  { %3209 = vmatmul.msk.f32.vlgmr.msra.gmra.mxu0 %vm516_vm1, %v6777_v2 }
 0x384   :  { %v6781_v28 = vpop.f32.mrf.mxu0  ;;  %2709 = vmatpush.msra.mxu0 %v3479_v63  ;;  %v6786_v34 = vpop.f32.mrf.mxu3 }
 0x386   :  { %2710 = vmatpush.msra.mxu0 %v3480_v17  ;;  %v2185_v40 = vpop.f32.mrf.mxu2  ;;  %v3490_v17 = vld [vmem:[%s7515_s3 + $0x1e0] sm:$0xff] }
 0x388   :  { %v2290_v59 = vpop.f32.mrf.mxu1  ;;  %2711 = vmatpush.msra.mxu0 %v3481_v26 }
 0x389   :  { %v6794_v7 = vsub.f32 %v2185_v40, %v2290_v59  ;;  %v3491_v59 = vld [vmem:[%s7515_s3 + $0x1c8] sm:$0xff] }
 0x38a   :  { %2712 = vmatpush.msra.mxu0 %v3482_v6  ;;  %v3492_v6 = vld [vmem:[%s7515_s3 + $0x1b0] sm:$0xff] }
 0x38b   :  { %3210 = vmatmul.msk.f32.gmra.mxu0 %vm516_vm1, %v6794_v7 }
 0x38c   :  { %v6801_v47 = vpop.f32.mrf.mxu0  ;;  %2713 = vmatpush.msra.mxu0 %v3483_v62  ;;  %v6806_v50 = vpop.f32.mrf.mxu3 }
 0x38e   :  { %2714 = vmatpush.msra.mxu0 %v3484_v1  ;;  %v2188_v19 = vpop.f32.mrf.mxu2 }
 0x390   :  { %v2293_v49 = vpop.f32.mrf.mxu1  ;;  %2715 = vmatpush.msra.mxu0 %v3485_v20  ;;  %v3494_v20 = vld [vmem:[%s7515_s3 + $0x180] sm:$0xff] }
 0x391   :  { %v6814_v25 = vsub.f32 %v2188_v19, %v2293_v49  ;;  %v3493_v19 = vld [vmem:[%s7515_s3 + $0x198] sm:$0xff] }
 0x392   :  { %2716 = vmatpush.msra.mxu0 %v3486_v33 }
 0x393   :  { %3211 = vmatmul.msk.f32.gmra.mxu0 %vm516_vm1, %v6814_v25 }
 0x394   :  { %v6821_v15 = vpop.f32.mrf.mxu0  ;;  %2717 = vmatpush.msra.mxu0 %v3487_v32  ;;  %v6826_v12 = vpop.f32.mrf.mxu3 }
 0x396   :  { %2718 = vmatpush.msra.mxu0 %v3488_v18  ;;  %v2191_v45 = vpop.f32.mrf.mxu2 }
 0x398   :  { %v2296_v43 = vpop.f32.mrf.mxu1  ;;  %2719 = vmatpush.msra.mxu0 %v3489_v42 }
 0x399   :  { %v6834_v63 = vsub.f32 %v2191_v45, %v2296_v43 }
 0x39a   :  { %2720 = vmatpush.msra.mxu0 %v3490_v17 }
 0x39b   :  { %3212 = vmatmul.msk.f32.gmra.mxu0 %vm516_vm1, %v6834_v63 }
 0x39c   :  { %v6841_v40 = vpop.f32.mrf.mxu0  ;;  %2721 = vmatpush.msra.mxu0 %v3491_v59  ;;  %v6846_v26 = vpop.f32.mrf.mxu3 }
 0x39e   :  { %2722 = vmatpush.msra.mxu0 %v3492_v6  ;;  %v2194_v62 = vpop.f32.mrf.mxu2 }
 0x3a0   :  { %v2299_v1 = vpop.f32.mrf.mxu1  ;;  %2723 = vmatpush.msra.mxu0 %v3493_v19 }
 0x3a1   :  { %v6854_v49 = vsub.f32 %v2194_v62, %v2299_v1  ;;  %v3495_v62 = vld [vmem:[%s7515_s3 + $0x168] sm:$0xff]  ;;  %v3496_v1 = vld [vmem:[%s7516_s4 + $0x358] sm:$0xff] }
 0x3a2   :  { %2724 = vmatpush.msra.mxu0 %v3494_v20  ;;  %v3499_v20 = vld [vmem:[%s7516_s4 + $0x340] sm:$0xff] }
 0x3a3   :  { %3213 = vmatmul.msk.f32.gmra.mxu0 %vm516_vm1, %v6854_v49 }
 0x3a4   :  { %v6861_v33 = vpop.f32.mrf.mxu0  ;;  %v6863_v32 = vpop.f32.mrf.mxu3 }
 0x3a6   :  { %v2197_v18 = vpop.f32.mrf.mxu2 }
 0x3a8   :  { %v2302_v45 = vpop.f32.mrf.mxu1 }
 0x3a9   :  { %v6865_v43 = vsub.f32 %v2197_v18, %v2302_v45  ;;  %v3500_v18 = vld [vmem:[%s7515_s3 + $0x330] sm:$0xff] }
 0x3ab   :  { %3214 = vmatmul.msk.f32.gmra.mxu0 %vm516_vm1, %v6865_v43 }
 0x3ac   :  { %v2252_v42 = vpop.f32.mrf.mxu0  ;;  %v2217_v59 = vpop.f32.mrf.mxu3 }
 0x3ad   :  { %v6870_v17 = vsub.f32 %v6727_v5, %v2252_v42  ;;  %v2305_v6 = vsub.f32 %v6773_v10, %v2217_v59  ;;  %v3497_v5 = vld [vmem:[%s7515_s3 + $0x348] sm:$0xff]  ;;  %v3498_v10 = vld [vmem:[%s7515_s3 + $0x150] sm:$0xff]  ;;  %v3501_v59 = vld [vmem:[%s7515_s3 + $0x138] sm:$0xff] }
 0x3af   :  { %2392 = vmatmul.f32.vlgmr.msrb.gmra.mxu3 %v6870_v17  ;;  %2357 = vmatmul.f32.vlgmr.msrb.gmra.mxu2 %v2305_v6 }
 0x3b0   :  { %2462 = vmatmul.f32.vlgmr.msra.gmra.mxu1 %v2305_v6  ;;  %2674 = vmatpush.msrb.mxu3 %v3495_v62 }
 0x3b1   :  { %2633 = vmatpush.msrb.mxu2 %v3496_v1  ;;  %2756 = vmatpush.msra.mxu1 %v3497_v5  ;;  %v3503_v1 = vld [vmem:[%s7516_s4 + $0x328] sm:$0xff]  ;;  %v3505_v5 = vld [vmem:[%s7515_s3 + $0x338] sm:$0xff] }
 0x3b2   :  { %2675 = vmatpush.msrb.mxu3 %v3498_v10  ;;  %v3507_v10 = vld [vmem:[%s7516_s4 + $0x310] sm:$0xff] }
 0x3b3   :  { %2567 = vmatmul.f32.vlgmr.msrb.gmra.mxu0 %v2305_v6  ;;  %2634 = vmatpush.msrb.mxu2 %v3499_v20  ;;  %v3502_v6 = vld [vmem:[%s7515_s3 + $0x350] sm:$0xff]  ;;  %v3509_v20 = vld [vmem:[%s7515_s3 + $0x320] sm:$0xff] }
 0x3b4   :  { %v2255_v19 = vpop.f32.mrf.mxu0  ;;  %2757 = vmatpush.msra.mxu1 %v3500_v18  ;;  %v2220_v42 = vpop.f32.mrf.mxu3  ;;  %2676 = vmatpush.msrb.mxu3 %v3501_v59  ;;  %v3510_v18 = vld [vmem:[%s7515_s3 + $0x108] sm:$0xff] }
 0x3b5   :  { %v6893_v45 = vsub.f32 %v6739_v30, %v2255_v19  ;;  %2861 = vmatpush.msrb.mxu0 %v3502_v6  ;;  %v2308_v62 = vsub.f32 %v6781_v28, %v2220_v42  ;;  %2635 = vmatpush.msrb.mxu2 %v3503_v1  ;;  %v3504_v30 = vld [vmem:[%s7515_s3 + $0x318] sm:$0xff]  ;;  %v3506_v28 = vld [vmem:[%s7515_s3 + $0x120] sm:$0xff]  ;;  %v3511_v59 = vld [vmem:[%s7515_s3 + $0x308] sm:$0xff] }
 0x3b6   :  { %2758 = vmatpush.msra.mxu1 %v3504_v30  ;;  %2677 = vmatpush.msrb.mxu3 %v3506_v28  ;;  %v3508_v19 = vld [vmem:[%s7515_s3 + $0x300] sm:$0xff]  ;;  %v3512_v30 = vld [vmem:[%s7515_s3 + $0xf0] sm:$0xff] }
 0x3b7   :  { %2395 = vmatmul.f32.gmra.mxu3 %v6893_v45  ;;  %2862 = vmatpush.msrb.mxu0 %v3505_v5  ;;  %v3513_v5 = vld [vmem:[%s7515_s3 + $0xd8] sm:$0xff] }
 0x3b8   :  { %2360 = vmatmul.f32.gmra.mxu2 %v2308_v62  ;;  %2465 = vmatmul.f32.gmra.mxu1 %v2308_v62 }
 0x3b9   :  { %2636 = vmatpush.msrb.mxu2 %v3507_v10  ;;  %2759 = vmatpush.msra.mxu1 %v3508_v19  ;;  %v3515_v19 = vld [vmem:[%s7515_s3 + $0xa8] sm:$0xff] }
 0x3ba   :  { %2863 = vmatpush.msrb.mxu0 %v3509_v20  ;;  %2678 = vmatpush.msrb.mxu3 %v3510_v18  ;;  %v3516_v18 = vld [vmem:[%s7515_s3 + $0x90] sm:$0xff] }
 0x3bb   :  { %2570 = vmatmul.f32.gmra.mxu0 %v2308_v62 }
 0x3bc   :  { %v2258_v42 = vpop.f32.mrf.mxu0  ;;  %2864 = vmatpush.msrb.mxu0 %v3511_v59  ;;  %v2223_v1 = vpop.f32.mrf.mxu3  ;;  %2679 = vmatpush.msrb.mxu3 %v3512_v30 }
 0x3bd   :  { %v6931_v6 = vsub.f32 %v6747_v21, %v2258_v42  ;;  %v2311_v62 = vsub.f32 %v6801_v47, %v2223_v1  ;;  %v3514_v21 = vld [vmem:[%s7515_s3 + $0xc0] sm:$0xff] }
 0x3be   :  { %2680 = vmatpush.msrb.mxu3 %v3513_v5  ;;  %v3518_v1 = vld [vmem:[%s7515_s3 + $0x60] sm:$0xff] }
 0x3bf   :  { %2398 = vmatmul.f32.gmra.mxu3 %v6931_v6 }
 0x3c0   :  { %2363 = vmatmul.f32.gmra.mxu2 %v2311_v62  ;;  %2468 = vmatmul.f32.gmra.mxu1 %v2311_v62 }
 0x3c1   :  { %2681 = vmatpush.msrb.mxu3 %v3514_v21 }
 0x3c3   :  { %2573 = vmatmul.f32.gmra.mxu0 %v2311_v62  ;;  %2682 = vmatpush.msrb.mxu3 %v3515_v19  ;;  %v3519_v62 = vld [vmem:[%s7515_s3 + $0x48] sm:$0xff]  ;;  %v3522_v19 = vld [vmem:[%s7515_s3] sm:$0xff] }
 0x3c4   :  { %v2261_v28 = vpop.f32.mrf.mxu0  ;;  %v2226_v47 = vpop.f32.mrf.mxu3 }
 0x3c5   :  { %v6945_v10 = vsub.f32 %v6755_v61, %v2261_v28  ;;  %v2314_v20 = vsub.f32 %v6821_v15, %v2226_v47  ;;  %2683 = vmatpush.msrb.mxu3 %v3516_v18  ;;  %v3517_v61 = vld [vmem:[%s7515_s3 + $0x78] sm:$0xff] }
 0x3c6   :  { %v3521_v28 = vld [vmem:[%s7515_s3 + $0x18] sm:$0xff] }
 0x3c7   :  { %2401 = vmatmul.f32.gmra.mxu3 %v6945_v10  ;;  %v3525_v18 = vld [vmem:[%s7515_s3 + $0x178] sm:$0xff] }
 0x3c8   :  { %2366 = vmatmul.f32.gmra.mxu2 %v2314_v20  ;;  %2471 = vmatmul.f32.gmra.mxu1 %v2314_v20 }
 0x3c9   :  { %2684 = vmatpush.msrb.mxu3 %v3517_v61  ;;  %v3529_v61 = vld [vmem:[%s7515_s3 + $0x2c0] sm:$0xff] }
 0x3cb   :  { %2576 = vmatmul.f32.gmra.mxu0 %v2314_v20  ;;  %2685 = vmatpush.msrb.mxu3 %v3518_v1  ;;  %v3524_v20 = vld [vmem:[%s7515_s3 + $0x170] sm:$0xff]  ;;  %v7025_v1 = vadd.f32 %v6735_v52, %v6733_v9 }
 0x3cc   :  { %v2264_v42 = vpop.f32.mrf.mxu0  ;;  %v2229_v15 = vpop.f32.mrf.mxu3  ;;  %v3535_v9 = vld [vmem:[%s7515_s3 + $0x290] sm:$0xff] }
 0x3cd   :  { %v6959_v59 = vsub.f32 %v6763_v27, %v2264_v42  ;;  %v2317_v30 = vsub.f32 %v6841_v40, %v2229_v15  ;;  %2686 = vmatpush.msrb.mxu3 %v3519_v62  ;;  %v3520_v27 = vld [vmem:[%s7515_s3 + $0x30] sm:$0xff]  ;;  %v3530_v42 = vld [vmem:[%s7515_s3 + $0x140] sm:$0xff]  ;;  %v3531_v15 = vld [vmem:[%s7515_s3 + $0x148] sm:$0xff] }
 0x3ce   :  { %v3533_v62 = vld [vmem:[%s7515_s3 + $0x128] sm:$0xff]  ;;  %v3536_v52 = vld [vmem:[%s7515_s3 + $0x110] sm:$0xff] }
 0x3cf   :  { %2404 = vmatmul.f32.gmra.mxu3 %v6959_v59 }
 0x3d0   :  { %2369 = vmatmul.f32.gmra.mxu2 %v2317_v30  ;;  %2474 = vmatmul.f32.gmra.mxu1 %v2317_v30 }
 0x3d1   :  { %2687 = vmatpush.msrb.mxu3 %v3520_v27  ;;  %v3534_v27 = vld [vmem:[%s7515_s3 + $0x130] sm:$0xff] }
 0x3d3   :  { %2579 = vmatmul.f32.gmra.mxu0 %v2317_v30  ;;  %2688 = vmatpush.msrb.mxu3 %v3521_v28  ;;  %v3532_v30 = vld [vmem:[%s7515_s3 + $0x2a8] sm:$0xff]  ;;  %v3540_v28 = vld [vmem:[%s7515_s3 + $0x100] sm:$0xff] }
 0x3d4   :  { %v2267_v5 = vpop.f32.mrf.mxu0  ;;  %v2232_v40 = vpop.f32.mrf.mxu3 }
 0x3d5   :  { %v6973_v21 = vsub.f32 %v6771_v35, %v2267_v5  ;;  %v2320_v47 = vsub.f32 %v6861_v33, %v2232_v40  ;;  %2689 = vmatpush.msrb.mxu3 %v3522_v19  ;;  %v6989_v35 = vadd.f32 %v6720_v46, %v6715_v8  ;;  %v3523_v33 = vld [vmem:[%s7515_s3 + $0x2f0] sm:$0xff]  ;;  %v3526_v8 = vld [vmem:[%s7515_s3 + $0x2d8] sm:$0xff]  ;;  %v3541_v19 = vld [vmem:[%s7515_s3 + $0x260] sm:$0xff] }
 0x3d6   :  { %v3527_v46 = vld [vmem:[%s7515_s3 + $0x158] sm:$0xff] }
 0x3d7   :  { %2407 = vmatmul.f32.gmra.mxu3 %v6973_v21  ;;  %v3538_v5 = vld [vmem:[%s7515_s3 + $0x278] sm:$0xff] }
 0x3d8   :  { %2372 = vmatmul.f32.gmra.mxu2 %v2320_v47  ;;  %2477 = vmatmul.f32.gmra.mxu1 %v2320_v47  ;;  %v3539_v40 = vld [vmem:[%s7515_s3 + $0xf8] sm:$0xff] }
 0x3db   :  { %2582 = vmatmul.f32.gmra.mxu0 %v2320_v47  ;;  %v7061_v47 = vadd.f32 %v6745_v14, %v6743_v31  ;;  %v3544_v31 = vld [vmem:[%s7515_s3 + $0x248] sm:$0xff] }
 0x3dc   :  { %v3545_v14 = vld [vmem:[%s7515_s3 + $0xc8] sm:$0xff] }
 0x3df   :  { %3215 = vmatmul.msk.f32.vlgmr.msra.gmra.mxu3 %vm516_vm1, %v6777_v2 }
 0x3e0   :  { %2497 = vmatmul.f32.vlgmr.msra.gmra.mxu2 %v6870_v17  ;;  %2602 = vmatmul.f32.vlgmr.msrb.gmra.mxu1 %v6870_v17  ;;  %v3528_v17 = vld [vmem:[%s7515_s3 + $0x160] sm:$0xff] }
 0x3e1   :  { %2814 = vmatpush.msra.mxu3 %v3523_v33  ;;  %2779 = vmatpush.msra.mxu2 %v3524_v20  ;;  %v3542_v33 = vld [vmem:[%s7515_s3 + $0xe0] sm:$0xff]  ;;  %v3543_v20 = vld [vmem:[%s7515_s3 + $0xe8] sm:$0xff] }
 0x3e2   :  { %2884 = vmatpush.msrb.mxu1 %v3525_v18  ;;  %v3547_v18 = vld [vmem:[%s7515_s3 + $0x230] sm:$0xff] }
 0x3e3   :  { %2725 = vmatmul.f32.vlgmr.msra.gmra.mxu0 %v6989_v35  ;;  %2815 = vmatpush.msra.mxu3 %v3526_v8  ;;  %v3548_v8 = vld [vmem:[%s7515_s3 + $0xb0] sm:$0xff] }
 0x3e4   :  { %2780 = vmatpush.msra.mxu2 %v3527_v46  ;;  %2885 = vmatpush.msrb.mxu1 %v3528_v17  ;;  %v3549_v46 = vld [vmem:[%s7515_s3 + $0xb8] sm:$0xff]  ;;  %v7097_v17 = vadd.f32 %v6753_v37, %v6751_v60  ;;  %v3553_v60 = vld [vmem:[%s7515_s3 + $0x200] sm:$0xff] }
 0x3e5   :  { %2816 = vmatpush.msra.mxu3 %v3529_v61  ;;  %v3550_v61 = vld [vmem:[%s7515_s3 + $0x218] sm:$0xff]  ;;  %v3554_v37 = vld [vmem:[%s7515_s3 + $0x80] sm:$0xff] }
 0x3e6   :  { %2781 = vmatpush.msra.mxu2 %v3530_v42  ;;  %2886 = vmatpush.msrb.mxu1 %v3531_v15  ;;  %v3551_v42 = vld [vmem:[%s7515_s3 + $0x98] sm:$0xff]  ;;  %v3552_v15 = vld [vmem:[%s7515_s3 + $0xa0] sm:$0xff] }
 0x3e7   :  { %3216 = vmatmul.msk.f32.gmra.mxu3 %vm516_vm1, %v6794_v7 }
 0x3e8   :  { %2500 = vmatmul.f32.gmra.mxu2 %v6893_v45  ;;  %2605 = vmatmul.f32.gmra.mxu1 %v6893_v45  ;;  %v3537_v45 = vld [vmem:[%s7515_s3 + $0x118] sm:$0xff] }
 0x3e9   :  { %2817 = vmatpush.msra.mxu3 %v3532_v30  ;;  %2782 = vmatpush.msra.mxu2 %v3533_v62  ;;  %v3556_v30 = vld [vmem:[%s7515_s3 + $0x1e8] sm:$0xff] }
 0x3ea   :  { %2887 = vmatpush.msrb.mxu1 %v3534_v27  ;;  %v3557_v62 = vld [vmem:[%s7515_s3 + $0x68] sm:$0xff]  ;;  %v3558_v27 = vld [vmem:[%s7515_s3 + $0x70] sm:$0xff] }
 0x3eb   :  { %2728 = vmatmul.f32.gmra.mxu0 %v7025_v1  ;;  %2818 = vmatpush.msra.mxu3 %v3535_v9  ;;  %v7133_v9 = vadd.f32 %v6761_v41, %v6759_v22  ;;  %v3562_v22 = vld [vmem:[%s7515_s3 + $0x1b8] sm:$0xff] }
 0x3ec   :  { %2783 = vmatpush.msra.mxu2 %v3536_v52  ;;  %2888 = vmatpush.msrb.mxu1 %v3537_v45  ;;  %v3559_v52 = vld [vmem:[%s7515_s3 + $0x1d0] sm:$0xff]  ;;  %v3563_v41 = vld [vmem:[%s7515_s3 + $0x38] sm:$0xff] }
 0x3ed   :  { %2819 = vmatpush.msra.mxu3 %v3538_v5  ;;  %v3560_v45 = vld [vmem:[%s7515_s3 + $0x50] sm:$0xff]  ;;  %v3561_v5 = vld [vmem:[%s7515_s3 + $0x58] sm:$0xff] }
 0x3ee   :  { %2784 = vmatpush.msra.mxu2 %v3539_v40  ;;  %2889 = vmatpush.msrb.mxu1 %v3540_v28  ;;  %v3565_v40 = vld [vmem:[%s7515_s3 + $0x1a0] sm:$0xff] }
 0x3ef   :  { %3217 = vmatmul.msk.f32.gmra.mxu3 %vm516_vm1, %v6814_v25  ;;  %v3566_v28 = vld [vmem:[%s7515_s3 + $0x20] sm:$0xff] }
 0x3f0   :  { %2503 = vmatmul.f32.gmra.mxu2 %v6931_v6  ;;  %2608 = vmatmul.f32.gmra.mxu1 %v6931_v6  ;;  %v3546_v6 = vld [vmem:[%s7515_s3 + $0xd0] sm:$0xff] }
 0x3f1   :  { %2820 = vmatpush.msra.mxu3 %v3541_v19  ;;  %2785 = vmatpush.msra.mxu2 %v3542_v33  ;;  %v3567_v19 = vld [vmem:[%s7515_s3 + $0x28] sm:$0xff]  ;;  %v7169_v33 = vadd.f32 %v6769_v36, %v6767_v24  ;;  %v7185_v24 = vadd.f32 %v6531_v44, %v6568_v54  ;;  %v7189_v36 = vadd.f32 %v6775_v3, %v6710_v48  ;;  %v3572_v44 = vld [vmem:[%s7515_s3 + $0x358] sm:$0xff]  ;;  %v3573_v48 = vld [vmem:[%s7515_s3 + $0x2e0] sm:$0xff] }
 0x3f2   :  { %2890 = vmatpush.msrb.mxu1 %v3543_v20  ;;  %v3574_v3 = vld [vmem:[%s7515_s3 + $0x340] sm:$0xff] }
 0x3f3   :  { %2731 = vmatmul.f32.gmra.mxu0 %v7061_v47  ;;  %2821 = vmatpush.msra.mxu3 %v3544_v31  ;;  %v3568_v31 = vld [vmem:[%s7515_s3 + $0x188] sm:$0xff] }
 0x3f4   :  { %2786 = vmatpush.msra.mxu2 %v3545_v14  ;;  %2891 = vmatpush.msrb.mxu1 %v3546_v6  ;;  %v3569_v14 = vld [vmem:[%s7515_s3 + $0x8] sm:$0xff]  ;;  %v3571_v6 = vld [vmem:[%s7515_s3 + $0x2f8] sm:$0xff] }
 0x3f5   :  { %2822 = vmatpush.msra.mxu3 %v3547_v18  ;;  %v3575_v18 = vld [vmem:[%s7515_s3 + $0x2c8] sm:$0xff] }
 0x3f6   :  { %2787 = vmatpush.msra.mxu2 %v3548_v8  ;;  %2892 = vmatpush.msrb.mxu1 %v3549_v46  ;;  %v7221_v8 = vadd.f32 %v6786_v34, %v6731_v56  ;;  %v3576_v46 = vld [vmem:[%s7515_s3 + $0x328] sm:$0xff]  ;;  %v3579_v56 = vld [vmem:[%s7515_s3 + $0x310] sm:$0xff]  ;;  %v3580_v34 = vld [vmem:[%s7515_s3 + $0x280] sm:$0xff] }
 0x3f7   :  { %3218 = vmatmul.msk.f32.gmra.mxu3 %vm516_vm1, %v6834_v63 }
 0x3f8   :  { %2506 = vmatmul.f32.gmra.mxu2 %v6945_v10  ;;  %2611 = vmatmul.f32.gmra.mxu1 %v6945_v10  ;;  %v3555_v10 = vld [vmem:[%s7515_s3 + $0x88] sm:$0xff] }
 0x3f9   :  { %2823 = vmatpush.msra.mxu3 %v3550_v61  ;;  %2788 = vmatpush.msra.mxu2 %v3551_v42  ;;  %v3581_v42 = vld [vmem:[%s7515_s3 + $0x268] sm:$0xff] }
 0x3fa   :  { %2893 = vmatpush.msrb.mxu1 %v3552_v15  ;;  %v7256_v15 = vadd.f32 %v6806_v50, %v6741_v4  ;;  %v7276_v4 = vadd.f32 %v6650_v55, %v6655_v16  ;;  %v3585_v50 = vld [vmem:[%s7515_s3 + $0x208] sm:$0xff]  ;;  %v3587_v55 = vld [vmem:[%s7515_s3 + $0x1d8] sm:$0xff]  ;;  %v3588_v16 = vld [vmem:[%s7515_s3 + $0x1c0] sm:$0xff] }
 0x3fb   :  { %2734 = vmatmul.f32.gmra.mxu0 %v7097_v17  ;;  %2824 = vmatpush.msra.mxu3 %v3553_v60  ;;  %v3582_v60 = vld [vmem:[%s7515_s3 + $0x250] sm:$0xff] }
 0x3fc   :  { %2789 = vmatpush.msra.mxu2 %v3554_v37  ;;  %2894 = vmatpush.msrb.mxu1 %v3555_v10  ;;  %v3586_v10 = vld [vmem:[%s7515_s3 + $0x1f0] sm:$0xff] }
 0x3fd   :  { %2825 = vmatpush.msra.mxu3 %v3556_v30  ;;  %v7312_v30 = vadd.f32 %v6846_v26, %v6757_v13 }
 0x3fe   :  { %2790 = vmatpush.msra.mxu2 %v3557_v62  ;;  %2895 = vmatpush.msrb.mxu1 %v3558_v27  ;;  %v3590_v62 = vld [vmem:[%s7515_s3 + $0x190] sm:$0xff]  ;;  %v2023_v27 = vadd.f32 %v6698_v29, %v6696_v38 }
 0x3ff   :  { %3219 = vmatmul.msk.f32.gmra.mxu3 %vm516_vm1, %v6854_v49 }
 0x400   :  { %2509 = vmatmul.f32.gmra.mxu2 %v6959_v59  ;;  %2614 = vmatmul.f32.gmra.mxu1 %v6959_v59  ;;  %v3564_v59 = vld [vmem:[%s7515_s3 + $0x40] sm:$0xff]  ;;  %v7171_v20 = vpop.f32.mrf.mxu0 }
 0x401   :  { %2826 = vmatpush.msra.mxu3 %v3559_v52  ;;  %2791 = vmatpush.msra.mxu2 %v3560_v45  ;;  %v7330_v45 = vadd.f32 %v6863_v32, %v6765_v53 }
 0x402   :  { %2896 = vmatpush.msrb.mxu1 %v3561_v5 }
 0x403   :  { %2737 = vmatmul.f32.gmra.mxu0 %v7133_v9  ;;  %2827 = vmatpush.msra.mxu3 %v3562_v22 }
 0x404   :  { %2792 = vmatpush.msra.mxu2 %v3563_v41  ;;  %2897 = vmatpush.msrb.mxu1 %v3564_v59 }
 0x405   :  { %2828 = vmatpush.msra.mxu3 %v3565_v40 }
 0x406   :  { %2793 = vmatpush.msra.mxu2 %v3566_v28  ;;  %2898 = vmatpush.msrb.mxu1 %v3567_v19 }
 0x407   :  { %3220 = vmatmul.msk.f32.gmra.mxu3 %vm516_vm1, %v6865_v43 }
 0x408   :  { %2512 = vmatmul.f32.gmra.mxu2 %v6973_v21  ;;  %2617 = vmatmul.f32.gmra.mxu1 %v6973_v21  ;;  %v3570_v21 = vld [vmem:[%s7515_s3 + $0x10] sm:$0xff]  ;;  %v7202_v54 = vpop.f32.mrf.mxu0 }
 0x409   :  { %2829 = vmatpush.msra.mxu3 %v3568_v31  ;;  %2794 = vmatpush.msra.mxu2 %v3569_v14 }
 0x40a   :  { %2899 = vmatpush.msrb.mxu1 %v3570_v21 }
 0x40b   :  { %2740 = vmatmul.f32.gmra.mxu0 %v7169_v33 }
 0x40f   :  { %2690 = vmatmul.f32.vlgmr.msrb.gmra.mxu3 %v7185_v24 }
 0x410   :  { %3221 = vmatmul.msk.f32.vlgmr.msrb.gmra.mxu2 %vm516_vm1, %v6777_v2  ;;  %3227 = vmatmul.msk.f32.vlgmr.msra.gmra.mxu1 %vm516_vm1, %v7189_v36  ;;  %v7214_v2 = vadd.f32 %v6576_v58, %v6604_v23  ;;  %v3577_v58 = vld [vmem:[%s7515_s3 + $0x2b0] sm:$0xff]  ;;  %v3578_v23 = vld [vmem:[%s7515_s3 + $0x298] sm:$0xff]  ;;  %v7249_v61 = vpop.f32.mrf.mxu0 }
 0x411   :  { %2919 = vmatpush.msrb.mxu2 %v3571_v6  ;;  %2966 = vmatpush.msrb.mxu3 %v3572_v44 }
 0x413   :  { %3233 = vmatmul.msk.f32.vlgmr.msrb.gmra.mxu0 %vm516_vm1, %v7189_v36  ;;  %2920 = vmatpush.msrb.mxu2 %v3573_v48 }
 0x414   :  { %2967 = vmatpush.msrb.mxu3 %v3574_v3 }
 0x415   :  { %2921 = vmatpush.msrb.mxu2 %v3575_v18 }
 0x416   :  { %2968 = vmatpush.msrb.mxu3 %v3576_v46 }
 0x417   :  { %2693 = vmatmul.f32.gmra.mxu3 %v7214_v2  ;;  %2922 = vmatpush.msrb.mxu2 %v3577_v58 }
 0x418   :  { %3222 = vmatmul.msk.f32.gmra.mxu2 %vm516_vm1, %v6794_v7  ;;  %3228 = vmatmul.msk.f32.gmra.mxu1 %vm516_vm1, %v7221_v8  ;;  %v7247_v7 = vadd.f32 %v6620_v39, %v6632_v11  ;;  %v3583_v39 = vld [vmem:[%s7515_s3 + $0x238] sm:$0xff]  ;;  %v3584_v11 = vld [vmem:[%s7515_s3 + $0x220] sm:$0xff]  ;;  %v2437_v37 = vpop.f32.mrf.mxu0 }
 0x419   :  { %2923 = vmatpush.msrb.mxu2 %v3578_v23  ;;  %2969 = vmatpush.msrb.mxu3 %v3579_v56 }
 0x41b   :  { %3234 = vmatmul.msk.f32.gmra.mxu0 %vm516_vm1, %v7221_v8  ;;  %2924 = vmatpush.msrb.mxu2 %v3580_v34 }
 0x41d   :  { %2925 = vmatpush.msrb.mxu2 %v3581_v42 }
 0x41f   :  { %2696 = vmatmul.f32.gmra.mxu3 %v7247_v7  ;;  %2926 = vmatpush.msrb.mxu2 %v3582_v60 }
 0x420   :  { %3223 = vmatmul.msk.f32.gmra.mxu2 %vm516_vm1, %v6814_v25  ;;  %3229 = vmatmul.msk.f32.gmra.mxu1 %vm516_vm1, %v7256_v15  ;;  %v7283_v25 = vadd.f32 %v6826_v12, %v6749_v57  ;;  %v7303_v57 = vadd.f32 %v6675_v51, %v6673_v0  ;;  %v2440_v0 = vpop.f32.mrf.mxu0 }
 0x421   :  { %2927 = vmatpush.msrb.mxu2 %v3583_v39 }
 0x423   :  { %3235 = vmatmul.msk.f32.gmra.mxu0 %vm516_vm1, %v7256_v15  ;;  %2928 = vmatpush.msrb.mxu2 %v3584_v11 }
 0x425   :  { %2929 = vmatpush.msrb.mxu2 %v3585_v50 }
 0x427   :  { %2699 = vmatmul.f32.gmra.mxu3 %v7276_v4  ;;  %2930 = vmatpush.msrb.mxu2 %v3586_v10 }
 0x428   :  { %3224 = vmatmul.msk.f32.gmra.mxu2 %vm516_vm1, %v6834_v63  ;;  %3230 = vmatmul.msk.f32.gmra.mxu1 %vm516_vm1, %v7283_v25  ;;  %v3589_v63 = vld [vmem:[%s7515_s3 + $0x1a8] sm:$0xff]  ;;  %v2443_v22 = vpop.f32.mrf.mxu0 }
 0x429   :  { %2931 = vmatpush.msrb.mxu2 %v3587_v55 }
 0x42b   :  { %3236 = vmatmul.msk.f32.gmra.mxu0 %vm516_vm1, %v7283_v25  ;;  %2932 = vmatpush.msrb.mxu2 %v3588_v16 }
 0x42d   :  { %v7305_v12 = vpop.f32.mrf.mxu1  ;;  %2933 = vmatpush.msrb.mxu2 %v3589_v63 }
 0x42f   :  { %2702 = vmatmul.f32.gmra.mxu3 %v7303_v57  ;;  %2934 = vmatpush.msrb.mxu2 %v3590_v62 }
 0x430   :  { %3225 = vmatmul.msk.f32.gmra.mxu2 %vm516_vm1, %v6854_v49  ;;  %3231 = vmatmul.msk.f32.gmra.mxu1 %vm516_vm1, %v7312_v30  ;;  %v2568_v40 = vpop.f32.mrf.mxu0 }
 0x432   :  { %v2393_v51 = vpop.f32.mrf.mxu3  ;;  %v2358_v13 = vpop.f32.mrf.mxu2 }
 0x433   :  { %3237 = vmatmul.msk.f32.gmra.mxu0 %vm516_vm1, %v7312_v30  ;;  %v2394_v26 = vadd.f32 %v2393_v51, %v2358_v13 }
 0x435   :  { %v7326_v52 = vpop.f32.mrf.mxu1  ;;  %v7333_v49 = vadd.f32 %v7171_v20, %v2394_v26 }
 0x437   :  { %2705 = vmatmul.f32.gmra.mxu3 %v2023_v27 }
 0x438   :  { %3226 = vmatmul.msk.f32.gmra.mxu2 %vm516_vm1, %v6865_v43  ;;  %3232 = vmatmul.msk.f32.gmra.mxu1 %vm516_vm1, %v7330_v45  ;;  %v2571_v6 = vpop.f32.mrf.mxu0 }
 0x43a   :  { %v2396_v5 = vpop.f32.mrf.mxu3 }
 0x43b   :  { %3238 = vmatmul.msk.f32.gmra.mxu0 %vm516_vm1, %v7330_v45  ;;  %v2361_v38 = vpop.f32.mrf.mxu2 }
 0x43c   :  { %v2397_v29 = vadd.f32 %v2396_v5, %v2361_v38 }
 0x43d   :  { %v2469_v41 = vpop.f32.mrf.mxu1 }
 0x43e   :  { %v7342_v53 = vadd.f32 %v7202_v54, %v2397_v29 }
 0x43f   :  { %2830 = vmatmul.f32.vlgmr.msra.gmra.mxu3 %v6989_v35 }
 0x440   :  { %2795 = vmatmul.f32.vlgmr.msra.gmra.mxu2 %v7185_v24  ;;  %2900 = vmatmul.f32.vlgmr.msrb.gmra.mxu1 %v7185_v24  ;;  %v2574_v18 = vpop.f32.mrf.mxu0 }
 0x442   :  { %v2399_v32 = vpop.f32.mrf.mxu3 }
 0x443   :  { %v2364_v43 = vpop.f32.mrf.mxu2 }
 0x444   :  { %v2400_v59 = vadd.f32 %v2399_v32, %v2364_v43 }
 0x445   :  { %v2472_v28 = vpop.f32.mrf.mxu1 }
 0x446   :  { %v7348_v19 = vadd.f32 %v7249_v61, %v2400_v59 }
 0x447   :  { %2833 = vmatmul.f32.gmra.mxu3 %v7025_v1 }
 0x448   :  { %2798 = vmatmul.f32.gmra.mxu2 %v7214_v2  ;;  %2903 = vmatmul.f32.gmra.mxu1 %v7214_v2  ;;  %v2577_v42 = vpop.f32.mrf.mxu0 }
 0x44a   :  { %v2402_v20 = vpop.f32.mrf.mxu3 }
 0x44b   :  { %v2367_v31 = vpop.f32.mrf.mxu2 }
 0x44c   :  { %v2403_v14 = vadd.f32 %v2402_v20, %v2367_v31 }
 0x44d   :  { %v7353_v21 = vpop.f32.mrf.mxu1 }
 0x44e   :  { %v7355_v24 = vadd.f32 %v2437_v37, %v2403_v14 }
 0x44f   :  { %2836 = vmatmul.f32.gmra.mxu3 %v7061_v47 }
 0x450   :  { %2801 = vmatmul.f32.gmra.mxu2 %v7247_v7  ;;  %2906 = vmatmul.f32.gmra.mxu1 %v7247_v7  ;;  %v2580_v16 = vpop.f32.mrf.mxu0 }
 0x452   :  { %v2405_v44 = vpop.f32.mrf.mxu3 }
 0x453   :  { %v2370_v54 = vpop.f32.mrf.mxu2 }
 0x454   :  { %v2406_v48 = vadd.f32 %v2405_v44, %v2370_v54 }
 0x455   :  { %v7360_v3 = vpop.f32.mrf.mxu1 }
 0x456   :  { %v7362_v2 = vadd.f32 %v2440_v0, %v2406_v48 }
 0x457   :  { %2839 = vmatmul.f32.gmra.mxu3 %v7097_v17 }
 0x458   :  { %2804 = vmatmul.f32.gmra.mxu2 %v7276_v4  ;;  %2909 = vmatmul.f32.gmra.mxu1 %v7276_v4 }
 0x45a   :  { %v2408_v46 = vpop.f32.mrf.mxu3 }
 0x45b   :  { %v2373_v58 = vpop.f32.mrf.mxu2 }
 0x45c   :  { %v2409_v23 = vadd.f32 %v2408_v46, %v2373_v58 }
 0x45d   :  { %v2603_v56 = vpop.f32.mrf.mxu1 }
 0x45e   :  { %v2604_v34 = vadd.f32 %v2603_v56, %v2568_v40  ;;  %v7367_v7 = vadd.f32 %v2443_v22, %v2409_v23 }
 0x45f   :  { %2842 = vmatmul.f32.gmra.mxu3 %v7133_v9 }
 0x460   :  { %2807 = vmatmul.f32.gmra.mxu2 %v7303_v57  ;;  %2912 = vmatmul.f32.gmra.mxu1 %v7303_v57 }
 0x462   :  { %v2533_v61 = vpop.f32.mrf.mxu3 }
 0x463   :  { %v2498_v60 = vpop.f32.mrf.mxu2 }
 0x464   :  { %v2499_v39 = vadd.f32 %v2498_v60, %v7305_v12 }
 0x465   :  { %v2606_v11 = vpop.f32.mrf.mxu1 }
 0x466   :  { %v7373_v4 = vadd.f32 %v2606_v11, %v2571_v6  ;;  %v7375_v50 = vadd.f32 %v2533_v61, %v2499_v39 }
 0x467   :  { %2845 = vmatmul.f32.gmra.mxu3 %v7169_v33 }
 0x468   :  { %2810 = vmatmul.f32.gmra.mxu2 %v2023_v27  ;;  %2915 = vmatmul.f32.gmra.mxu1 %v2023_v27 }
 0x46a   :  { %v2536_v37 = vpop.f32.mrf.mxu3 }
 0x46b   :  { %v2501_v10 = vpop.f32.mrf.mxu2 }
 0x46c   :  { %v2502_v55 = vadd.f32 %v2501_v10, %v7326_v52  ;;  %v2583_v52 = vpop.f32.mrf.mxu0 }
 0x46d   :  { %v2609_v57 = vpop.f32.mrf.mxu1 }
 0x46e   :  { %v7379_v63 = vadd.f32 %v2609_v57, %v2574_v18  ;;  %v7381_v62 = vadd.f32 %v2536_v37, %v2502_v55 }
 0x46f   :  { %3239 = vmatmul.msk.f32.vlgmr.msrb.gmra.mxu3 %vm516_vm1, %v7189_v36 }
 0x470   :  { %2935 = vmatmul.f32.vlgmr.msrb.gmra.mxu2 %v6989_v35 }
 0x472   :  { %v2539_v12 = vpop.f32.mrf.mxu3 }
 0x473   :  { %v2504_v0 = vpop.f32.mrf.mxu2 }
 0x474   :  { %v2505_v51 = vadd.f32 %v2504_v0, %v2469_v41  ;;  %v2726_v41 = vpop.f32.mrf.mxu0 }
 0x475   :  { %v2612_v13 = vpop.f32.mrf.mxu1 }
 0x476   :  { %v7386_v26 = vadd.f32 %v2612_v13, %v2577_v42  ;;  %v7388_v27 = vadd.f32 %v2539_v12, %v2505_v51 }
 0x477   :  { %3240 = vmatmul.msk.f32.gmra.mxu3 %vm516_vm1, %v7221_v8 }
 0x478   :  { %2938 = vmatmul.f32.gmra.mxu2 %v7025_v1 }
 0x47a   :  { %v2542_v5 = vpop.f32.mrf.mxu3 }
 0x47b   :  { %v2507_v22 = vpop.f32.mrf.mxu2 }
 0x47c   :  { %v2508_v38 = vadd.f32 %v2507_v22, %v2472_v28  ;;  %v2729_v20 = vpop.f32.mrf.mxu0 }
 0x47d   :  { %v2615_v36 = vpop.f32.mrf.mxu1 }
 0x47e   :  { %v7393_v29 = vadd.f32 %v2615_v36, %v2580_v16  ;;  %v7395_v35 = vadd.f32 %v2542_v5, %v2508_v38 }
 0x47f   :  { %3241 = vmatmul.msk.f32.gmra.mxu3 %vm516_vm1, %v7256_v15 }
 0x480   :  { %2941 = vmatmul.f32.gmra.mxu2 %v7061_v47 }
 0x482   :  { %v2545_v32 = vpop.f32.mrf.mxu3 }
 0x483   :  { %v2510_v43 = vpop.f32.mrf.mxu2 }
 0x484   :  { %v2511_v8 = vadd.f32 %v2510_v43, %v7353_v21 }
 0x485   :  { %v2618_v59 = vpop.f32.mrf.mxu1 }
 0x486   :  { %v7401_v1 = vadd.f32 %v2618_v59, %v2583_v52  ;;  %v7403_v40 = vadd.f32 %v2545_v32, %v2511_v8 }
 0x487   :  { %3242 = vmatmul.msk.f32.gmra.mxu3 %vm516_vm1, %v7283_v25 }
 0x488   :  { %2944 = vmatmul.f32.gmra.mxu2 %v7097_v17  ;;  %v2732_v17 = vpop.f32.mrf.mxu0 }
 0x48a   :  { %v2548_v28 = vpop.f32.mrf.mxu3 }
 0x48b   :  { %v2513_v15 = vpop.f32.mrf.mxu2 }
 0x48c   :  { %v2514_v47 = vadd.f32 %v2513_v15, %v7360_v3 }
 0x48d   :  { %v2761_v31 = vpop.f32.mrf.mxu1 }
 0x48e   :  { %v7409_v14 = vadd.f32 %v2548_v28, %v2514_v47 }
 0x48f   :  { %3243 = vmatmul.msk.f32.gmra.mxu3 %vm516_vm1, %v7312_v30 }
 0x490   :  { %2947 = vmatmul.f32.gmra.mxu2 %v7133_v9  ;;  %v2735_v23 = vpop.f32.mrf.mxu0 }
 0x492   :  { %v2691_v21 = vpop.f32.mrf.mxu3 }
 0x493   :  { %v2692_v6 = vadd.f32 %v2691_v21, %v7333_v49  ;;  %v2638_v44 = vpop.f32.mrf.mxu2 }
 0x494   :  { %v7415_v25 = vadd.f32 %v2638_v44, %v2604_v34 }
 0x495   :  { %v2727_v54 = vadd.f32 %v2726_v41, %v2692_v6  ;;  %v2764_v48 = vpop.f32.mrf.mxu1 }
 0x497   :  { %v2762_v18 = vadd.f32 %v2761_v31, %v2727_v54  ;;  %3244 = vmatmul.msk.f32.gmra.mxu3 %vm516_vm1, %v7330_v45 }
 0x498   :  { %2950 = vmatmul.f32.gmra.mxu2 %v7169_v33  ;;  %v2738_v11 = vpop.f32.mrf.mxu0 }
 0x499   :  { %v2989_v3 = vmul.f32 0.00043402778, %v2762_v18 }
 0x49a   :  { %v2694_v46 = vpop.f32.mrf.mxu3 }
 0x49b   :  { %3007 = vst [vmem:[%s7518_s6] sm:$0xff] %v2989_v3  ;;  %v2695_v9 = vadd.f32 %v2694_v46, %v7342_v53  ;;  %v2641_v30 = vpop.f32.mrf.mxu2 }
 0x49c   :  { %v7425_v49 = vadd.f32 %v2641_v30, %v7373_v4 }
 0x49d   :  { %v2730_v58 = vadd.f32 %v2729_v20, %v2695_v9  ;;  %v2767_v34 = vpop.f32.mrf.mxu1 }
 0x49f   :  { %v2765_v56 = vadd.f32 %v2764_v48, %v2730_v58 }
 0x4a0   :  { %v2741_v51 = vpop.f32.mrf.mxu0 }
 0x4a1   :  { %v2992_v61 = vmul.f32 0.00043402778, %v2765_v56 }
 0x4a2   :  { %v2697_v45 = vpop.f32.mrf.mxu3 }
 0x4a3   :  { %3010 = vst [vmem:[%s7518_s6 + $0x18] sm:$0xff] %v2992_v61  ;;  %v2698_v33 = vadd.f32 %v2697_v45, %v7348_v19  ;;  %v2644_v42 = vpop.f32.mrf.mxu2 }
 0x4a4   :  { %v7432_v60 = vadd.f32 %v2644_v42, %v7379_v63 }
 0x4a5   :  { %v2733_v53 = vadd.f32 %v2732_v17, %v2698_v33  ;;  %v2770_v37 = vpop.f32.mrf.mxu1 }
 0x4a7   :  { %v2768_v39 = vadd.f32 %v2767_v34, %v2733_v53 }
 0x4a9   :  { %v2995_v4 = vmul.f32 0.00043402778, %v2768_v39 }
 0x4aa   :  { %v2700_v10 = vpop.f32.mrf.mxu3 }
 0x4ab   :  { %3013 = vst [vmem:[%s7518_s6 + $0x30] sm:$0xff] %v2995_v4  ;;  %v2701_v55 = vadd.f32 %v2700_v10, %v7355_v24  ;;  %v2647_v16 = vpop.f32.mrf.mxu2 }
 0x4ac   :  { %v7439_v57 = vadd.f32 %v2647_v16, %v7386_v26 }
 0x4ad   :  { %v2736_v19 = vadd.f32 %v2735_v23, %v2701_v55  ;;  %v2773_v5 = vpop.f32.mrf.mxu1 }
 0x4af   :  { %v2771_v12 = vadd.f32 %v2770_v37, %v2736_v19 }
 0x4b1   :  { %v2998_v63 = vmul.f32 0.00043402778, %v2771_v12 }
 0x4b2   :  { %v2703_v0 = vpop.f32.mrf.mxu3 }
 0x4b3   :  { %3016 = vst [vmem:[%s7518_s6 + $0x48] sm:$0xff] %v2998_v63  ;;  %v2704_v13 = vadd.f32 %v2703_v0, %v7362_v2  ;;  %v2650_v52 = vpop.f32.mrf.mxu2  ;;  %v2866_v2 = vpop.f32.mrf.mxu0 }
 0x4b4   :  { %v7446_v22 = vadd.f32 %v2650_v52, %v7393_v29 }
 0x4b5   :  { %v2739_v24 = vadd.f32 %v2738_v11, %v2704_v13  ;;  %v2776_v59 = vpop.f32.mrf.mxu1 }
 0x4b7   :  { %v2774_v38 = vadd.f32 %v2773_v5, %v2739_v24 }
 0x4b9   :  { %v3001_v26 = vmul.f32 0.00043402778, %v2774_v38 }
 0x4ba   :  { %v2706_v36 = vpop.f32.mrf.mxu3 }
 0x4bb   :  { %3019 = vst [vmem:[%s7518_s6 + $0x60] sm:$0xff] %v3001_v26  ;;  %v2707_v41 = vadd.f32 %v2706_v36, %v7367_v7  ;;  %v2653_v32 = vpop.f32.mrf.mxu2  ;;  %v2869_v21 = vpop.f32.mrf.mxu0 }
 0x4bc   :  { %v7453_v43 = vadd.f32 %v2653_v32, %v7401_v1 }
 0x4bd   :  { %v2742_v8 = vadd.f32 %v2741_v51, %v2707_v41  ;;  %v2901_v4 = vpop.f32.mrf.mxu1 }
 0x4be   :  { %v2902_v13 = vadd.f32 %v2901_v4, %v7415_v25 }
 0x4bf   :  { %v2777_v28 = vadd.f32 %v2776_v59, %v2742_v8 }
 0x4c1   :  { %v3004_v29 = vmul.f32 0.00043402778, %v2777_v28 }
 0x4c2   :  { %v2831_v20 = vpop.f32.mrf.mxu3 }
 0x4c3   :  { %3022 = vst [vmem:[%s7518_s6 + $0x78] sm:$0xff] %v3004_v29  ;;  %v2796_v15 = vpop.f32.mrf.mxu2  ;;  %v2872_v18 = vpop.f32.mrf.mxu0 }
 0x4c4   :  { %v2797_v47 = vadd.f32 %v2796_v15, %v7375_v50 }
 0x4c5   :  { %v2904_v0 = vpop.f32.mrf.mxu1 }
 0x4c6   :  { %v2832_v31 = vadd.f32 %v2831_v20, %v2797_v47  ;;  %v2905_v41 = vadd.f32 %v2904_v0, %v7425_v49 }
 0x4c8   :  { %v2867_v7 = vadd.f32 %v2866_v2, %v2832_v31 }
 0x4ca   :  { %v2990_v6 = vmul.f32 0.00043402778, %v2867_v7  ;;  %v2834_v44 = vpop.f32.mrf.mxu3 }
 0x4cb   :  { %v2799_v1 = vpop.f32.mrf.mxu2  ;;  %v2875_v34 = vpop.f32.mrf.mxu0 }
 0x4cc   :  { %3008 = vst [vmem:[%s7518_s6 + $0x8] sm:$0xff] %v2990_v6  ;;  %v2800_v17 = vadd.f32 %v2799_v1, %v7381_v62 }
 0x4cd   :  { %v2907_v36 = vpop.f32.mrf.mxu1 }
 0x4ce   :  { %v2835_v54 = vadd.f32 %v2834_v44, %v2800_v17  ;;  %v2908_v59 = vadd.f32 %v2907_v36, %v7432_v60 }
 0x4d0   :  { %v2870_v48 = vadd.f32 %v2869_v21, %v2835_v54 }
 0x4d2   :  { %v2993_v3 = vmul.f32 0.00043402778, %v2870_v48  ;;  %v2837_v46 = vpop.f32.mrf.mxu3 }
 0x4d3   :  { %v2802_v9 = vpop.f32.mrf.mxu2  ;;  %v2878_v11 = vpop.f32.mrf.mxu0 }
 0x4d4   :  { %3011 = vst [vmem:[%s7518_s6 + $0x20] sm:$0xff] %v2993_v3  ;;  %v2803_v50 = vadd.f32 %v2802_v9, %v7388_v27 }
 0x4d5   :  { %v2910_v29 = vpop.f32.mrf.mxu1 }
 0x4d6   :  { %v2838_v30 = vadd.f32 %v2837_v46, %v2803_v50  ;;  %v2911_v31 = vadd.f32 %v2910_v29, %v7439_v57 }
 0x4d8   :  { %v2873_v58 = vadd.f32 %v2872_v18, %v2838_v30 }
 0x4da   :  { %v2996_v23 = vmul.f32 0.00043402778, %v2873_v58  ;;  %v2840_v56 = vpop.f32.mrf.mxu3 }
 0x4db   :  { %v2805_v61 = vpop.f32.mrf.mxu2  ;;  %v2881_v63 = vpop.f32.mrf.mxu0 }
 0x4dc   :  { %3014 = vst [vmem:[%s7518_s6 + $0x38] sm:$0xff] %v2996_v23  ;;  %v2806_v62 = vadd.f32 %v2805_v61, %v7395_v35 }
 0x4dd   :  { %v2913_v6 = vpop.f32.mrf.mxu1 }
 0x4de   :  { %v2841_v45 = vadd.f32 %v2840_v56, %v2806_v62  ;;  %v2914_v17 = vadd.f32 %v2913_v6, %v7446_v22 }
 0x4e0   :  { %v2876_v33 = vadd.f32 %v2875_v34, %v2841_v45 }
 0x4e2   :  { %v2999_v42 = vmul.f32 0.00043402778, %v2876_v33  ;;  %v2843_v53 = vpop.f32.mrf.mxu3 }
 0x4e3   :  { %v2808_v39 = vpop.f32.mrf.mxu2 }
 0x4e4   :  { %3017 = vst [vmem:[%s7518_s6 + $0x50] sm:$0xff] %v2999_v42  ;;  %v2809_v27 = vadd.f32 %v2808_v39, %v7403_v40 }
 0x4e5   :  { %v2916_v3 = vpop.f32.mrf.mxu1 }
 0x4e6   :  { %v2844_v37 = vadd.f32 %v2843_v53, %v2809_v27  ;;  %v2917_v9 = vadd.f32 %v2916_v3, %v7453_v43 }
 0x4e8   :  { %v2879_v10 = vadd.f32 %v2878_v11, %v2844_v37 }
 0x4ea   :  { %v3002_v55 = vmul.f32 0.00043402778, %v2879_v10  ;;  %v2846_v16 = vpop.f32.mrf.mxu3 }
 0x4eb   :  { %v2811_v19 = vpop.f32.mrf.mxu2 }
 0x4ec   :  { %3020 = vst [vmem:[%s7518_s6 + $0x68] sm:$0xff] %v3002_v55  ;;  %v2812_v35 = vadd.f32 %v2811_v19, %v7409_v14 }
 0x4ee   :  { %v2847_v12 = vadd.f32 %v2846_v16, %v2812_v35 }
 0x4f0   :  { %v2882_v51 = vadd.f32 %v2881_v63, %v2847_v12 }
 0x4f2   :  { %v3005_v40 = vmul.f32 0.00043402778, %v2882_v51  ;;  %v2971_v52 = vpop.f32.mrf.mxu3 }
 0x4f3   :  { %v2936_v5 = vpop.f32.mrf.mxu2 }
 0x4f4   :  { %3023 = vst [vmem:[%s7518_s6 + $0x80] sm:$0xff] %v3005_v40  ;;  %v2937_v24 = vadd.f32 %v2936_v5, %v2902_v13 }
 0x4f6   :  { %v2972_v38 = vadd.f32 %v2971_v52, %v2937_v24 }
 0x4f8   :  { %v2991_v26 = vmul.f32 0.00043402778, %v2972_v38 }
 0x4fa   :  { %3009 = vst.msk [vmem:[%s7518_s6 + $0x10] sm:$0xff] %vm516_vm1, %v2991_v26  ;;  %v2974_v14 = vpop.f32.mrf.mxu3 }
 0x4fb   :  { %v2939_v25 = vpop.f32.mrf.mxu2 }
 0x4fc   :  { %v2940_v32 = vadd.f32 %v2939_v25, %v2905_v41 }
 0x4fe   :  { %v2975_v2 = vadd.f32 %v2974_v14, %v2940_v32 }
 0x500   :  { %v2994_v8 = vmul.f32 0.00043402778, %v2975_v2 }
 0x502   :  { %3012 = vst.msk [vmem:[%s7518_s6 + $0x28] sm:$0xff] %vm516_vm1, %v2994_v8  ;;  %v2977_v28 = vpop.f32.mrf.mxu3 }
 0x503   :  { %v2942_v49 = vpop.f32.mrf.mxu2 }
 0x504   :  { %v2943_v20 = vadd.f32 %v2942_v49, %v2908_v59 }
 0x506   :  { %v2978_v15 = vadd.f32 %v2977_v28, %v2943_v20 }
 0x508   :  { %v2997_v47 = vmul.f32 0.00043402778, %v2978_v15 }
 0x50a   :  { %3015 = vst.msk [vmem:[%s7518_s6 + $0x40] sm:$0xff] %vm516_vm1, %v2997_v47  ;;  %v2980_v21 = vpop.f32.mrf.mxu3 }
 0x50b   :  { %v2945_v60 = vpop.f32.mrf.mxu2 }
 0x50c   :  { %v2946_v7 = vadd.f32 %v2945_v60, %v2911_v31 }
 0x50e   :  { %v2981_v44 = vadd.f32 %v2980_v21, %v2946_v7 }
 0x510   :  { %v3000_v1 = vmul.f32 0.00043402778, %v2981_v44 }
 0x512   :  { %3018 = vst.msk [vmem:[%s7518_s6 + $0x58] sm:$0xff] %vm516_vm1, %v3000_v1  ;;  %v2983_v54 = vpop.f32.mrf.mxu3 }
 0x513   :  { %v2948_v57 = vpop.f32.mrf.mxu2 }
 0x514   :  { %v2949_v48 = vadd.f32 %v2948_v57, %v2914_v17 }
 0x516   :  { %v2984_v18 = vadd.f32 %v2983_v54, %v2949_v48 }
 0x518   :  { %v3003_v46 = vmul.f32 0.00043402778, %v2984_v18 }
 0x51a   :  { %3021 = vst.msk [vmem:[%s7518_s6 + $0x70] sm:$0xff] %vm516_vm1, %v3003_v46  ;;  %v2986_v30 = vpop.f32.mrf.mxu3 }
 0x51b   :  { %v2951_v50 = vpop.f32.mrf.mxu2 }
 0x51c   :  { %v2952_v22 = vadd.f32 %v2951_v50, %v2917_v9 }
 0x51e   :  { %v2987_v58 = vadd.f32 %v2986_v30, %v2952_v22 }
 0x520   :  { %v3006_v23 = vmul.f32 0.00043402778, %v2987_v58 }
 0x522   :  { %3024 = vst.msk [vmem:[%s7518_s6 + $0x88] sm:$0xff] %vm516_vm1, %v3006_v23 }

// kernel: re_vision_eresnet_forward.6
= control target key start
LH: loop header
LB: loop body
LE: loop exit
PB: predicated region body
PF: predicated region fallthrough
CT: control target
= control target key end

     0   :  { %s2349_s15 = smov 0   ;;  %s2756_s0 = inlined_call_operand.vmem [shape: bf16[4240,54], index: 0, kind: input, shape index: {}]   ;;  %s2757_s1 = inlined_call_operand.vmem [shape: bf16[54,128], index: 1, kind: input, shape index: {}]   ;;  %s2758_s2 = inlined_call_operand.vmem [shape: f32[1,128], index: 2, kind: input, shape index: {}]   ;;  %s2759_s3 = inlined_call_operand.vmem [shape: f32[1,128], index: 3, kind: input, shape index: {}]   ;;  %s2760_s4 = inlined_call_operand.vmem [shape: bf16[4240,128], index: 4, kind: output, shape index: {}]  }
   0x1 LB: > { %s1633_s16 = sadd.s32 4294967295, %s2322_s15   ;;  %p1637_p0 = scmp.ge.s32.totalorder %s2322_s15, 1  ;;  %s2322_s15 = sphi %s2349_s15, %s14_s15  }
   0x2   : > { %p163_p1 = scmp.lt.s32.totalorder %s2322_s15, 6 }
   0x4   : > { %p164_p2 = pnand %p1637_p0, %p163_p1 }
   0x5   : > { %s189_s19 = smul.u32 (!%p164_p2), 106, %s1633_s16 }
   0x6   : > { %167 = sbr.rel (%p164_p2) target bundleno = 389 (0x185), region = 36 }
   0x7   : > { %p190_p3 = scmp.lt.s32.totalorder (!%p164_p2), %s189_s19, 529 }
   0xb   : > { %v314_v0 = vld [vmem:[%s2757_s1 + $0x18] sm:$0x7]  ;;  %vm761_vm0 = vcmask 1042432   ;;  %v1974_v4 = vld [vmem:[%s2757_s1 + $0x10] sm:$0xff]  ;;  %s2762_s19 = smov (!%p190_p3, %s189_s19), 529  ;;  %v1973_v5 = vld [vmem:[%s2757_s1 + $0x8] sm:$0xff] }
   0xc   : > { %v593_v1 = vunpack.c.l.b16 %v314_v0  ;;  %s1638_s24 = sshll.u32 %s2762_s19, 2  ;;  %v1972_v6 = vld [vmem:[%s2757_s1] sm:$0xff]  ;;  %vm601_vm1 = vcmask 441344  }
   0xd   : > { %s2377_s29 = scalar_lea.vmem %s2756_s0, %s1638_s24  ;;  %v2450_v45 = vld [vmem:[%s2758_s2] ss:$0 sm:$0xff]  ;;  %s2484_s10 = scalar_lea.vmem %s2760_s4, %s1638_s24 }
   0xe   : > { %v597_v2 = vpack.c.b16 %v593_v1, %v593_v1  ;;  %v1945_v7 = vld [vmem:[%s2377_s29 + $0xd0] sm:$0xff]  ;;  %v1959_v8 = vld [vmem:[%s2377_s29 + $0x140] sm:$0xff]  ;;  %v1932_v10 = vld [vmem:[%s2377_s29 + $0x68] sm:$0xff] }
   0xf   : > { %v1919_v9 = vld [vmem:[%s2377_s29] sm:$0xff]  ;;  %v1946_v11 = vld [vmem:[%s2377_s29 + $0xd8] sm:$0xff]  ;;  %v1960_v12 = vld [vmem:[%s2377_s29 + $0x148] sm:$0xff] }
  0x10   : > { %v763_v3 = vsel %vm761_vm0, %v597_v2, 0  ;;  %v1920_v13 = vld [vmem:[%s2377_s29 + $0x8] sm:$0xff]  ;;  %v1933_v14 = vld [vmem:[%s2377_s29 + $0x70] sm:$0xff]  ;;  %v1947_v15 = vld [vmem:[%s2377_s29 + $0xe0] sm:$0xff] }
  0x11   : > { %2293 = vmatpush.bf16.msra.mxu2 %v763_v3  ;;  %2294 = vmatpush.bf16.msra.mxu3 %v763_v3  ;;  %v1961_v16 = vld [vmem:[%s2377_s29 + $0x150] sm:$0xff]  ;;  %v1934_v18 = vld [vmem:[%s2377_s29 + $0x78] sm:$0xff]  ;;  %v1948_v19 = vld [vmem:[%s2377_s29 + $0xe8] sm:$0xff] }
  0x12   : > { %769 = vmatpush.bf16.msra.mxu0 %v763_v3  ;;  %2292 = vmatpush.bf16.msra.mxu1 %v763_v3  ;;  %v1921_v17 = vld [vmem:[%s2377_s29 + $0x10] sm:$0xff]  ;;  %v1962_v20 = vld [vmem:[%s2377_s29 + $0x158] sm:$0xff]  ;;  %v1935_v22 = vld [vmem:[%s2377_s29 + $0x80] sm:$0xff] }
  0x13   : > { %v1922_v21 = vld [vmem:[%s2377_s29 + $0x18] sm:$0xff]  ;;  %v1949_v23 = vld [vmem:[%s2377_s29 + $0xf0] sm:$0xff]  ;;  %v1963_v24 = vld [vmem:[%s2377_s29 + $0x160] sm:$0xff] }
  0x14   : > { %v1923_v25 = vld [vmem:[%s2377_s29 + $0x20] sm:$0xff]  ;;  %v1936_v26 = vld [vmem:[%s2377_s29 + $0x88] sm:$0xff]  ;;  %v1950_v27 = vld [vmem:[%s2377_s29 + $0xf8] sm:$0xff] }
  0x15   : > { %2296 = vmatpush.bf16.msra.mxu2 %v1974_v4  ;;  %2297 = vmatpush.bf16.msra.mxu3 %v1974_v4  ;;  %v1964_v28 = vld [vmem:[%s2377_s29 + $0x168] sm:$0xff]  ;;  %v1937_v30 = vld [vmem:[%s2377_s29 + $0x90] sm:$0xff]  ;;  %v1951_v31 = vld [vmem:[%s2377_s29 + $0x100] sm:$0xff] }
  0x16   : > { %770 = vmatpush.bf16.msra.mxu0 %v1974_v4  ;;  %2295 = vmatpush.bf16.msra.mxu1 %v1974_v4  ;;  %v1924_v29 = vld [vmem:[%s2377_s29 + $0x28] sm:$0xff]  ;;  %v1965_v32 = vld [vmem:[%s2377_s29 + $0x170] sm:$0xff]  ;;  %v1938_v34 = vld [vmem:[%s2377_s29 + $0x98] sm:$0xff] }
  0x17   : > { %v1925_v33 = vld [vmem:[%s2377_s29 + $0x30] sm:$0xff]  ;;  %v1952_v35 = vld [vmem:[%s2377_s29 + $0x108] sm:$0xff]  ;;  %v1966_v36 = vld [vmem:[%s2377_s29 + $0x178] sm:$0xff] }
  0x18   : > { %v1926_v37 = vld [vmem:[%s2377_s29 + $0x38] sm:$0xff]  ;;  %v1939_v38 = vld [vmem:[%s2377_s29 + $0xa0] sm:$0xff]  ;;  %v1953_v39 = vld [vmem:[%s2377_s29 + $0x110] sm:$0xff] }
  0x19   : > { %2299 = vmatpush.bf16.msra.mxu2 %v1973_v5  ;;  %2300 = vmatpush.bf16.msra.mxu3 %v1973_v5  ;;  %v1967_v40 = vld [vmem:[%s2377_s29 + $0x180] sm:$0xff]  ;;  %v1940_v42 = vld [vmem:[%s2377_s29 + $0xa8] sm:$0xff] }
  0x1a   : > { %771 = vmatpush.bf16.msra.mxu0 %v1973_v5  ;;  %2298 = vmatpush.bf16.msra.mxu1 %v1973_v5  ;;  %v1927_v41 = vld [vmem:[%s2377_s29 + $0x40] sm:$0xff] }
  0x1b   : > { %v2461_v49 = vld [vmem:[%s2759_s3] ss:$0 sm:$0xff] }
  0x1d   : > { %2302 = vmatpush.bf16.msra.mxu2 %v1972_v6  ;;  %2303 = vmatpush.bf16.msra.mxu3 %v1972_v6 }
  0x1e   : > { %772 = vmatpush.bf16.msra.mxu0 %v1972_v6  ;;  %2301 = vmatpush.bf16.msra.mxu1 %v1972_v6  ;;  %v1954_v6 = vld [vmem:[%s2377_s29 + $0x118] sm:$0xff] }
  0x20   : > { %1890 = vmatmul.msk.bf16.vlgmr.msra.gmra.mxu2 %vm601_vm1, %v1945_v7  ;;  %1904 = vmatmul.msk.bf16.vlgmr.msra.gmra.mxu3 %vm601_vm1, %v1959_v8  ;;  %v1968_v8 = vld [vmem:[%s2377_s29 + $0x188] sm:$0xff] }
  0x21   : > { %1864 = vmatmul.msk.bf16.vlgmr.msra.gmra.mxu0 %vm601_vm1, %v1919_v9  ;;  %1877 = vmatmul.msk.bf16.vlgmr.msra.gmra.mxu1 %vm601_vm1, %v1932_v10 }
  0x30   : > { %1891 = vmatmul.msk.bf16.gmra.mxu2 %vm601_vm1, %v1946_v11  ;;  %1905 = vmatmul.msk.bf16.gmra.mxu3 %vm601_vm1, %v1960_v12  ;;  %v1928_v11 = vld [vmem:[%s2377_s29 + $0x48] sm:$0xff]  ;;  %v1941_v12 = vld [vmem:[%s2377_s29 + $0xb0] sm:$0xff] }
  0x31   : > { %1865 = vmatmul.msk.bf16.gmra.mxu0 %vm601_vm1, %v1920_v13  ;;  %1878 = vmatmul.msk.bf16.gmra.mxu1 %vm601_vm1, %v1933_v14 }
  0x40   : > { %1892 = vmatmul.msk.bf16.gmra.mxu2 %vm601_vm1, %v1947_v15  ;;  %1906 = vmatmul.msk.bf16.gmra.mxu3 %vm601_vm1, %v1961_v16 }
  0x41   : > { %1866 = vmatmul.msk.bf16.gmra.mxu0 %vm601_vm1, %v1921_v17  ;;  %1879 = vmatmul.msk.bf16.gmra.mxu1 %vm601_vm1, %v1934_v18 }
  0x50   : > { %1893 = vmatmul.msk.bf16.gmra.mxu2 %vm601_vm1, %v1948_v19  ;;  %1907 = vmatmul.msk.bf16.gmra.mxu3 %vm601_vm1, %v1962_v20 }
  0x51   : > { %1867 = vmatmul.msk.bf16.gmra.mxu0 %vm601_vm1, %v1922_v21  ;;  %1880 = vmatmul.msk.bf16.gmra.mxu1 %vm601_vm1, %v1935_v22 }
  0x60   : > { %1894 = vmatmul.msk.bf16.gmra.mxu2 %vm601_vm1, %v1949_v23  ;;  %1908 = vmatmul.msk.bf16.gmra.mxu3 %vm601_vm1, %v1963_v24 }
  0x61   : > { %1868 = vmatmul.msk.bf16.gmra.mxu0 %vm601_vm1, %v1923_v25  ;;  %1881 = vmatmul.msk.bf16.gmra.mxu1 %vm601_vm1, %v1936_v26 }
  0x70   : > { %1895 = vmatmul.msk.bf16.gmra.mxu2 %vm601_vm1, %v1950_v27  ;;  %1909 = vmatmul.msk.bf16.gmra.mxu3 %vm601_vm1, %v1964_v28 }
  0x71   : > { %1869 = vmatmul.msk.bf16.gmra.mxu0 %vm601_vm1, %v1924_v29  ;;  %1882 = vmatmul.msk.bf16.gmra.mxu1 %vm601_vm1, %v1937_v30 }
  0x80   : > { %1896 = vmatmul.msk.bf16.gmra.mxu2 %vm601_vm1, %v1951_v31  ;;  %1910 = vmatmul.msk.bf16.gmra.mxu3 %vm601_vm1, %v1965_v32 }
  0x81   : > { %1870 = vmatmul.msk.bf16.gmra.mxu0 %vm601_vm1, %v1925_v33  ;;  %1883 = vmatmul.msk.bf16.gmra.mxu1 %vm601_vm1, %v1938_v34 }
  0x90   : > { %1897 = vmatmul.msk.bf16.gmra.mxu2 %vm601_vm1, %v1952_v35  ;;  %1911 = vmatmul.msk.bf16.gmra.mxu3 %vm601_vm1, %v1966_v36 }
  0x91   : > { %1871 = vmatmul.msk.bf16.gmra.mxu0 %vm601_vm1, %v1926_v37  ;;  %1884 = vmatmul.msk.bf16.gmra.mxu1 %vm601_vm1, %v1939_v38 }
  0x9e   : > { %v774_v43 = vpop.f32.mrf.mxu0  ;;  %v839_v44 = vpop.f32.mrf.mxu1 }
  0x9f   : > { %v1043_v46 = vmul.f32 %v2450_v45, %v774_v43  ;;  %v1069_v47 = vmul.f32 %v2450_v45, %v839_v44 }
  0xa0   : > { %1898 = vmatmul.msk.bf16.gmra.mxu2 %vm601_vm1, %v1953_v39  ;;  %1912 = vmatmul.msk.bf16.gmra.mxu3 %vm601_vm1, %v1967_v40 }
  0xa1   : > { %1872 = vmatmul.msk.bf16.gmra.mxu0 %vm601_vm1, %v1927_v41  ;;  %1885 = vmatmul.msk.bf16.gmra.mxu1 %vm601_vm1, %v1940_v42  ;;  %v1153_v51 = vadd.f32 %v2461_v49, %v1043_v46  ;;  %v1179_v52 = vadd.f32 %v2461_v49, %v1069_v47  ;;  %v1955_v47 = vld [vmem:[%s2377_s29 + $0x120] sm:$0xff] }
  0xa3   : > { %v904_v48 = vpop.f32.mrf.mxu2  ;;  %v974_v50 = vpop.f32.mrf.mxu3  ;;  %v1259_v59 = vmax.f32 %v1153_v51, 0.0  ;;  %v1285_v60 = vmax.f32 %v1179_v52, 0.0 }
  0xa4   : > { %v1123_v53 = vmul.f32 %v2450_v45, %v974_v50  ;;  %v1095_v58 = vmul.f32 %v2450_v45, %v904_v48  ;;  %v1969_v50 = vld [vmem:[%s2377_s29 + $0x190] sm:$0xff] }
  0xa6   : > { %v776_v54 = vpop.f32.mrf.mxu0  ;;  %v841_v55 = vpop.f32.mrf.mxu1  ;;  %v1233_v63 = vadd.f32 %v2461_v49, %v1123_v53  ;;  %v1205_v4 = vadd.f32 %v2461_v49, %v1095_v58  ;;  %v1929_v53 = vld [vmem:[%s2377_s29 + $0x50] sm:$0xff] }
  0xa7   : > { %v1044_v56 = vmul.f32 %v2450_v45, %v776_v54  ;;  %v1070_v57 = vmul.f32 %v2450_v45, %v841_v55  ;;  %v1942_v54 = vld [vmem:[%s2377_s29 + $0xb8] sm:$0xff] }
  0xa8   : > { %v1339_v14 = vmax.f32 %v1233_v63, 0.0  ;;  %v1311_v18 = vmax.f32 %v1205_v4, 0.0 }
  0xa9   : > { %v1154_v61 = vadd.f32 %v2461_v49, %v1044_v56  ;;  %v1180_v62 = vadd.f32 %v2461_v49, %v1070_v57 }
  0xab   : > { %v906_v0 = vpop.f32.mrf.mxu2  ;;  %v1260_v1 = vmax.f32 %v1154_v61, 0.0  ;;  %v1286_v2 = vmax.f32 %v1180_v62, 0.0  ;;  %v976_v3 = vpop.f32.mrf.mxu3 }
  0xac   : > { %v1096_v5 = vmul.f32 %v2450_v45, %v906_v0  ;;  %v1124_v7 = vmul.f32 %v2450_v45, %v976_v3 }
  0xad   : > { %v1978_v9 = vpack.c.bf16 %v1260_v1, %v1259_v59  ;;  %v2043_v10 = vpack.c.bf16 %v1286_v2, %v1285_v60 }
  0xae   : > { %v1206_v13 = vadd.f32 %v2461_v49, %v1096_v5  ;;  %v1234_v15 = vadd.f32 %v2461_v49, %v1124_v7  ;;  %v779_v16 = vpop.f32.mrf.mxu0  ;;  %v844_v17 = vpop.f32.mrf.mxu1 }
  0xaf   : > { %1979 = vst [vmem:[%s2484_s10] sm:$0xff] %v1978_v9   ;;  %v1045_v21 = vmul.f32 %v2450_v45, %v779_v16  ;;  %v1071_v22 = vmul.f32 %v2450_v45, %v844_v17 }
  0xb0   : > { %v1312_v19 = vmax.f32 %v1206_v13, 0.0  ;;  %1899 = vmatmul.msk.bf16.gmra.mxu2 %vm601_vm1, %v1954_v6  ;;  %2252 = vst [vmem:[%s2484_s10 + $0x68] sm:$0xff] %v2043_v10   ;;  %v1340_v20 = vmax.f32 %v1234_v15, 0.0  ;;  %1913 = vmatmul.msk.bf16.gmra.mxu3 %vm601_vm1, %v1968_v8 }
  0xb1   : > { %1873 = vmatmul.msk.bf16.gmra.mxu0 %vm601_vm1, %v1928_v11  ;;  %1886 = vmatmul.msk.bf16.gmra.mxu1 %vm601_vm1, %v1941_v12  ;;  %v1155_v27 = vadd.f32 %v2461_v49, %v1045_v21  ;;  %v1181_v28 = vadd.f32 %v2461_v49, %v1071_v22 }
  0xb2   : > { %v2108_v23 = vpack.c.bf16 %v1312_v19, %v1311_v18  ;;  %v2178_v24 = vpack.c.bf16 %v1340_v20, %v1339_v14 }
  0xb3   : > { %v909_v25 = vpop.f32.mrf.mxu2  ;;  %v979_v26 = vpop.f32.mrf.mxu3  ;;  %v1261_v35 = vmax.f32 %v1155_v27, 0.0  ;;  %v1287_v36 = vmax.f32 %v1181_v28, 0.0 }
  0xb4   : > { %2265 = vst [vmem:[%s2484_s10 + $0xd0] sm:$0xff] %v2108_v23   ;;  %v1125_v29 = vmul.f32 %v2450_v45, %v979_v26  ;;  %v1097_v34 = vmul.f32 %v2450_v45, %v909_v25  ;;  %v1970_v26 = vld [vmem:[%s2377_s29 + $0x198] sm:$0xff] }
  0xb5   : > { %2279 = vst [vmem:[%s2484_s10 + $0x140] sm:$0xff] %v2178_v24   ;;  %v1956_v24 = vld [vmem:[%s2377_s29 + $0x128] sm:$0xff] }
  0xb6   : > { %v781_v30 = vpop.f32.mrf.mxu0  ;;  %v846_v31 = vpop.f32.mrf.mxu1  ;;  %v1235_v39 = vadd.f32 %v2461_v49, %v1125_v29  ;;  %v1207_v44 = vadd.f32 %v2461_v49, %v1097_v34  ;;  %v1930_v29 = vld [vmem:[%s2377_s29 + $0x58] sm:$0xff] }
  0xb7   : > { %v1046_v32 = vmul.f32 %v2450_v45, %v781_v30  ;;  %v1072_v33 = vmul.f32 %v2450_v45, %v846_v31  ;;  %v1943_v30 = vld [vmem:[%s2377_s29 + $0xc0] sm:$0xff] }
  0xb8   : > { %v1341_v56 = vmax.f32 %v1235_v39, 0.0  ;;  %v1313_v60 = vmax.f32 %v1207_v44, 0.0 }
  0xb9   : > { %v1156_v37 = vadd.f32 %v2461_v49, %v1046_v32  ;;  %v1182_v38 = vadd.f32 %v2461_v49, %v1072_v33 }
  0xbb   : > { %v911_v40 = vpop.f32.mrf.mxu2  ;;  %v1262_v41 = vmax.f32 %v1156_v37, 0.0  ;;  %v1288_v42 = vmax.f32 %v1182_v38, 0.0  ;;  %v981_v43 = vpop.f32.mrf.mxu3 }
  0xbc   : > { %v1098_v46 = vmul.f32 %v2450_v45, %v911_v40  ;;  %v1126_v48 = vmul.f32 %v2450_v45, %v981_v43 }
  0xbd   : > { %v1983_v51 = vpack.c.bf16 %v1262_v41, %v1261_v35  ;;  %v2048_v52 = vpack.c.bf16 %v1288_v42, %v1287_v36 }
  0xbe   : > { %v1208_v55 = vadd.f32 %v2461_v49, %v1098_v46  ;;  %v1236_v57 = vadd.f32 %v2461_v49, %v1126_v48  ;;  %v784_v58 = vpop.f32.mrf.mxu0  ;;  %v849_v59 = vpop.f32.mrf.mxu1 }
  0xbf   : > { %2240 = vst [vmem:[%s2484_s10 + $0x8] sm:$0xff] %v1983_v51   ;;  %v1047_v63 = vmul.f32 %v2450_v45, %v784_v58  ;;  %v1073_v0 = vmul.f32 %v2450_v45, %v849_v59 }
  0xc0   : > { %v1314_v61 = vmax.f32 %v1208_v55, 0.0  ;;  %1900 = vmatmul.msk.bf16.gmra.mxu2 %vm601_vm1, %v1955_v47  ;;  %2253 = vst [vmem:[%s2484_s10 + $0x70] sm:$0xff] %v2048_v52   ;;  %v1342_v62 = vmax.f32 %v1236_v57, 0.0  ;;  %1914 = vmatmul.msk.bf16.gmra.mxu3 %vm601_vm1, %v1969_v50 }
  0xc1   : > { %1874 = vmatmul.msk.bf16.gmra.mxu0 %vm601_vm1, %v1929_v53  ;;  %1887 = vmatmul.msk.bf16.gmra.mxu1 %vm601_vm1, %v1942_v54  ;;  %v1157_v5 = vadd.f32 %v2461_v49, %v1047_v63  ;;  %v1183_v6 = vadd.f32 %v2461_v49, %v1073_v0 }
  0xc2   : > { %v2113_v1 = vpack.c.bf16 %v1314_v61, %v1313_v60  ;;  %v2183_v2 = vpack.c.bf16 %v1342_v62, %v1341_v56 }
  0xc3   : > { %v914_v3 = vpop.f32.mrf.mxu2  ;;  %v984_v4 = vpop.f32.mrf.mxu3  ;;  %v1263_v13 = vmax.f32 %v1157_v5, 0.0  ;;  %v1289_v14 = vmax.f32 %v1183_v6, 0.0 }
  0xc4   : > { %2266 = vst [vmem:[%s2484_s10 + $0xd8] sm:$0xff] %v2113_v1   ;;  %v1127_v7 = vmul.f32 %v2450_v45, %v984_v4  ;;  %v1099_v12 = vmul.f32 %v2450_v45, %v914_v3  ;;  %v1971_v4 = vld [vmem:[%s2377_s29 + $0x1a0] sm:$0xff] }
  0xc5   : > { %2280 = vst [vmem:[%s2484_s10 + $0x148] sm:$0xff] %v2183_v2   ;;  %v1957_v2 = vld [vmem:[%s2377_s29 + $0x130] sm:$0xff] }
  0xc6   : > { %v786_v8 = vpop.f32.mrf.mxu0  ;;  %v851_v9 = vpop.f32.mrf.mxu1  ;;  %v1237_v17 = vadd.f32 %v2461_v49, %v1127_v7  ;;  %v1209_v22 = vadd.f32 %v2461_v49, %v1099_v12  ;;  %v1931_v7 = vld [vmem:[%s2377_s29 + $0x60] sm:$0xff] }
  0xc7   : > { %v1048_v10 = vmul.f32 %v2450_v45, %v786_v8  ;;  %v1074_v11 = vmul.f32 %v2450_v45, %v851_v9  ;;  %v1944_v8 = vld [vmem:[%s2377_s29 + $0xc8] sm:$0xff] }
  0xc8   : > { %v1343_v32 = vmax.f32 %v1237_v17, 0.0  ;;  %v1315_v36 = vmax.f32 %v1209_v22, 0.0 }
  0xc9   : > { %v1158_v15 = vadd.f32 %v2461_v49, %v1048_v10  ;;  %v1184_v16 = vadd.f32 %v2461_v49, %v1074_v11 }
  0xcb   : > { %v916_v18 = vpop.f32.mrf.mxu2  ;;  %v1264_v19 = vmax.f32 %v1158_v15, 0.0  ;;  %v1290_v20 = vmax.f32 %v1184_v16, 0.0  ;;  %v986_v21 = vpop.f32.mrf.mxu3 }
  0xcc   : > { %v1100_v23 = vmul.f32 %v2450_v45, %v916_v18  ;;  %v1128_v25 = vmul.f32 %v2450_v45, %v986_v21 }
  0xcd   : > { %v1988_v27 = vpack.c.bf16 %v1264_v19, %v1263_v13  ;;  %v2053_v28 = vpack.c.bf16 %v1290_v20, %v1289_v14 }
  0xce   : > { %v1210_v31 = vadd.f32 %v2461_v49, %v1100_v23  ;;  %v1238_v33 = vadd.f32 %v2461_v49, %v1128_v25  ;;  %v789_v34 = vpop.f32.mrf.mxu0  ;;  %v854_v35 = vpop.f32.mrf.mxu1 }
  0xcf   : > { %2241 = vst [vmem:[%s2484_s10 + $0x10] sm:$0xff] %v1988_v27   ;;  %v1049_v39 = vmul.f32 %v2450_v45, %v789_v34  ;;  %v1075_v40 = vmul.f32 %v2450_v45, %v854_v35 }
  0xd0   : > { %v1316_v37 = vmax.f32 %v1210_v31, 0.0  ;;  %1901 = vmatmul.msk.bf16.gmra.mxu2 %vm601_vm1, %v1956_v24  ;;  %2254 = vst [vmem:[%s2484_s10 + $0x78] sm:$0xff] %v2053_v28   ;;  %v1344_v38 = vmax.f32 %v1238_v33, 0.0  ;;  %1915 = vmatmul.msk.bf16.gmra.mxu3 %vm601_vm1, %v1970_v26 }
  0xd1   : > { %1875 = vmatmul.msk.bf16.gmra.mxu0 %vm601_vm1, %v1930_v29  ;;  %1888 = vmatmul.msk.bf16.gmra.mxu1 %vm601_vm1, %v1943_v30  ;;  %v1159_v46 = vadd.f32 %v2461_v49, %v1049_v39  ;;  %v1185_v47 = vadd.f32 %v2461_v49, %v1075_v40 }
  0xd2   : > { %v2118_v41 = vpack.c.bf16 %v1316_v37, %v1315_v36  ;;  %v2188_v42 = vpack.c.bf16 %v1344_v38, %v1343_v32 }
  0xd3   : > { %v919_v43 = vpop.f32.mrf.mxu2  ;;  %v989_v44 = vpop.f32.mrf.mxu3  ;;  %v1265_v55 = vmax.f32 %v1159_v46, 0.0  ;;  %v1291_v56 = vmax.f32 %v1185_v47, 0.0 }
  0xd4   : > { %2267 = vst [vmem:[%s2484_s10 + $0xe0] sm:$0xff] %v2118_v41   ;;  %v1129_v48 = vmul.f32 %v2450_v45, %v989_v44  ;;  %v1101_v54 = vmul.f32 %v2450_v45, %v919_v43 }
  0xd5   : > { %2281 = vst [vmem:[%s2484_s10 + $0x150] sm:$0xff] %v2188_v42   ;;  %v1958_v42 = vld [vmem:[%s2377_s29 + $0x138] sm:$0xff] }
  0xd6   : > { %v791_v50 = vpop.f32.mrf.mxu0  ;;  %v856_v51 = vpop.f32.mrf.mxu1  ;;  %v1239_v59 = vadd.f32 %v2461_v49, %v1129_v48  ;;  %v1211_v0 = vadd.f32 %v2461_v49, %v1101_v54 }
  0xd7   : > { %v1050_v52 = vmul.f32 %v2450_v45, %v791_v50  ;;  %v1076_v53 = vmul.f32 %v2450_v45, %v856_v51 }
  0xd8   : > { %v1345_v10 = vmax.f32 %v1239_v59, 0.0  ;;  %v1317_v14 = vmax.f32 %v1211_v0, 0.0 }
  0xd9   : > { %v1160_v57 = vadd.f32 %v2461_v49, %v1050_v52  ;;  %v1186_v58 = vadd.f32 %v2461_v49, %v1076_v53 }
  0xdb   : > { %v921_v60 = vpop.f32.mrf.mxu2  ;;  %v1266_v61 = vmax.f32 %v1160_v57, 0.0  ;;  %v1292_v62 = vmax.f32 %v1186_v58, 0.0  ;;  %v991_v63 = vpop.f32.mrf.mxu3 }
  0xdc   : > { %v1102_v1 = vmul.f32 %v2450_v45, %v921_v60  ;;  %v1130_v3 = vmul.f32 %v2450_v45, %v991_v63 }
  0xdd   : > { %v1993_v5 = vpack.c.bf16 %v1266_v61, %v1265_v55  ;;  %v2058_v6 = vpack.c.bf16 %v1292_v62, %v1291_v56 }
  0xde   : > { %v1212_v9 = vadd.f32 %v2461_v49, %v1102_v1  ;;  %v1240_v11 = vadd.f32 %v2461_v49, %v1130_v3  ;;  %v794_v12 = vpop.f32.mrf.mxu0  ;;  %v859_v13 = vpop.f32.mrf.mxu1 }
  0xdf   : > { %2242 = vst [vmem:[%s2484_s10 + $0x18] sm:$0xff] %v1993_v5   ;;  %v1051_v17 = vmul.f32 %v2450_v45, %v794_v12  ;;  %v1077_v18 = vmul.f32 %v2450_v45, %v859_v13 }
  0xe0   : > { %v1318_v15 = vmax.f32 %v1212_v9, 0.0  ;;  %1902 = vmatmul.msk.bf16.gmra.mxu2 %vm601_vm1, %v1957_v2  ;;  %2255 = vst [vmem:[%s2484_s10 + $0x80] sm:$0xff] %v2058_v6   ;;  %v1346_v16 = vmax.f32 %v1240_v11, 0.0  ;;  %1916 = vmatmul.msk.bf16.gmra.mxu3 %vm601_vm1, %v1971_v4 }
  0xe1   : > { %1876 = vmatmul.msk.bf16.gmra.mxu0 %vm601_vm1, %v1931_v7  ;;  %1889 = vmatmul.msk.bf16.gmra.mxu1 %vm601_vm1, %v1944_v8  ;;  %v1161_v23 = vadd.f32 %v2461_v49, %v1051_v17  ;;  %v1187_v24 = vadd.f32 %v2461_v49, %v1077_v18 }
  0xe2   : > { %v2123_v19 = vpack.c.bf16 %v1318_v15, %v1317_v14  ;;  %v2193_v20 = vpack.c.bf16 %v1346_v16, %v1345_v10 }
  0xe3   : > { %v924_v21 = vpop.f32.mrf.mxu2  ;;  %v994_v22 = vpop.f32.mrf.mxu3  ;;  %v1267_v31 = vmax.f32 %v1161_v23, 0.0  ;;  %v1293_v32 = vmax.f32 %v1187_v24, 0.0 }
  0xe4   : > { %2268 = vst [vmem:[%s2484_s10 + $0xe8] sm:$0xff] %v2123_v19   ;;  %v1131_v25 = vmul.f32 %v2450_v45, %v994_v22  ;;  %v1103_v30 = vmul.f32 %v2450_v45, %v924_v21 }
  0xe5   : > { %2282 = vst [vmem:[%s2484_s10 + $0x158] sm:$0xff] %v2193_v20  }
  0xe6   : > { %v796_v26 = vpop.f32.mrf.mxu0  ;;  %v861_v27 = vpop.f32.mrf.mxu1  ;;  %v1241_v35 = vadd.f32 %v2461_v49, %v1131_v25  ;;  %v1213_v40 = vadd.f32 %v2461_v49, %v1103_v30 }
  0xe7   : > { %v1052_v28 = vmul.f32 %v2450_v45, %v796_v26  ;;  %v1078_v29 = vmul.f32 %v2450_v45, %v861_v27 }
  0xe8   : > { %v1347_v48 = vmax.f32 %v1241_v35, 0.0  ;;  %v1319_v53 = vmax.f32 %v1213_v40, 0.0 }
  0xe9   : > { %v1162_v33 = vadd.f32 %v2461_v49, %v1052_v28  ;;  %v1188_v34 = vadd.f32 %v2461_v49, %v1078_v29 }
  0xeb   : > { %v926_v36 = vpop.f32.mrf.mxu2  ;;  %v1268_v37 = vmax.f32 %v1162_v33, 0.0  ;;  %v1294_v38 = vmax.f32 %v1188_v34, 0.0  ;;  %v996_v39 = vpop.f32.mrf.mxu3 }
  0xec   : > { %v1104_v41 = vmul.f32 %v2450_v45, %v926_v36  ;;  %v1132_v43 = vmul.f32 %v2450_v45, %v996_v39 }
  0xed   : > { %v1998_v44 = vpack.c.bf16 %v1268_v37, %v1267_v31  ;;  %v2063_v46 = vpack.c.bf16 %v1294_v38, %v1293_v32 }
  0xee   : > { %v1214_v47 = vadd.f32 %v2461_v49, %v1104_v41  ;;  %v1242_v50 = vadd.f32 %v2461_v49, %v1132_v43  ;;  %v799_v51 = vpop.f32.mrf.mxu0  ;;  %v864_v52 = vpop.f32.mrf.mxu1 }
  0xef   : > { %2243 = vst [vmem:[%s2484_s10 + $0x20] sm:$0xff] %v1998_v44   ;;  %v1053_v56 = vmul.f32 %v2450_v45, %v799_v51  ;;  %v1079_v57 = vmul.f32 %v2450_v45, %v864_v52 }
  0xf0   : > { %v1320_v54 = vmax.f32 %v1214_v47, 0.0  ;;  %1903 = vmatmul.msk.bf16.gmra.mxu2 %vm601_vm1, %v1958_v42  ;;  %2256 = vst [vmem:[%s2484_s10 + $0x88] sm:$0xff] %v2063_v46   ;;  %v1348_v55 = vmax.f32 %v1242_v50, 0.0 }
  0xf1   : > { %v1163_v62 = vadd.f32 %v2461_v49, %v1053_v56  ;;  %v1189_v63 = vadd.f32 %v2461_v49, %v1079_v57 }
  0xf2   : > { %v2128_v58 = vpack.c.bf16 %v1320_v54, %v1319_v53  ;;  %v2198_v59 = vpack.c.bf16 %v1348_v55, %v1347_v48 }
  0xf3   : > { %v929_v60 = vpop.f32.mrf.mxu2  ;;  %v999_v61 = vpop.f32.mrf.mxu3  ;;  %v1269_v6 = vmax.f32 %v1163_v62, 0.0  ;;  %v1295_v7 = vmax.f32 %v1189_v63, 0.0 }
  0xf4   : > { %2269 = vst [vmem:[%s2484_s10 + $0xf0] sm:$0xff] %v2128_v58   ;;  %v1133_v0 = vmul.f32 %v2450_v45, %v999_v61  ;;  %v1105_v5 = vmul.f32 %v2450_v45, %v929_v60 }
  0xf5   : > { %2283 = vst [vmem:[%s2484_s10 + $0x160] sm:$0xff] %v2198_v59  }
  0xf6   : > { %v801_v1 = vpop.f32.mrf.mxu0  ;;  %v866_v2 = vpop.f32.mrf.mxu1  ;;  %v1243_v10 = vadd.f32 %v2461_v49, %v1133_v0  ;;  %v1215_v15 = vadd.f32 %v2461_v49, %v1105_v5 }
  0xf7   : > { %v1054_v3 = vmul.f32 %v2450_v45, %v801_v1  ;;  %v1080_v4 = vmul.f32 %v2450_v45, %v866_v2 }
  0xf8   : > { %v1349_v21 = vmax.f32 %v1243_v10, 0.0  ;;  %v1321_v25 = vmax.f32 %v1215_v15, 0.0 }
  0xf9   : > { %v1164_v8 = vadd.f32 %v2461_v49, %v1054_v3  ;;  %v1190_v9 = vadd.f32 %v2461_v49, %v1080_v4 }
  0xfb   : > { %v931_v11 = vpop.f32.mrf.mxu2  ;;  %v1270_v12 = vmax.f32 %v1164_v8, 0.0  ;;  %v1296_v13 = vmax.f32 %v1190_v9, 0.0  ;;  %v1001_v14 = vpop.f32.mrf.mxu3 }
  0xfc   : > { %v1106_v16 = vmul.f32 %v2450_v45, %v931_v11  ;;  %v1134_v17 = vmul.f32 %v2450_v45, %v1001_v14 }
  0xfd   : > { %v2003_v18 = vpack.c.bf16 %v1270_v12, %v1269_v6  ;;  %v2068_v19 = vpack.c.bf16 %v1296_v13, %v1295_v7 }
  0xfe   : > { %v1216_v20 = vadd.f32 %v2461_v49, %v1106_v16  ;;  %v1244_v22 = vadd.f32 %v2461_v49, %v1134_v17  ;;  %v804_v23 = vpop.f32.mrf.mxu0  ;;  %v869_v24 = vpop.f32.mrf.mxu1 }
  0xff   : > { %2244 = vst [vmem:[%s2484_s10 + $0x28] sm:$0xff] %v2003_v18   ;;  %v1055_v28 = vmul.f32 %v2450_v45, %v804_v23  ;;  %v1081_v29 = vmul.f32 %v2450_v45, %v869_v24 }
 0x100   : > { %v1322_v26 = vmax.f32 %v1216_v20, 0.0  ;;  %2257 = vst [vmem:[%s2484_s10 + $0x90] sm:$0xff] %v2068_v19   ;;  %v1350_v27 = vmax.f32 %v1244_v22, 0.0 }
 0x101   : > { %v1165_v34 = vadd.f32 %v2461_v49, %v1055_v28  ;;  %v1191_v35 = vadd.f32 %v2461_v49, %v1081_v29 }
 0x102   : > { %v2133_v30 = vpack.c.bf16 %v1322_v26, %v1321_v25  ;;  %v2203_v31 = vpack.c.bf16 %v1350_v27, %v1349_v21 }
 0x103   : > { %v934_v32 = vpop.f32.mrf.mxu2  ;;  %v1004_v33 = vpop.f32.mrf.mxu3  ;;  %v1271_v42 = vmax.f32 %v1165_v34, 0.0  ;;  %v1297_v43 = vmax.f32 %v1191_v35, 0.0 }
 0x104   : > { %2270 = vst [vmem:[%s2484_s10 + $0xf8] sm:$0xff] %v2133_v30   ;;  %v1135_v36 = vmul.f32 %v2450_v45, %v1004_v33  ;;  %v1107_v41 = vmul.f32 %v2450_v45, %v934_v32 }
 0x105   : > { %2284 = vst [vmem:[%s2484_s10 + $0x168] sm:$0xff] %v2203_v31  }
 0x106   : > { %v806_v37 = vpop.f32.mrf.mxu0  ;;  %v871_v38 = vpop.f32.mrf.mxu1  ;;  %v1245_v47 = vadd.f32 %v2461_v49, %v1135_v36  ;;  %v1217_v53 = vadd.f32 %v2461_v49, %v1107_v41 }
 0x107   : > { %v1056_v39 = vmul.f32 %v2450_v45, %v806_v37  ;;  %v1082_v40 = vmul.f32 %v2450_v45, %v871_v38 }
 0x108   : > { %v1351_v59 = vmax.f32 %v1245_v47, 0.0  ;;  %v1323_v63 = vmax.f32 %v1217_v53, 0.0 }
 0x109   : > { %v1166_v44 = vadd.f32 %v2461_v49, %v1056_v39  ;;  %v1192_v46 = vadd.f32 %v2461_v49, %v1082_v40 }
 0x10b   : > { %v936_v48 = vpop.f32.mrf.mxu2  ;;  %v1272_v50 = vmax.f32 %v1166_v44, 0.0  ;;  %v1298_v51 = vmax.f32 %v1192_v46, 0.0  ;;  %v1006_v52 = vpop.f32.mrf.mxu3 }
 0x10c   : > { %v1108_v54 = vmul.f32 %v2450_v45, %v936_v48  ;;  %v1136_v55 = vmul.f32 %v2450_v45, %v1006_v52 }
 0x10d   : > { %v2008_v56 = vpack.c.bf16 %v1272_v50, %v1271_v42  ;;  %v2073_v57 = vpack.c.bf16 %v1298_v51, %v1297_v43 }
 0x10e   : > { %v1218_v58 = vadd.f32 %v2461_v49, %v1108_v54  ;;  %v1246_v60 = vadd.f32 %v2461_v49, %v1136_v55  ;;  %v809_v61 = vpop.f32.mrf.mxu0  ;;  %v874_v62 = vpop.f32.mrf.mxu1 }
 0x10f   : > { %2245 = vst [vmem:[%s2484_s10 + $0x30] sm:$0xff] %v2008_v56   ;;  %v1057_v2 = vmul.f32 %v2450_v45, %v809_v61  ;;  %v1083_v3 = vmul.f32 %v2450_v45, %v874_v62 }
 0x110   : > { %v1324_v0 = vmax.f32 %v1218_v58, 0.0  ;;  %2258 = vst [vmem:[%s2484_s10 + $0x98] sm:$0xff] %v2073_v57   ;;  %v1352_v1 = vmax.f32 %v1246_v60, 0.0 }
 0x111   : > { %v1167_v8 = vadd.f32 %v2461_v49, %v1057_v2  ;;  %v1193_v9 = vadd.f32 %v2461_v49, %v1083_v3 }
 0x112   : > { %v2138_v4 = vpack.c.bf16 %v1324_v0, %v1323_v63  ;;  %v2208_v5 = vpack.c.bf16 %v1352_v1, %v1351_v59 }
 0x113   : > { %v939_v6 = vpop.f32.mrf.mxu2  ;;  %v1009_v7 = vpop.f32.mrf.mxu3  ;;  %v1273_v16 = vmax.f32 %v1167_v8, 0.0  ;;  %v1299_v17 = vmax.f32 %v1193_v9, 0.0 }
 0x114   : > { %2271 = vst [vmem:[%s2484_s10 + $0x100] sm:$0xff] %v2138_v4   ;;  %v1137_v10 = vmul.f32 %v2450_v45, %v1009_v7  ;;  %v1109_v15 = vmul.f32 %v2450_v45, %v939_v6 }
 0x115   : > { %2285 = vst [vmem:[%s2484_s10 + $0x170] sm:$0xff] %v2208_v5  }
 0x116   : > { %v811_v11 = vpop.f32.mrf.mxu0  ;;  %v876_v12 = vpop.f32.mrf.mxu1  ;;  %v1247_v20 = vadd.f32 %v2461_v49, %v1137_v10  ;;  %v1219_v25 = vadd.f32 %v2461_v49, %v1109_v15 }
 0x117   : > { %v1058_v13 = vmul.f32 %v2450_v45, %v811_v11  ;;  %v1084_v14 = vmul.f32 %v2450_v45, %v876_v12 }
 0x118   : > { %v1353_v31 = vmax.f32 %v1247_v20, 0.0  ;;  %v1325_v35 = vmax.f32 %v1219_v25, 0.0 }
 0x119   : > { %v1168_v18 = vadd.f32 %v2461_v49, %v1058_v13  ;;  %v1194_v19 = vadd.f32 %v2461_v49, %v1084_v14 }
 0x11b   : > { %v941_v21 = vpop.f32.mrf.mxu2  ;;  %v1274_v22 = vmax.f32 %v1168_v18, 0.0  ;;  %v1300_v23 = vmax.f32 %v1194_v19, 0.0  ;;  %v1011_v24 = vpop.f32.mrf.mxu3 }
 0x11c   : > { %v1110_v26 = vmul.f32 %v2450_v45, %v941_v21  ;;  %v1138_v27 = vmul.f32 %v2450_v45, %v1011_v24 }
 0x11d   : > { %v2013_v28 = vpack.c.bf16 %v1274_v22, %v1273_v16  ;;  %v2078_v29 = vpack.c.bf16 %v1300_v23, %v1299_v17 }
 0x11e   : > { %v1220_v30 = vadd.f32 %v2461_v49, %v1110_v26  ;;  %v1248_v32 = vadd.f32 %v2461_v49, %v1138_v27  ;;  %v814_v33 = vpop.f32.mrf.mxu0  ;;  %v879_v34 = vpop.f32.mrf.mxu1 }
 0x11f   : > { %2246 = vst [vmem:[%s2484_s10 + $0x38] sm:$0xff] %v2013_v28   ;;  %v1059_v38 = vmul.f32 %v2450_v45, %v814_v33  ;;  %v1085_v39 = vmul.f32 %v2450_v45, %v879_v34 }
 0x120   : > { %v1326_v36 = vmax.f32 %v1220_v30, 0.0  ;;  %2259 = vst [vmem:[%s2484_s10 + $0xa0] sm:$0xff] %v2078_v29   ;;  %v1354_v37 = vmax.f32 %v1248_v32, 0.0 }
 0x121   : > { %v1169_v44 = vadd.f32 %v2461_v49, %v1059_v38  ;;  %v1195_v46 = vadd.f32 %v2461_v49, %v1085_v39 }
 0x122   : > { %v2143_v40 = vpack.c.bf16 %v1326_v36, %v1325_v35  ;;  %v2213_v41 = vpack.c.bf16 %v1354_v37, %v1353_v31 }
 0x123   : > { %v944_v42 = vpop.f32.mrf.mxu2  ;;  %v1014_v43 = vpop.f32.mrf.mxu3  ;;  %v1275_v54 = vmax.f32 %v1169_v44, 0.0  ;;  %v1301_v55 = vmax.f32 %v1195_v46, 0.0 }
 0x124   : > { %2272 = vst [vmem:[%s2484_s10 + $0x108] sm:$0xff] %v2143_v40   ;;  %v1139_v47 = vmul.f32 %v2450_v45, %v1014_v43  ;;  %v1111_v53 = vmul.f32 %v2450_v45, %v944_v42 }
 0x125   : > { %2286 = vst [vmem:[%s2484_s10 + $0x178] sm:$0xff] %v2213_v41  }
 0x126   : > { %v816_v48 = vpop.f32.mrf.mxu0  ;;  %v881_v50 = vpop.f32.mrf.mxu1  ;;  %v1249_v58 = vadd.f32 %v2461_v49, %v1139_v47  ;;  %v1221_v63 = vadd.f32 %v2461_v49, %v1111_v53 }
 0x127   : > { %v1060_v51 = vmul.f32 %v2450_v45, %v816_v48  ;;  %v1086_v52 = vmul.f32 %v2450_v45, %v881_v50 }
 0x128   : > { %v1355_v5 = vmax.f32 %v1249_v58, 0.0  ;;  %v1327_v9 = vmax.f32 %v1221_v63, 0.0 }
 0x129   : > { %v1170_v56 = vadd.f32 %v2461_v49, %v1060_v51  ;;  %v1196_v57 = vadd.f32 %v2461_v49, %v1086_v52 }
 0x12b   : > { %v946_v59 = vpop.f32.mrf.mxu2  ;;  %v1276_v60 = vmax.f32 %v1170_v56, 0.0  ;;  %v1302_v61 = vmax.f32 %v1196_v57, 0.0  ;;  %v1016_v62 = vpop.f32.mrf.mxu3 }
 0x12c   : > { %v1112_v0 = vmul.f32 %v2450_v45, %v946_v59  ;;  %v1140_v1 = vmul.f32 %v2450_v45, %v1016_v62 }
 0x12d   : > { %v2018_v2 = vpack.c.bf16 %v1276_v60, %v1275_v54  ;;  %v2083_v3 = vpack.c.bf16 %v1302_v61, %v1301_v55 }
 0x12e   : > { %v1222_v4 = vadd.f32 %v2461_v49, %v1112_v0  ;;  %v1250_v6 = vadd.f32 %v2461_v49, %v1140_v1  ;;  %v819_v7 = vpop.f32.mrf.mxu0  ;;  %v884_v8 = vpop.f32.mrf.mxu1 }
 0x12f   : > { %2247 = vst [vmem:[%s2484_s10 + $0x40] sm:$0xff] %v2018_v2   ;;  %v1061_v12 = vmul.f32 %v2450_v45, %v819_v7  ;;  %v1087_v13 = vmul.f32 %v2450_v45, %v884_v8 }
 0x130   : > { %v1328_v10 = vmax.f32 %v1222_v4, 0.0  ;;  %2260 = vst [vmem:[%s2484_s10 + $0xa8] sm:$0xff] %v2083_v3   ;;  %v1356_v11 = vmax.f32 %v1250_v6, 0.0 }
 0x131   : > { %v1171_v18 = vadd.f32 %v2461_v49, %v1061_v12  ;;  %v1197_v19 = vadd.f32 %v2461_v49, %v1087_v13 }
 0x132   : > { %v2148_v14 = vpack.c.bf16 %v1328_v10, %v1327_v9  ;;  %v2218_v15 = vpack.c.bf16 %v1356_v11, %v1355_v5 }
 0x133   : > { %v949_v16 = vpop.f32.mrf.mxu2  ;;  %v1019_v17 = vpop.f32.mrf.mxu3  ;;  %v1277_v26 = vmax.f32 %v1171_v18, 0.0  ;;  %v1303_v27 = vmax.f32 %v1197_v19, 0.0 }
 0x134   : > { %2273 = vst [vmem:[%s2484_s10 + $0x110] sm:$0xff] %v2148_v14   ;;  %v1141_v20 = vmul.f32 %v2450_v45, %v1019_v17  ;;  %v1113_v25 = vmul.f32 %v2450_v45, %v949_v16 }
 0x135   : > { %2287 = vst [vmem:[%s2484_s10 + $0x180] sm:$0xff] %v2218_v15  }
 0x136   : > { %v821_v21 = vpop.f32.mrf.mxu0  ;;  %v886_v22 = vpop.f32.mrf.mxu1  ;;  %v1251_v30 = vadd.f32 %v2461_v49, %v1141_v20  ;;  %v1223_v35 = vadd.f32 %v2461_v49, %v1113_v25 }
 0x137   : > { %v1062_v23 = vmul.f32 %v2450_v45, %v821_v21  ;;  %v1088_v24 = vmul.f32 %v2450_v45, %v886_v22 }
 0x138   : > { %v1357_v41 = vmax.f32 %v1251_v30, 0.0  ;;  %v1329_v46 = vmax.f32 %v1223_v35, 0.0 }
 0x139   : > { %v1172_v28 = vadd.f32 %v2461_v49, %v1062_v23  ;;  %v1198_v29 = vadd.f32 %v2461_v49, %v1088_v24 }
 0x13b   : > { %v951_v31 = vpop.f32.mrf.mxu2  ;;  %v1278_v32 = vmax.f32 %v1172_v28, 0.0  ;;  %v1304_v33 = vmax.f32 %v1198_v29, 0.0  ;;  %v1021_v34 = vpop.f32.mrf.mxu3 }
 0x13c   : > { %v1114_v36 = vmul.f32 %v2450_v45, %v951_v31  ;;  %v1142_v37 = vmul.f32 %v2450_v45, %v1021_v34 }
 0x13d   : > { %v2023_v38 = vpack.c.bf16 %v1278_v32, %v1277_v26  ;;  %v2088_v39 = vpack.c.bf16 %v1304_v33, %v1303_v27 }
 0x13e   : > { %v1224_v40 = vadd.f32 %v2461_v49, %v1114_v36  ;;  %v1252_v42 = vadd.f32 %v2461_v49, %v1142_v37  ;;  %v824_v43 = vpop.f32.mrf.mxu0  ;;  %v889_v44 = vpop.f32.mrf.mxu1 }
 0x13f   : > { %2248 = vst [vmem:[%s2484_s10 + $0x48] sm:$0xff] %v2023_v38   ;;  %v1063_v50 = vmul.f32 %v2450_v45, %v824_v43  ;;  %v1089_v51 = vmul.f32 %v2450_v45, %v889_v44 }
 0x140   : > { %v1330_v47 = vmax.f32 %v1224_v40, 0.0  ;;  %2261 = vst [vmem:[%s2484_s10 + $0xb0] sm:$0xff] %v2088_v39   ;;  %v1358_v48 = vmax.f32 %v1252_v42, 0.0 }
 0x141   : > { %v1173_v56 = vadd.f32 %v2461_v49, %v1063_v50  ;;  %v1199_v57 = vadd.f32 %v2461_v49, %v1089_v51 }
 0x142   : > { %v2153_v52 = vpack.c.bf16 %v1330_v47, %v1329_v46  ;;  %v2223_v53 = vpack.c.bf16 %v1358_v48, %v1357_v41 }
 0x143   : > { %v954_v54 = vpop.f32.mrf.mxu2  ;;  %v1024_v55 = vpop.f32.mrf.mxu3  ;;  %v1279_v0 = vmax.f32 %v1173_v56, 0.0  ;;  %v1305_v1 = vmax.f32 %v1199_v57, 0.0 }
 0x144   : > { %2274 = vst [vmem:[%s2484_s10 + $0x118] sm:$0xff] %v2153_v52   ;;  %v1143_v58 = vmul.f32 %v2450_v45, %v1024_v55  ;;  %v1115_v63 = vmul.f32 %v2450_v45, %v954_v54 }
 0x145   : > { %2288 = vst [vmem:[%s2484_s10 + $0x188] sm:$0xff] %v2223_v53  }
 0x146   : > { %v826_v59 = vpop.f32.mrf.mxu0  ;;  %v891_v60 = vpop.f32.mrf.mxu1  ;;  %v1253_v4 = vadd.f32 %v2461_v49, %v1143_v58  ;;  %v1225_v9 = vadd.f32 %v2461_v49, %v1115_v63 }
 0x147   : > { %v1064_v61 = vmul.f32 %v2450_v45, %v826_v59  ;;  %v1090_v62 = vmul.f32 %v2450_v45, %v891_v60 }
 0x148   : > { %v1359_v15 = vmax.f32 %v1253_v4, 0.0  ;;  %v1331_v19 = vmax.f32 %v1225_v9, 0.0 }
 0x149   : > { %v1174_v2 = vadd.f32 %v2461_v49, %v1064_v61  ;;  %v1200_v3 = vadd.f32 %v2461_v49, %v1090_v62 }
 0x14b   : > { %v956_v5 = vpop.f32.mrf.mxu2  ;;  %v1280_v6 = vmax.f32 %v1174_v2, 0.0  ;;  %v1306_v7 = vmax.f32 %v1200_v3, 0.0  ;;  %v1026_v8 = vpop.f32.mrf.mxu3 }
 0x14c   : > { %v1116_v10 = vmul.f32 %v2450_v45, %v956_v5  ;;  %v1144_v11 = vmul.f32 %v2450_v45, %v1026_v8 }
 0x14d   : > { %v2028_v12 = vpack.c.bf16 %v1280_v6, %v1279_v0  ;;  %v2093_v13 = vpack.c.bf16 %v1306_v7, %v1305_v1 }
 0x14e   : > { %v1226_v14 = vadd.f32 %v2461_v49, %v1116_v10  ;;  %v1254_v16 = vadd.f32 %v2461_v49, %v1144_v11  ;;  %v829_v17 = vpop.f32.mrf.mxu0  ;;  %v894_v18 = vpop.f32.mrf.mxu1 }
 0x14f   : > { %2249 = vst [vmem:[%s2484_s10 + $0x50] sm:$0xff] %v2028_v12   ;;  %v1065_v22 = vmul.f32 %v2450_v45, %v829_v17  ;;  %v1091_v23 = vmul.f32 %v2450_v45, %v894_v18 }
 0x150   : > { %v1332_v20 = vmax.f32 %v1226_v14, 0.0  ;;  %2262 = vst [vmem:[%s2484_s10 + $0xb8] sm:$0xff] %v2093_v13   ;;  %v1360_v21 = vmax.f32 %v1254_v16, 0.0 }
 0x151   : > { %v1175_v28 = vadd.f32 %v2461_v49, %v1065_v22  ;;  %v1201_v29 = vadd.f32 %v2461_v49, %v1091_v23 }
 0x152   : > { %v2158_v24 = vpack.c.bf16 %v1332_v20, %v1331_v19  ;;  %v2228_v25 = vpack.c.bf16 %v1360_v21, %v1359_v15 }
 0x153   : > { %v959_v26 = vpop.f32.mrf.mxu2  ;;  %v1029_v27 = vpop.f32.mrf.mxu3  ;;  %v1281_v36 = vmax.f32 %v1175_v28, 0.0  ;;  %v1307_v37 = vmax.f32 %v1201_v29, 0.0 }
 0x154   : > { %2275 = vst [vmem:[%s2484_s10 + $0x120] sm:$0xff] %v2158_v24   ;;  %v1145_v30 = vmul.f32 %v2450_v45, %v1029_v27  ;;  %v1117_v35 = vmul.f32 %v2450_v45, %v959_v26 }
 0x155   : > { %2289 = vst [vmem:[%s2484_s10 + $0x190] sm:$0xff] %v2228_v25  }
 0x156   : > { %v831_v31 = vpop.f32.mrf.mxu0  ;;  %v896_v32 = vpop.f32.mrf.mxu1  ;;  %v1255_v40 = vadd.f32 %v2461_v49, %v1145_v30  ;;  %v1227_v46 = vadd.f32 %v2461_v49, %v1117_v35 }
 0x157   : > { %v1066_v33 = vmul.f32 %v2450_v45, %v831_v31  ;;  %v1092_v34 = vmul.f32 %v2450_v45, %v896_v32 }
 0x158   : > { %v1361_v53 = vmax.f32 %v1255_v40, 0.0  ;;  %v1333_v57 = vmax.f32 %v1227_v46, 0.0 }
 0x159   : > { %v1176_v38 = vadd.f32 %v2461_v49, %v1066_v33  ;;  %v1202_v39 = vadd.f32 %v2461_v49, %v1092_v34 }
 0x15b   : > { %v961_v41 = vpop.f32.mrf.mxu2  ;;  %v1282_v42 = vmax.f32 %v1176_v38, 0.0  ;;  %v1308_v43 = vmax.f32 %v1202_v39, 0.0  ;;  %v1031_v44 = vpop.f32.mrf.mxu3 }
 0x15c   : > { %v1118_v47 = vmul.f32 %v2450_v45, %v961_v41  ;;  %v1146_v48 = vmul.f32 %v2450_v45, %v1031_v44  ;;  %v2314_v45 = vld [vmem:[%s2758_s2] ss:$0 sm:$0xff] }
 0x15d   : > { %v2033_v50 = vpack.c.bf16 %v1282_v42, %v1281_v36  ;;  %v2098_v51 = vpack.c.bf16 %v1308_v43, %v1307_v37 }
 0x15e   : > { %v1228_v52 = vadd.f32 %v2461_v49, %v1118_v47  ;;  %v1256_v54 = vadd.f32 %v2461_v49, %v1146_v48  ;;  %v834_v55 = vpop.f32.mrf.mxu0  ;;  %v899_v56 = vpop.f32.mrf.mxu1  ;;  %v2315_v49 = vld [vmem:[%s2759_s3] ss:$0 sm:$0xff] }
 0x15f   : > { %2250 = vst [vmem:[%s2484_s10 + $0x58] sm:$0xff] %v2033_v50   ;;  %v1067_v60 = vmul.f32 %v2314_v45, %v834_v55  ;;  %v1093_v61 = vmul.f32 %v2314_v45, %v899_v56 }
 0x160   : > { %v1334_v58 = vmax.f32 %v1228_v52, 0.0  ;;  %2263 = vst [vmem:[%s2484_s10 + $0xc0] sm:$0xff] %v2098_v51   ;;  %v1362_v59 = vmax.f32 %v1256_v54, 0.0 }
 0x161   : > { %v1177_v2 = vadd.f32 %v2315_v49, %v1067_v60  ;;  %v1203_v3 = vadd.f32 %v2315_v49, %v1093_v61 }
 0x162   : > { %v2163_v62 = vpack.c.bf16 %v1334_v58, %v1333_v57  ;;  %v2233_v63 = vpack.c.bf16 %v1362_v59, %v1361_v53 }
 0x163   : > { %v964_v0 = vpop.f32.mrf.mxu2  ;;  %v1034_v1 = vpop.f32.mrf.mxu3  ;;  %v1283_v10 = vmax.f32 %v1177_v2, 0.0  ;;  %v1309_v11 = vmax.f32 %v1203_v3, 0.0 }
 0x164   : > { %2276 = vst [vmem:[%s2484_s10 + $0x128] sm:$0xff] %v2163_v62   ;;  %v1147_v4 = vmul.f32 %v2314_v45, %v1034_v1  ;;  %v1119_v9 = vmul.f32 %v2314_v45, %v964_v0 }
 0x165   : > { %2290 = vst [vmem:[%s2484_s10 + $0x198] sm:$0xff] %v2233_v63  }
 0x166   : > { %v836_v5 = vpop.f32.mrf.mxu0  ;;  %v901_v6 = vpop.f32.mrf.mxu1  ;;  %v1257_v14 = vadd.f32 %v2315_v49, %v1147_v4  ;;  %v1229_v19 = vadd.f32 %v2315_v49, %v1119_v9 }
 0x167   : > { %v1068_v7 = vmul.f32 %v2314_v45, %v836_v5  ;;  %v1094_v8 = vmul.f32 %v2314_v45, %v901_v6 }
 0x168   : > { %v1363_v25 = vmax.f32 %v1257_v14, 0.0  ;;  %v1335_v27 = vmax.f32 %v1229_v19, 0.0 }
 0x169   : > { %v1178_v12 = vadd.f32 %v2315_v49, %v1068_v7  ;;  %v1204_v13 = vadd.f32 %v2315_v49, %v1094_v8 }
 0x16b   : > { %v966_v15 = vpop.f32.mrf.mxu2  ;;  %v1284_v16 = vmax.f32 %v1178_v12, 0.0  ;;  %v1310_v17 = vmax.f32 %v1204_v13, 0.0  ;;  %v1036_v18 = vpop.f32.mrf.mxu3 }
 0x16c   : > { %v1120_v20 = vmul.f32 %v2314_v45, %v966_v15  ;;  %v1148_v21 = vmul.f32 %v2314_v45, %v1036_v18 }
 0x16d   : > { %v2038_v22 = vpack.c.bf16 %v1284_v16, %v1283_v10  ;;  %v2103_v23 = vpack.c.bf16 %v1310_v17, %v1309_v11 }
 0x16e   : > { %v1230_v24 = vadd.f32 %v2315_v49, %v1120_v20  ;;  %v1258_v26 = vadd.f32 %v2315_v49, %v1148_v21 }
 0x16f   : > { %2251 = vst [vmem:[%s2484_s10 + $0x60] sm:$0xff] %v2038_v22  }
 0x170   : > { %v1336_v28 = vmax.f32 %v1230_v24, 0.0  ;;  %2264 = vst [vmem:[%s2484_s10 + $0xc8] sm:$0xff] %v2103_v23   ;;  %v1364_v29 = vmax.f32 %v1258_v26, 0.0 }
 0x172   : > { %v2168_v30 = vpack.c.bf16 %v1336_v28, %v1335_v27  ;;  %v2238_v31 = vpack.c.bf16 %v1364_v29, %v1363_v25 }
 0x173   : > { %v969_v32 = vpop.f32.mrf.mxu2 }
 0x174   : > { %2277 = vst [vmem:[%s2484_s10 + $0x130] sm:$0xff] %v2168_v30   ;;  %v1121_v33 = vmul.f32 %v2314_v45, %v969_v32 }
 0x175   : > { %2291 = vst [vmem:[%s2484_s10 + $0x1a0] sm:$0xff] %v2238_v31  }
 0x176   : > { %v1231_v35 = vadd.f32 %v2315_v49, %v1121_v33 }
 0x178   : > { %v1337_v38 = vmax.f32 %v1231_v35, 0.0 }
 0x17b   : > { %v971_v34 = vpop.f32.mrf.mxu2 }
 0x17c   : > { %v1122_v36 = vmul.f32 %v2314_v45, %v971_v34 }
 0x17e   : > { %v1232_v37 = vadd.f32 %v2315_v49, %v1122_v36 }
 0x180   : > { %v1338_v39 = vmax.f32 %v1232_v37, 0.0 }
 0x182   : > { %v2173_v40 = vpack.c.bf16 %v1338_v39, %v1337_v38 }
 0x184   : > { %2278 = vst [vmem:[%s2484_s10 + $0x138] sm:$0xff] %v2173_v40  }
 0x185 PF: > { %s14_s15 = sadd.s32 1, %s2322_s15  }
 0x186   : > { %p11_p4 = scmp.ge.s32.totalorder %s14_s15, 7  }
 0x188   :  { %13 = sbr.rel (!%p11_p4) target bundleno = 1 (0x1), region = 66 }

// kernel: re_vision_eresnet_forward.7
= control target key start
LH: loop header
LB: loop body
LE: loop exit
PB: predicated region body
PF: predicated region fallthrough
CT: control target
= control target key end

     0   :  { %s3627_s15 = smov 0   ;;  %s4231_s0 = inlined_call_operand.vmem [shape: bf16[1072,432], index: 0, kind: input, shape index: {}]   ;;  %s4232_s1 = inlined_call_operand.vmem [shape: bf16[432,128], index: 1, kind: input, shape index: {}]   ;;  %s4233_s2 = inlined_call_operand.vmem [shape: f32[1,128], index: 2, kind: input, shape index: {}]   ;;  %s4234_s3 = inlined_call_operand.vmem [shape: f32[1,128], index: 3, kind: input, shape index: {}]   ;;  %s4235_s4 = inlined_call_operand.vmem [shape: bf16[1072,128], index: 4, kind: output, shape index: {}]  }
   0x1 LB: > { %s2543_s16 = sadd.s32 4294967295, %s3600_s15   ;;  %p2547_p0 = scmp.ge.s32.totalorder %s3600_s15, 1  ;;  %s3600_s15 = sphi %s3627_s15, %s14_s15  }
   0x2   : > { %p164_p1 = scmp.lt.s32.totalorder %s3600_s15, 3 }
   0x4   : > { %p165_p2 = pnand %p2547_p0, %p164_p1 }
   0x5   : > { %s191_s23 = smul.u32 (!%p165_p2), 67, %s2543_s16 }
   0x6   : > { %168 = sbr.rel (%p165_p2) target bundleno = 719 (0x2cf), region = 36 }
   0x7   : > { %p192_p3 = scmp.lt.s32.totalorder (!%p165_p2), %s191_s23, 133 }
   0xb   : > { %v3363_v0 = vld [vmem:[%s4232_s1 + $0x38] sm:$0xff]  ;;  %v3362_v3 = vld [vmem:[%s4232_s1 + $0x30] sm:$0xff]  ;;  %s4237_s23 = smov (!%p192_p3, %s191_s23), 133  ;;  %v3361_v7 = vld [vmem:[%s4232_s1 + $0x28] sm:$0xff]  ;;  %vm1195_vm0 = vcmask 392192  }
   0xc   : > { %v3371_v1 = vld [vmem:[%s4232_s1 + $0x78] sm:$0xff]  ;;  %1298 = vmatpush.bf16.msra.mxu0 %v3363_v0  ;;  %v3370_v4 = vld [vmem:[%s4232_s1 + $0x70] sm:$0xff]  ;;  %v3369_v8 = vld [vmem:[%s4232_s1 + $0x68] sm:$0xff]  ;;  %s3223_s10 = sshll.u32 %s4237_s23, 4  ;;  %s2550_s7 = sshll.u32 %s4237_s23, 2 }
   0xd   : > { %v3379_v2 = vld [vmem:[%s4232_s1 + $0xb8] sm:$0xff]  ;;  %1476 = vmatpush.bf16.msra.mxu1 %v3371_v1  ;;  %v3378_v5 = vld [vmem:[%s4232_s1 + $0xb0] sm:$0xff]  ;;  %v3377_v9 = vld [vmem:[%s4232_s1 + $0xa8] sm:$0xff]  ;;  %s3674_s18 = scalar_lea.vmem %s4231_s0, %s3223_s10  ;;  %s3835_s10 = scalar_lea.vmem %s4235_s4, %s2550_s7 }
   0xe   : > { %1654 = vmatpush.bf16.msra.mxu2 %v3379_v2  ;;  %v3382_v6 = vld [vmem:[%s4232_s1 + $0xd0] sm:$0xff]  ;;  %v3381_v10 = vld [vmem:[%s4232_s1 + $0xc8] sm:$0xff]  ;;  %v3360_v11 = vld [vmem:[%s4232_s1 + $0x20] sm:$0xff] }
   0xf   : > { %1837 = vmatpush.bf16.msra.mxu3 %v3382_v6  ;;  %v3368_v12 = vld [vmem:[%s4232_s1 + $0x60] sm:$0xff]  ;;  %v3225_v15 = vld [vmem:[%s3674_s18 + $0xc] sm:$0xf]  ;;  %v2563_v16 = vld [vmem:[%s3674_s18 + $0x18] sm:$0xf0] }
  0x10   : > { %1299 = vmatpush.bf16.msra.mxu0 %v3362_v3  ;;  %v3376_v13 = vld [vmem:[%s4232_s1 + $0xa0] sm:$0xff]  ;;  %v3359_v17 = vld [vmem:[%s4232_s1 + $0x18] sm:$0xff]  ;;  %v2566_v20 = vor.u32 %v3225_v15, %v2563_v16  ;;  %v3358_v21 = vld [vmem:[%s4232_s1 + $0x10] sm:$0xff] }
  0x11   : > { %1477 = vmatpush.bf16.msra.mxu1 %v3370_v4  ;;  %v3380_v14 = vld [vmem:[%s4232_s1 + $0xc0] sm:$0xff]  ;;  %v3367_v18 = vld [vmem:[%s4232_s1 + $0x58] sm:$0xff]  ;;  %v3366_v22 = vld [vmem:[%s4232_s1 + $0x50] sm:$0xff] }
  0x12   : > { %1655 = vmatpush.bf16.msra.mxu2 %v3378_v5  ;;  %v3375_v19 = vld [vmem:[%s4232_s1 + $0x98] sm:$0xff]  ;;  %v3374_v23 = vld [vmem:[%s4232_s1 + $0x90] sm:$0xff]  ;;  %v3357_v24 = vld [vmem:[%s4232_s1 + $0x8] sm:$0xff] }
  0x13   : > { %1838 = vmatpush.bf16.msra.mxu3 %v3381_v10  ;;  %v3365_v25 = vld [vmem:[%s4232_s1 + $0x48] sm:$0xff]  ;;  %v3356_v27 = vld [vmem:[%s4232_s1] sm:$0xff]  ;;  %v3226_v30 = vld [vmem:[%s3674_s18 + $0xc] sm:$0xf0] }
  0x14   : > { %1300 = vmatpush.bf16.msra.mxu0 %v3361_v7  ;;  %v3373_v26 = vld [vmem:[%s4232_s1 + $0x88] sm:$0xff]  ;;  %v3364_v28 = vld [vmem:[%s4232_s1 + $0x40] sm:$0xff]  ;;  %v2555_v32 = vld [vmem:[%s3674_s18 + $0x10] sm:$0xf0] }
  0x15   : > { %1478 = vmatpush.bf16.msra.mxu1 %v3369_v8  ;;  %v2553_v29 = vld [vmem:[%s3674_s18] sm:$0xf]  ;;  %v3224_v31 = vld [vmem:[%s3674_s18 + $0x4] sm:$0xf]  ;;  %v2561_v34 = vld [vmem:[%s3674_s18 + $0x8] sm:$0xf] }
  0x16   : > { %1656 = vmatpush.bf16.msra.mxu2 %v3377_v9  ;;  %v3372_v33 = vld [vmem:[%s4232_s1 + $0x80] sm:$0xff]  ;;  %v3227_v35 = vld [vmem:[%s3674_s18 + $0x14] sm:$0xf0]  ;;  %v3229_v36 = vld [vmem:[%s3674_s18 + $0x2c] sm:$0xf]  ;;  %v2554_v38 = vor.u32 %v3226_v30, %v2553_v29  ;;  %v2558_v39 = vor.u32 %v3224_v31, %v2555_v32 }
  0x17   : > { %1839 = vmatpush.bf16.msra.mxu3 %v3380_v14  ;;  %v2579_v37 = vld [vmem:[%s3674_s18 + $0x38] sm:$0xf0]  ;;  %v2562_v40 = vor.u32 %v3227_v35, %v2561_v34  ;;  %v2569_v42 = vld [vmem:[%s3674_s18 + $0x20] sm:$0xf]  ;;  %v3230_v43 = vld [vmem:[%s3674_s18 + $0x2c] sm:$0xf0] }
  0x18   : > { %1301 = vmatpush.bf16.msra.mxu0 %v3360_v11  ;;  %v2582_v41 = vor.u32 %v3229_v36, %v2579_v37  ;;  %v3228_v44 = vld [vmem:[%s3674_s18 + $0x24] sm:$0xf]  ;;  %v2571_v45 = vld [vmem:[%s3674_s18 + $0x30] sm:$0xf0]  ;;  %v2577_v46 = vld [vmem:[%s3674_s18 + $0x28] sm:$0xf]  ;;  %v2570_v50 = vor.u32 %v3230_v43, %v2569_v42 }
  0x19   : > { %1479 = vmatpush.bf16.msra.mxu1 %v3368_v12  ;;  %v3231_v47 = vld [vmem:[%s3674_s18 + $0x34] sm:$0xf0]  ;;  %v3233_v48 = vld [vmem:[%s3674_s18 + $0x4c] sm:$0xf]  ;;  %v2595_v49 = vld [vmem:[%s3674_s18 + $0x58] sm:$0xf0]  ;;  %v2574_v51 = vor.u32 %v3228_v44, %v2571_v45 }
  0x1a   : > { %1657 = vmatpush.bf16.msra.mxu2 %v3376_v13  ;;  %3187 = vmatmul.msk.bf16.vlgmr.msra.gmra.mxu3 %vm1195_vm0, %v2566_v20  ;;  %v2578_v52 = vor.u32 %v3231_v47, %v2577_v46  ;;  %v2598_v53 = vor.u32 %v3233_v48, %v2595_v49  ;;  %v2585_v54 = vld [vmem:[%s3674_s18 + $0x40] sm:$0xf]  ;;  %v3234_v55 = vld [vmem:[%s3674_s18 + $0x4c] sm:$0xf0]  ;;  %v3232_v56 = vld [vmem:[%s3674_s18 + $0x44] sm:$0xf] }
  0x1b   : > { %v2587_v57 = vld [vmem:[%s3674_s18 + $0x50] sm:$0xf0]  ;;  %v2593_v58 = vld [vmem:[%s3674_s18 + $0x48] sm:$0xf]  ;;  %v3235_v59 = vld [vmem:[%s3674_s18 + $0x54] sm:$0xf0]  ;;  %v2586_v62 = vor.u32 %v3234_v55, %v2585_v54 }
  0x1c   : > { %1302 = vmatpush.bf16.msra.mxu0 %v3359_v17  ;;  %v3237_v60 = vld [vmem:[%s3674_s18 + $0x6c] sm:$0xf]  ;;  %v2611_v61 = vld [vmem:[%s3674_s18 + $0x78] sm:$0xf0]  ;;  %v2590_v63 = vor.u32 %v3232_v56, %v2587_v57  ;;  %v2594_v0 = vor.u32 %v3235_v59, %v2593_v58  ;;  %v2601_v2 = vld [vmem:[%s3674_s18 + $0x60] sm:$0xf] }
  0x1d   : > { %1480 = vmatpush.bf16.msra.mxu1 %v3367_v18  ;;  %v2614_v1 = vor.u32 %v3237_v60, %v2611_v61  ;;  %v3238_v3 = vld [vmem:[%s3674_s18 + $0x6c] sm:$0xf0]  ;;  %v3236_v4 = vld [vmem:[%s3674_s18 + $0x64] sm:$0xf]  ;;  %v2603_v5 = vld [vmem:[%s3674_s18 + $0x70] sm:$0xf0] }
  0x1e   : > { %1658 = vmatpush.bf16.msra.mxu2 %v3375_v19  ;;  %v2609_v6 = vld [vmem:[%s3674_s18 + $0x68] sm:$0xf]  ;;  %v3239_v7 = vld [vmem:[%s3674_s18 + $0x74] sm:$0xf0]  ;;  %v3241_v8 = vld [vmem:[%s3674_s18 + $0x8c] sm:$0xf]  ;;  %v2602_v10 = vor.u32 %v3238_v3, %v2601_v2  ;;  %v2606_v11 = vor.u32 %v3236_v4, %v2603_v5 }
  0x1f   : > { %v2627_v9 = vld [vmem:[%s3674_s18 + $0x98] sm:$0xf0]  ;;  %v2610_v12 = vor.u32 %v3239_v7, %v2609_v6  ;;  %v2617_v14 = vld [vmem:[%s3674_s18 + $0x80] sm:$0xf]  ;;  %v3242_v15 = vld [vmem:[%s3674_s18 + $0x8c] sm:$0xf0] }
  0x20   : > { %1303 = vmatpush.bf16.msra.mxu0 %v3358_v21  ;;  %v2630_v13 = vor.u32 %v3241_v8, %v2627_v9  ;;  %v3240_v16 = vld [vmem:[%s3674_s18 + $0x84] sm:$0xf]  ;;  %v2619_v17 = vld [vmem:[%s3674_s18 + $0x90] sm:$0xf0]  ;;  %v2625_v18 = vld [vmem:[%s3674_s18 + $0x88] sm:$0xf] }
  0x21   : > { %1481 = vmatpush.bf16.msra.mxu1 %v3366_v22  ;;  %v3243_v19 = vld [vmem:[%s3674_s18 + $0x94] sm:$0xf0]  ;;  %v3245_v20 = vld [vmem:[%s3674_s18 + $0xac] sm:$0xf]  ;;  %v2643_v21 = vld [vmem:[%s3674_s18 + $0xb8] sm:$0xf0]  ;;  %v2618_v22 = vor.u32 %v3242_v15, %v2617_v14 }
  0x22   : > { %1659 = vmatpush.bf16.msra.mxu2 %v3374_v23  ;;  %v2622_v23 = vor.u32 %v3240_v16, %v2619_v17  ;;  %v2635_v29 = vld [vmem:[%s3674_s18 + $0xb0] sm:$0xf0]  ;;  %v2641_v30 = vld [vmem:[%s3674_s18 + $0xa8] sm:$0xf]  ;;  %v3247_v31 = vld [vmem:[%s3674_s18 + $0xb4] sm:$0xf0] }
  0x23   : > { %v3249_v32 = vld [vmem:[%s3674_s18 + $0xcc] sm:$0xf]  ;;  %v2642_v36 = vor.u32 %v3247_v31, %v2641_v30  ;;  %v2657_v42 = vld [vmem:[%s3674_s18 + $0xc8] sm:$0xf]  ;;  %v3251_v43 = vld [vmem:[%s3674_s18 + $0xd4] sm:$0xf0] }
  0x24   : > { %1304 = vmatpush.bf16.msra.mxu0 %v3357_v24  ;;  %v2626_v24 = vor.u32 %v3243_v19, %v2625_v18  ;;  %v3253_v44 = vld [vmem:[%s3674_s18 + $0xec] sm:$0xf]  ;;  %v2675_v45 = vld [vmem:[%s3674_s18 + $0xf8] sm:$0xf0]  ;;  %v2658_v48 = vor.u32 %v3251_v43, %v2657_v42  ;;  %v2673_v54 = vld [vmem:[%s3674_s18 + $0xe8] sm:$0xf] }
  0x25   : > { %1482 = vmatpush.bf16.msra.mxu1 %v3365_v25  ;;  %v2646_v25 = vor.u32 %v3245_v20, %v2643_v21  ;;  %v2678_v49 = vor.u32 %v3253_v44, %v2675_v45  ;;  %v3255_v55 = vld [vmem:[%s3674_s18 + $0xf4] sm:$0xf0]  ;;  %v3257_v56 = vld [vmem:[%s3674_s18 + $0x10c] sm:$0xf]  ;;  %v2691_v57 = vld [vmem:[%s3674_s18 + $0x118] sm:$0xf0] }
  0x26   : > { %1660 = vmatpush.bf16.msra.mxu2 %v3373_v26  ;;  %v2633_v26 = vld [vmem:[%s3674_s18 + $0xa0] sm:$0xf]  ;;  %v2674_v60 = vor.u32 %v3255_v55, %v2673_v54  ;;  %v2694_v61 = vor.u32 %v3257_v56, %v2691_v57  ;;  %v2683_v2 = vld [vmem:[%s3674_s18 + $0x110] sm:$0xf0]  ;;  %v2689_v3 = vld [vmem:[%s3674_s18 + $0x108] sm:$0xf] }
  0x27   : > { %v3259_v4 = vld [vmem:[%s3674_s18 + $0x114] sm:$0xf0]  ;;  %v3261_v5 = vld [vmem:[%s3674_s18 + $0x12c] sm:$0xf]  ;;  %v2707_v6 = vld [vmem:[%s3674_s18 + $0x138] sm:$0xf0] }
  0x28   : > { %1305 = vmatpush.bf16.msra.mxu0 %v3356_v27  ;;  %v3246_v27 = vld [vmem:[%s3674_s18 + $0xac] sm:$0xf0]  ;;  %v3811_v21 = vld [vmem:[%s4233_s2] ss:$0 sm:$0xff]  ;;  %v3265_v31 = vld [vmem:[%s3674_s18 + $0x14c] sm:$0xf] }
  0x29   : > { %1483 = vmatpush.bf16.msra.mxu1 %v3364_v28  ;;  %v3244_v28 = vld [vmem:[%s3674_s18 + $0xa4] sm:$0xf]  ;;  %v2634_v34 = vor.u32 %v3246_v27, %v2633_v26  ;;  %v2705_v26 = vld [vmem:[%s3674_s18 + $0x128] sm:$0xf]  ;;  %v3263_v27 = vld [vmem:[%s3674_s18 + $0x134] sm:$0xf0] }
  0x2a   : > { %1661 = vmatpush.bf16.msra.mxu2 %v3372_v33  ;;  %3188 = vmatmul.msk.bf16.gmra.mxu3 %vm1195_vm0, %v2582_v41  ;;  %v2659_v33 = vld [vmem:[%s3674_s18 + $0xd8] sm:$0xf0]  ;;  %v2638_v35 = vor.u32 %v3244_v28, %v2635_v29  ;;  %v2651_v41 = vld [vmem:[%s3674_s18 + $0xd0] sm:$0xf0]  ;;  %v3823_v29 = vld [vmem:[%s4234_s3] ss:$0 sm:$0xff] }
  0x2b   : > { %1306 = vmatmul.bf16.vlgmr.msra.gmra.mxu0 %v2554_v38  ;;  %v2662_v37 = vor.u32 %v3249_v32, %v2659_v33  ;;  %v2649_v38 = vld [vmem:[%s3674_s18 + $0xc0] sm:$0xf]  ;;  %v2723_v32 = vld [vmem:[%s3674_s18 + $0x158] sm:$0xf0] }
  0x2c   : > { %1484 = vmatmul.bf16.vlgmr.msra.gmra.mxu1 %v2558_v39  ;;  %v3250_v39 = vld [vmem:[%s3674_s18 + $0xcc] sm:$0xf0] }
  0x2d   : > { %1662 = vmatmul.bf16.vlgmr.msra.gmra.mxu2 %v2562_v40  ;;  %v3248_v40 = vld [vmem:[%s3674_s18 + $0xc4] sm:$0xf]  ;;  %v2650_v46 = vor.u32 %v3250_v39, %v2649_v38  ;;  %v2706_v39 = vor.u32 %v3263_v27, %v2705_v26 }
  0x2e   : > { %v2654_v47 = vor.u32 %v3248_v40, %v2651_v41  ;;  %v2726_v41 = vor.u32 %v3265_v31, %v2723_v32  ;;  %v2729_v31 = vld [vmem:[%s3674_s18 + $0x160] sm:$0xf]  ;;  %v3270_v32 = vld [vmem:[%s3674_s18 + $0x16c] sm:$0xf0] }
  0x3a   : > { %3189 = vmatmul.msk.bf16.gmra.mxu3 %vm1195_vm0, %v2598_v53  ;;  %v2667_v53 = vld [vmem:[%s3674_s18 + $0xf0] sm:$0xf0] }
  0x3b   : > { %1311 = vmatmul.bf16.gmra.mxu0 %v2570_v50  ;;  %v2665_v50 = vld [vmem:[%s3674_s18 + $0xe0] sm:$0xf] }
  0x3c   : > { %1489 = vmatmul.bf16.gmra.mxu1 %v2574_v51  ;;  %v3254_v51 = vld [vmem:[%s3674_s18 + $0xec] sm:$0xf0] }
  0x3d   : > { %1667 = vmatmul.bf16.gmra.mxu2 %v2578_v52  ;;  %v3252_v52 = vld [vmem:[%s3674_s18 + $0xe4] sm:$0xf]  ;;  %v2666_v58 = vor.u32 %v3254_v51, %v2665_v50 }
  0x3e   : > { %v2670_v59 = vor.u32 %v3252_v52, %v2667_v53 }
  0x4a   : > { %3190 = vmatmul.msk.bf16.gmra.mxu3 %vm1195_vm0, %v2614_v1  ;;  %v3256_v1 = vld [vmem:[%s3674_s18 + $0x104] sm:$0xf] }
  0x4b   : > { %1316 = vmatmul.bf16.gmra.mxu0 %v2586_v62  ;;  %v2686_v8 = vor.u32 %v3256_v1, %v2683_v2  ;;  %v3269_v2 = vld [vmem:[%s3674_s18 + $0x16c] sm:$0xf] }
  0x4c   : > { %1494 = vmatmul.bf16.gmra.mxu1 %v2590_v63  ;;  %v2681_v63 = vld [vmem:[%s3674_s18 + $0x100] sm:$0xf] }
  0x4d   : > { %1672 = vmatmul.bf16.gmra.mxu2 %v2594_v0  ;;  %v3258_v0 = vld [vmem:[%s3674_s18 + $0x10c] sm:$0xf0] }
  0x4e   : > { %v2682_v7 = vor.u32 %v3258_v0, %v2681_v63  ;;  %v3267_v63 = vld [vmem:[%s3674_s18 + $0x154] sm:$0xf0] }
  0x5a   : > { %3191 = vmatmul.msk.bf16.gmra.mxu3 %vm1195_vm0, %v2630_v13  ;;  %v2710_v13 = vor.u32 %v3261_v5, %v2707_v6 }
  0x5b   : > { %1321 = vmatmul.bf16.gmra.mxu0 %v2602_v10 }
  0x5c   : > { %1499 = vmatmul.bf16.gmra.mxu1 %v2606_v11  ;;  %v2690_v11 = vor.u32 %v3259_v4, %v2689_v3  ;;  %v2739_v3 = vld [vmem:[%s3674_s18 + $0x178] sm:$0xf0] }
  0x5d   : > { %1677 = vmatmul.bf16.gmra.mxu2 %v2610_v12 }
  0x6a   : > { %3192 = vmatmul.msk.bf16.gmra.mxu3 %vm1195_vm0, %v2646_v25  ;;  %v2699_v25 = vld [vmem:[%s3674_s18 + $0x130] sm:$0xf0] }
  0x6b   : > { %1326 = vmatmul.bf16.gmra.mxu0 %v2618_v22  ;;  %v2697_v22 = vld [vmem:[%s3674_s18 + $0x120] sm:$0xf] }
  0x6c   : > { %1504 = vmatmul.bf16.gmra.mxu1 %v2622_v23  ;;  %v3262_v23 = vld [vmem:[%s3674_s18 + $0x12c] sm:$0xf0] }
  0x6d   : > { %1682 = vmatmul.bf16.gmra.mxu2 %v2626_v24  ;;  %v3260_v24 = vld [vmem:[%s3674_s18 + $0x124] sm:$0xf] }
  0x7a   : > { %3193 = vmatmul.msk.bf16.gmra.mxu3 %vm1195_vm0, %v2662_v37 }
  0x7b   : > { %1331 = vmatmul.bf16.gmra.mxu0 %v2634_v34  ;;  %v2698_v34 = vor.u32 %v3262_v23, %v2697_v22 }
  0x7c   : > { %1509 = vmatmul.bf16.gmra.mxu1 %v2638_v35  ;;  %v2702_v35 = vor.u32 %v3260_v24, %v2699_v25 }
  0x7d   : > { %1687 = vmatmul.bf16.gmra.mxu2 %v2642_v36 }
  0x8a   : > { %3194 = vmatmul.msk.bf16.gmra.mxu3 %vm1195_vm0, %v2678_v49 }
  0x8b   : > { %1336 = vmatmul.bf16.gmra.mxu0 %v2650_v46 }
  0x8c   : > { %1514 = vmatmul.bf16.gmra.mxu1 %v2654_v47 }
  0x8d   : > { %1692 = vmatmul.bf16.gmra.mxu2 %v2658_v48 }
  0x9a   : > { %3195 = vmatmul.msk.bf16.gmra.mxu3 %vm1195_vm0, %v2694_v61  ;;  %v2715_v61 = vld [vmem:[%s3674_s18 + $0x150] sm:$0xf0] }
  0x9b   : > { %1341 = vmatmul.bf16.gmra.mxu0 %v2666_v58  ;;  %v2713_v58 = vld [vmem:[%s3674_s18 + $0x140] sm:$0xf] }
  0x9c   : > { %1519 = vmatmul.bf16.gmra.mxu1 %v2670_v59  ;;  %v3266_v59 = vld [vmem:[%s3674_s18 + $0x14c] sm:$0xf0] }
  0x9d   : > { %1697 = vmatmul.bf16.gmra.mxu2 %v2674_v60  ;;  %v1841_v62 = vpop.f32.mrf.mxu3  ;;  %v3264_v60 = vld [vmem:[%s3674_s18 + $0x144] sm:$0xf]  ;;  %v2714_v5 = vor.u32 %v3266_v59, %v2713_v58 }
  0x9e   : > { %v2718_v6 = vor.u32 %v3264_v60, %v2715_v61 }
  0xa5   : > { %v1843_v12 = vpop.f32.mrf.mxu3 }
  0xa8   : > { %v1307_v9 = vpop.f32.mrf.mxu0 }
  0xa9   : > { %v1485_v10 = vpop.f32.mrf.mxu1 }
  0xaa   : > { %v1486_v14 = vadd.f32 %v1485_v10, %v1307_v9  ;;  %3196 = vmatmul.msk.bf16.gmra.mxu3 %vm1195_vm0, %v2710_v13 }
  0xab   : > { %1346 = vmatmul.bf16.gmra.mxu0 %v2682_v7 }
  0xac   : > { %1524 = vmatmul.bf16.gmra.mxu1 %v2686_v8 }
  0xad   : > { %1702 = vmatmul.bf16.gmra.mxu2 %v2690_v11  ;;  %v1846_v19 = vpop.f32.mrf.mxu3 }
  0xb0   : > { %v1663_v15 = vpop.f32.mrf.mxu2  ;;  %v1309_v17 = vpop.f32.mrf.mxu0 }
  0xb1   : > { %v1664_v16 = vadd.f32 %v1663_v15, %v1486_v14  ;;  %v1487_v18 = vpop.f32.mrf.mxu1 }
  0xb2   : > { %v1488_v30 = vadd.f32 %v1487_v18, %v1309_v17 }
  0xb3   : > { %v1842_v20 = vadd.f32 %v1841_v62, %v1664_v16  ;;  %v2721_v62 = vld [vmem:[%s3674_s18 + $0x148] sm:$0xf] }
  0xb4   : > { %v2722_v10 = vor.u32 %v3267_v63, %v2721_v62 }
  0xb5   : > { %v2014_v28 = vmul.f32 %v3811_v21, %v1842_v20  ;;  %v1848_v40 = vpop.f32.mrf.mxu3 }
  0xb7   : > { %v2085_v42 = vadd.f32 %v3823_v29, %v2014_v28 }
  0xb8   : > { %v1665_v33 = vpop.f32.mrf.mxu2  ;;  %v1312_v37 = vpop.f32.mrf.mxu0 }
  0xb9   : > { %v1666_v36 = vadd.f32 %v1665_v33, %v1488_v30  ;;  %v1490_v38 = vpop.f32.mrf.mxu1  ;;  %v2219_v46 = vmul.f32 0.01, %v2085_v42  ;;  %vm2152_vm1 = vcmp.gt.f32.partialorder %v2085_v42, 0.0  ;;  %v3268_v33 = vld [vmem:[%s3674_s18 + $0x164] sm:$0xf] }
  0xba   : > { %v1491_v45 = vadd.f32 %v1490_v38, %v1312_v37  ;;  %3197 = vmatmul.msk.bf16.gmra.mxu3 %vm1195_vm0, %v2726_v41 }
  0xbb   : > { %v1844_v43 = vadd.f32 %v1843_v12, %v1666_v36  ;;  %1351 = vmatmul.bf16.gmra.mxu0 %v2698_v34  ;;  %v2286_v54 = vsel %vm2152_vm1, %v2085_v42, %v2219_v46  ;;  %v2742_v12 = vor.u32 %v3269_v2, %v2739_v3  ;;  %v2731_v34 = vld [vmem:[%s3674_s18 + $0x170] sm:$0xf0]  ;;  %v3271_v36 = vld [vmem:[%s3674_s18 + $0x174] sm:$0xf0]  ;;  %v2730_v42 = vor.u32 %v3270_v32, %v2729_v31  ;;  %v2745_v2 = vld [vmem:[%s3674_s18 + $0x180] sm:$0xf] }
  0xbc   : > { %1529 = vmatmul.bf16.gmra.mxu1 %v2702_v35  ;;  %v2737_v35 = vld [vmem:[%s3674_s18 + $0x168] sm:$0xf]  ;;  %v3274_v3 = vld [vmem:[%s3674_s18 + $0x18c] sm:$0xf0] }
  0xbd   : > { %v2015_v44 = vmul.f32 %v3811_v21, %v1844_v43  ;;  %1707 = vmatmul.bf16.gmra.mxu2 %v2706_v39  ;;  %v1851_v53 = vpop.f32.mrf.mxu3  ;;  %v3273_v39 = vld [vmem:[%s3674_s18 + $0x18c] sm:$0xf]  ;;  %v2734_v43 = vor.u32 %v3268_v33, %v2731_v34 }
  0xbf   : > { %v2086_v47 = vadd.f32 %v3823_v29, %v2015_v44 }
  0xc0   : > { %v1668_v48 = vpop.f32.mrf.mxu2  ;;  %v1314_v51 = vpop.f32.mrf.mxu0 }
  0xc1   : > { %vm2153_vm2 = vcmp.gt.f32.partialorder %v2086_v47, 0.0  ;;  %v2220_v49 = vmul.f32 0.01, %v2086_v47  ;;  %v1669_v50 = vadd.f32 %v1668_v48, %v1491_v45  ;;  %v1492_v52 = vpop.f32.mrf.mxu1 }
  0xc2   : > { %v1493_v1 = vadd.f32 %v1492_v52, %v1314_v51 }
  0xc3   : > { %v2287_v55 = vsel %vm2153_vm2, %v2086_v47, %v2220_v49  ;;  %v1847_v56 = vadd.f32 %v1846_v19, %v1669_v50  ;;  %v2738_v47 = vor.u32 %v3271_v36, %v2737_v35 }
  0xc4   : > { %v3386_v57 = vpack.c.bf16 %v2287_v55, %v2286_v54 }
  0xc5   : > { %v2016_v0 = vmul.f32 %v3811_v21, %v1847_v56  ;;  %v1853_v11 = vpop.f32.mrf.mxu3 }
  0xc6   : > { %3387 = vst [vmem:[%s3835_s10] sm:$0xff] %v3386_v57  }
  0xc7   : > { %v2087_v13 = vadd.f32 %v3823_v29, %v2016_v0 }
  0xc8   : > { %v1670_v4 = vpop.f32.mrf.mxu2  ;;  %v1317_v8 = vpop.f32.mrf.mxu0 }
  0xc9   : > { %v1671_v7 = vadd.f32 %v1670_v4, %v1493_v1  ;;  %v1495_v9 = vpop.f32.mrf.mxu1  ;;  %v2221_v17 = vmul.f32 0.01, %v2087_v13  ;;  %vm2154_vm3 = vcmp.gt.f32.partialorder %v2087_v13, 0.0  ;;  %v3272_v4 = vld [vmem:[%s3674_s18 + $0x184] sm:$0xf] }
  0xca   : > { %v1496_v16 = vadd.f32 %v1495_v9, %v1317_v8  ;;  %3198 = vmatmul.msk.bf16.gmra.mxu3 %vm1195_vm0, %v2742_v12 }
  0xcb   : > { %v1849_v14 = vadd.f32 %v1848_v40, %v1671_v7  ;;  %1356 = vmatmul.bf16.gmra.mxu0 %v2714_v5  ;;  %v2288_v26 = vsel %vm2154_vm3, %v2087_v13, %v2221_v17  ;;  %v2755_v40 = vld [vmem:[%s3674_s18 + $0x198] sm:$0xf0]  ;;  %v2747_v5 = vld [vmem:[%s3674_s18 + $0x190] sm:$0xf0]  ;;  %v3275_v7 = vld [vmem:[%s3674_s18 + $0x194] sm:$0xf0]  ;;  %v2746_v13 = vor.u32 %v3274_v3, %v2745_v2 }
  0xcc   : > { %1534 = vmatmul.bf16.gmra.mxu1 %v2718_v6  ;;  %v2758_v49 = vor.u32 %v3273_v39, %v2755_v40  ;;  %v2753_v6 = vld [vmem:[%s3674_s18 + $0x188] sm:$0xf]  ;;  %v2761_v39 = vld [vmem:[%s3674_s18 + $0x1a0] sm:$0xf]  ;;  %v3278_v40 = vld [vmem:[%s3674_s18 + $0x1ac] sm:$0xf0] }
  0xcd   : > { %v2017_v15 = vmul.f32 %v3811_v21, %v1849_v14  ;;  %1712 = vmatmul.bf16.gmra.mxu2 %v2722_v10  ;;  %v1856_v25 = vpop.f32.mrf.mxu3  ;;  %v3277_v10 = vld [vmem:[%s3674_s18 + $0x1ac] sm:$0xf]  ;;  %v2750_v14 = vor.u32 %v3272_v4, %v2747_v5 }
  0xcf   : > { %v2088_v18 = vadd.f32 %v3823_v29, %v2017_v15 }
  0xd0   : > { %v1673_v19 = vpop.f32.mrf.mxu2  ;;  %v1319_v23 = vpop.f32.mrf.mxu0 }
  0xd1   : > { %vm2155_vm4 = vcmp.gt.f32.partialorder %v2088_v18, 0.0  ;;  %v2222_v20 = vmul.f32 0.01, %v2088_v18  ;;  %v1674_v22 = vadd.f32 %v1673_v19, %v1496_v16  ;;  %v1497_v24 = vpop.f32.mrf.mxu1 }
  0xd2   : > { %v1498_v38 = vadd.f32 %v1497_v24, %v1319_v23 }
  0xd3   : > { %v2289_v27 = vsel %vm2155_vm4, %v2088_v18, %v2222_v20  ;;  %v1852_v28 = vadd.f32 %v1851_v53, %v1674_v22  ;;  %v2754_v18 = vor.u32 %v3275_v7, %v2753_v6 }
  0xd4   : > { %v3391_v30 = vpack.c.bf16 %v2289_v27, %v2288_v26 }
  0xd5   : > { %v2018_v37 = vmul.f32 %v3811_v21, %v1852_v28  ;;  %v1858_v48 = vpop.f32.mrf.mxu3 }
  0xd6   : > { %3548 = vst [vmem:[%s3835_s10 + $0x8] sm:$0xff] %v3391_v30  }
  0xd7   : > { %v2089_v50 = vadd.f32 %v3823_v29, %v2018_v37 }
  0xd8   : > { %v1675_v41 = vpop.f32.mrf.mxu2  ;;  %v1322_v45 = vpop.f32.mrf.mxu0 }
  0xd9   : > { %v1676_v44 = vadd.f32 %v1675_v41, %v1498_v38  ;;  %v1500_v46 = vpop.f32.mrf.mxu1  ;;  %v2223_v54 = vmul.f32 0.01, %v2089_v50  ;;  %vm2156_vm5 = vcmp.gt.f32.partialorder %v2089_v50, 0.0  ;;  %v3276_v41 = vld [vmem:[%s3674_s18 + $0x1a4] sm:$0xf] }
  0xda   : > { %v1501_v53 = vadd.f32 %v1500_v46, %v1322_v45  ;;  %3199 = vmatmul.msk.bf16.gmra.mxu3 %vm1195_vm0, %v2758_v49 }
  0xdb   : > { %v1854_v51 = vadd.f32 %v1853_v11, %v1676_v44  ;;  %1361 = vmatmul.bf16.gmra.mxu0 %v2730_v42  ;;  %v2290_v62 = vsel %vm2156_vm5, %v2089_v50, %v2223_v54  ;;  %v2771_v11 = vld [vmem:[%s3674_s18 + $0x1b8] sm:$0xf0]  ;;  %v2763_v42 = vld [vmem:[%s3674_s18 + $0x1b0] sm:$0xf0]  ;;  %v3279_v44 = vld [vmem:[%s3674_s18 + $0x1b4] sm:$0xf0]  ;;  %v2762_v50 = vor.u32 %v3278_v40, %v2761_v39 }
  0xdc   : > { %1539 = vmatmul.bf16.gmra.mxu1 %v2734_v43  ;;  %v2774_v20 = vor.u32 %v3277_v10, %v2771_v11  ;;  %v2769_v43 = vld [vmem:[%s3674_s18 + $0x1a8] sm:$0xf]  ;;  %v2777_v10 = vld [vmem:[%s3674_s18 + $0x1c0] sm:$0xf]  ;;  %v3282_v11 = vld [vmem:[%s3674_s18 + $0x1cc] sm:$0xf0] }
  0xdd   : > { %v2019_v52 = vmul.f32 %v3811_v21, %v1854_v51  ;;  %1717 = vmatmul.bf16.gmra.mxu2 %v2738_v47  ;;  %v1861_v61 = vpop.f32.mrf.mxu3  ;;  %v3281_v47 = vld [vmem:[%s3674_s18 + $0x1cc] sm:$0xf]  ;;  %v2766_v51 = vor.u32 %v3276_v41, %v2763_v42 }
  0xdf   : > { %v2090_v55 = vadd.f32 %v3823_v29, %v2019_v52 }
  0xe0   : > { %v1678_v56 = vpop.f32.mrf.mxu2  ;;  %v1324_v59 = vpop.f32.mrf.mxu0 }
  0xe1   : > { %vm2157_vm6 = vcmp.gt.f32.partialorder %v2090_v55, 0.0  ;;  %v2224_v57 = vmul.f32 0.01, %v2090_v55  ;;  %v1679_v58 = vadd.f32 %v1678_v56, %v1501_v53  ;;  %v1502_v60 = vpop.f32.mrf.mxu1 }
  0xe2   : > { %v1503_v9 = vadd.f32 %v1502_v60, %v1324_v59 }
  0xe3   : > { %v2291_v63 = vsel %vm2157_vm6, %v2090_v55, %v2224_v57  ;;  %v1857_v0 = vadd.f32 %v1856_v25, %v1679_v58  ;;  %v2770_v55 = vor.u32 %v3279_v44, %v2769_v43 }
  0xe4   : > { %v3396_v1 = vpack.c.bf16 %v2291_v63, %v2290_v62 }
  0xe5   : > { %v2020_v8 = vmul.f32 %v3811_v21, %v1857_v0  ;;  %v1863_v19 = vpop.f32.mrf.mxu3 }
  0xe6   : > { %3549 = vst [vmem:[%s3835_s10 + $0x10] sm:$0xff] %v3396_v1  }
  0xe7   : > { %v2091_v22 = vadd.f32 %v3823_v29, %v2020_v8 }
  0xe8   : > { %v1680_v12 = vpop.f32.mrf.mxu2  ;;  %v1327_v16 = vpop.f32.mrf.mxu0 }
  0xe9   : > { %v1681_v15 = vadd.f32 %v1680_v12, %v1503_v9  ;;  %v1505_v17 = vpop.f32.mrf.mxu1  ;;  %v2225_v26 = vmul.f32 0.01, %v2091_v22  ;;  %vm2158_vm7 = vcmp.gt.f32.partialorder %v2091_v22, 0.0  ;;  %v3280_v12 = vld [vmem:[%s3674_s18 + $0x1c4] sm:$0xf] }
  0xea   : > { %v1506_v25 = vadd.f32 %v1505_v17, %v1327_v16  ;;  %3200 = vmatmul.msk.bf16.gmra.mxu3 %vm1195_vm0, %v2774_v20 }
  0xeb   : > { %v1859_v23 = vadd.f32 %v1858_v48, %v1681_v15  ;;  %1366 = vmatmul.bf16.gmra.mxu0 %v2746_v13  ;;  %v2292_v35 = vsel %vm2158_vm7, %v2091_v22, %v2225_v26  ;;  %v2787_v48 = vld [vmem:[%s3674_s18 + $0x1d8] sm:$0xf0]  ;;  %v2779_v13 = vld [vmem:[%s3674_s18 + $0x1d0] sm:$0xf0]  ;;  %v3283_v15 = vld [vmem:[%s3674_s18 + $0x1d4] sm:$0xf0]  ;;  %v2778_v22 = vor.u32 %v3282_v11, %v2777_v10 }
  0xec   : > { %1544 = vmatmul.bf16.gmra.mxu1 %v2750_v14  ;;  %v2790_v57 = vor.u32 %v3281_v47, %v2787_v48  ;;  %v2785_v14 = vld [vmem:[%s3674_s18 + $0x1c8] sm:$0xf]  ;;  %v2793_v47 = vld [vmem:[%s3674_s18 + $0x1e0] sm:$0xf]  ;;  %v3286_v48 = vld [vmem:[%s3674_s18 + $0x1ec] sm:$0xf0] }
  0xed   : > { %v2021_v24 = vmul.f32 %v3811_v21, %v1859_v23  ;;  %1722 = vmatmul.bf16.gmra.mxu2 %v2754_v18  ;;  %v1866_v34 = vpop.f32.mrf.mxu3  ;;  %v3285_v18 = vld [vmem:[%s3674_s18 + $0x1ec] sm:$0xf]  ;;  %v2782_v23 = vor.u32 %v3280_v12, %v2779_v13 }
  0xef   : > { %v2092_v27 = vadd.f32 %v3823_v29, %v2021_v24 }
  0xf0   : > { %v1683_v28 = vpop.f32.mrf.mxu2  ;;  %v1329_v32 = vpop.f32.mrf.mxu0 }
  0xf1   : > { %vm2159_vm8 = vcmp.gt.f32.partialorder %v2092_v27, 0.0  ;;  %v2226_v30 = vmul.f32 0.01, %v2092_v27  ;;  %v1684_v31 = vadd.f32 %v1683_v28, %v1506_v25  ;;  %v1507_v33 = vpop.f32.mrf.mxu1 }
  0xf2   : > { %v1508_v46 = vadd.f32 %v1507_v33, %v1329_v32 }
  0xf3   : > { %v2293_v36 = vsel %vm2159_vm8, %v2092_v27, %v2226_v30  ;;  %v1862_v37 = vadd.f32 %v1861_v61, %v1684_v31  ;;  %v2786_v27 = vor.u32 %v3283_v15, %v2785_v14 }
  0xf4   : > { %v3401_v38 = vpack.c.bf16 %v2293_v36, %v2292_v35 }
  0xf5   : > { %v2022_v45 = vmul.f32 %v3811_v21, %v1862_v37  ;;  %v1868_v56 = vpop.f32.mrf.mxu3 }
  0xf6   : > { %3550 = vst [vmem:[%s3835_s10 + $0x18] sm:$0xff] %v3401_v38  }
  0xf7   : > { %v2093_v58 = vadd.f32 %v3823_v29, %v2022_v45 }
  0xf8   : > { %v1685_v49 = vpop.f32.mrf.mxu2  ;;  %v1332_v53 = vpop.f32.mrf.mxu0 }
  0xf9   : > { %v1686_v52 = vadd.f32 %v1685_v49, %v1508_v46  ;;  %v1510_v54 = vpop.f32.mrf.mxu1  ;;  %v2227_v62 = vmul.f32 0.01, %v2093_v58  ;;  %vm2160_vm9 = vcmp.gt.f32.partialorder %v2093_v58, 0.0  ;;  %v3284_v49 = vld [vmem:[%s3674_s18 + $0x1e4] sm:$0xf] }
  0xfa   : > { %v1511_v61 = vadd.f32 %v1510_v54, %v1332_v53  ;;  %3201 = vmatmul.msk.bf16.gmra.mxu3 %vm1195_vm0, %v2790_v57 }
  0xfb   : > { %v1864_v59 = vadd.f32 %v1863_v19, %v1686_v52  ;;  %1371 = vmatmul.bf16.gmra.mxu0 %v2762_v50  ;;  %v2294_v6 = vsel %vm2160_vm9, %v2093_v58, %v2227_v62  ;;  %v2803_v19 = vld [vmem:[%s3674_s18 + $0x1f8] sm:$0xf0]  ;;  %v2795_v50 = vld [vmem:[%s3674_s18 + $0x1f0] sm:$0xf0]  ;;  %v3287_v52 = vld [vmem:[%s3674_s18 + $0x1f4] sm:$0xf0]  ;;  %v2794_v58 = vor.u32 %v3286_v48, %v2793_v47 }
  0xfc   : > { %1549 = vmatmul.bf16.gmra.mxu1 %v2766_v51  ;;  %v2806_v30 = vor.u32 %v3285_v18, %v2803_v19  ;;  %v2801_v51 = vld [vmem:[%s3674_s18 + $0x1e8] sm:$0xf]  ;;  %v2809_v18 = vld [vmem:[%s3674_s18 + $0x200] sm:$0xf]  ;;  %v3290_v19 = vld [vmem:[%s3674_s18 + $0x20c] sm:$0xf0] }
  0xfd   : > { %v2023_v60 = vmul.f32 %v3811_v21, %v1864_v59  ;;  %1727 = vmatmul.bf16.gmra.mxu2 %v2770_v55  ;;  %v1871_v5 = vpop.f32.mrf.mxu3  ;;  %v3289_v55 = vld [vmem:[%s3674_s18 + $0x20c] sm:$0xf]  ;;  %v2798_v59 = vor.u32 %v3284_v49, %v2795_v50 }
  0xff   : > { %v2094_v63 = vadd.f32 %v3823_v29, %v2023_v60 }
 0x100   : > { %v1688_v0 = vpop.f32.mrf.mxu2  ;;  %v1334_v3 = vpop.f32.mrf.mxu0 }
 0x101   : > { %vm2161_vm10 = vcmp.gt.f32.partialorder %v2094_v63, 0.0  ;;  %v2228_v1 = vmul.f32 0.01, %v2094_v63  ;;  %v1689_v2 = vadd.f32 %v1688_v0, %v1511_v61  ;;  %v1512_v4 = vpop.f32.mrf.mxu1 }
 0x102   : > { %v1513_v17 = vadd.f32 %v1512_v4, %v1334_v3 }
 0x103   : > { %v2295_v7 = vsel %vm2161_vm10, %v2094_v63, %v2228_v1  ;;  %v1867_v8 = vadd.f32 %v1866_v34, %v1689_v2  ;;  %v2802_v63 = vor.u32 %v3287_v52, %v2801_v51 }
 0x104   : > { %v3406_v9 = vpack.c.bf16 %v2295_v7, %v2294_v6 }
 0x105   : > { %v2024_v16 = vmul.f32 %v3811_v21, %v1867_v8  ;;  %v1873_v28 = vpop.f32.mrf.mxu3 }
 0x106   : > { %3551 = vst [vmem:[%s3835_s10 + $0x20] sm:$0xff] %v3406_v9  }
 0x107   : > { %v2095_v31 = vadd.f32 %v3823_v29, %v2024_v16 }
 0x108   : > { %v1690_v20 = vpop.f32.mrf.mxu2  ;;  %v1337_v25 = vpop.f32.mrf.mxu0 }
 0x109   : > { %v1691_v24 = vadd.f32 %v1690_v20, %v1513_v17  ;;  %v1515_v26 = vpop.f32.mrf.mxu1  ;;  %v2229_v35 = vmul.f32 0.01, %v2095_v31  ;;  %vm2162_vm11 = vcmp.gt.f32.partialorder %v2095_v31, 0.0  ;;  %v3288_v20 = vld [vmem:[%s3674_s18 + $0x204] sm:$0xf] }
 0x10a   : > { %v1516_v34 = vadd.f32 %v1515_v26, %v1337_v25  ;;  %3202 = vmatmul.msk.bf16.gmra.mxu3 %vm1195_vm0, %v2806_v30 }
 0x10b   : > { %v1869_v32 = vadd.f32 %v1868_v56, %v1691_v24  ;;  %1376 = vmatmul.bf16.gmra.mxu0 %v2778_v22  ;;  %v2296_v43 = vsel %vm2162_vm11, %v2095_v31, %v2229_v35  ;;  %v2819_v56 = vld [vmem:[%s3674_s18 + $0x218] sm:$0xf0]  ;;  %v2811_v22 = vld [vmem:[%s3674_s18 + $0x210] sm:$0xf0]  ;;  %v3291_v24 = vld [vmem:[%s3674_s18 + $0x214] sm:$0xf0]  ;;  %v2810_v31 = vor.u32 %v3290_v19, %v2809_v18 }
 0x10c   : > { %1554 = vmatmul.bf16.gmra.mxu1 %v2782_v23  ;;  %v2822_v1 = vor.u32 %v3289_v55, %v2819_v56  ;;  %v2817_v23 = vld [vmem:[%s3674_s18 + $0x208] sm:$0xf]  ;;  %v2825_v55 = vld [vmem:[%s3674_s18 + $0x220] sm:$0xf]  ;;  %v3294_v56 = vld [vmem:[%s3674_s18 + $0x22c] sm:$0xf0] }
 0x10d   : > { %v2025_v33 = vmul.f32 %v3811_v21, %v1869_v32  ;;  %1732 = vmatmul.bf16.gmra.mxu2 %v2786_v27  ;;  %v1876_v42 = vpop.f32.mrf.mxu3  ;;  %v3293_v27 = vld [vmem:[%s3674_s18 + $0x22c] sm:$0xf]  ;;  %v2814_v32 = vor.u32 %v3288_v20, %v2811_v22 }
 0x10f   : > { %v2096_v36 = vadd.f32 %v3823_v29, %v2025_v33 }
 0x110   : > { %v1693_v37 = vpop.f32.mrf.mxu2  ;;  %v1339_v40 = vpop.f32.mrf.mxu0 }
 0x111   : > { %vm2163_vm12 = vcmp.gt.f32.partialorder %v2096_v36, 0.0  ;;  %v2230_v38 = vmul.f32 0.01, %v2096_v36  ;;  %v1694_v39 = vadd.f32 %v1693_v37, %v1516_v34  ;;  %v1517_v41 = vpop.f32.mrf.mxu1 }
 0x112   : > { %v1518_v54 = vadd.f32 %v1517_v41, %v1339_v40 }
 0x113   : > { %v2297_v44 = vsel %vm2163_vm12, %v2096_v36, %v2230_v38  ;;  %v1872_v45 = vadd.f32 %v1871_v5, %v1694_v39  ;;  %v2818_v36 = vor.u32 %v3291_v24, %v2817_v23 }
 0x114   : > { %v3411_v46 = vpack.c.bf16 %v2297_v44, %v2296_v43 }
 0x115   : > { %v2026_v53 = vmul.f32 %v3811_v21, %v1872_v45  ;;  %v1878_v0 = vpop.f32.mrf.mxu3 }
 0x116   : > { %3552 = vst [vmem:[%s3835_s10 + $0x28] sm:$0xff] %v3411_v46  }
 0x117   : > { %v2097_v2 = vadd.f32 %v3823_v29, %v2026_v53 }
 0x118   : > { %v1695_v57 = vpop.f32.mrf.mxu2  ;;  %v1342_v61 = vpop.f32.mrf.mxu0 }
 0x119   : > { %v1696_v60 = vadd.f32 %v1695_v57, %v1518_v54  ;;  %v1520_v62 = vpop.f32.mrf.mxu1  ;;  %v2231_v6 = vmul.f32 0.01, %v2097_v2  ;;  %vm2164_vm13 = vcmp.gt.f32.partialorder %v2097_v2, 0.0  ;;  %v3292_v57 = vld [vmem:[%s3674_s18 + $0x224] sm:$0xf] }
 0x11a   : > { %v1521_v5 = vadd.f32 %v1520_v62, %v1342_v61  ;;  %3203 = vmatmul.msk.bf16.gmra.mxu3 %vm1195_vm0, %v2822_v1 }
 0x11b   : > { %v1874_v3 = vadd.f32 %v1873_v28, %v1696_v60  ;;  %1381 = vmatmul.bf16.gmra.mxu0 %v2794_v58  ;;  %v2298_v14 = vsel %vm2164_vm13, %v2097_v2, %v2231_v6  ;;  %v2835_v28 = vld [vmem:[%s3674_s18 + $0x238] sm:$0xf0]  ;;  %v2827_v58 = vld [vmem:[%s3674_s18 + $0x230] sm:$0xf0]  ;;  %v3295_v60 = vld [vmem:[%s3674_s18 + $0x234] sm:$0xf0]  ;;  %v2826_v2 = vor.u32 %v3294_v56, %v2825_v55 }
 0x11c   : > { %1559 = vmatmul.bf16.gmra.mxu1 %v2798_v59  ;;  %v2838_v38 = vor.u32 %v3293_v27, %v2835_v28  ;;  %v2833_v59 = vld [vmem:[%s3674_s18 + $0x228] sm:$0xf]  ;;  %v2841_v27 = vld [vmem:[%s3674_s18 + $0x240] sm:$0xf]  ;;  %v3298_v28 = vld [vmem:[%s3674_s18 + $0x24c] sm:$0xf0] }
 0x11d   : > { %v2027_v4 = vmul.f32 %v3811_v21, %v1874_v3  ;;  %1737 = vmatmul.bf16.gmra.mxu2 %v2802_v63  ;;  %v1881_v13 = vpop.f32.mrf.mxu3  ;;  %v3297_v63 = vld [vmem:[%s3674_s18 + $0x24c] sm:$0xf]  ;;  %v2830_v3 = vor.u32 %v3292_v57, %v2827_v58 }
 0x11f   : > { %v2098_v7 = vadd.f32 %v3823_v29, %v2027_v4 }
 0x120   : > { %v1698_v8 = vpop.f32.mrf.mxu2  ;;  %v1344_v11 = vpop.f32.mrf.mxu0 }
 0x121   : > { %vm2165_vm14 = vcmp.gt.f32.partialorder %v2098_v7, 0.0  ;;  %v2232_v9 = vmul.f32 0.01, %v2098_v7  ;;  %v1699_v10 = vadd.f32 %v1698_v8, %v1521_v5  ;;  %v1522_v12 = vpop.f32.mrf.mxu1 }
 0x122   : > { %v1523_v26 = vadd.f32 %v1522_v12, %v1344_v11 }
 0x123   : > { %v2299_v15 = vsel %vm2165_vm14, %v2098_v7, %v2232_v9  ;;  %v1877_v16 = vadd.f32 %v1876_v42, %v1699_v10  ;;  %v2834_v7 = vor.u32 %v3295_v60, %v2833_v59 }
 0x124   : > { %v3416_v17 = vpack.c.bf16 %v2299_v15, %v2298_v14 }
 0x125   : > { %v2028_v25 = vmul.f32 %v3811_v21, %v1877_v16  ;;  %v1883_v37 = vpop.f32.mrf.mxu3 }
 0x126   : > { %3553 = vst [vmem:[%s3835_s10 + $0x30] sm:$0xff] %v3416_v17  }
 0x127   : > { %v2099_v39 = vadd.f32 %v3823_v29, %v2028_v25 }
 0x128   : > { %v1700_v30 = vpop.f32.mrf.mxu2  ;;  %v1347_v34 = vpop.f32.mrf.mxu0 }
 0x129   : > { %v1701_v33 = vadd.f32 %v1700_v30, %v1523_v26  ;;  %v1525_v35 = vpop.f32.mrf.mxu1  ;;  %v2233_v43 = vmul.f32 0.01, %v2099_v39  ;;  %vm2166_vm15 = vcmp.gt.f32.partialorder %v2099_v39, 0.0  ;;  %v3296_v30 = vld [vmem:[%s3674_s18 + $0x244] sm:$0xf] }
 0x12a   : > { %v1526_v42 = vadd.f32 %v1525_v35, %v1347_v34  ;;  %3204 = vmatmul.msk.bf16.gmra.mxu3 %vm1195_vm0, %v2838_v38 }
 0x12b   : > { %v1879_v40 = vadd.f32 %v1878_v0, %v1701_v33  ;;  %1386 = vmatmul.bf16.gmra.mxu0 %v2810_v31  ;;  %v2300_v51 = vsel %vm2166_vm15, %v2099_v39, %v2233_v43  ;;  %v2851_v0 = vld [vmem:[%s3674_s18 + $0x258] sm:$0xf0]  ;;  %v2843_v31 = vld [vmem:[%s3674_s18 + $0x250] sm:$0xf0]  ;;  %v3299_v33 = vld [vmem:[%s3674_s18 + $0x254] sm:$0xf0]  ;;  %v2842_v39 = vor.u32 %v3298_v28, %v2841_v27 }
 0x12c   : > { %1564 = vmatmul.bf16.gmra.mxu1 %v2814_v32  ;;  %v2854_v9 = vor.u32 %v3297_v63, %v2851_v0  ;;  %v2849_v32 = vld [vmem:[%s3674_s18 + $0x248] sm:$0xf]  ;;  %v2857_v63 = vld [vmem:[%s3674_s18 + $0x260] sm:$0xf]  ;;  %v3302_v0 = vld [vmem:[%s3674_s18 + $0x26c] sm:$0xf0] }
 0x12d   : > { %v2029_v41 = vmul.f32 %v3811_v21, %v1879_v40  ;;  %1742 = vmatmul.bf16.gmra.mxu2 %v2818_v36  ;;  %v1886_v50 = vpop.f32.mrf.mxu3  ;;  %v3301_v36 = vld [vmem:[%s3674_s18 + $0x26c] sm:$0xf]  ;;  %v2846_v40 = vor.u32 %v3296_v30, %v2843_v31 }
 0x12f   : > { %v2100_v44 = vadd.f32 %v3823_v29, %v2029_v41 }
 0x130   : > { %v1703_v45 = vpop.f32.mrf.mxu2  ;;  %v1349_v48 = vpop.f32.mrf.mxu0 }
 0x131   : > { %vm2167_vm1 = vcmp.gt.f32.partialorder %v2100_v44, 0.0  ;;  %v2234_v46 = vmul.f32 0.01, %v2100_v44  ;;  %v1704_v47 = vadd.f32 %v1703_v45, %v1526_v42  ;;  %v1527_v49 = vpop.f32.mrf.mxu1 }
 0x132   : > { %v1528_v62 = vadd.f32 %v1527_v49, %v1349_v48 }
 0x133   : > { %v2301_v52 = vsel %vm2167_vm1, %v2100_v44, %v2234_v46  ;;  %v1882_v53 = vadd.f32 %v1881_v13, %v1704_v47  ;;  %v2850_v44 = vor.u32 %v3299_v33, %v2849_v32 }
 0x134   : > { %v3421_v54 = vpack.c.bf16 %v2301_v52, %v2300_v51 }
 0x135   : > { %v2030_v61 = vmul.f32 %v3811_v21, %v1882_v53  ;;  %v1888_v8 = vpop.f32.mrf.mxu3 }
 0x136   : > { %3554 = vst [vmem:[%s3835_s10 + $0x38] sm:$0xff] %v3421_v54  }
 0x137   : > { %v2101_v10 = vadd.f32 %v3823_v29, %v2030_v61 }
 0x138   : > { %v1705_v1 = vpop.f32.mrf.mxu2  ;;  %v1352_v5 = vpop.f32.mrf.mxu0 }
 0x139   : > { %v1706_v4 = vadd.f32 %v1705_v1, %v1528_v62  ;;  %v1530_v6 = vpop.f32.mrf.mxu1  ;;  %v2235_v14 = vmul.f32 0.01, %v2101_v10  ;;  %vm2168_vm2 = vcmp.gt.f32.partialorder %v2101_v10, 0.0  ;;  %v3300_v1 = vld [vmem:[%s3674_s18 + $0x264] sm:$0xf] }
 0x13a   : > { %v1531_v13 = vadd.f32 %v1530_v6, %v1352_v5  ;;  %3205 = vmatmul.msk.bf16.gmra.mxu3 %vm1195_vm0, %v2854_v9 }
 0x13b   : > { %v1884_v11 = vadd.f32 %v1883_v37, %v1706_v4  ;;  %1391 = vmatmul.bf16.gmra.mxu0 %v2826_v2  ;;  %v2302_v23 = vsel %vm2168_vm2, %v2101_v10, %v2235_v14  ;;  %v2867_v37 = vld [vmem:[%s3674_s18 + $0x278] sm:$0xf0]  ;;  %v2859_v2 = vld [vmem:[%s3674_s18 + $0x270] sm:$0xf0]  ;;  %v3303_v4 = vld [vmem:[%s3674_s18 + $0x274] sm:$0xf0]  ;;  %v2858_v10 = vor.u32 %v3302_v0, %v2857_v63 }
 0x13c   : > { %1569 = vmatmul.bf16.gmra.mxu1 %v2830_v3  ;;  %v2870_v46 = vor.u32 %v3301_v36, %v2867_v37  ;;  %v2865_v3 = vld [vmem:[%s3674_s18 + $0x268] sm:$0xf]  ;;  %v2873_v36 = vld [vmem:[%s3674_s18 + $0x280] sm:$0xf]  ;;  %v3306_v37 = vld [vmem:[%s3674_s18 + $0x28c] sm:$0xf0] }
 0x13d   : > { %v2031_v12 = vmul.f32 %v3811_v21, %v1884_v11  ;;  %1747 = vmatmul.bf16.gmra.mxu2 %v2834_v7  ;;  %v1891_v22 = vpop.f32.mrf.mxu3  ;;  %v3305_v7 = vld [vmem:[%s3674_s18 + $0x28c] sm:$0xf]  ;;  %v2862_v11 = vor.u32 %v3300_v1, %v2859_v2 }
 0x13f   : > { %v2102_v15 = vadd.f32 %v3823_v29, %v2031_v12 }
 0x140   : > { %v1708_v16 = vpop.f32.mrf.mxu2  ;;  %v1354_v19 = vpop.f32.mrf.mxu0 }
 0x141   : > { %vm2169_vm3 = vcmp.gt.f32.partialorder %v2102_v15, 0.0  ;;  %v2236_v17 = vmul.f32 0.01, %v2102_v15  ;;  %v1709_v18 = vadd.f32 %v1708_v16, %v1531_v13  ;;  %v1532_v20 = vpop.f32.mrf.mxu1 }
 0x142   : > { %v1533_v35 = vadd.f32 %v1532_v20, %v1354_v19 }
 0x143   : > { %v2303_v24 = vsel %vm2169_vm3, %v2102_v15, %v2236_v17  ;;  %v1887_v25 = vadd.f32 %v1886_v50, %v1709_v18  ;;  %v2866_v15 = vor.u32 %v3303_v4, %v2865_v3 }
 0x144   : > { %v3426_v26 = vpack.c.bf16 %v2303_v24, %v2302_v23 }
 0x145   : > { %v2032_v34 = vmul.f32 %v3811_v21, %v1887_v25  ;;  %v1893_v45 = vpop.f32.mrf.mxu3 }
 0x146   : > { %3555 = vst [vmem:[%s3835_s10 + $0x40] sm:$0xff] %v3426_v26  }
 0x147   : > { %v2103_v47 = vadd.f32 %v3823_v29, %v2032_v34 }
 0x148   : > { %v1710_v38 = vpop.f32.mrf.mxu2  ;;  %v1357_v42 = vpop.f32.mrf.mxu0 }
 0x149   : > { %v1711_v41 = vadd.f32 %v1710_v38, %v1533_v35  ;;  %v1535_v43 = vpop.f32.mrf.mxu1  ;;  %v2237_v51 = vmul.f32 0.01, %v2103_v47  ;;  %vm2170_vm4 = vcmp.gt.f32.partialorder %v2103_v47, 0.0  ;;  %v3304_v38 = vld [vmem:[%s3674_s18 + $0x284] sm:$0xf] }
 0x14a   : > { %v1536_v50 = vadd.f32 %v1535_v43, %v1357_v42  ;;  %3206 = vmatmul.msk.bf16.gmra.mxu3 %vm1195_vm0, %v2870_v46 }
 0x14b   : > { %v1889_v48 = vadd.f32 %v1888_v8, %v1711_v41  ;;  %1396 = vmatmul.bf16.gmra.mxu0 %v2842_v39  ;;  %v2304_v59 = vsel %vm2170_vm4, %v2103_v47, %v2237_v51  ;;  %v2883_v8 = vld [vmem:[%s3674_s18 + $0x298] sm:$0xf0]  ;;  %v2875_v39 = vld [vmem:[%s3674_s18 + $0x290] sm:$0xf0]  ;;  %v3307_v41 = vld [vmem:[%s3674_s18 + $0x294] sm:$0xf0]  ;;  %v2874_v47 = vor.u32 %v3306_v37, %v2873_v36 }
 0x14c   : > { %1574 = vmatmul.bf16.gmra.mxu1 %v2846_v40  ;;  %v2886_v17 = vor.u32 %v3305_v7, %v2883_v8  ;;  %v2881_v40 = vld [vmem:[%s3674_s18 + $0x288] sm:$0xf]  ;;  %v3308_v7 = vld [vmem:[%s3674_s18 + $0x2a4] sm:$0xf]  ;;  %v2891_v8 = vld [vmem:[%s3674_s18 + $0x2b0] sm:$0xf0] }
 0x14d   : > { %v2033_v49 = vmul.f32 %v3811_v21, %v1889_v48  ;;  %1752 = vmatmul.bf16.gmra.mxu2 %v2850_v44  ;;  %v1896_v58 = vpop.f32.mrf.mxu3  ;;  %v3309_v44 = vld [vmem:[%s3674_s18 + $0x2ac] sm:$0xf]  ;;  %v2878_v48 = vor.u32 %v3304_v38, %v2875_v39 }
 0x14f   : > { %v2104_v52 = vadd.f32 %v3823_v29, %v2033_v49 }
 0x150   : > { %v1713_v53 = vpop.f32.mrf.mxu2  ;;  %v1359_v56 = vpop.f32.mrf.mxu0 }
 0x151   : > { %vm2171_vm5 = vcmp.gt.f32.partialorder %v2104_v52, 0.0  ;;  %v2238_v54 = vmul.f32 0.01, %v2104_v52  ;;  %v1714_v55 = vadd.f32 %v1713_v53, %v1536_v50  ;;  %v1537_v57 = vpop.f32.mrf.mxu1 }
 0x152   : > { %v1538_v6 = vadd.f32 %v1537_v57, %v1359_v56 }
 0x153   : > { %v2305_v60 = vsel %vm2171_vm5, %v2104_v52, %v2238_v54  ;;  %v1892_v61 = vadd.f32 %v1891_v22, %v1714_v55  ;;  %v2882_v52 = vor.u32 %v3307_v41, %v2881_v40 }
 0x154   : > { %v3431_v62 = vpack.c.bf16 %v2305_v60, %v2304_v59 }
 0x155   : > { %v2034_v5 = vmul.f32 %v3811_v21, %v1892_v61  ;;  %v1898_v16 = vpop.f32.mrf.mxu3 }
 0x156   : > { %3556 = vst [vmem:[%s3835_s10 + $0x48] sm:$0xff] %v3431_v62  }
 0x157   : > { %v2105_v18 = vadd.f32 %v3823_v29, %v2034_v5 }
 0x158   : > { %v1715_v9 = vpop.f32.mrf.mxu2  ;;  %v1362_v13 = vpop.f32.mrf.mxu0 }
 0x159   : > { %v1716_v12 = vadd.f32 %v1715_v9, %v1538_v6  ;;  %v1540_v14 = vpop.f32.mrf.mxu1  ;;  %v2239_v23 = vmul.f32 0.01, %v2105_v18  ;;  %vm2172_vm6 = vcmp.gt.f32.partialorder %v2105_v18, 0.0  ;;  %v2889_v6 = vld [vmem:[%s3674_s18 + $0x2a0] sm:$0xf] }
 0x15a   : > { %v1541_v22 = vadd.f32 %v1540_v14, %v1362_v13  ;;  %3207 = vmatmul.msk.bf16.gmra.mxu3 %vm1195_vm0, %v2886_v17  ;;  %v2897_v9 = vld [vmem:[%s3674_s18 + $0x2a8] sm:$0xf]  ;;  %v3313_v14 = vld [vmem:[%s3674_s18 + $0x2cc] sm:$0xf] }
 0x15b   : > { %v1894_v19 = vadd.f32 %v1893_v45, %v1716_v12  ;;  %1401 = vmatmul.bf16.gmra.mxu0 %v2858_v10  ;;  %v2306_v32 = vsel %vm2172_vm6, %v2105_v18, %v2239_v23  ;;  %v2899_v45 = vld [vmem:[%s3674_s18 + $0x2b8] sm:$0xf0]  ;;  %v3311_v10 = vld [vmem:[%s3674_s18 + $0x2b4] sm:$0xf0]  ;;  %v2894_v18 = vor.u32 %v3308_v7, %v2891_v8 }
 0x15c   : > { %1579 = vmatmul.bf16.gmra.mxu1 %v2862_v11  ;;  %v2902_v54 = vor.u32 %v3309_v44, %v2899_v45  ;;  %v4001_v11 = vld [vmem:[%s4233_s2] ss:$0 sm:$0xff]  ;;  %v2898_v23 = vor.u32 %v3311_v10, %v2897_v9  ;;  %v3314_v45 = vld [vmem:[%s3674_s18 + $0x2cc] sm:$0xf0] }
 0x15d   : > { %v2035_v20 = vmul.f32 %v3811_v21, %v1894_v19  ;;  %1757 = vmatmul.bf16.gmra.mxu2 %v2866_v15  ;;  %v1901_v31 = vpop.f32.mrf.mxu3  ;;  %v2915_v15 = vld [vmem:[%s3674_s18 + $0x2d8] sm:$0xf0]  ;;  %v2905_v44 = vld [vmem:[%s3674_s18 + $0x2c0] sm:$0xf] }
 0x15f   : > { %v2106_v24 = vadd.f32 %v3823_v29, %v2035_v20 }
 0x160   : > { %v1718_v25 = vpop.f32.mrf.mxu2  ;;  %v1364_v28 = vpop.f32.mrf.mxu0 }
 0x161   : > { %vm2173_vm7 = vcmp.gt.f32.partialorder %v2106_v24, 0.0  ;;  %v2240_v26 = vmul.f32 0.01, %v2106_v24  ;;  %v1719_v27 = vadd.f32 %v1718_v25, %v1541_v22  ;;  %v1542_v30 = vpop.f32.mrf.mxu1  ;;  %v2918_v25 = vor.u32 %v3313_v14, %v2915_v15  ;;  %v2921_v14 = vld [vmem:[%s3674_s18 + $0x2e0] sm:$0xf] }
 0x162   : > { %v1543_v43 = vadd.f32 %v1542_v30, %v1364_v28  ;;  %v3318_v15 = vld [vmem:[%s3674_s18 + $0x2ec] sm:$0xf0] }
 0x163   : > { %v2307_v33 = vsel %vm2173_vm7, %v2106_v24, %v2240_v26  ;;  %v1897_v34 = vadd.f32 %v1896_v58, %v1719_v27  ;;  %v4009_v26 = vld [vmem:[%s4234_s3] ss:$0 sm:$0xff] }
 0x164   : > { %v3436_v35 = vpack.c.bf16 %v2307_v33, %v2306_v32 }
 0x165   : > { %v2036_v42 = vmul.f32 %v3811_v21, %v1897_v34  ;;  %v1903_v53 = vpop.f32.mrf.mxu3 }
 0x166   : > { %3557 = vst [vmem:[%s3835_s10 + $0x50] sm:$0xff] %v3436_v35  }
 0x167   : > { %v2107_v55 = vadd.f32 %v3823_v29, %v2036_v42 }
 0x168   : > { %v1720_v46 = vpop.f32.mrf.mxu2  ;;  %v1367_v50 = vpop.f32.mrf.mxu0 }
 0x169   : > { %v1721_v49 = vadd.f32 %v1720_v46, %v1543_v43  ;;  %v1545_v51 = vpop.f32.mrf.mxu1  ;;  %v2241_v59 = vmul.f32 0.01, %v2107_v55  ;;  %vm2174_vm8 = vcmp.gt.f32.partialorder %v2107_v55, 0.0  ;;  %v3312_v46 = vld [vmem:[%s3674_s18 + $0x2c4] sm:$0xf] }
 0x16a   : > { %v1546_v58 = vadd.f32 %v1545_v51, %v1367_v50  ;;  %3208 = vmatmul.msk.bf16.gmra.mxu3 %vm1195_vm0, %v2902_v54 }
 0x16b   : > { %v1899_v56 = vadd.f32 %v1898_v16, %v1721_v49  ;;  %1406 = vmatmul.bf16.gmra.mxu0 %v2874_v47  ;;  %v2308_v2 = vsel %vm2174_vm8, %v2107_v55, %v2241_v59  ;;  %v2907_v47 = vld [vmem:[%s3674_s18 + $0x2d0] sm:$0xf0]  ;;  %v3315_v49 = vld [vmem:[%s3674_s18 + $0x2d4] sm:$0xf0]  ;;  %v2906_v55 = vor.u32 %v3314_v45, %v2905_v44 }
 0x16c   : > { %1584 = vmatmul.bf16.gmra.mxu1 %v2878_v48  ;;  %v2913_v48 = vld [vmem:[%s3674_s18 + $0x2c8] sm:$0xf] }
 0x16d   : > { %v2037_v57 = vmul.f32 %v3811_v21, %v1899_v56  ;;  %1762 = vmatmul.bf16.gmra.mxu2 %v2882_v52  ;;  %v1906_v1 = vpop.f32.mrf.mxu3  ;;  %v3317_v52 = vld [vmem:[%s3674_s18 + $0x2ec] sm:$0xf]  ;;  %v2910_v56 = vor.u32 %v3312_v46, %v2907_v47 }
 0x16f   : > { %v2108_v60 = vadd.f32 %v3823_v29, %v2037_v57  ;;  %v3310_v29 = vld [vmem:[%s3674_s18 + $0x2ac] sm:$0xf0] }
 0x170   : > { %v1723_v61 = vpop.f32.mrf.mxu2  ;;  %v1369_v21 = vpop.f32.mrf.mxu0  ;;  %v2890_v17 = vor.u32 %v3310_v29, %v2889_v6 }
 0x171   : > { %vm2175_vm9 = vcmp.gt.f32.partialorder %v2108_v60, 0.0  ;;  %v2242_v62 = vmul.f32 0.01, %v2108_v60  ;;  %v1724_v63 = vadd.f32 %v1723_v61, %v1546_v58  ;;  %v1547_v0 = vpop.f32.mrf.mxu1 }
 0x172   : > { %v1548_v13 = vadd.f32 %v1547_v0, %v1369_v21 }
 0x173   : > { %v2309_v3 = vsel %vm2175_vm9, %v2108_v60, %v2242_v62  ;;  %v1902_v4 = vadd.f32 %v1901_v31, %v1724_v63  ;;  %v2914_v60 = vor.u32 %v3315_v49, %v2913_v48 }
 0x174   : > { %v3441_v5 = vpack.c.bf16 %v2309_v3, %v2308_v2 }
 0x175   : > { %v2038_v12 = vmul.f32 %v4001_v11, %v1902_v4  ;;  %v1908_v24 = vpop.f32.mrf.mxu3 }
 0x176   : > { %3558 = vst [vmem:[%s3835_s10 + $0x58] sm:$0xff] %v3441_v5  }
 0x177   : > { %v2109_v27 = vadd.f32 %v4009_v26, %v2038_v12 }
 0x178   : > { %v1725_v16 = vpop.f32.mrf.mxu2  ;;  %v1372_v20 = vpop.f32.mrf.mxu0 }
 0x179   : > { %v1726_v19 = vadd.f32 %v1725_v16, %v1548_v13  ;;  %v1550_v22 = vpop.f32.mrf.mxu1  ;;  %v2243_v32 = vmul.f32 0.01, %v2109_v27  ;;  %vm2176_vm10 = vcmp.gt.f32.partialorder %v2109_v27, 0.0  ;;  %v3316_v16 = vld [vmem:[%s3674_s18 + $0x2e4] sm:$0xf] }
 0x17a   : > { %v1551_v31 = vadd.f32 %v1550_v22, %v1372_v20  ;;  %3209 = vmatmul.msk.bf16.gmra.mxu3 %vm1195_vm0, %v2918_v25 }
 0x17b   : > { %v1904_v28 = vadd.f32 %v1903_v53, %v1726_v19  ;;  %1411 = vmatmul.bf16.gmra.mxu0 %v2890_v17  ;;  %v2310_v40 = vsel %vm2176_vm10, %v2109_v27, %v2243_v32  ;;  %v2931_v53 = vld [vmem:[%s3674_s18 + $0x2f8] sm:$0xf0]  ;;  %v2923_v17 = vld [vmem:[%s3674_s18 + $0x2f0] sm:$0xf0]  ;;  %v3319_v19 = vld [vmem:[%s3674_s18 + $0x2f4] sm:$0xf0]  ;;  %v2922_v27 = vor.u32 %v3318_v15, %v2921_v14 }
 0x17c   : > { %1589 = vmatmul.bf16.gmra.mxu1 %v2894_v18  ;;  %v2934_v62 = vor.u32 %v3317_v52, %v2931_v53  ;;  %v2929_v18 = vld [vmem:[%s3674_s18 + $0x2e8] sm:$0xf]  ;;  %v2937_v52 = vld [vmem:[%s3674_s18 + $0x300] sm:$0xf]  ;;  %v3322_v53 = vld [vmem:[%s3674_s18 + $0x30c] sm:$0xf0] }
 0x17d   : > { %v2039_v30 = vmul.f32 %v4001_v11, %v1904_v28  ;;  %1767 = vmatmul.bf16.gmra.mxu2 %v2898_v23  ;;  %v1911_v39 = vpop.f32.mrf.mxu3  ;;  %v3321_v23 = vld [vmem:[%s3674_s18 + $0x30c] sm:$0xf]  ;;  %v2926_v28 = vor.u32 %v3316_v16, %v2923_v17 }
 0x17f   : > { %v2110_v33 = vadd.f32 %v4009_v26, %v2039_v30 }
 0x180   : > { %v1728_v34 = vpop.f32.mrf.mxu2  ;;  %v1374_v37 = vpop.f32.mrf.mxu0 }
 0x181   : > { %vm2177_vm11 = vcmp.gt.f32.partialorder %v2110_v33, 0.0  ;;  %v2244_v35 = vmul.f32 0.01, %v2110_v33  ;;  %v1729_v36 = vadd.f32 %v1728_v34, %v1551_v31  ;;  %v1552_v38 = vpop.f32.mrf.mxu1 }
 0x182   : > { %v1553_v51 = vadd.f32 %v1552_v38, %v1374_v37 }
 0x183   : > { %v2311_v41 = vsel %vm2177_vm11, %v2110_v33, %v2244_v35  ;;  %v1907_v42 = vadd.f32 %v1906_v1, %v1729_v36  ;;  %v2930_v33 = vor.u32 %v3319_v19, %v2929_v18 }
 0x184   : > { %v3446_v43 = vpack.c.bf16 %v2311_v41, %v2310_v40 }
 0x185   : > { %v2040_v50 = vmul.f32 %v4001_v11, %v1907_v42  ;;  %v1913_v61 = vpop.f32.mrf.mxu3 }
 0x186   : > { %3559 = vst [vmem:[%s3835_s10 + $0x60] sm:$0xff] %v3446_v43  }
 0x187   : > { %v2111_v63 = vadd.f32 %v4009_v26, %v2040_v50 }
 0x188   : > { %v1730_v54 = vpop.f32.mrf.mxu2  ;;  %v1377_v58 = vpop.f32.mrf.mxu0 }
 0x189   : > { %v1731_v57 = vadd.f32 %v1730_v54, %v1553_v51  ;;  %v1555_v59 = vpop.f32.mrf.mxu1  ;;  %v2245_v2 = vmul.f32 0.01, %v2111_v63  ;;  %vm2178_vm12 = vcmp.gt.f32.partialorder %v2111_v63, 0.0  ;;  %v3320_v54 = vld [vmem:[%s3674_s18 + $0x304] sm:$0xf] }
 0x18a   : > { %v1556_v1 = vadd.f32 %v1555_v59, %v1377_v58  ;;  %3210 = vmatmul.msk.bf16.gmra.mxu3 %vm1195_vm0, %v2934_v62 }
 0x18b   : > { %v1909_v21 = vadd.f32 %v1908_v24, %v1731_v57  ;;  %1416 = vmatmul.bf16.gmra.mxu0 %v2906_v55  ;;  %v2312_v9 = vsel %vm2178_vm12, %v2111_v63, %v2245_v2  ;;  %v2947_v24 = vld [vmem:[%s3674_s18 + $0x318] sm:$0xf0]  ;;  %v2939_v55 = vld [vmem:[%s3674_s18 + $0x310] sm:$0xf0]  ;;  %v3323_v57 = vld [vmem:[%s3674_s18 + $0x314] sm:$0xf0]  ;;  %v2938_v63 = vor.u32 %v3322_v53, %v2937_v52 }
 0x18c   : > { %1594 = vmatmul.bf16.gmra.mxu1 %v2910_v56  ;;  %v2950_v35 = vor.u32 %v3321_v23, %v2947_v24  ;;  %v2945_v56 = vld [vmem:[%s3674_s18 + $0x308] sm:$0xf]  ;;  %v2953_v23 = vld [vmem:[%s3674_s18 + $0x320] sm:$0xf]  ;;  %v3326_v24 = vld [vmem:[%s3674_s18 + $0x32c] sm:$0xf0] }
 0x18d   : > { %v2041_v0 = vmul.f32 %v4001_v11, %v1909_v21  ;;  %1772 = vmatmul.bf16.gmra.mxu2 %v2914_v60  ;;  %v1916_v8 = vpop.f32.mrf.mxu3  ;;  %v3325_v60 = vld [vmem:[%s3674_s18 + $0x32c] sm:$0xf]  ;;  %v2942_v21 = vor.u32 %v3320_v54, %v2939_v55 }
 0x18f   : > { %v2112_v3 = vadd.f32 %v4009_v26, %v2041_v0 }
 0x190   : > { %v1733_v4 = vpop.f32.mrf.mxu2  ;;  %v1379_v29 = vpop.f32.mrf.mxu0 }
 0x191   : > { %vm2179_vm13 = vcmp.gt.f32.partialorder %v2112_v3, 0.0  ;;  %v2246_v5 = vmul.f32 0.01, %v2112_v3  ;;  %v1734_v6 = vadd.f32 %v1733_v4, %v1556_v1  ;;  %v1557_v7 = vpop.f32.mrf.mxu1 }
 0x192   : > { %v1558_v22 = vadd.f32 %v1557_v7, %v1379_v29 }
 0x193   : > { %v2313_v10 = vsel %vm2179_vm13, %v2112_v3, %v2246_v5  ;;  %v1912_v12 = vadd.f32 %v1911_v39, %v1734_v6  ;;  %v2946_v3 = vor.u32 %v3323_v57, %v2945_v56 }
 0x194   : > { %v3451_v13 = vpack.c.bf16 %v2313_v10, %v2312_v9 }
 0x195   : > { %v2042_v20 = vmul.f32 %v4001_v11, %v1912_v12  ;;  %v1918_v34 = vpop.f32.mrf.mxu3 }
 0x196   : > { %3560 = vst [vmem:[%s3835_s10 + $0x68] sm:$0xff] %v3451_v13  }
 0x197   : > { %v2113_v36 = vadd.f32 %v4009_v26, %v2042_v20 }
 0x198   : > { %v1735_v25 = vpop.f32.mrf.mxu2  ;;  %v1382_v31 = vpop.f32.mrf.mxu0 }
 0x199   : > { %v1736_v30 = vadd.f32 %v1735_v25, %v1558_v22  ;;  %v1560_v32 = vpop.f32.mrf.mxu1  ;;  %v2247_v40 = vmul.f32 0.01, %v2113_v36  ;;  %vm2180_vm14 = vcmp.gt.f32.partialorder %v2113_v36, 0.0  ;;  %v3324_v25 = vld [vmem:[%s3674_s18 + $0x324] sm:$0xf] }
 0x19a   : > { %v1561_v39 = vadd.f32 %v1560_v32, %v1382_v31  ;;  %3211 = vmatmul.msk.bf16.gmra.mxu3 %vm1195_vm0, %v2950_v35 }
 0x19b   : > { %v1914_v37 = vadd.f32 %v1913_v61, %v1736_v30  ;;  %1421 = vmatmul.bf16.gmra.mxu0 %v2922_v27  ;;  %v2314_v48 = vsel %vm2180_vm14, %v2113_v36, %v2247_v40  ;;  %v2963_v61 = vld [vmem:[%s3674_s18 + $0x338] sm:$0xf0]  ;;  %v2955_v27 = vld [vmem:[%s3674_s18 + $0x330] sm:$0xf0]  ;;  %v3327_v30 = vld [vmem:[%s3674_s18 + $0x334] sm:$0xf0]  ;;  %v2954_v36 = vor.u32 %v3326_v24, %v2953_v23 }
 0x19c   : > { %1599 = vmatmul.bf16.gmra.mxu1 %v2926_v28  ;;  %v2966_v5 = vor.u32 %v3325_v60, %v2963_v61  ;;  %v2961_v28 = vld [vmem:[%s3674_s18 + $0x328] sm:$0xf]  ;;  %v2969_v60 = vld [vmem:[%s3674_s18 + $0x340] sm:$0xf]  ;;  %v3330_v61 = vld [vmem:[%s3674_s18 + $0x34c] sm:$0xf0] }
 0x19d   : > { %v2043_v38 = vmul.f32 %v4001_v11, %v1914_v37  ;;  %1777 = vmatmul.bf16.gmra.mxu2 %v2930_v33  ;;  %v1921_v47 = vpop.f32.mrf.mxu3  ;;  %v3329_v33 = vld [vmem:[%s3674_s18 + $0x34c] sm:$0xf]  ;;  %v2958_v37 = vor.u32 %v3324_v25, %v2955_v27 }
 0x19f   : > { %v2114_v41 = vadd.f32 %v4009_v26, %v2043_v38 }
 0x1a0   : > { %v1738_v42 = vpop.f32.mrf.mxu2  ;;  %v1384_v45 = vpop.f32.mrf.mxu0 }
 0x1a1   : > { %vm2181_vm15 = vcmp.gt.f32.partialorder %v2114_v41, 0.0  ;;  %v2248_v43 = vmul.f32 0.01, %v2114_v41  ;;  %v1739_v44 = vadd.f32 %v1738_v42, %v1561_v39  ;;  %v1562_v46 = vpop.f32.mrf.mxu1 }
 0x1a2   : > { %v1563_v59 = vadd.f32 %v1562_v46, %v1384_v45 }
 0x1a3   : > { %v2315_v49 = vsel %vm2181_vm15, %v2114_v41, %v2248_v43  ;;  %v1917_v50 = vadd.f32 %v1916_v8, %v1739_v44  ;;  %v2962_v41 = vor.u32 %v3327_v30, %v2961_v28 }
 0x1a4   : > { %v3456_v51 = vpack.c.bf16 %v2315_v49, %v2314_v48 }
 0x1a5   : > { %v2044_v58 = vmul.f32 %v4001_v11, %v1917_v50  ;;  %v1923_v4 = vpop.f32.mrf.mxu3 }
 0x1a6   : > { %3561 = vst [vmem:[%s3835_s10 + $0x70] sm:$0xff] %v3456_v51  }
 0x1a7   : > { %v2115_v6 = vadd.f32 %v4009_v26, %v2044_v58 }
 0x1a8   : > { %v1740_v62 = vpop.f32.mrf.mxu2  ;;  %v1387_v1 = vpop.f32.mrf.mxu0 }
 0x1a9   : > { %v1741_v0 = vadd.f32 %v1740_v62, %v1563_v59  ;;  %v1565_v2 = vpop.f32.mrf.mxu1  ;;  %v2249_v9 = vmul.f32 0.01, %v2115_v6  ;;  %vm2182_vm1 = vcmp.gt.f32.partialorder %v2115_v6, 0.0  ;;  %v3328_v62 = vld [vmem:[%s3674_s18 + $0x344] sm:$0xf] }
 0x1aa   : > { %v1566_v8 = vadd.f32 %v1565_v2, %v1387_v1  ;;  %3212 = vmatmul.msk.bf16.gmra.mxu3 %vm1195_vm0, %v2966_v5 }
 0x1ab   : > { %v1919_v29 = vadd.f32 %v1918_v34, %v1741_v0  ;;  %1426 = vmatmul.bf16.gmra.mxu0 %v2938_v63  ;;  %v2316_v18 = vsel %vm2182_vm1, %v2115_v6, %v2249_v9  ;;  %v2979_v34 = vld [vmem:[%s3674_s18 + $0x358] sm:$0xf0]  ;;  %v2971_v63 = vld [vmem:[%s3674_s18 + $0x350] sm:$0xf0]  ;;  %v3331_v0 = vld [vmem:[%s3674_s18 + $0x354] sm:$0xf0]  ;;  %v2970_v6 = vor.u32 %v3330_v61, %v2969_v60 }
 0x1ac   : > { %1604 = vmatmul.bf16.gmra.mxu1 %v2942_v21  ;;  %v2982_v43 = vor.u32 %v3329_v33, %v2979_v34  ;;  %v2977_v21 = vld [vmem:[%s3674_s18 + $0x348] sm:$0xf]  ;;  %v2985_v33 = vld [vmem:[%s3674_s18 + $0x360] sm:$0xf]  ;;  %v3334_v34 = vld [vmem:[%s3674_s18 + $0x36c] sm:$0xf0] }
 0x1ad   : > { %v2045_v7 = vmul.f32 %v4001_v11, %v1919_v29  ;;  %1782 = vmatmul.bf16.gmra.mxu2 %v2946_v3  ;;  %v1926_v17 = vpop.f32.mrf.mxu3  ;;  %v3333_v3 = vld [vmem:[%s3674_s18 + $0x36c] sm:$0xf]  ;;  %v2974_v29 = vor.u32 %v3328_v62, %v2971_v63 }
 0x1af   : > { %v2116_v10 = vadd.f32 %v4009_v26, %v2045_v7 }
 0x1b0   : > { %v1743_v12 = vpop.f32.mrf.mxu2  ;;  %v1389_v15 = vpop.f32.mrf.mxu0 }
 0x1b1   : > { %vm2183_vm2 = vcmp.gt.f32.partialorder %v2116_v10, 0.0  ;;  %v2250_v13 = vmul.f32 0.01, %v2116_v10  ;;  %v1744_v14 = vadd.f32 %v1743_v12, %v1566_v8  ;;  %v1567_v16 = vpop.f32.mrf.mxu1 }
 0x1b2   : > { %v1568_v32 = vadd.f32 %v1567_v16, %v1389_v15 }
 0x1b3   : > { %v2317_v19 = vsel %vm2183_vm2, %v2116_v10, %v2250_v13  ;;  %v1922_v20 = vadd.f32 %v1921_v47, %v1744_v14  ;;  %v2978_v10 = vor.u32 %v3331_v0, %v2977_v21 }
 0x1b4   : > { %v3461_v22 = vpack.c.bf16 %v2317_v19, %v2316_v18 }
 0x1b5   : > { %v2046_v31 = vmul.f32 %v4001_v11, %v1922_v20  ;;  %v1928_v42 = vpop.f32.mrf.mxu3 }
 0x1b6   : > { %3562 = vst [vmem:[%s3835_s10 + $0x78] sm:$0xff] %v3461_v22  }
 0x1b7   : > { %v2117_v44 = vadd.f32 %v4009_v26, %v2046_v31 }
 0x1b8   : > { %v1745_v35 = vpop.f32.mrf.mxu2  ;;  %v1392_v39 = vpop.f32.mrf.mxu0 }
 0x1b9   : > { %v1746_v38 = vadd.f32 %v1745_v35, %v1568_v32  ;;  %v1570_v40 = vpop.f32.mrf.mxu1  ;;  %v2251_v48 = vmul.f32 0.01, %v2117_v44  ;;  %vm2184_vm3 = vcmp.gt.f32.partialorder %v2117_v44, 0.0  ;;  %v3332_v35 = vld [vmem:[%s3674_s18 + $0x364] sm:$0xf] }
 0x1ba   : > { %v1571_v47 = vadd.f32 %v1570_v40, %v1392_v39  ;;  %3213 = vmatmul.msk.bf16.gmra.mxu3 %vm1195_vm0, %v2982_v43 }
 0x1bb   : > { %v1924_v45 = vadd.f32 %v1923_v4, %v1746_v38  ;;  %1431 = vmatmul.bf16.gmra.mxu0 %v2954_v36  ;;  %v2318_v56 = vsel %vm2184_vm3, %v2117_v44, %v2251_v48  ;;  %v2995_v4 = vld [vmem:[%s3674_s18 + $0x378] sm:$0xf0]  ;;  %v2987_v36 = vld [vmem:[%s3674_s18 + $0x370] sm:$0xf0]  ;;  %v3335_v38 = vld [vmem:[%s3674_s18 + $0x374] sm:$0xf0]  ;;  %v2986_v44 = vor.u32 %v3334_v34, %v2985_v33 }
 0x1bc   : > { %1609 = vmatmul.bf16.gmra.mxu1 %v2958_v37  ;;  %v2998_v13 = vor.u32 %v3333_v3, %v2995_v4  ;;  %v2993_v37 = vld [vmem:[%s3674_s18 + $0x368] sm:$0xf]  ;;  %v3001_v3 = vld [vmem:[%s3674_s18 + $0x380] sm:$0xf]  ;;  %v3338_v4 = vld [vmem:[%s3674_s18 + $0x38c] sm:$0xf0] }
 0x1bd   : > { %v2047_v46 = vmul.f32 %v4001_v11, %v1924_v45  ;;  %1787 = vmatmul.bf16.gmra.mxu2 %v2962_v41  ;;  %v1931_v55 = vpop.f32.mrf.mxu3  ;;  %v3337_v41 = vld [vmem:[%s3674_s18 + $0x38c] sm:$0xf]  ;;  %v2990_v45 = vor.u32 %v3332_v35, %v2987_v36 }
 0x1bf   : > { %v2118_v49 = vadd.f32 %v4009_v26, %v2047_v46 }
 0x1c0   : > { %v1748_v50 = vpop.f32.mrf.mxu2  ;;  %v1394_v53 = vpop.f32.mrf.mxu0 }
 0x1c1   : > { %vm2185_vm4 = vcmp.gt.f32.partialorder %v2118_v49, 0.0  ;;  %v2252_v51 = vmul.f32 0.01, %v2118_v49  ;;  %v1749_v52 = vadd.f32 %v1748_v50, %v1571_v47  ;;  %v1572_v54 = vpop.f32.mrf.mxu1 }
 0x1c2   : > { %v1573_v2 = vadd.f32 %v1572_v54, %v1394_v53 }
 0x1c3   : > { %v2319_v57 = vsel %vm2185_vm4, %v2118_v49, %v2252_v51  ;;  %v1927_v58 = vadd.f32 %v1926_v17, %v1749_v52  ;;  %v2994_v49 = vor.u32 %v3335_v38, %v2993_v37 }
 0x1c4   : > { %v3466_v59 = vpack.c.bf16 %v2319_v57, %v2318_v56 }
 0x1c5   : > { %v2048_v1 = vmul.f32 %v4001_v11, %v1927_v58  ;;  %v1933_v12 = vpop.f32.mrf.mxu3 }
 0x1c6   : > { %3563 = vst [vmem:[%s3835_s10 + $0x80] sm:$0xff] %v3466_v59  }
 0x1c7   : > { %v2119_v14 = vadd.f32 %v4009_v26, %v2048_v1 }
 0x1c8   : > { %v1750_v5 = vpop.f32.mrf.mxu2  ;;  %v1397_v8 = vpop.f32.mrf.mxu0 }
 0x1c9   : > { %v1751_v7 = vadd.f32 %v1750_v5, %v1573_v2  ;;  %v1575_v9 = vpop.f32.mrf.mxu1  ;;  %v2253_v18 = vmul.f32 0.01, %v2119_v14  ;;  %vm2186_vm5 = vcmp.gt.f32.partialorder %v2119_v14, 0.0  ;;  %v3336_v5 = vld [vmem:[%s3674_s18 + $0x384] sm:$0xf] }
 0x1ca   : > { %v1576_v17 = vadd.f32 %v1575_v9, %v1397_v8  ;;  %3214 = vmatmul.msk.bf16.gmra.mxu3 %vm1195_vm0, %v2998_v13 }
 0x1cb   : > { %v1929_v15 = vadd.f32 %v1928_v42, %v1751_v7  ;;  %1436 = vmatmul.bf16.gmra.mxu0 %v2970_v6  ;;  %v2320_v28 = vsel %vm2186_vm5, %v2119_v14, %v2253_v18  ;;  %v3011_v42 = vld [vmem:[%s3674_s18 + $0x398] sm:$0xf0]  ;;  %v3003_v6 = vld [vmem:[%s3674_s18 + $0x390] sm:$0xf0]  ;;  %v3339_v7 = vld [vmem:[%s3674_s18 + $0x394] sm:$0xf0]  ;;  %v3002_v14 = vor.u32 %v3338_v4, %v3001_v3 }
 0x1cc   : > { %1614 = vmatmul.bf16.gmra.mxu1 %v2974_v29  ;;  %v3014_v51 = vor.u32 %v3337_v41, %v3011_v42  ;;  %v3009_v29 = vld [vmem:[%s3674_s18 + $0x388] sm:$0xf]  ;;  %v3017_v41 = vld [vmem:[%s3674_s18 + $0x3a0] sm:$0xf]  ;;  %v3342_v42 = vld [vmem:[%s3674_s18 + $0x3ac] sm:$0xf0] }
 0x1cd   : > { %v2049_v16 = vmul.f32 %v4001_v11, %v1929_v15  ;;  %1792 = vmatmul.bf16.gmra.mxu2 %v2978_v10  ;;  %v1936_v27 = vpop.f32.mrf.mxu3  ;;  %v3341_v10 = vld [vmem:[%s3674_s18 + $0x3ac] sm:$0xf]  ;;  %v3006_v15 = vor.u32 %v3336_v5, %v3003_v6 }
 0x1cf   : > { %v2120_v19 = vadd.f32 %v4009_v26, %v2049_v16 }
 0x1d0   : > { %v1753_v20 = vpop.f32.mrf.mxu2  ;;  %v1399_v24 = vpop.f32.mrf.mxu0 }
 0x1d1   : > { %vm2187_vm6 = vcmp.gt.f32.partialorder %v2120_v19, 0.0  ;;  %v2254_v22 = vmul.f32 0.01, %v2120_v19  ;;  %v1754_v23 = vadd.f32 %v1753_v20, %v1576_v17  ;;  %v1577_v25 = vpop.f32.mrf.mxu1 }
 0x1d2   : > { %v1578_v40 = vadd.f32 %v1577_v25, %v1399_v24 }
 0x1d3   : > { %v2321_v30 = vsel %vm2187_vm6, %v2120_v19, %v2254_v22  ;;  %v1932_v31 = vadd.f32 %v1931_v55, %v1754_v23  ;;  %v3010_v19 = vor.u32 %v3339_v7, %v3009_v29 }
 0x1d4   : > { %v3471_v32 = vpack.c.bf16 %v2321_v30, %v2320_v28 }
 0x1d5   : > { %v2050_v39 = vmul.f32 %v4001_v11, %v1932_v31  ;;  %v1938_v50 = vpop.f32.mrf.mxu3 }
 0x1d6   : > { %3564 = vst [vmem:[%s3835_s10 + $0x88] sm:$0xff] %v3471_v32  }
 0x1d7   : > { %v2121_v52 = vadd.f32 %v4009_v26, %v2050_v39 }
 0x1d8   : > { %v1755_v43 = vpop.f32.mrf.mxu2  ;;  %v1402_v47 = vpop.f32.mrf.mxu0 }
 0x1d9   : > { %v1756_v46 = vadd.f32 %v1755_v43, %v1578_v40  ;;  %v1580_v48 = vpop.f32.mrf.mxu1  ;;  %v2255_v56 = vmul.f32 0.01, %v2121_v52  ;;  %vm2188_vm7 = vcmp.gt.f32.partialorder %v2121_v52, 0.0  ;;  %v3340_v43 = vld [vmem:[%s3674_s18 + $0x3a4] sm:$0xf] }
 0x1da   : > { %v1581_v55 = vadd.f32 %v1580_v48, %v1402_v47  ;;  %3215 = vmatmul.msk.bf16.gmra.mxu3 %vm1195_vm0, %v3014_v51 }
 0x1db   : > { %v1934_v53 = vadd.f32 %v1933_v12, %v1756_v46  ;;  %1441 = vmatmul.bf16.gmra.mxu0 %v2986_v44  ;;  %v2322_v21 = vsel %vm2188_vm7, %v2121_v52, %v2255_v56  ;;  %v3027_v12 = vld [vmem:[%s3674_s18 + $0x3b8] sm:$0xf0]  ;;  %v3019_v44 = vld [vmem:[%s3674_s18 + $0x3b0] sm:$0xf0]  ;;  %v3343_v46 = vld [vmem:[%s3674_s18 + $0x3b4] sm:$0xf0]  ;;  %v3018_v52 = vor.u32 %v3342_v42, %v3017_v41 }
 0x1dc   : > { %1619 = vmatmul.bf16.gmra.mxu1 %v2990_v45  ;;  %v3030_v22 = vor.u32 %v3341_v10, %v3027_v12  ;;  %v3025_v45 = vld [vmem:[%s3674_s18 + $0x3a8] sm:$0xf]  ;;  %v3033_v10 = vld [vmem:[%s3674_s18 + $0x3c0] sm:$0xf]  ;;  %v3346_v12 = vld [vmem:[%s3674_s18 + $0x3cc] sm:$0xf0] }
 0x1dd   : > { %v2051_v54 = vmul.f32 %v4001_v11, %v1934_v53  ;;  %1797 = vmatmul.bf16.gmra.mxu2 %v2994_v49  ;;  %v1941_v63 = vpop.f32.mrf.mxu3  ;;  %v3345_v49 = vld [vmem:[%s3674_s18 + $0x3cc] sm:$0xf]  ;;  %v3022_v53 = vor.u32 %v3340_v43, %v3019_v44 }
 0x1df   : > { %v2122_v57 = vadd.f32 %v4009_v26, %v2051_v54 }
 0x1e0   : > { %v1758_v58 = vpop.f32.mrf.mxu2  ;;  %v1404_v61 = vpop.f32.mrf.mxu0 }
 0x1e1   : > { %vm2189_vm8 = vcmp.gt.f32.partialorder %v2122_v57, 0.0  ;;  %v2256_v59 = vmul.f32 0.01, %v2122_v57  ;;  %v1759_v60 = vadd.f32 %v1758_v58, %v1581_v55  ;;  %v1582_v62 = vpop.f32.mrf.mxu1 }
 0x1e2   : > { %v1583_v9 = vadd.f32 %v1582_v62, %v1404_v61 }
 0x1e3   : > { %v2323_v0 = vsel %vm2189_vm8, %v2122_v57, %v2256_v59  ;;  %v1937_v1 = vadd.f32 %v1936_v27, %v1759_v60  ;;  %v3026_v57 = vor.u32 %v3343_v46, %v3025_v45 }
 0x1e4   : > { %v3476_v2 = vpack.c.bf16 %v2323_v0, %v2322_v21 }
 0x1e5   : > { %v2052_v8 = vmul.f32 %v4001_v11, %v1937_v1  ;;  %v1943_v20 = vpop.f32.mrf.mxu3 }
 0x1e6   : > { %3565 = vst [vmem:[%s3835_s10 + $0x90] sm:$0xff] %v3476_v2  }
 0x1e7   : > { %v2123_v23 = vadd.f32 %v4009_v26, %v2052_v8 }
 0x1e8   : > { %v1760_v13 = vpop.f32.mrf.mxu2  ;;  %v1407_v17 = vpop.f32.mrf.mxu0 }
 0x1e9   : > { %v1761_v16 = vadd.f32 %v1760_v13, %v1583_v9  ;;  %v1585_v18 = vpop.f32.mrf.mxu1  ;;  %v2257_v28 = vmul.f32 0.01, %v2123_v23  ;;  %vm2190_vm9 = vcmp.gt.f32.partialorder %v2123_v23, 0.0  ;;  %v3344_v13 = vld [vmem:[%s3674_s18 + $0x3c4] sm:$0xf] }
 0x1ea   : > { %v1586_v27 = vadd.f32 %v1585_v18, %v1407_v17  ;;  %3216 = vmatmul.msk.bf16.gmra.mxu3 %vm1195_vm0, %v3030_v22 }
 0x1eb   : > { %v1939_v24 = vadd.f32 %v1938_v50, %v1761_v16  ;;  %1446 = vmatmul.bf16.gmra.mxu0 %v3002_v14  ;;  %v2324_v37 = vsel %vm2190_vm9, %v2123_v23, %v2257_v28  ;;  %v3043_v50 = vld [vmem:[%s3674_s18 + $0x3d8] sm:$0xf0]  ;;  %v3035_v14 = vld [vmem:[%s3674_s18 + $0x3d0] sm:$0xf0]  ;;  %v3347_v16 = vld [vmem:[%s3674_s18 + $0x3d4] sm:$0xf0]  ;;  %v3034_v23 = vor.u32 %v3346_v12, %v3033_v10 }
 0x1ec   : > { %1624 = vmatmul.bf16.gmra.mxu1 %v3006_v15  ;;  %v3046_v59 = vor.u32 %v3345_v49, %v3043_v50  ;;  %v3041_v15 = vld [vmem:[%s3674_s18 + $0x3c8] sm:$0xf]  ;;  %v3049_v49 = vld [vmem:[%s3674_s18 + $0x3e0] sm:$0xf]  ;;  %v3350_v50 = vld [vmem:[%s3674_s18 + $0x3ec] sm:$0xf0] }
 0x1ed   : > { %v2053_v25 = vmul.f32 %v4001_v11, %v1939_v24  ;;  %1802 = vmatmul.bf16.gmra.mxu2 %v3010_v19  ;;  %v1946_v36 = vpop.f32.mrf.mxu3  ;;  %v3349_v19 = vld [vmem:[%s3674_s18 + $0x3ec] sm:$0xf]  ;;  %v3038_v24 = vor.u32 %v3344_v13, %v3035_v14 }
 0x1ef   : > { %v2124_v30 = vadd.f32 %v4009_v26, %v2053_v25 }
 0x1f0   : > { %v1763_v31 = vpop.f32.mrf.mxu2  ;;  %v1409_v34 = vpop.f32.mrf.mxu0 }
 0x1f1   : > { %vm2191_vm10 = vcmp.gt.f32.partialorder %v2124_v30, 0.0  ;;  %v2258_v32 = vmul.f32 0.01, %v2124_v30  ;;  %v1764_v33 = vadd.f32 %v1763_v31, %v1586_v27  ;;  %v1587_v35 = vpop.f32.mrf.mxu1 }
 0x1f2   : > { %v1588_v48 = vadd.f32 %v1587_v35, %v1409_v34 }
 0x1f3   : > { %v2325_v38 = vsel %vm2191_vm10, %v2124_v30, %v2258_v32  ;;  %v1942_v39 = vadd.f32 %v1941_v63, %v1764_v33  ;;  %v3042_v30 = vor.u32 %v3347_v16, %v3041_v15 }
 0x1f4   : > { %v3481_v40 = vpack.c.bf16 %v2325_v38, %v2324_v37 }
 0x1f5   : > { %v2054_v47 = vmul.f32 %v4001_v11, %v1942_v39  ;;  %v1948_v58 = vpop.f32.mrf.mxu3 }
 0x1f6   : > { %3566 = vst [vmem:[%s3835_s10 + $0x98] sm:$0xff] %v3481_v40  }
 0x1f7   : > { %v2125_v60 = vadd.f32 %v4009_v26, %v2054_v47 }
 0x1f8   : > { %v1765_v51 = vpop.f32.mrf.mxu2  ;;  %v1412_v55 = vpop.f32.mrf.mxu0 }
 0x1f9   : > { %v1766_v54 = vadd.f32 %v1765_v51, %v1588_v48  ;;  %v1590_v56 = vpop.f32.mrf.mxu1  ;;  %v2259_v21 = vmul.f32 0.01, %v2125_v60  ;;  %vm2192_vm11 = vcmp.gt.f32.partialorder %v2125_v60, 0.0  ;;  %v3348_v51 = vld [vmem:[%s3674_s18 + $0x3e4] sm:$0xf] }
 0x1fa   : > { %v1591_v63 = vadd.f32 %v1590_v56, %v1412_v55  ;;  %3217 = vmatmul.msk.bf16.gmra.mxu3 %vm1195_vm0, %v3046_v59 }
 0x1fb   : > { %v1944_v61 = vadd.f32 %v1943_v20, %v1766_v54  ;;  %1451 = vmatmul.bf16.gmra.mxu0 %v3018_v52  ;;  %v2326_v29 = vsel %vm2192_vm11, %v2125_v60, %v2259_v21  ;;  %v3059_v20 = vld [vmem:[%s3674_s18 + $0x3f8] sm:$0xf0]  ;;  %v3051_v52 = vld [vmem:[%s3674_s18 + $0x3f0] sm:$0xf0]  ;;  %v3351_v54 = vld [vmem:[%s3674_s18 + $0x3f4] sm:$0xf0]  ;;  %v3050_v60 = vor.u32 %v3350_v50, %v3049_v49 }
 0x1fc   : > { %1629 = vmatmul.bf16.gmra.mxu1 %v3022_v53  ;;  %v3062_v32 = vor.u32 %v3349_v19, %v3059_v20  ;;  %v3057_v53 = vld [vmem:[%s3674_s18 + $0x3e8] sm:$0xf]  ;;  %v3065_v20 = vld [vmem:[%s3674_s18 + $0x400] sm:$0xf] }
 0x1fd   : > { %v2055_v62 = vmul.f32 %v4001_v11, %v1944_v61  ;;  %1807 = vmatmul.bf16.gmra.mxu2 %v3026_v57  ;;  %v1951_v6 = vpop.f32.mrf.mxu3  ;;  %v3353_v57 = vld [vmem:[%s3674_s18 + $0x40c] sm:$0xf]  ;;  %v3054_v61 = vor.u32 %v3348_v51, %v3051_v52  ;;  %v337_v52 = vld [vmem:[%s3674_s18 + $0x420] sm:$0xff] }
 0x1ff   : > { %v2126_v0 = vadd.f32 %v4009_v26, %v2055_v62 }
 0x200   : > { %v1768_v1 = vpop.f32.mrf.mxu2  ;;  %v1414_v4 = vpop.f32.mrf.mxu0 }
 0x201   : > { %vm2193_vm12 = vcmp.gt.f32.partialorder %v2126_v0, 0.0  ;;  %v2260_v2 = vmul.f32 0.01, %v2126_v0  ;;  %v1769_v3 = vadd.f32 %v1768_v1, %v1591_v63  ;;  %v1592_v5 = vpop.f32.mrf.mxu1 }
 0x202   : > { %v1593_v18 = vadd.f32 %v1592_v5, %v1414_v4 }
 0x203   : > { %v2327_v7 = vsel %vm2193_vm12, %v2126_v0, %v2260_v2  ;;  %v1947_v8 = vadd.f32 %v1946_v36, %v1769_v3  ;;  %v3058_v0 = vor.u32 %v3351_v54, %v3057_v53 }
 0x204   : > { %v3486_v9 = vpack.c.bf16 %v2327_v7, %v2326_v29 }
 0x205   : > { %v2056_v17 = vmul.f32 %v4001_v11, %v1947_v8  ;;  %v1953_v31 = vpop.f32.mrf.mxu3 }
 0x206   : > { %3567 = vst [vmem:[%s3835_s10 + $0xa0] sm:$0xff] %v3486_v9  }
 0x207   : > { %v2127_v33 = vadd.f32 %v4009_v26, %v2056_v17 }
 0x208   : > { %v1770_v22 = vpop.f32.mrf.mxu2  ;;  %v1417_v27 = vpop.f32.mrf.mxu0 }
 0x209   : > { %v1771_v25 = vadd.f32 %v1770_v22, %v1593_v18  ;;  %v1595_v28 = vpop.f32.mrf.mxu1  ;;  %v2261_v37 = vmul.f32 0.01, %v2127_v33  ;;  %vm2194_vm13 = vcmp.gt.f32.partialorder %v2127_v33, 0.0  ;;  %v338_v18 = vld [vmem:[%s3674_s18 + $0x428] sm:$0xff]  ;;  %v3354_v22 = vld [vmem:[%s3674_s18 + $0x40c] sm:$0xf0] }
 0x20a   : > { %v1596_v36 = vadd.f32 %v1595_v28, %v1417_v27  ;;  %3218 = vmatmul.msk.bf16.gmra.mxu3 %vm1195_vm0, %v3062_v32  ;;  %v3355_v27 = vld [vmem:[%s3674_s18 + $0x414] sm:$0xf0]  ;;  %v794_v28 = vunpack.c.h.b16 %v338_v18 }
 0x20b   : > { %v1949_v34 = vadd.f32 %v1948_v58, %v1771_v25  ;;  %1456 = vmatmul.bf16.gmra.mxu0 %v3034_v23  ;;  %v2328_v45 = vsel %vm2194_vm13, %v2127_v33, %v2261_v37  ;;  %v3075_v58 = vld [vmem:[%s3674_s18 + $0x418] sm:$0xf0]  ;;  %v3352_v23 = vld [vmem:[%s3674_s18 + $0x404] sm:$0xf]  ;;  %v3073_v25 = vld [vmem:[%s3674_s18 + $0x408] sm:$0xf]  ;;  %v3066_v33 = vor.u32 %v3354_v22, %v3065_v20 }
 0x20c   : > { %1634 = vmatmul.bf16.gmra.mxu1 %v3038_v24  ;;  %v3078_v2 = vor.u32 %v3353_v57, %v3075_v58  ;;  %v3067_v24 = vld [vmem:[%s3674_s18 + $0x410] sm:$0xf0]  ;;  %v791_v58 = vunpack.c.l.b16 %v337_v52 }
 0x20d   : > { %v2057_v35 = vmul.f32 %v4001_v11, %v1949_v34  ;;  %1812 = vmatmul.bf16.gmra.mxu2 %v3042_v30  ;;  %v1956_v44 = vpop.f32.mrf.mxu3  ;;  %v3070_v34 = vor.u32 %v3352_v23, %v3067_v24 }
 0x20f   : > { %v2128_v38 = vadd.f32 %v4009_v26, %v2057_v35 }
 0x210   : > { %v1773_v39 = vpop.f32.mrf.mxu2  ;;  %v1419_v42 = vpop.f32.mrf.mxu0 }
 0x211   : > { %vm2195_vm14 = vcmp.gt.f32.partialorder %v2128_v38, 0.0  ;;  %v2262_v40 = vmul.f32 0.01, %v2128_v38  ;;  %v1774_v41 = vadd.f32 %v1773_v39, %v1596_v36  ;;  %v1597_v43 = vpop.f32.mrf.mxu1 }
 0x212   : > { %v1598_v56 = vadd.f32 %v1597_v43, %v1419_v42 }
 0x213   : > { %v2329_v46 = vsel %vm2195_vm14, %v2128_v38, %v2262_v40  ;;  %v1952_v47 = vadd.f32 %v1951_v6, %v1774_v41  ;;  %v3074_v38 = vor.u32 %v3355_v27, %v3073_v25  ;;  %v930_v40 = vpack.c.b16 %v794_v28, %v794_v28 }
 0x214   : > { %v3491_v48 = vpack.c.bf16 %v2329_v46, %v2328_v45 }
 0x215   : > { %v2058_v55 = vmul.f32 %v4001_v11, %v1952_v47  ;;  %v1958_v1 = vpop.f32.mrf.mxu3 }
 0x216   : > { %3568 = vst [vmem:[%s3835_s10 + $0xa8] sm:$0xff] %v3491_v48  }
 0x217   : > { %v2129_v3 = vadd.f32 %v4009_v26, %v2058_v55 }
 0x218   : > { %v1775_v59 = vpop.f32.mrf.mxu2  ;;  %v1422_v63 = vpop.f32.mrf.mxu0 }
 0x219   : > { %v1776_v62 = vadd.f32 %v1775_v59, %v1598_v56  ;;  %v1600_v21 = vpop.f32.mrf.mxu1  ;;  %v2263_v29 = vmul.f32 0.01, %v2129_v3  ;;  %vm2196_vm15 = vcmp.gt.f32.partialorder %v2129_v3, 0.0  ;;  %v792_v59 = vunpack.c.h.b16 %v337_v52 }
 0x21a   : > { %v1601_v6 = vadd.f32 %v1600_v21, %v1422_v63  ;;  %3219 = vmatmul.msk.bf16.gmra.mxu3 %vm1195_vm0, %v3078_v2  ;;  %v927_v21 = vpack.c.b16 %v791_v58, %v791_v58 }
 0x21b   : > { %v1954_v4 = vadd.f32 %v1953_v31, %v1776_v62  ;;  %1461 = vmatmul.bf16.gmra.mxu0 %v3050_v60  ;;  %v2330_v15 = vsel %vm2196_vm15, %v2129_v3, %v2263_v29  ;;  %v793_v60 = vunpack.c.l.b16 %v338_v18 }
 0x21c   : > { %1639 = vmatmul.bf16.gmra.mxu1 %v3054_v61 }
 0x21d   : > { %v2059_v5 = vmul.f32 %v4001_v11, %v1954_v4  ;;  %1817 = vmatmul.bf16.gmra.mxu2 %v3058_v0  ;;  %v1961_v14 = vpop.f32.mrf.mxu3  ;;  %v928_v0 = vpack.c.b16 %v792_v59, %v792_v59  ;;  %v929_v4 = vpack.c.b16 %v793_v60, %v793_v60 }
 0x21f   : > { %v2130_v7 = vadd.f32 %v4009_v26, %v2059_v5 }
 0x220   : > { %v1778_v8 = vpop.f32.mrf.mxu2  ;;  %v1424_v12 = vpop.f32.mrf.mxu0 }
 0x221   : > { %vm2197_vm1 = vcmp.gt.f32.partialorder %v2130_v7, 0.0  ;;  %v2264_v9 = vmul.f32 0.01, %v2130_v7  ;;  %v1779_v10 = vadd.f32 %v1778_v8, %v1601_v6  ;;  %v1602_v13 = vpop.f32.mrf.mxu1 }
 0x222   : > { %v1603_v31 = vadd.f32 %v1602_v13, %v1424_v12 }
 0x223   : > { %v2331_v16 = vsel %vm2197_vm1, %v2130_v7, %v2264_v9  ;;  %v1957_v17 = vadd.f32 %v1956_v44, %v1779_v10  ;;  %v4175_v7 = vld [vmem:[%s4233_s2] ss:$0 sm:$0xff] }
 0x224   : > { %v3496_v19 = vpack.c.bf16 %v2331_v16, %v2330_v15 }
 0x225   : > { %v2060_v30 = vmul.f32 %v4001_v11, %v1957_v17  ;;  %v1963_v39 = vpop.f32.mrf.mxu3 }
 0x226   : > { %3569 = vst [vmem:[%s3835_s10 + $0xb0] sm:$0xff] %v3496_v19  }
 0x227   : > { %v2131_v41 = vadd.f32 %v4009_v26, %v2060_v30 }
 0x228   : > { %v1780_v32 = vpop.f32.mrf.mxu2  ;;  %v1427_v36 = vpop.f32.mrf.mxu0 }
 0x229   : > { %v1781_v35 = vadd.f32 %v1780_v32, %v1603_v31  ;;  %v1605_v37 = vpop.f32.mrf.mxu1  ;;  %v2265_v45 = vmul.f32 0.01, %v2131_v41  ;;  %vm2198_vm2 = vcmp.gt.f32.partialorder %v2131_v41, 0.0  ;;  %v4184_v31 = vld [vmem:[%s4234_s3] ss:$0 sm:$0xff] }
 0x22a   : > { %v1606_v44 = vadd.f32 %v1605_v37, %v1427_v36  ;;  %3220 = vmatmul.msk.bf16.gmra.mxu3 %vm1195_vm0, %v930_v40 }
 0x22b   : > { %v1959_v42 = vadd.f32 %v1958_v1, %v1781_v35  ;;  %1466 = vmatmul.bf16.gmra.mxu0 %v3066_v33  ;;  %v2332_v54 = vsel %vm2198_vm2, %v2131_v41, %v2265_v45 }
 0x22c   : > { %1644 = vmatmul.bf16.gmra.mxu1 %v3070_v34 }
 0x22d   : > { %v2061_v43 = vmul.f32 %v4001_v11, %v1959_v42  ;;  %1822 = vmatmul.bf16.gmra.mxu2 %v3074_v38  ;;  %v1966_v53 = vpop.f32.mrf.mxu3 }
 0x22f   : > { %v2132_v46 = vadd.f32 %v4009_v26, %v2061_v43 }
 0x230   : > { %v1783_v47 = vpop.f32.mrf.mxu2  ;;  %v1429_v50 = vpop.f32.mrf.mxu0 }
 0x231   : > { %vm2199_vm3 = vcmp.gt.f32.partialorder %v2132_v46, 0.0  ;;  %v2266_v48 = vmul.f32 0.01, %v2132_v46  ;;  %v1784_v49 = vadd.f32 %v1783_v47, %v1606_v44  ;;  %v1607_v51 = vpop.f32.mrf.mxu1 }
 0x232   : > { %v1608_v62 = vadd.f32 %v1607_v51, %v1429_v50 }
 0x233   : > { %v2333_v55 = vsel %vm2199_vm3, %v2132_v46, %v2266_v48  ;;  %v1962_v56 = vadd.f32 %v1961_v14, %v1784_v49 }
 0x234   : > { %v3501_v57 = vpack.c.bf16 %v2333_v55, %v2332_v54 }
 0x235   : > { %v2062_v61 = vmul.f32 %v4001_v11, %v1962_v56  ;;  %v1968_v5 = vpop.f32.mrf.mxu3 }
 0x236   : > { %3570 = vst [vmem:[%s3835_s10 + $0xb8] sm:$0xff] %v3501_v57  }
 0x237   : > { %v2133_v6 = vadd.f32 %v4009_v26, %v2062_v61 }
 0x238   : > { %v1785_v63 = vpop.f32.mrf.mxu2  ;;  %v1432_v2 = vpop.f32.mrf.mxu0 }
 0x239   : > { %v1786_v1 = vadd.f32 %v1785_v63, %v1608_v62  ;;  %v1610_v3 = vpop.f32.mrf.mxu1  ;;  %v2267_v9 = vmul.f32 0.01, %v2133_v6  ;;  %vm2200_vm0 = vcmp.gt.f32.partialorder %v2133_v6, 0.0 }
 0x23a   : > { %v1611_v8 = vadd.f32 %v1610_v3, %v1432_v2 }
 0x23b   : > { %v1964_v29 = vadd.f32 %v1963_v39, %v1786_v1  ;;  %1471 = vmatmul.bf16.gmra.mxu0 %v927_v21  ;;  %v2334_v18 = vsel %vm2200_vm0, %v2133_v6, %v2267_v9 }
 0x23c   : > { %1649 = vmatmul.bf16.gmra.mxu1 %v928_v0 }
 0x23d   : > { %v2063_v11 = vmul.f32 %v4175_v7, %v1964_v29  ;;  %1827 = vmatmul.bf16.gmra.mxu2 %v929_v4  ;;  %v1971_v17 = vpop.f32.mrf.mxu3 }
 0x23f   : > { %v2134_v10 = vadd.f32 %v4009_v26, %v2063_v11 }
 0x240   : > { %v1788_v12 = vpop.f32.mrf.mxu2  ;;  %v1434_v15 = vpop.f32.mrf.mxu0 }
 0x241   : > { %vm2201_vm4 = vcmp.gt.f32.partialorder %v2134_v10, 0.0  ;;  %v2268_v13 = vmul.f32 0.01, %v2134_v10  ;;  %v1789_v14 = vadd.f32 %v1788_v12, %v1611_v8  ;;  %v1612_v16 = vpop.f32.mrf.mxu1 }
 0x242   : > { %v1613_v24 = vadd.f32 %v1612_v16, %v1434_v15 }
 0x243   : > { %v2335_v19 = vsel %vm2201_vm4, %v2134_v10, %v2268_v13  ;;  %v1967_v20 = vadd.f32 %v1966_v53, %v1789_v14 }
 0x244   : > { %v3506_v22 = vpack.c.bf16 %v2335_v19, %v2334_v18 }
 0x245   : > { %v2064_v23 = vmul.f32 %v4175_v7, %v1967_v20  ;;  %v1973_v30 = vpop.f32.mrf.mxu3 }
 0x246   : > { %3571 = vst [vmem:[%s3835_s10 + $0xc0] sm:$0xff] %v3506_v22  }
 0x247   : > { %v2135_v32 = vadd.f32 %v4184_v31, %v2064_v23 }
 0x248   : > { %v1790_v25 = vpop.f32.mrf.mxu2  ;;  %v1437_v28 = vpop.f32.mrf.mxu0 }
 0x249   : > { %v1791_v27 = vadd.f32 %v1790_v25, %v1613_v24  ;;  %v1615_v26 = vpop.f32.mrf.mxu1  ;;  %v2269_v36 = vmul.f32 0.01, %v2135_v32  ;;  %vm2202_vm5 = vcmp.gt.f32.partialorder %v2135_v32, 0.0 }
 0x24a   : > { %v1616_v35 = vadd.f32 %v1615_v26, %v1437_v28 }
 0x24b   : > { %v1969_v33 = vadd.f32 %v1968_v5, %v1791_v27  ;;  %v2336_v44 = vsel %vm2202_vm5, %v2135_v32, %v2269_v36 }
 0x24d   : > { %v2065_v34 = vmul.f32 %v4175_v7, %v1969_v33  ;;  %v1976_v43 = vpop.f32.mrf.mxu3 }
 0x24f   : > { %v2136_v37 = vadd.f32 %v4184_v31, %v2065_v34 }
 0x250   : > { %v1793_v38 = vpop.f32.mrf.mxu2  ;;  %v1439_v41 = vpop.f32.mrf.mxu0 }
 0x251   : > { %vm2203_vm6 = vcmp.gt.f32.partialorder %v2136_v37, 0.0  ;;  %v2270_v39 = vmul.f32 0.01, %v2136_v37  ;;  %v1794_v40 = vadd.f32 %v1793_v38, %v1616_v35  ;;  %v1617_v42 = vpop.f32.mrf.mxu1 }
 0x252   : > { %v1618_v49 = vadd.f32 %v1617_v42, %v1439_v41 }
 0x253   : > { %v2337_v45 = vsel %vm2203_vm6, %v2136_v37, %v2270_v39  ;;  %v1972_v46 = vadd.f32 %v1971_v17, %v1794_v40 }
 0x254   : > { %v3511_v47 = vpack.c.bf16 %v2337_v45, %v2336_v44 }
 0x255   : > { %v2066_v48 = vmul.f32 %v4175_v7, %v1972_v46  ;;  %v1978_v54 = vpop.f32.mrf.mxu3 }
 0x256   : > { %3572 = vst [vmem:[%s3835_s10 + $0xc8] sm:$0xff] %v3511_v47  }
 0x257   : > { %v2137_v55 = vadd.f32 %v4184_v31, %v2066_v48 }
 0x258   : > { %v1795_v50 = vpop.f32.mrf.mxu2  ;;  %v1442_v52 = vpop.f32.mrf.mxu0 }
 0x259   : > { %v1796_v51 = vadd.f32 %v1795_v50, %v1618_v49  ;;  %v1620_v53 = vpop.f32.mrf.mxu1  ;;  %v2271_v59 = vmul.f32 0.01, %v2137_v55  ;;  %vm2204_vm7 = vcmp.gt.f32.partialorder %v2137_v55, 0.0 }
 0x25a   : > { %v1621_v58 = vadd.f32 %v1620_v53, %v1442_v52 }
 0x25b   : > { %v1974_v56 = vadd.f32 %v1973_v30, %v1796_v51  ;;  %v2338_v2 = vsel %vm2204_vm7, %v2137_v55, %v2271_v59 }
 0x25d   : > { %v2067_v57 = vmul.f32 %v4175_v7, %v1974_v56  ;;  %v1981_v1 = vpop.f32.mrf.mxu3 }
 0x25f   : > { %v2138_v60 = vadd.f32 %v4184_v31, %v2067_v57 }
 0x260   : > { %v1798_v61 = vpop.f32.mrf.mxu2  ;;  %v1444_v21 = vpop.f32.mrf.mxu0 }
 0x261   : > { %vm2205_vm8 = vcmp.gt.f32.partialorder %v2138_v60, 0.0  ;;  %v2272_v62 = vmul.f32 0.01, %v2138_v60  ;;  %v1799_v63 = vadd.f32 %v1798_v61, %v1621_v58  ;;  %v1622_v0 = vpop.f32.mrf.mxu1 }
 0x262   : > { %v1623_v29 = vadd.f32 %v1622_v0, %v1444_v21 }
 0x263   : > { %v2339_v3 = vsel %vm2205_vm8, %v2138_v60, %v2272_v62  ;;  %v1977_v4 = vadd.f32 %v1976_v43, %v1799_v63 }
 0x264   : > { %v3516_v5 = vpack.c.bf16 %v2339_v3, %v2338_v2 }
 0x265   : > { %v2068_v6 = vmul.f32 %v4175_v7, %v1977_v4  ;;  %v1983_v12 = vpop.f32.mrf.mxu3 }
 0x266   : > { %3573 = vst [vmem:[%s3835_s10 + $0xd0] sm:$0xff] %v3516_v5  }
 0x267   : > { %v2139_v13 = vadd.f32 %v4184_v31, %v2068_v6 }
 0x268   : > { %v1800_v11 = vpop.f32.mrf.mxu2  ;;  %v1447_v9 = vpop.f32.mrf.mxu0 }
 0x269   : > { %v1801_v8 = vadd.f32 %v1800_v11, %v1623_v29  ;;  %v1625_v10 = vpop.f32.mrf.mxu1  ;;  %v2273_v17 = vmul.f32 0.01, %v2139_v13  ;;  %vm2206_vm9 = vcmp.gt.f32.partialorder %v2139_v13, 0.0 }
 0x26a   : > { %v1626_v16 = vadd.f32 %v1625_v10, %v1447_v9 }
 0x26b   : > { %v1979_v14 = vadd.f32 %v1978_v54, %v1801_v8  ;;  %v2340_v27 = vsel %vm2206_vm9, %v2139_v13, %v2273_v17 }
 0x26d   : > { %v2069_v15 = vmul.f32 %v4175_v7, %v1979_v14  ;;  %v1986_v25 = vpop.f32.mrf.mxu3 }
 0x26f   : > { %v2140_v18 = vadd.f32 %v4184_v31, %v2069_v15 }
 0x270   : > { %v1803_v19 = vpop.f32.mrf.mxu2  ;;  %v1449_v23 = vpop.f32.mrf.mxu0 }
 0x271   : > { %vm2207_vm10 = vcmp.gt.f32.partialorder %v2140_v18, 0.0  ;;  %v2274_v20 = vmul.f32 0.01, %v2140_v18  ;;  %v1804_v22 = vadd.f32 %v1803_v19, %v1626_v16  ;;  %v1627_v24 = vpop.f32.mrf.mxu1 }
 0x272   : > { %v1628_v33 = vadd.f32 %v1627_v24, %v1449_v23 }
 0x273   : > { %v2341_v28 = vsel %vm2207_vm10, %v2140_v18, %v2274_v20  ;;  %v1982_v26 = vadd.f32 %v1981_v1, %v1804_v22 }
 0x274   : > { %v3521_v30 = vpack.c.bf16 %v2341_v28, %v2340_v27 }
 0x275   : > { %v2070_v32 = vmul.f32 %v4175_v7, %v1982_v26  ;;  %v1988_v38 = vpop.f32.mrf.mxu3 }
 0x276   : > { %3574 = vst [vmem:[%s3835_s10 + $0xd8] sm:$0xff] %v3521_v30  }
 0x277   : > { %v2141_v39 = vadd.f32 %v4184_v31, %v2070_v32 }
 0x278   : > { %v1805_v34 = vpop.f32.mrf.mxu2  ;;  %v1452_v36 = vpop.f32.mrf.mxu0 }
 0x279   : > { %v1806_v35 = vadd.f32 %v1805_v34, %v1628_v33  ;;  %v1630_v37 = vpop.f32.mrf.mxu1  ;;  %v2275_v43 = vmul.f32 0.01, %v2141_v39  ;;  %vm2208_vm11 = vcmp.gt.f32.partialorder %v2141_v39, 0.0 }
 0x27a   : > { %v1631_v42 = vadd.f32 %v1630_v37, %v1452_v36 }
 0x27b   : > { %v1984_v40 = vadd.f32 %v1983_v12, %v1806_v35  ;;  %v2342_v51 = vsel %vm2208_vm11, %v2141_v39, %v2275_v43 }
 0x27d   : > { %v2071_v41 = vmul.f32 %v4175_v7, %v1984_v40  ;;  %v1991_v50 = vpop.f32.mrf.mxu3 }
 0x27f   : > { %v2142_v44 = vadd.f32 %v4184_v31, %v2071_v41 }
 0x280   : > { %v1808_v45 = vpop.f32.mrf.mxu2  ;;  %v1454_v48 = vpop.f32.mrf.mxu0 }
 0x281   : > { %vm2209_vm12 = vcmp.gt.f32.partialorder %v2142_v44, 0.0  ;;  %v2276_v46 = vmul.f32 0.01, %v2142_v44  ;;  %v1809_v47 = vadd.f32 %v1808_v45, %v1631_v42  ;;  %v1632_v49 = vpop.f32.mrf.mxu1 }
 0x282   : > { %v1633_v56 = vadd.f32 %v1632_v49, %v1454_v48 }
 0x283   : > { %v2343_v52 = vsel %vm2209_vm12, %v2142_v44, %v2276_v46  ;;  %v1987_v53 = vadd.f32 %v1986_v25, %v1809_v47 }
 0x284   : > { %v3526_v54 = vpack.c.bf16 %v2343_v52, %v2342_v51 }
 0x285   : > { %v2072_v55 = vmul.f32 %v4175_v7, %v1987_v53  ;;  %v1993_v61 = vpop.f32.mrf.mxu3 }
 0x286   : > { %3575 = vst [vmem:[%s3835_s10 + $0xe0] sm:$0xff] %v3526_v54  }
 0x287   : > { %v2143_v62 = vadd.f32 %v4184_v31, %v2072_v55 }
 0x288   : > { %v1810_v57 = vpop.f32.mrf.mxu2  ;;  %v1457_v59 = vpop.f32.mrf.mxu0 }
 0x289   : > { %v1811_v58 = vadd.f32 %v1810_v57, %v1633_v56  ;;  %v1635_v60 = vpop.f32.mrf.mxu1  ;;  %v2277_v1 = vmul.f32 0.01, %v2143_v62  ;;  %vm2210_vm13 = vcmp.gt.f32.partialorder %v2143_v62, 0.0 }
 0x28a   : > { %v1636_v0 = vadd.f32 %v1635_v60, %v1457_v59 }
 0x28b   : > { %v1989_v63 = vadd.f32 %v1988_v38, %v1811_v58  ;;  %v2344_v8 = vsel %vm2210_vm13, %v2143_v62, %v2277_v1 }
 0x28d   : > { %v2073_v21 = vmul.f32 %v4175_v7, %v1989_v63  ;;  %v1996_v11 = vpop.f32.mrf.mxu3 }
 0x28f   : > { %v2144_v2 = vadd.f32 %v4184_v31, %v2073_v21 }
 0x290   : > { %v1813_v3 = vpop.f32.mrf.mxu2  ;;  %v1459_v6 = vpop.f32.mrf.mxu0 }
 0x291   : > { %vm2211_vm14 = vcmp.gt.f32.partialorder %v2144_v2, 0.0  ;;  %v2278_v4 = vmul.f32 0.01, %v2144_v2  ;;  %v1814_v5 = vadd.f32 %v1813_v3, %v1636_v0  ;;  %v1637_v29 = vpop.f32.mrf.mxu1 }
 0x292   : > { %v1638_v14 = vadd.f32 %v1637_v29, %v1459_v6 }
 0x293   : > { %v2345_v9 = vsel %vm2211_vm14, %v2144_v2, %v2278_v4  ;;  %v1992_v10 = vadd.f32 %v1991_v50, %v1814_v5 }
 0x294   : > { %v3531_v12 = vpack.c.bf16 %v2345_v9, %v2344_v8 }
 0x295   : > { %v2074_v13 = vmul.f32 %v4175_v7, %v1992_v10  ;;  %v1998_v19 = vpop.f32.mrf.mxu3 }
 0x296   : > { %3576 = vst [vmem:[%s3835_s10 + $0xe8] sm:$0xff] %v3531_v12  }
 0x297   : > { %v2145_v20 = vadd.f32 %v4184_v31, %v2074_v13 }
 0x298   : > { %v1815_v15 = vpop.f32.mrf.mxu2  ;;  %v1462_v17 = vpop.f32.mrf.mxu0 }
 0x299   : > { %v1816_v16 = vadd.f32 %v1815_v15, %v1638_v14  ;;  %v1640_v18 = vpop.f32.mrf.mxu1  ;;  %v2279_v25 = vmul.f32 0.01, %v2145_v20  ;;  %vm2212_vm15 = vcmp.gt.f32.partialorder %v2145_v20, 0.0 }
 0x29a   : > { %v1641_v24 = vadd.f32 %v1640_v18, %v1462_v17 }
 0x29b   : > { %v1994_v22 = vadd.f32 %v1993_v61, %v1816_v16  ;;  %v2346_v35 = vsel %vm2212_vm15, %v2145_v20, %v2279_v25 }
 0x29d   : > { %v2075_v23 = vmul.f32 %v4175_v7, %v1994_v22  ;;  %v2001_v34 = vpop.f32.mrf.mxu3 }
 0x29f   : > { %v2146_v27 = vadd.f32 %v4184_v31, %v2075_v23 }
 0x2a0   : > { %v1818_v28 = vpop.f32.mrf.mxu2  ;;  %v1464_v32 = vpop.f32.mrf.mxu0 }
 0x2a1   : > { %vm2213_vm1 = vcmp.gt.f32.partialorder %v2146_v27, 0.0  ;;  %v2280_v26 = vmul.f32 0.01, %v2146_v27  ;;  %v1819_v30 = vadd.f32 %v1818_v28, %v1641_v24  ;;  %v1642_v33 = vpop.f32.mrf.mxu1 }
 0x2a2   : > { %v1643_v40 = vadd.f32 %v1642_v33, %v1464_v32 }
 0x2a3   : > { %v2347_v36 = vsel %vm2213_vm1, %v2146_v27, %v2280_v26  ;;  %v1997_v37 = vadd.f32 %v1996_v11, %v1819_v30 }
 0x2a4   : > { %v3536_v38 = vpack.c.bf16 %v2347_v36, %v2346_v35 }
 0x2a5   : > { %v2076_v39 = vmul.f32 %v4175_v7, %v1997_v37  ;;  %v2003_v45 = vpop.f32.mrf.mxu3 }
 0x2a6   : > { %3577 = vst [vmem:[%s3835_s10 + $0xf0] sm:$0xff] %v3536_v38  }
 0x2a7   : > { %v2147_v46 = vadd.f32 %v4184_v31, %v2076_v39 }
 0x2a8   : > { %v1820_v41 = vpop.f32.mrf.mxu2  ;;  %v1467_v43 = vpop.f32.mrf.mxu0 }
 0x2a9   : > { %v1821_v42 = vadd.f32 %v1820_v41, %v1643_v40  ;;  %v1645_v44 = vpop.f32.mrf.mxu1  ;;  %v2281_v50 = vmul.f32 0.01, %v2147_v46  ;;  %vm2214_vm2 = vcmp.gt.f32.partialorder %v2147_v46, 0.0 }
 0x2aa   : > { %v1646_v49 = vadd.f32 %v1645_v44, %v1467_v43 }
 0x2ab   : > { %v1999_v47 = vadd.f32 %v1998_v19, %v1821_v42  ;;  %v2348_v58 = vsel %vm2214_vm2, %v2147_v46, %v2281_v50 }
 0x2ad   : > { %v2077_v48 = vmul.f32 %v4175_v7, %v1999_v47  ;;  %v2006_v57 = vpop.f32.mrf.mxu3 }
 0x2af   : > { %v2148_v51 = vadd.f32 %v4184_v31, %v2077_v48 }
 0x2b0   : > { %v1823_v52 = vpop.f32.mrf.mxu2  ;;  %v1469_v55 = vpop.f32.mrf.mxu0 }
 0x2b1   : > { %vm2215_vm3 = vcmp.gt.f32.partialorder %v2148_v51, 0.0  ;;  %v2282_v53 = vmul.f32 0.01, %v2148_v51  ;;  %v1824_v54 = vadd.f32 %v1823_v52, %v1646_v49  ;;  %v1647_v56 = vpop.f32.mrf.mxu1 }
 0x2b2   : > { %v1648_v63 = vadd.f32 %v1647_v56, %v1469_v55 }
 0x2b3   : > { %v2349_v59 = vsel %vm2215_vm3, %v2148_v51, %v2282_v53  ;;  %v2002_v60 = vadd.f32 %v2001_v34, %v1824_v54 }
 0x2b4   : > { %v3541_v61 = vpack.c.bf16 %v2349_v59, %v2348_v58 }
 0x2b5   : > { %v2078_v62 = vmul.f32 %v4175_v7, %v2002_v60  ;;  %v2008_v3 = vpop.f32.mrf.mxu3 }
 0x2b6   : > { %3578 = vst [vmem:[%s3835_s10 + $0xf8] sm:$0xff] %v3541_v61  }
 0x2b7   : > { %v2149_v4 = vadd.f32 %v4184_v31, %v2078_v62 }
 0x2b8   : > { %v1825_v21 = vpop.f32.mrf.mxu2  ;;  %v1472_v1 = vpop.f32.mrf.mxu0 }
 0x2b9   : > { %v1826_v0 = vadd.f32 %v1825_v21, %v1648_v63  ;;  %v1650_v2 = vpop.f32.mrf.mxu1  ;;  %v2283_v11 = vmul.f32 0.01, %v2149_v4  ;;  %vm2216_vm0 = vcmp.gt.f32.partialorder %v2149_v4, 0.0 }
 0x2ba   : > { %v1651_v29 = vadd.f32 %v1650_v2, %v1472_v1 }
 0x2bb   : > { %v2004_v5 = vadd.f32 %v2003_v45, %v1826_v0  ;;  %v2350_v15 = vsel %vm2216_vm0, %v2149_v4, %v2283_v11 }
 0x2bd   : > { %v2079_v6 = vmul.f32 %v4175_v7, %v2004_v5 }
 0x2bf   : > { %v2150_v8 = vadd.f32 %v4184_v31, %v2079_v6 }
 0x2c0   : > { %v1828_v9 = vpop.f32.mrf.mxu2  ;;  %v1474_v13 = vpop.f32.mrf.mxu0 }
 0x2c1   : > { %vm2217_vm4 = vcmp.gt.f32.partialorder %v2150_v8, 0.0  ;;  %v2284_v10 = vmul.f32 0.01, %v2150_v8  ;;  %v1829_v12 = vadd.f32 %v1828_v9, %v1651_v29  ;;  %v1652_v14 = vpop.f32.mrf.mxu1 }
 0x2c3   : > { %v2351_v16 = vsel %vm2217_vm4, %v2150_v8, %v2284_v10  ;;  %v2007_v17 = vadd.f32 %v2006_v57, %v1829_v12 }
 0x2c4   : > { %v3546_v18 = vpack.c.bf16 %v2351_v16, %v2350_v15 }
 0x2c5   : > { %v2080_v19 = vmul.f32 %v4175_v7, %v2007_v17 }
 0x2c6   : > { %3579 = vst [vmem:[%s3835_s10 + $0x100] sm:$0xff] %v3546_v18  }
 0x2c7   : > { %v2151_v20 = vadd.f32 %v4184_v31, %v2080_v19 }
 0x2c8   : > { %v1830_v22 = vpop.f32.mrf.mxu2 }
 0x2c9   : > { %vm2218_vm5 = vcmp.gt.f32.partialorder %v2151_v20, 0.0  ;;  %v2285_v23 = vmul.f32 0.01, %v2151_v20 }
 0x2cb   : > { %v2352_v24 = vsel %vm2218_vm5, %v2151_v20, %v2285_v23 }
 0x2cc   : > { %v2419_v25 = vpack.c.bf16 %v2352_v24, %v2352_v24 }
 0x2ce   : > { %2486 = vst [vmem:[%s3835_s10 + $0x108] sm:$0xf] %v2419_v25 }
 0x2cf PF: > { %s14_s15 = sadd.s32 1, %s3600_s15  }
 0x2d0   : > { %p11_p4 = scmp.ge.s32.totalorder %s14_s15, 4  }
 0x2d2   :  { %13 = sbr.rel (!%p11_p4) target bundleno = 1 (0x1), region = 66 }

// kernel: re_vision_eresnet_forward.8
= control target key start
LH: loop header
LB: loop body
LE: loop exit
PB: predicated region body
PF: predicated region fallthrough
CT: control target
= control target key end

     0   :  { %vm341_vm0 = vcmask 392192   ;;  %s1065_s1 = inlined_call_operand.vmem [shape: bf16[432,128], index: 1, kind: input, shape index: {}]   ;;  %s1066_s0 = inlined_call_operand.vmem [shape: bf16[72,432], index: 0, kind: input, shape index: {}]   ;;  %s1067_s2 = inlined_call_operand.vmem [shape: f32[1,128], index: 2, kind: input, shape index: {}]   ;;  %s1068_s3 = inlined_call_operand.vmem [shape: f32[1,128], index: 3, kind: input, shape index: {}]   ;;  %s1069_s4 = inlined_call_operand.vmem [shape: bf16[72,128], index: 4, kind: output, shape index: {}]  }
   0x1   :  { %v764_v0 = vld [vmem:[%s1065_s1 + $0x38] sm:$0xff]  ;;  %v763_v3 = vld [vmem:[%s1065_s1 + $0x30] sm:$0xff]  ;;  %v762_v7 = vld [vmem:[%s1065_s1 + $0x28] sm:$0xff] }
   0x2   :  { %v772_v1 = vld [vmem:[%s1065_s1 + $0x78] sm:$0xff]  ;;  %357 = vmatpush.bf16.msra.mxu0 %v764_v0  ;;  %v771_v4 = vld [vmem:[%s1065_s1 + $0x70] sm:$0xff]  ;;  %v770_v8 = vld [vmem:[%s1065_s1 + $0x68] sm:$0xff] }
   0x3   :  { %v780_v2 = vld [vmem:[%s1065_s1 + $0xb8] sm:$0xff]  ;;  %390 = vmatpush.bf16.msra.mxu1 %v772_v1  ;;  %v779_v5 = vld [vmem:[%s1065_s1 + $0xb0] sm:$0xff]  ;;  %v778_v9 = vld [vmem:[%s1065_s1 + $0xa8] sm:$0xff] }
   0x4   :  { %423 = vmatpush.bf16.msra.mxu2 %v780_v2  ;;  %v783_v6 = vld [vmem:[%s1065_s1 + $0xd0] sm:$0xff]  ;;  %v782_v10 = vld [vmem:[%s1065_s1 + $0xc8] sm:$0xff]  ;;  %v761_v11 = vld [vmem:[%s1065_s1 + $0x20] sm:$0xff] }
   0x5   :  { %461 = vmatpush.bf16.msra.mxu3 %v783_v6  ;;  %v769_v12 = vld [vmem:[%s1065_s1 + $0x60] sm:$0xff]  ;;  %v742_v15 = vld [vmem:[%s1066_s0 + $0xc] sm:$0xf]  ;;  %v576_v16 = vld [vmem:[%s1066_s0 + $0x18] sm:$0xf0] }
   0x6   :  { %358 = vmatpush.bf16.msra.mxu0 %v763_v3  ;;  %v777_v13 = vld [vmem:[%s1065_s1 + $0xa0] sm:$0xff]  ;;  %v760_v17 = vld [vmem:[%s1065_s1 + $0x18] sm:$0xff]  ;;  %v579_v20 = vor.u32 %v742_v15, %v576_v16  ;;  %v759_v21 = vld [vmem:[%s1065_s1 + $0x10] sm:$0xff] }
   0x7   :  { %391 = vmatpush.bf16.msra.mxu1 %v771_v4  ;;  %v781_v14 = vld [vmem:[%s1065_s1 + $0xc0] sm:$0xff]  ;;  %v768_v18 = vld [vmem:[%s1065_s1 + $0x58] sm:$0xff]  ;;  %v767_v22 = vld [vmem:[%s1065_s1 + $0x50] sm:$0xff] }
   0x8   :  { %424 = vmatpush.bf16.msra.mxu2 %v779_v5  ;;  %v776_v19 = vld [vmem:[%s1065_s1 + $0x98] sm:$0xff]  ;;  %v775_v23 = vld [vmem:[%s1065_s1 + $0x90] sm:$0xff]  ;;  %v758_v24 = vld [vmem:[%s1065_s1 + $0x8] sm:$0xff] }
   0x9   :  { %462 = vmatpush.bf16.msra.mxu3 %v782_v10  ;;  %v766_v25 = vld [vmem:[%s1065_s1 + $0x48] sm:$0xff]  ;;  %v757_v27 = vld [vmem:[%s1065_s1] sm:$0xff]  ;;  %v743_v30 = vld [vmem:[%s1066_s0 + $0xc] sm:$0xf0] }
   0xa   :  { %359 = vmatpush.bf16.msra.mxu0 %v762_v7  ;;  %v774_v26 = vld [vmem:[%s1065_s1 + $0x88] sm:$0xff]  ;;  %v765_v28 = vld [vmem:[%s1065_s1 + $0x40] sm:$0xff]  ;;  %v568_v32 = vld [vmem:[%s1066_s0 + $0x10] sm:$0xf0] }
   0xb   :  { %392 = vmatpush.bf16.msra.mxu1 %v770_v8  ;;  %v566_v29 = vld [vmem:[%s1066_s0] sm:$0xf]  ;;  %v741_v31 = vld [vmem:[%s1066_s0 + $0x4] sm:$0xf]  ;;  %v574_v34 = vld [vmem:[%s1066_s0 + $0x8] sm:$0xf] }
   0xc   :  { %425 = vmatpush.bf16.msra.mxu2 %v778_v9  ;;  %v773_v33 = vld [vmem:[%s1065_s1 + $0x80] sm:$0xff]  ;;  %v744_v35 = vld [vmem:[%s1066_s0 + $0x14] sm:$0xf0]  ;;  %v746_v36 = vld [vmem:[%s1066_s0 + $0x2c] sm:$0xf]  ;;  %v567_v38 = vor.u32 %v743_v30, %v566_v29  ;;  %v571_v39 = vor.u32 %v741_v31, %v568_v32 }
   0xd   :  { %463 = vmatpush.bf16.msra.mxu3 %v781_v14  ;;  %v592_v37 = vld [vmem:[%s1066_s0 + $0x38] sm:$0xf0]  ;;  %v575_v40 = vor.u32 %v744_v35, %v574_v34  ;;  %v582_v42 = vld [vmem:[%s1066_s0 + $0x20] sm:$0xf]  ;;  %v747_v43 = vld [vmem:[%s1066_s0 + $0x2c] sm:$0xf0] }
   0xe   :  { %360 = vmatpush.bf16.msra.mxu0 %v761_v11  ;;  %v595_v41 = vor.u32 %v746_v36, %v592_v37  ;;  %v745_v44 = vld [vmem:[%s1066_s0 + $0x24] sm:$0xf]  ;;  %v584_v45 = vld [vmem:[%s1066_s0 + $0x30] sm:$0xf0]  ;;  %v590_v46 = vld [vmem:[%s1066_s0 + $0x28] sm:$0xf]  ;;  %v583_v50 = vor.u32 %v747_v43, %v582_v42 }
   0xf   :  { %393 = vmatpush.bf16.msra.mxu1 %v769_v12  ;;  %v748_v47 = vld [vmem:[%s1066_s0 + $0x34] sm:$0xf0]  ;;  %v750_v48 = vld [vmem:[%s1066_s0 + $0x4c] sm:$0xf]  ;;  %v608_v49 = vld [vmem:[%s1066_s0 + $0x58] sm:$0xf0]  ;;  %v587_v51 = vor.u32 %v745_v44, %v584_v45 }
  0x10   :  { %426 = vmatpush.bf16.msra.mxu2 %v777_v13  ;;  %736 = vmatmul.msk.bf16.vlgmr.msra.gmra.mxu3 %vm341_vm0, %v579_v20  ;;  %v591_v52 = vor.u32 %v748_v47, %v590_v46  ;;  %v611_v53 = vor.u32 %v750_v48, %v608_v49  ;;  %v598_v54 = vld [vmem:[%s1066_s0 + $0x40] sm:$0xf]  ;;  %v751_v55 = vld [vmem:[%s1066_s0 + $0x4c] sm:$0xf0]  ;;  %v749_v56 = vld [vmem:[%s1066_s0 + $0x44] sm:$0xf] }
  0x11   :  { %v600_v57 = vld [vmem:[%s1066_s0 + $0x50] sm:$0xf0]  ;;  %v606_v58 = vld [vmem:[%s1066_s0 + $0x48] sm:$0xf]  ;;  %v752_v59 = vld [vmem:[%s1066_s0 + $0x54] sm:$0xf0]  ;;  %v599_v62 = vor.u32 %v751_v55, %v598_v54 }
  0x12   :  { %361 = vmatpush.bf16.msra.mxu0 %v760_v17  ;;  %v754_v60 = vld [vmem:[%s1066_s0 + $0x6c] sm:$0xf]  ;;  %v624_v61 = vld [vmem:[%s1066_s0 + $0x78] sm:$0xf0]  ;;  %v603_v63 = vor.u32 %v749_v56, %v600_v57  ;;  %v607_v0 = vor.u32 %v752_v59, %v606_v58  ;;  %v614_v3 = vld [vmem:[%s1066_s0 + $0x60] sm:$0xf] }
  0x13   :  { %394 = vmatpush.bf16.msra.mxu1 %v768_v18  ;;  %v627_v1 = vor.u32 %v754_v60, %v624_v61  ;;  %v35_v2 = vld [vmem:[%s1066_s0 + $0x88] sm:$0xff]  ;;  %v755_v4 = vld [vmem:[%s1066_s0 + $0x6c] sm:$0xf0]  ;;  %v753_v5 = vld [vmem:[%s1066_s0 + $0x64] sm:$0xf] }
  0x14   :  { %427 = vmatpush.bf16.msra.mxu2 %v776_v19  ;;  %v616_v6 = vld [vmem:[%s1066_s0 + $0x70] sm:$0xf0]  ;;  %v622_v7 = vld [vmem:[%s1066_s0 + $0x68] sm:$0xf]  ;;  %v756_v8 = vld [vmem:[%s1066_s0 + $0x74] sm:$0xf0]  ;;  %v143_v9 = vunpack.c.h.b16 %v35_v2  ;;  %v615_v10 = vor.u32 %v755_v4, %v614_v3  ;;  %v142_v17 = vunpack.c.l.b16 %v35_v2 }
  0x15   :  { %v619_v11 = vor.u32 %v753_v5, %v616_v6  ;;  %v623_v12 = vor.u32 %v756_v8, %v622_v7  ;;  %v34_v14 = vld [vmem:[%s1066_s0 + $0x80] sm:$0xff] }
  0x16   :  { %362 = vmatpush.bf16.msra.mxu0 %v759_v21  ;;  %v163_v13 = vpack.c.b16 %v143_v9, %v143_v9  ;;  %v140_v15 = vunpack.c.l.b16 %v34_v14  ;;  %v141_v16 = vunpack.c.h.b16 %v34_v14  ;;  %v162_v20 = vpack.c.b16 %v142_v17, %v142_v17  ;;  %v1025_v32 = vld [vmem:[%s1067_s2] ss:$0 sm:$0xff] }
  0x17   :  { %395 = vmatpush.bf16.msra.mxu1 %v767_v22  ;;  %v1031_v34 = vld [vmem:[%s1068_s3] ss:$0 sm:$0xff] }
  0x18   :  { %428 = vmatpush.bf16.msra.mxu2 %v775_v23  ;;  %v160_v18 = vpack.c.b16 %v140_v15, %v140_v15  ;;  %v161_v19 = vpack.c.b16 %v141_v16, %v141_v16 }
  0x1a   :  { %363 = vmatpush.bf16.msra.mxu0 %v758_v24 }
  0x1b   :  { %396 = vmatpush.bf16.msra.mxu1 %v766_v25 }
  0x1c   :  { %429 = vmatpush.bf16.msra.mxu2 %v774_v26 }
  0x1e   :  { %364 = vmatpush.bf16.msra.mxu0 %v757_v27 }
  0x1f   :  { %397 = vmatpush.bf16.msra.mxu1 %v765_v28 }
  0x20   :  { %430 = vmatpush.bf16.msra.mxu2 %v773_v33  ;;  %737 = vmatmul.msk.bf16.gmra.mxu3 %vm341_vm0, %v595_v41 }
  0x21   :  { %365 = vmatmul.bf16.vlgmr.msra.gmra.mxu0 %v567_v38 }
  0x22   :  { %398 = vmatmul.bf16.vlgmr.msra.gmra.mxu1 %v571_v39 }
  0x23   :  { %431 = vmatmul.bf16.vlgmr.msra.gmra.mxu2 %v575_v40 }
  0x30   :  { %738 = vmatmul.msk.bf16.gmra.mxu3 %vm341_vm0, %v611_v53 }
  0x31   :  { %370 = vmatmul.bf16.gmra.mxu0 %v583_v50 }
  0x32   :  { %403 = vmatmul.bf16.gmra.mxu1 %v587_v51 }
  0x33   :  { %436 = vmatmul.bf16.gmra.mxu2 %v591_v52 }
  0x40   :  { %739 = vmatmul.msk.bf16.gmra.mxu3 %vm341_vm0, %v627_v1 }
  0x41   :  { %375 = vmatmul.bf16.gmra.mxu0 %v599_v62 }
  0x42   :  { %408 = vmatmul.bf16.gmra.mxu1 %v603_v63 }
  0x43   :  { %441 = vmatmul.bf16.gmra.mxu2 %v607_v0 }
  0x50   :  { %740 = vmatmul.msk.bf16.gmra.mxu3 %vm341_vm0, %v163_v13 }
  0x51   :  { %380 = vmatmul.bf16.gmra.mxu0 %v615_v10 }
  0x52   :  { %413 = vmatmul.bf16.gmra.mxu1 %v619_v11 }
  0x53   :  { %446 = vmatmul.bf16.gmra.mxu2 %v623_v12 }
  0x61   :  { %385 = vmatmul.bf16.gmra.mxu0 %v160_v18 }
  0x62   :  { %418 = vmatmul.bf16.gmra.mxu1 %v161_v19 }
  0x63   :  { %451 = vmatmul.bf16.gmra.mxu2 %v162_v20 }
  0x93   :  { %v465_v21 = vpop.f32.mrf.mxu3 }
  0x9b   :  { %v467_v24 = vpop.f32.mrf.mxu3 }
  0x9e   :  { %v366_v22 = vpop.f32.mrf.mxu0 }
  0x9f   :  { %v399_v23 = vpop.f32.mrf.mxu1 }
  0xa0   :  { %v400_v25 = vadd.f32 %v399_v23, %v366_v22 }
  0xa3   :  { %v470_v30 = vpop.f32.mrf.mxu3 }
  0xa6   :  { %v432_v26 = vpop.f32.mrf.mxu2  ;;  %v368_v28 = vpop.f32.mrf.mxu0 }
  0xa7   :  { %v433_v27 = vadd.f32 %v432_v26, %v400_v25  ;;  %v401_v29 = vpop.f32.mrf.mxu1 }
  0xa8   :  { %v402_v35 = vadd.f32 %v401_v29, %v368_v28 }
  0xa9   :  { %v466_v31 = vadd.f32 %v465_v21, %v433_v27 }
  0xab   :  { %v493_v33 = vmul.f32 %v1025_v32, %v466_v31  ;;  %v472_v40 = vpop.f32.mrf.mxu3 }
  0xad   :  { %v506_v41 = vadd.f32 %v1031_v34, %v493_v33 }
  0xae   :  { %v434_v36 = vpop.f32.mrf.mxu2  ;;  %v371_v38 = vpop.f32.mrf.mxu0 }
  0xaf   :  { %v435_v37 = vadd.f32 %v434_v36, %v402_v35  ;;  %v404_v39 = vpop.f32.mrf.mxu1  ;;  %v524_v45 = vmul.f32 0.01, %v506_v41  ;;  %vm515_vm1 = vcmp.gt.f32.partialorder %v506_v41, 0.0 }
  0xb0   :  { %v405_v44 = vadd.f32 %v404_v39, %v371_v38 }
  0xb1   :  { %v468_v42 = vadd.f32 %v467_v24, %v435_v37  ;;  %v533_v53 = vsel %vm515_vm1, %v506_v41, %v524_v45 }
  0xb3   :  { %v494_v43 = vmul.f32 %v1025_v32, %v468_v42  ;;  %v475_v52 = vpop.f32.mrf.mxu3 }
  0xb5   :  { %v507_v46 = vadd.f32 %v1031_v34, %v494_v43 }
  0xb6   :  { %v437_v47 = vpop.f32.mrf.mxu2  ;;  %v373_v50 = vpop.f32.mrf.mxu0 }
  0xb7   :  { %vm516_vm2 = vcmp.gt.f32.partialorder %v507_v46, 0.0  ;;  %v525_v48 = vmul.f32 0.01, %v507_v46  ;;  %v438_v49 = vadd.f32 %v437_v47, %v405_v44  ;;  %v406_v51 = vpop.f32.mrf.mxu1 }
  0xb8   :  { %v407_v58 = vadd.f32 %v406_v51, %v373_v50 }
  0xb9   :  { %v534_v54 = vsel %vm516_vm2, %v507_v46, %v525_v48  ;;  %v471_v55 = vadd.f32 %v470_v30, %v438_v49 }
  0xba   :  { %v787_v56 = vpack.c.bf16 %v534_v54, %v533_v53 }
  0xbb   :  { %v495_v57 = vmul.f32 %v1025_v32, %v471_v55  ;;  %v477_v63 = vpop.f32.mrf.mxu3 }
  0xbc   :  { %788 = vst [vmem:[%s1069_s4] sm:$0xff] %v787_v56  }
  0xbd   :  { %v508_v0 = vadd.f32 %v1031_v34, %v495_v57 }
  0xbe   :  { %v439_v59 = vpop.f32.mrf.mxu2  ;;  %v376_v61 = vpop.f32.mrf.mxu0 }
  0xbf   :  { %v440_v60 = vadd.f32 %v439_v59, %v407_v58  ;;  %v409_v62 = vpop.f32.mrf.mxu1  ;;  %v526_v4 = vmul.f32 0.01, %v508_v0  ;;  %vm517_vm3 = vcmp.gt.f32.partialorder %v508_v0, 0.0 }
  0xc0   :  { %v410_v3 = vadd.f32 %v409_v62, %v376_v61 }
  0xc1   :  { %v473_v1 = vadd.f32 %v472_v40, %v440_v60  ;;  %v535_v12 = vsel %vm517_vm3, %v508_v0, %v526_v4 }
  0xc3   :  { %v496_v2 = vmul.f32 %v1025_v32, %v473_v1  ;;  %v480_v11 = vpop.f32.mrf.mxu3 }
  0xc5   :  { %v509_v5 = vadd.f32 %v1031_v34, %v496_v2 }
  0xc6   :  { %v442_v6 = vpop.f32.mrf.mxu2  ;;  %v378_v9 = vpop.f32.mrf.mxu0 }
  0xc7   :  { %vm518_vm4 = vcmp.gt.f32.partialorder %v509_v5, 0.0  ;;  %v527_v7 = vmul.f32 0.01, %v509_v5  ;;  %v443_v8 = vadd.f32 %v442_v6, %v410_v3  ;;  %v411_v10 = vpop.f32.mrf.mxu1 }
  0xc8   :  { %v412_v17 = vadd.f32 %v411_v10, %v378_v9 }
  0xc9   :  { %v536_v13 = vsel %vm518_vm4, %v509_v5, %v527_v7  ;;  %v476_v14 = vadd.f32 %v475_v52, %v443_v8 }
  0xca   :  { %v792_v15 = vpack.c.bf16 %v536_v13, %v535_v12 }
  0xcb   :  { %v497_v16 = vmul.f32 %v1025_v32, %v476_v14  ;;  %v482_v22 = vpop.f32.mrf.mxu3 }
  0xcc   :  { %804 = vst [vmem:[%s1069_s4 + $0x8] sm:$0xff] %v792_v15  }
  0xcd   :  { %v510_v23 = vadd.f32 %v1031_v34, %v497_v16 }
  0xce   :  { %v444_v18 = vpop.f32.mrf.mxu2  ;;  %v381_v20 = vpop.f32.mrf.mxu0 }
  0xcf   :  { %v445_v19 = vadd.f32 %v444_v18, %v412_v17  ;;  %v414_v21 = vpop.f32.mrf.mxu1  ;;  %v528_v27 = vmul.f32 0.01, %v510_v23  ;;  %vm519_vm5 = vcmp.gt.f32.partialorder %v510_v23, 0.0 }
  0xd0   :  { %v415_v26 = vadd.f32 %v414_v21, %v381_v20 }
  0xd1   :  { %v478_v24 = vadd.f32 %v477_v63, %v445_v19  ;;  %v537_v37 = vsel %vm519_vm5, %v510_v23, %v528_v27 }
  0xd3   :  { %v498_v25 = vmul.f32 %v1025_v32, %v478_v24  ;;  %v485_v36 = vpop.f32.mrf.mxu3 }
  0xd5   :  { %v511_v28 = vadd.f32 %v1031_v34, %v498_v25 }
  0xd6   :  { %v447_v29 = vpop.f32.mrf.mxu2  ;;  %v383_v33 = vpop.f32.mrf.mxu0 }
  0xd7   :  { %vm520_vm6 = vcmp.gt.f32.partialorder %v511_v28, 0.0  ;;  %v529_v30 = vmul.f32 0.01, %v511_v28  ;;  %v448_v31 = vadd.f32 %v447_v29, %v415_v26  ;;  %v416_v35 = vpop.f32.mrf.mxu1 }
  0xd8   :  { %v417_v42 = vadd.f32 %v416_v35, %v383_v33 }
  0xd9   :  { %v538_v38 = vsel %vm520_vm6, %v511_v28, %v529_v30  ;;  %v481_v39 = vadd.f32 %v480_v11, %v448_v31 }
  0xda   :  { %v797_v40 = vpack.c.bf16 %v538_v38, %v537_v37 }
  0xdb   :  { %v499_v41 = vmul.f32 %v1025_v32, %v481_v39  ;;  %v487_v47 = vpop.f32.mrf.mxu3 }
  0xdc   :  { %805 = vst [vmem:[%s1069_s4 + $0x10] sm:$0xff] %v797_v40  }
  0xdd   :  { %v512_v48 = vadd.f32 %v1031_v34, %v499_v41 }
  0xde   :  { %v449_v43 = vpop.f32.mrf.mxu2  ;;  %v386_v45 = vpop.f32.mrf.mxu0 }
  0xdf   :  { %v450_v44 = vadd.f32 %v449_v43, %v417_v42  ;;  %v419_v46 = vpop.f32.mrf.mxu1  ;;  %v530_v52 = vmul.f32 0.01, %v512_v48  ;;  %vm521_vm7 = vcmp.gt.f32.partialorder %v512_v48, 0.0 }
  0xe0   :  { %v420_v51 = vadd.f32 %v419_v46, %v386_v45 }
  0xe1   :  { %v483_v49 = vadd.f32 %v482_v22, %v450_v44  ;;  %v539_v59 = vsel %vm521_vm7, %v512_v48, %v530_v52 }
  0xe3   :  { %v500_v50 = vmul.f32 %v1025_v32, %v483_v49 }
  0xe5   :  { %v513_v53 = vadd.f32 %v1031_v34, %v500_v50 }
  0xe6   :  { %v452_v54 = vpop.f32.mrf.mxu2  ;;  %v388_v57 = vpop.f32.mrf.mxu0 }
  0xe7   :  { %vm522_vm8 = vcmp.gt.f32.partialorder %v513_v53, 0.0  ;;  %v531_v55 = vmul.f32 0.01, %v513_v53  ;;  %v453_v56 = vadd.f32 %v452_v54, %v420_v51  ;;  %v421_v58 = vpop.f32.mrf.mxu1 }
  0xe9   :  { %v540_v60 = vsel %vm522_vm8, %v513_v53, %v531_v55  ;;  %v486_v61 = vadd.f32 %v485_v36, %v453_v56 }
  0xea   :  { %v802_v62 = vpack.c.bf16 %v540_v60, %v539_v59 }
  0xeb   :  { %v501_v63 = vmul.f32 %v1025_v32, %v486_v61 }
  0xec   :  { %806 = vst [vmem:[%s1069_s4 + $0x18] sm:$0xff] %v802_v62  }
  0xed   :  { %v514_v0 = vadd.f32 %v1031_v34, %v501_v63 }
  0xee   :  { %v454_v1 = vpop.f32.mrf.mxu2 }
  0xef   :  { %vm523_vm9 = vcmp.gt.f32.partialorder %v514_v0, 0.0  ;;  %v532_v2 = vmul.f32 0.01, %v514_v0 }
  0xf1   :  { %v541_v3 = vsel %vm523_vm9, %v514_v0, %v532_v2 }
  0xf2   :  { %v550_v4 = vpack.c.bf16 %v541_v3, %v541_v3 }
  0xf4   :  { %559 = vst [vmem:[%s1069_s4 + $0x20] sm:$0xf] %v550_v4 }

// kernel: re_vision_eresnet_forward.9
= control target key start
LH: loop header
LB: loop body
LE: loop exit
PB: predicated region body
PF: predicated region fallthrough
CT: control target
= control target key end

     0   :  { %vm681_vm0 = vcmask 392192   ;;  %s2222_s1 = inlined_call_operand.vmem [shape: bf16[432,512], index: 1, kind: input, shape index: {}]   ;;  %s2223_s0 = inlined_call_operand.vmem [shape: bf16[8,432], index: 0, kind: input, shape index: {}]   ;;  %s2224_s2 = inlined_call_operand.vmem [shape: f32[1,512], index: 2, kind: input, shape index: {}]   ;;  %s2225_s3 = inlined_call_operand.vmem [shape: f32[1,512], index: 3, kind: input, shape index: {}]   ;;  %s2226_s4 = inlined_call_operand.vmem [shape: f32[8,512], index: 4, kind: output, shape index: {}]  }
   0x1   :  { %v1055_v0 = vld [vmem:[%s2222_s1 + $0xe0] sm:$0xf]  ;;  %v1407_v1 = vld [vmem:[%s2222_s1 + $0xec] sm:$0xf0]  ;;  %v1405_v35 = vld [vmem:[%s2222_s1 + $0xe4] sm:$0xf] }
   0x2   :  { %v1183_v2 = vld [vmem:[%s2222_s1 + $0x1e0] sm:$0xf]  ;;  %v1056_v3 = vor.u32 %v1407_v1, %v1055_v0  ;;  %v1439_v4 = vld [vmem:[%s2222_s1 + $0x1ec] sm:$0xf0]  ;;  %v1057_v36 = vld [vmem:[%s2222_s1 + $0xf0] sm:$0xf0] }
   0x3   :  { %v1311_v5 = vld [vmem:[%s2222_s1 + $0x2e0] sm:$0xf]  ;;  %v1471_v6 = vld [vmem:[%s2222_s1 + $0x2ec] sm:$0xf0]  ;;  %v1184_v7 = vor.u32 %v1439_v4, %v1183_v2  ;;  %v1060_v42 = vor.u32 %v1405_v35, %v1057_v36  ;;  %v1401_v46 = vld [vmem:[%s2222_s1 + $0xc4] sm:$0xf] }
   0x4   :  { %v1312_v8 = vor.u32 %v1471_v6, %v1311_v5  ;;  %v1359_v9 = vld [vmem:[%s2222_s1 + $0x340] sm:$0xf]  ;;  %v1483_v10 = vld [vmem:[%s2222_s1 + $0x34c] sm:$0xf0]  ;;  %685 = vmatpush.bf16.msra.mxu0 %v1056_v3  ;;  %v1041_v47 = vld [vmem:[%s2222_s1 + $0xd0] sm:$0xf0] }
   0x5   :  { %v1039_v11 = vld [vmem:[%s2222_s1 + $0xc0] sm:$0xf]  ;;  %v1360_v12 = vor.u32 %v1483_v10, %v1359_v9  ;;  %v1403_v13 = vld [vmem:[%s2222_s1 + $0xcc] sm:$0xf0]  ;;  %698 = vmatpush.bf16.msra.mxu1 %v1184_v7  ;;  %v1044_v56 = vor.u32 %v1401_v46, %v1041_v47  ;;  %v1397_v58 = vld [vmem:[%s2222_s1 + $0xa4] sm:$0xf] }
   0x6   :  { %v1167_v14 = vld [vmem:[%s2222_s1 + $0x1c0] sm:$0xf]  ;;  %v1435_v15 = vld [vmem:[%s2222_s1 + $0x1cc] sm:$0xf0]  ;;  %711 = vmatpush.bf16.msra.mxu2 %v1312_v8  ;;  %v1040_v16 = vor.u32 %v1403_v13, %v1039_v11  ;;  %v1025_v59 = vld [vmem:[%s2222_s1 + $0xb0] sm:$0xf0] }
   0x7   :  { %v1168_v17 = vor.u32 %v1435_v15, %v1167_v14  ;;  %v1295_v18 = vld [vmem:[%s2222_s1 + $0x2c0] sm:$0xf]  ;;  %v1467_v19 = vld [vmem:[%s2222_s1 + $0x2cc] sm:$0xf0]  ;;  %729 = vmatpush.bf16.msra.mxu3 %v1360_v12  ;;  %v1028_v4 = vor.u32 %v1397_v58, %v1025_v59  ;;  %v1393_v6 = vld [vmem:[%s2222_s1 + $0x84] sm:$0xf] }
   0x8   :  { %v1343_v20 = vld [vmem:[%s2222_s1 + $0x320] sm:$0xf]  ;;  %v1296_v21 = vor.u32 %v1467_v19, %v1295_v18  ;;  %v1479_v22 = vld [vmem:[%s2222_s1 + $0x32c] sm:$0xf0]  ;;  %686 = vmatpush.bf16.msra.mxu0 %v1040_v16  ;;  %v1009_v7 = vld [vmem:[%s2222_s1 + $0x90] sm:$0xf0] }
   0x9   :  { %v1023_v23 = vld [vmem:[%s2222_s1 + $0xa0] sm:$0xf]  ;;  %v1399_v24 = vld [vmem:[%s2222_s1 + $0xac] sm:$0xf0]  ;;  %v1344_v25 = vor.u32 %v1479_v22, %v1343_v20  ;;  %699 = vmatpush.bf16.msra.mxu1 %v1168_v17  ;;  %v1012_v16 = vor.u32 %v1393_v6, %v1009_v7  ;;  %v1389_v17 = vld [vmem:[%s2222_s1 + $0x64] sm:$0xf] }
   0xa   :  { %v1151_v26 = vld [vmem:[%s2222_s1 + $0x1a0] sm:$0xf]  ;;  %v1431_v27 = vld [vmem:[%s2222_s1 + $0x1ac] sm:$0xf0]  ;;  %v1024_v29 = vor.u32 %v1399_v24, %v1023_v23  ;;  %712 = vmatpush.bf16.msra.mxu2 %v1296_v21  ;;  %v993_v18 = vld [vmem:[%s2222_s1 + $0x70] sm:$0xf0] }
   0xb   :  { %v1279_v28 = vld [vmem:[%s2222_s1 + $0x2a0] sm:$0xf]  ;;  %v1463_v30 = vld [vmem:[%s2222_s1 + $0x2ac] sm:$0xf0]  ;;  %v1152_v33 = vor.u32 %v1431_v27, %v1151_v26  ;;  %730 = vmatpush.bf16.msra.mxu3 %v1344_v25  ;;  %v1313_v35 = vld [vmem:[%s2222_s1 + $0x2f0] sm:$0xf0] }
   0xc   :  { %v1327_v31 = vld [vmem:[%s2222_s1 + $0x300] sm:$0xf]  ;;  %v1475_v32 = vld [vmem:[%s2222_s1 + $0x30c] sm:$0xf0]  ;;  %v1280_v34 = vor.u32 %v1463_v30, %v1279_v28  ;;  %687 = vmatpush.bf16.msra.mxu0 %v1024_v29  ;;  %v19_v28 = vld [vmem:[%s2223_s0 + $0x8] sm:$0xff] }
   0xd   :  { %v1007_v37 = vld [vmem:[%s2222_s1 + $0x80] sm:$0xf]  ;;  %v1328_v38 = vor.u32 %v1475_v32, %v1327_v31  ;;  %v1395_v39 = vld [vmem:[%s2222_s1 + $0x8c] sm:$0xf0]  ;;  %700 = vmatpush.bf16.msra.mxu1 %v1152_v33  ;;  %v1385_v29 = vld [vmem:[%s2222_s1 + $0x44] sm:$0xf]  ;;  %v133_v32 = vunpack.c.h.b16 %v19_v28  ;;  %v996_v33 = vor.u32 %v1389_v17, %v993_v18 }
   0xe   :  { %v1135_v40 = vld [vmem:[%s2222_s1 + $0x180] sm:$0xf]  ;;  %v1427_v41 = vld [vmem:[%s2222_s1 + $0x18c] sm:$0xf0]  ;;  %v1008_v45 = vor.u32 %v1395_v39, %v1007_v37  ;;  %713 = vmatpush.bf16.msra.mxu2 %v1280_v34  ;;  %v1437_v30 = vld [vmem:[%s2222_s1 + $0x1e4] sm:$0xf] }
   0xf   :  { %v1263_v43 = vld [vmem:[%s2222_s1 + $0x280] sm:$0xf]  ;;  %v1459_v44 = vld [vmem:[%s2222_s1 + $0x28c] sm:$0xf0]  ;;  %v1136_v48 = vor.u32 %v1427_v41, %v1135_v40  ;;  %731 = vmatpush.bf16.msra.mxu3 %v1328_v38  ;;  %v1185_v31 = vld [vmem:[%s2222_s1 + $0x1f0] sm:$0xf0]  ;;  %v1729_v40 = vpack.c.b16 %v133_v32, %v133_v32  ;;  %v132_v41 = vunpack.c.l.b16 %v19_v28 }
  0x10   :  { %v1264_v49 = vor.u32 %v1459_v44, %v1263_v43  ;;  %v991_v50 = vld [vmem:[%s2222_s1 + $0x60] sm:$0xf]  ;;  %v1391_v51 = vld [vmem:[%s2222_s1 + $0x6c] sm:$0xf0]  ;;  %688 = vmatpush.bf16.msra.mxu0 %v1008_v45  ;;  %v1469_v34 = vld [vmem:[%s2222_s1 + $0x2e4] sm:$0xf]  ;;  %v1188_v44 = vor.u32 %v1437_v30, %v1185_v31 }
  0x11   :  { %v1119_v52 = vld [vmem:[%s2222_s1 + $0x160] sm:$0xf]  ;;  %v1423_v53 = vld [vmem:[%s2222_s1 + $0x16c] sm:$0xf0]  ;;  %v992_v57 = vor.u32 %v1391_v51, %v991_v50  ;;  %701 = vmatpush.bf16.msra.mxu1 %v1136_v48  ;;  %v977_v37 = vld [vmem:[%s2222_s1 + $0x50] sm:$0xf0]  ;;  %v1316_v45 = vor.u32 %v1469_v34, %v1313_v35 }
  0x12   :  { %v1247_v54 = vld [vmem:[%s2222_s1 + $0x260] sm:$0xf]  ;;  %v1455_v55 = vld [vmem:[%s2222_s1 + $0x26c] sm:$0xf0]  ;;  %714 = vmatpush.bf16.msra.mxu2 %v1264_v49  ;;  %v1120_v60 = vor.u32 %v1423_v53, %v1119_v52  ;;  %v1481_v38 = vld [vmem:[%s2222_s1 + $0x344] sm:$0xf]  ;;  %1373 = vmatmul.msk.bf16.vlgmr.msra.gmra.mxu3 %vm681_vm0, %v1729_v40  ;;  %v980_v49 = vor.u32 %v1385_v29, %v977_v37 }
  0x13   :  { %737 = vmatpush.bf16.msrb.mxu3 %v1060_v42  ;;  %v1248_v61 = vor.u32 %v1455_v55, %v1247_v54  ;;  %v975_v62 = vld [vmem:[%s2222_s1 + $0x40] sm:$0xf]  ;;  %v1387_v63 = vld [vmem:[%s2222_s1 + $0x4c] sm:$0xf0]  ;;  %v1361_v39 = vld [vmem:[%s2222_s1 + $0x350] sm:$0xf0] }
  0x14   :  { %v1103_v0 = vld [vmem:[%s2222_s1 + $0x140] sm:$0xf]  ;;  %v1419_v1 = vld [vmem:[%s2222_s1 + $0x14c] sm:$0xf0]  ;;  %689 = vmatpush.bf16.msra.mxu0 %v992_v57  ;;  %v976_v5 = vor.u32 %v1387_v63, %v975_v62  ;;  %v1381_v46 = vld [vmem:[%s2222_s1 + $0x24] sm:$0xf]  ;;  %v1364_v50 = vor.u32 %v1481_v38, %v1361_v39 }
  0x15   :  { %v1231_v2 = vld [vmem:[%s2222_s1 + $0x240] sm:$0xf]  ;;  %v1451_v3 = vld [vmem:[%s2222_s1 + $0x24c] sm:$0xf0]  ;;  %702 = vmatpush.bf16.msra.mxu1 %v1120_v60  ;;  %v1104_v8 = vor.u32 %v1419_v1, %v1103_v0  ;;  %v1433_v47 = vld [vmem:[%s2222_s1 + $0x1c4] sm:$0xf] }
  0x16   :  { %715 = vmatpush.bf16.msra.mxu2 %v1248_v61  ;;  %v1232_v9 = vor.u32 %v1451_v3, %v1231_v2  ;;  %v959_v10 = vld [vmem:[%s2222_s1 + $0x20] sm:$0xf]  ;;  %v1383_v11 = vld [vmem:[%s2222_s1 + $0x2c] sm:$0xf0]  ;;  %v1169_v51 = vld [vmem:[%s2222_s1 + $0x1d0] sm:$0xf0] }
  0x17   :  { %738 = vmatpush.bf16.msrb.mxu3 %v1044_v56  ;;  %v1087_v12 = vld [vmem:[%s2222_s1 + $0x120] sm:$0xf]  ;;  %v1415_v13 = vld [vmem:[%s2222_s1 + $0x12c] sm:$0xf0]  ;;  %v960_v20 = vor.u32 %v1383_v11, %v959_v10  ;;  %v1465_v52 = vld [vmem:[%s2222_s1 + $0x2c4] sm:$0xf]  ;;  %v1751_v56 = vpack.c.b16 %v132_v41, %v132_v41  ;;  %v1172_v62 = vor.u32 %v1433_v47, %v1169_v51 }
  0x18   :  { %v1215_v14 = vld [vmem:[%s2222_s1 + $0x220] sm:$0xf]  ;;  %v1447_v15 = vld [vmem:[%s2222_s1 + $0x22c] sm:$0xf0]  ;;  %690 = vmatpush.bf16.msra.mxu0 %v976_v5  ;;  %v1088_v24 = vor.u32 %v1415_v13, %v1087_v12  ;;  %v1297_v53 = vld [vmem:[%s2222_s1 + $0x2d0] sm:$0xf0] }
  0x19   :  { %v943_v19 = vld [vmem:[%s2222_s1] sm:$0xf]  ;;  %v1379_v21 = vld [vmem:[%s2222_s1 + $0xc] sm:$0xf0]  ;;  %703 = vmatpush.bf16.msra.mxu1 %v1104_v8  ;;  %v1216_v25 = vor.u32 %v1447_v15, %v1215_v14  ;;  %v961_v57 = vld [vmem:[%s2222_s1 + $0x30] sm:$0xf0]  ;;  %v1300_v63 = vor.u32 %v1465_v52, %v1297_v53 }
  0x1a   :  { %v1071_v22 = vld [vmem:[%s2222_s1 + $0x100] sm:$0xf]  ;;  %v1411_v23 = vld [vmem:[%s2222_s1 + $0x10c] sm:$0xf0]  ;;  %716 = vmatpush.bf16.msra.mxu2 %v1232_v9  ;;  %v944_v36 = vor.u32 %v1379_v21, %v943_v19  ;;  %v1477_v58 = vld [vmem:[%s2222_s1 + $0x324] sm:$0xf]  ;;  %v964_v3 = vor.u32 %v1381_v46, %v961_v57 }
  0x1b   :  { %739 = vmatpush.bf16.msrb.mxu3 %v1028_v4  ;;  %v1199_v26 = vld [vmem:[%s2222_s1 + $0x200] sm:$0xf]  ;;  %v1443_v27 = vld [vmem:[%s2222_s1 + $0x20c] sm:$0xf0]  ;;  %v1072_v42 = vor.u32 %v1411_v23, %v1071_v22  ;;  %v1345_v59 = vld [vmem:[%s2222_s1 + $0x330] sm:$0xf0] }
  0x1c   :  { %691 = vmatpush.bf16.msra.mxu0 %v960_v20  ;;  %v1200_v43 = vor.u32 %v1443_v27, %v1199_v26  ;;  %v18_v48 = vld [vmem:[%s2223_s0] sm:$0xff]  ;;  %v945_v1 = vld [vmem:[%s2222_s1 + $0x10] sm:$0xf0]  ;;  %v1348_v4 = vor.u32 %v1477_v58, %v1345_v59  ;;  %v1063_v10 = vld [vmem:[%s2222_s1 + $0xe8] sm:$0xf] }
  0x1d   :  { %704 = vmatpush.bf16.msra.mxu1 %v1088_v24  ;;  %v130_v54 = vunpack.c.l.b16 %v18_v48  ;;  %v131_v55 = vunpack.c.h.b16 %v18_v48  ;;  %v1377_v0 = vld [vmem:[%s2222_s1 + $0x4] sm:$0xf]  ;;  %v1153_v5 = vld [vmem:[%s2222_s1 + $0x1b0] sm:$0xf0]  ;;  %v1408_v11 = vld [vmem:[%s2222_s1 + $0xf4] sm:$0xf0] }
  0x1e   :  { %717 = vmatpush.bf16.msra.mxu2 %v1216_v25  ;;  %v1429_v2 = vld [vmem:[%s2222_s1 + $0x1a4] sm:$0xf]  ;;  %v1281_v7 = vld [vmem:[%s2222_s1 + $0x2b0] sm:$0xf0]  ;;  %v1191_v12 = vld [vmem:[%s2222_s1 + $0x1e8] sm:$0xf]  ;;  %v948_v17 = vor.u32 %v1377_v0, %v945_v1  ;;  %v1064_v22 = vor.u32 %v1408_v11, %v1063_v10 }
  0x1f   :  { %740 = vmatpush.bf16.msrb.mxu3 %v1012_v16  ;;  %v1762_v60 = vpack.c.b16 %v130_v54, %v130_v54  ;;  %v1764_v61 = vpack.c.b16 %v131_v55, %v131_v55  ;;  %v1461_v6 = vld [vmem:[%s2222_s1 + $0x2a4] sm:$0xf]  ;;  %v1329_v9 = vld [vmem:[%s2222_s1 + $0x310] sm:$0xf0]  ;;  %v1440_v13 = vld [vmem:[%s2222_s1 + $0x1f4] sm:$0xf0]  ;;  %v1156_v14 = vor.u32 %v1429_v2, %v1153_v5 }
  0x20   :  { %692 = vmatpush.bf16.msra.mxu0 %v944_v36  ;;  %v1473_v8 = vld [vmem:[%s2222_s1 + $0x304] sm:$0xf]  ;;  %v1284_v15 = vor.u32 %v1461_v6, %v1281_v7  ;;  %v1137_v19 = vld [vmem:[%s2222_s1 + $0x190] sm:$0xf0]  ;;  %v1192_v23 = vor.u32 %v1440_v13, %v1191_v12  ;;  %v1047_v24 = vld [vmem:[%s2222_s1 + $0xc8] sm:$0xf] }
  0x21   :  { %705 = vmatpush.bf16.msra.mxu1 %v1072_v42  ;;  %v1425_v16 = vld [vmem:[%s2222_s1 + $0x184] sm:$0xf]  ;;  %v1332_v18 = vor.u32 %v1473_v8, %v1329_v9  ;;  %v1265_v21 = vld [vmem:[%s2222_s1 + $0x290] sm:$0xf0]  ;;  %v1404_v25 = vld [vmem:[%s2222_s1 + $0xd4] sm:$0xf0] }
  0x22   :  { %718 = vmatpush.bf16.msra.mxu2 %v1200_v43  ;;  %v1457_v20 = vld [vmem:[%s2222_s1 + $0x284] sm:$0xf]  ;;  %v1175_v26 = vld [vmem:[%s2222_s1 + $0x1c8] sm:$0xf]  ;;  %v1436_v27 = vld [vmem:[%s2222_s1 + $0x1d4] sm:$0xf0]  ;;  %v1140_v28 = vor.u32 %v1425_v16, %v1137_v19  ;;  %v1048_v34 = vor.u32 %v1404_v25, %v1047_v24 }
  0x23   :  { %741 = vmatpush.bf16.msrb.mxu3 %v996_v33  ;;  %693 = vmatmul.bf16.vlgmr.msra.gmra.mxu0 %v1762_v60  ;;  %v1268_v29 = vor.u32 %v1457_v20, %v1265_v21  ;;  %v1421_v30 = vld [vmem:[%s2222_s1 + $0x164] sm:$0xf]  ;;  %v1121_v31 = vld [vmem:[%s2222_s1 + $0x170] sm:$0xf0]  ;;  %v1176_v35 = vor.u32 %v1436_v27, %v1175_v26  ;;  %v1031_v36 = vld [vmem:[%s2222_s1 + $0xa8] sm:$0xf] }
  0x24   :  { %750 = vmatpush.bf16.msrb.mxu0 %v1188_v44  ;;  %706 = vmatmul.bf16.vlgmr.msra.gmra.mxu1 %v1764_v61  ;;  %v1453_v32 = vld [vmem:[%s2222_s1 + $0x264] sm:$0xf]  ;;  %v1249_v33 = vld [vmem:[%s2222_s1 + $0x270] sm:$0xf0]  ;;  %v1400_v37 = vld [vmem:[%s2222_s1 + $0xb4] sm:$0xf0]  ;;  %v1124_v41 = vor.u32 %v1421_v30, %v1121_v31 }
  0x25   :  { %763 = vmatpush.bf16.msrb.mxu1 %v1316_v45  ;;  %719 = vmatmul.bf16.vlgmr.msra.gmra.mxu2 %v1751_v56  ;;  %v1159_v38 = vld [vmem:[%s2222_s1 + $0x1a8] sm:$0xf]  ;;  %v1432_v39 = vld [vmem:[%s2222_s1 + $0x1b4] sm:$0xf0]  ;;  %v1252_v42 = vor.u32 %v1453_v32, %v1249_v33  ;;  %v1417_v43 = vld [vmem:[%s2222_s1 + $0x144] sm:$0xf]  ;;  %v1032_v47 = vor.u32 %v1400_v37, %v1031_v36 }
  0x26   :  { %781 = vmatpush.bf16.msrb.mxu2 %v1364_v50  ;;  %v1105_v44 = vld [vmem:[%s2222_s1 + $0x150] sm:$0xf0]  ;;  %v1449_v45 = vld [vmem:[%s2222_s1 + $0x244] sm:$0xf]  ;;  %v1160_v48 = vor.u32 %v1432_v39, %v1159_v38  ;;  %v1396_v50 = vld [vmem:[%s2222_s1 + $0x94] sm:$0xf0] }
  0x27   :  { %742 = vmatpush.bf16.msrb.mxu3 %v980_v49  ;;  %v1233_v46 = vld [vmem:[%s2222_s1 + $0x250] sm:$0xf0]  ;;  %v1015_v49 = vld [vmem:[%s2222_s1 + $0x88] sm:$0xf]  ;;  %v1428_v52 = vld [vmem:[%s2222_s1 + $0x194] sm:$0xf0]  ;;  %v1108_v53 = vor.u32 %v1417_v43, %v1105_v44 }
  0x28   :  { %751 = vmatpush.bf16.msrb.mxu0 %v1172_v62  ;;  %v1143_v51 = vld [vmem:[%s2222_s1 + $0x188] sm:$0xf]  ;;  %v1236_v54 = vor.u32 %v1449_v45, %v1233_v46  ;;  %v1413_v55 = vld [vmem:[%s2222_s1 + $0x124] sm:$0xf]  ;;  %v1089_v57 = vld [vmem:[%s2222_s1 + $0x130] sm:$0xf0]  ;;  %v1016_v62 = vor.u32 %v1396_v50, %v1015_v49 }
  0x29   :  { %764 = vmatpush.bf16.msrb.mxu1 %v1300_v63  ;;  %v1445_v58 = vld [vmem:[%s2222_s1 + $0x224] sm:$0xf]  ;;  %v1217_v59 = vld [vmem:[%s2222_s1 + $0x230] sm:$0xf0]  ;;  %v1144_v63 = vor.u32 %v1428_v52, %v1143_v51  ;;  %v999_v0 = vld [vmem:[%s2222_s1 + $0x68] sm:$0xf] }
  0x2a   :  { %782 = vmatpush.bf16.msrb.mxu2 %v1348_v4  ;;  %v1392_v1 = vld [vmem:[%s2222_s1 + $0x74] sm:$0xf0]  ;;  %v1127_v2 = vld [vmem:[%s2222_s1 + $0x168] sm:$0xf]  ;;  %v1092_v4 = vor.u32 %v1413_v55, %v1089_v57  ;;  %v1220_v5 = vor.u32 %v1445_v58, %v1217_v59  ;;  %v1409_v6 = vld [vmem:[%s2222_s1 + $0x104] sm:$0xf] }
  0x2b   :  { %743 = vmatpush.bf16.msrb.mxu3 %v964_v3  ;;  %v1424_v3 = vld [vmem:[%s2222_s1 + $0x174] sm:$0xf0]  ;;  %v1073_v7 = vld [vmem:[%s2222_s1 + $0x110] sm:$0xf0]  ;;  %v1441_v8 = vld [vmem:[%s2222_s1 + $0x204] sm:$0xf]  ;;  %v1000_v12 = vor.u32 %v1392_v1, %v999_v0 }
  0x2c   :  { %752 = vmatpush.bf16.msrb.mxu0 %v1156_v14  ;;  %v1201_v9 = vld [vmem:[%s2222_s1 + $0x210] sm:$0xf0]  ;;  %v983_v10 = vld [vmem:[%s2222_s1 + $0x48] sm:$0xf]  ;;  %v1128_v13 = vor.u32 %v1424_v3, %v1127_v2  ;;  %v1472_v14 = vld [vmem:[%s2222_s1 + $0x2f4] sm:$0xf0]  ;;  %v1076_v20 = vor.u32 %v1409_v6, %v1073_v7 }
  0x2d   :  { %765 = vmatpush.bf16.msrb.mxu1 %v1284_v15  ;;  %v1319_v11 = vld [vmem:[%s2222_s1 + $0x2e8] sm:$0xf]  ;;  %v1484_v16 = vld [vmem:[%s2222_s1 + $0x354] sm:$0xf0]  ;;  %v1204_v21 = vor.u32 %v1441_v8, %v1201_v9  ;;  %v1438_v49 = vld [vmem:[%s2222_s1 + $0x1ec] sm:$0xf] }
  0x2e   :  { %783 = vmatpush.bf16.msrb.mxu2 %v1332_v18  ;;  %v1367_v15 = vld [vmem:[%s2222_s1 + $0x348] sm:$0xf]  ;;  %v1420_v19 = vld [vmem:[%s2222_s1 + $0x154] sm:$0xf0]  ;;  %v1193_v50 = vld [vmem:[%s2222_s1 + $0x1f8] sm:$0xf0] }
  0x2f   :  { %744 = vmatpush.bf16.msrb.mxu3 %v948_v17  ;;  %v1388_v17 = vld [vmem:[%s2222_s1 + $0x54] sm:$0xf0]  ;;  %v1111_v18 = vld [vmem:[%s2222_s1 + $0x148] sm:$0xf]  ;;  %v1402_v0 = vld [vmem:[%s2222_s1 + $0xcc] sm:$0xf] }
  0x30   :  { %753 = vmatpush.bf16.msrb.mxu0 %v1140_v28  ;;  %v967_v24 = vld [vmem:[%s2222_s1 + $0x28] sm:$0xf]  ;;  %v984_v26 = vor.u32 %v1388_v17, %v983_v10  ;;  %v1112_v27 = vor.u32 %v1420_v19, %v1111_v18  ;;  %v1468_v28 = vld [vmem:[%s2222_s1 + $0x2d4] sm:$0xf0]  ;;  %v1049_v2 = vld [vmem:[%s2222_s1 + $0xd8] sm:$0xf0] }
  0x31   :  { %766 = vmatpush.bf16.msrb.mxu1 %v1268_v29  ;;  %v1303_v25 = vld [vmem:[%s2222_s1 + $0x2c8] sm:$0xf]  ;;  %v1480_v30 = vld [vmem:[%s2222_s1 + $0x334] sm:$0xf0]  ;;  %v1434_v3 = vld [vmem:[%s2222_s1 + $0x1cc] sm:$0xf]  ;;  %v1052_v10 = vor.u32 %v1402_v0, %v1049_v2 }
  0x32   :  { %802 = vmatpush.bf16.msra.mxu2 %v1192_v23  ;;  %745 = vmatmul.bf16.vlgmr.msrb.gmra.mxu3 %v1762_v60  ;;  %v1368_v23 = vor.u32 %v1484_v16, %v1367_v15  ;;  %v1351_v29 = vld [vmem:[%s2222_s1 + $0x328] sm:$0xf]  ;;  %v1384_v31 = vld [vmem:[%s2222_s1 + $0x34] sm:$0xf0]  ;;  %v1466_v6 = vld [vmem:[%s2222_s1 + $0x2cc] sm:$0xf] }
  0x33   :  { %789 = vmatpush.bf16.msra.mxu3 %v1064_v22  ;;  %v1320_v22 = vor.u32 %v1472_v14, %v1319_v11  ;;  %v1095_v32 = vld [vmem:[%s2222_s1 + $0x128] sm:$0xf]  ;;  %v1416_v33 = vld [vmem:[%s2222_s1 + $0x134] sm:$0xf0]  ;;  %v968_v39 = vor.u32 %v1384_v31, %v967_v24  ;;  %v1305_v7 = vld [vmem:[%s2222_s1 + $0x2d8] sm:$0xf0] }
  0x34   :  { %754 = vmatpush.bf16.msrb.mxu0 %v1124_v41  ;;  %v951_v36 = vld [vmem:[%s2222_s1 + $0x8] sm:$0xf]  ;;  %v1380_v37 = vld [vmem:[%s2222_s1 + $0x14] sm:$0xf0]  ;;  %v1096_v41 = vor.u32 %v1416_v33, %v1095_v32  ;;  %v1033_v14 = vld [vmem:[%s2222_s1 + $0xb8] sm:$0xf0] }
  0x35   :  { %767 = vmatpush.bf16.msrb.mxu1 %v1252_v42  ;;  %1374 = vmatmul.msk.bf16.vlgmr.msrb.gmra.mxu2 %vm681_vm0, %v1729_v40  ;;  %v1287_v38 = vld [vmem:[%s2222_s1 + $0x2a8] sm:$0xf]  ;;  %v1464_v42 = vld [vmem:[%s2222_s1 + $0x2b4] sm:$0xf0]  ;;  %v952_v55 = vor.u32 %v1380_v37, %v951_v36  ;;  %v1430_v15 = vld [vmem:[%s2222_s1 + $0x1ac] sm:$0xf] }
  0x36   :  { %803 = vmatpush.bf16.msra.mxu2 %v1176_v35  ;;  %v1352_v35 = vor.u32 %v1480_v30, %v1351_v29  ;;  %v1335_v43 = vld [vmem:[%s2222_s1 + $0x308] sm:$0xf]  ;;  %v1476_v44 = vld [vmem:[%s2222_s1 + $0x314] sm:$0xf0]  ;;  %v1288_v51 = vor.u32 %v1464_v42, %v1287_v38  ;;  %v1161_v16 = vld [vmem:[%s2222_s1 + $0x1b8] sm:$0xf0] }
  0x37   :  { %790 = vmatpush.bf16.msra.mxu3 %v1048_v34  ;;  %v1304_v34 = vor.u32 %v1468_v28, %v1303_v25  ;;  %v1079_v45 = vld [vmem:[%s2222_s1 + $0x108] sm:$0xf]  ;;  %v1412_v46 = vld [vmem:[%s2222_s1 + $0x114] sm:$0xf0]  ;;  %v1336_v52 = vor.u32 %v1476_v44, %v1335_v43  ;;  %v1462_v18 = vld [vmem:[%s2222_s1 + $0x2ac] sm:$0xf] }
  0x38   :  { %755 = vmatpush.bf16.msrb.mxu0 %v1108_v53  ;;  %v1470_v53 = vld [vmem:[%s2222_s1 + $0x2ec] sm:$0xf]  ;;  %v1080_v57 = vor.u32 %v1412_v46, %v1079_v45  ;;  %v1271_v58 = vld [vmem:[%s2222_s1 + $0x288] sm:$0xf]  ;;  %v1460_v59 = vld [vmem:[%s2222_s1 + $0x294] sm:$0xf0] }
  0x39   :  { %768 = vmatpush.bf16.msrb.mxu1 %v1236_v54  ;;  %v1321_v54 = vld [vmem:[%s2222_s1 + $0x2f8] sm:$0xf0]  ;;  %v1255_v8 = vld [vmem:[%s2222_s1 + $0x268] sm:$0xf]  ;;  %v1456_v9 = vld [vmem:[%s2222_s1 + $0x274] sm:$0xf0] }
  0x3a   :  { %804 = vmatpush.bf16.msra.mxu2 %v1160_v48  ;;  %v1065_v48 = vld [vmem:[%s2222_s1 + $0xf8] sm:$0xf0]  ;;  %v1324_v1 = vor.u32 %v1470_v53, %v1321_v54  ;;  %v1256_v17 = vor.u32 %v1456_v9, %v1255_v8  ;;  %v1394_v24 = vld [vmem:[%s2222_s1 + $0x8c] sm:$0xf]  ;;  %v1223_v32 = vld [vmem:[%s2222_s1 + $0x228] sm:$0xf] }
  0x3b   :  { %791 = vmatpush.bf16.msra.mxu3 %v1032_v47  ;;  %v1406_v47 = vld [vmem:[%s2222_s1 + $0xec] sm:$0xf]  ;;  %v1289_v19 = vld [vmem:[%s2222_s1 + $0x2b8] sm:$0xf0]  ;;  %v1448_v33 = vld [vmem:[%s2222_s1 + $0x234] sm:$0xf0] }
  0x3c   :  { %756 = vmatpush.bf16.msrb.mxu0 %v1092_v4  ;;  %v1177_v4 = vld [vmem:[%s2222_s1 + $0x1d8] sm:$0xf0]  ;;  %v1292_v25 = vor.u32 %v1462_v18, %v1289_v19  ;;  %v1458_v30 = vld [vmem:[%s2222_s1 + $0x28c] sm:$0xf]  ;;  %v1224_v42 = vor.u32 %v1448_v33, %v1223_v32  ;;  %v1207_v45 = vld [vmem:[%s2222_s1 + $0x208] sm:$0xf] }
  0x3d   :  { %769 = vmatpush.bf16.msrb.mxu1 %v1220_v5  ;;  %v1272_v5 = vor.u32 %v1460_v59, %v1271_v58  ;;  %v1180_v11 = vor.u32 %v1434_v3, %v1177_v4  ;;  %v1145_v28 = vld [vmem:[%s2222_s1 + $0x198] sm:$0xf0]  ;;  %v1390_v36 = vld [vmem:[%s2222_s1 + $0x6c] sm:$0xf]  ;;  %v1444_v46 = vld [vmem:[%s2222_s1 + $0x214] sm:$0xf0] }
  0x3e   :  { %805 = vmatpush.bf16.msra.mxu2 %v1144_v63  ;;  %v1196_v63 = vor.u32 %v1438_v49, %v1193_v50  ;;  %v1273_v31 = vld [vmem:[%s2222_s1 + $0x298] sm:$0xf0]  ;;  %v1454_v43 = vld [vmem:[%s2222_s1 + $0x26c] sm:$0xf] }
  0x3f   :  { %792 = vmatpush.bf16.msra.mxu3 %v1016_v62  ;;  %v1068_v62 = vor.u32 %v1406_v47, %v1065_v48  ;;  %v1276_v37 = vor.u32 %v1458_v30, %v1273_v31  ;;  %v1001_v38 = vld [vmem:[%s2222_s1 + $0x78] sm:$0xf0]  ;;  %v1386_v49 = vld [vmem:[%s2222_s1 + $0x4c] sm:$0xf]  ;;  %v2195_v30 = vld [vmem:[%s2224_s2] sm:$0xf] }
  0x40   :  { %757 = vmatpush.bf16.msrb.mxu0 %v1076_v20  ;;  %v1239_v20 = vld [vmem:[%s2222_s1 + $0x248] sm:$0xf]  ;;  %v1257_v44 = vld [vmem:[%s2222_s1 + $0x278] sm:$0xf0]  ;;  %v1004_v47 = vor.u32 %v1390_v36, %v1001_v38  ;;  %v1482_v50 = vld [vmem:[%s2222_s1 + $0x34c] sm:$0xf] }
  0x41   :  { %770 = vmatpush.bf16.msrb.mxu1 %v1204_v21  ;;  %v1452_v21 = vld [vmem:[%s2222_s1 + $0x254] sm:$0xf0]  ;;  %v985_v53 = vld [vmem:[%s2222_s1 + $0x58] sm:$0xf0]  ;;  %v1418_v54 = vld [vmem:[%s2222_s1 + $0x14c] sm:$0xf] }
  0x42   :  { %806 = vmatpush.bf16.msra.mxu2 %v1128_v13  ;;  %v1308_v13 = vor.u32 %v1466_v6, %v1305_v7  ;;  %v1240_v29 = vor.u32 %v1452_v21, %v1239_v20  ;;  %v1450_v58 = vld [vmem:[%s2222_s1 + $0x24c] sm:$0xf]  ;;  %v1241_v59 = vld [vmem:[%s2222_s1 + $0x258] sm:$0xf0] }
  0x43   :  { %793 = vmatpush.bf16.msra.mxu3 %v1000_v12  ;;  %758 = vmatmul.bf16.vlgmr.msrb.gmra.mxu0 %v1764_v61  ;;  %v1398_v12 = vld [vmem:[%s2222_s1 + $0xac] sm:$0xf]  ;;  %v1353_v3 = vld [vmem:[%s2222_s1 + $0x338] sm:$0xf0]  ;;  %v1244_v4 = vor.u32 %v1450_v58, %v1241_v59 }
  0x44   :  { %815 = vmatpush.bf16.msra.mxu0 %v1320_v22  ;;  %771 = vmatmul.bf16.vlgmr.msrb.gmra.mxu1 %v1751_v56  ;;  %v1036_v22 = vor.u32 %v1398_v12, %v1033_v14  ;;  %v1478_v2 = vld [vmem:[%s2222_s1 + $0x32c] sm:$0xf]  ;;  %v1097_v7 = vld [vmem:[%s2222_s1 + $0x138] sm:$0xf0] }
  0x45   :  { %833 = vmatpush.bf16.msra.mxu1 %v1368_v23  ;;  %v1164_v23 = vor.u32 %v1430_v15, %v1161_v16  ;;  %v1414_v6 = vld [vmem:[%s2222_s1 + $0x12c] sm:$0xf]  ;;  %v1225_v9 = vld [vmem:[%s2222_s1 + $0x238] sm:$0xf0] }
  0x46   :  { %807 = vmatpush.bf16.msra.mxu2 %v1112_v27  ;;  %v1426_v27 = vld [vmem:[%s2222_s1 + $0x18c] sm:$0xf]  ;;  %v1100_v12 = vor.u32 %v1414_v6, %v1097_v7  ;;  %v1337_v15 = vld [vmem:[%s2222_s1 + $0x318] sm:$0xf0]  ;;  %v897_v7 = vperm.slane %v2195_v30, 2 }
  0x47   :  { %794 = vmatpush.bf16.msra.mxu3 %v984_v26  ;;  %v1017_v26 = vld [vmem:[%s2222_s1 + $0x98] sm:$0xf0]  ;;  %v1446_v8 = vld [vmem:[%s2222_s1 + $0x22c] sm:$0xf] }
  0x48   :  { %816 = vmatpush.bf16.msra.mxu0 %v1304_v34  ;;  %v1020_v34 = vor.u32 %v1394_v24, %v1017_v26  ;;  %v1474_v14 = vld [vmem:[%s2222_s1 + $0x30c] sm:$0xf]  ;;  %v1228_v16 = vor.u32 %v1446_v8, %v1225_v9  ;;  %v1081_v19 = vld [vmem:[%s2222_s1 + $0x118] sm:$0xf0] }
  0x49   :  { %834 = vmatpush.bf16.msra.mxu1 %v1352_v35  ;;  %v1148_v35 = vor.u32 %v1426_v27, %v1145_v28  ;;  %v1410_v18 = vld [vmem:[%s2222_s1 + $0x10c] sm:$0xf]  ;;  %v1209_v21 = vld [vmem:[%s2222_s1 + $0x218] sm:$0xf0] }
  0x4a   :  { %808 = vmatpush.bf16.msra.mxu2 %v1096_v41  ;;  %v1129_v41 = vld [vmem:[%s2222_s1 + $0x178] sm:$0xf0]  ;;  %v1442_v20 = vld [vmem:[%s2222_s1 + $0x20c] sm:$0xf]  ;;  %v1084_v24 = vor.u32 %v1410_v18, %v1081_v19 }
  0x4b   :  { %795 = vmatpush.bf16.msra.mxu3 %v968_v39  ;;  %v1422_v39 = vld [vmem:[%s2222_s1 + $0x16c] sm:$0xf] }
  0x4c   :  { %817 = vmatpush.bf16.msra.mxu0 %v1288_v51  ;;  %v1132_v48 = vor.u32 %v1422_v39, %v1129_v41  ;;  %v1369_v51 = vld [vmem:[%s2222_s1 + $0x358] sm:$0xf0] }
  0x4d   :  { %835 = vmatpush.bf16.msra.mxu1 %v1336_v52  ;;  %v1260_v52 = vor.u32 %v1454_v43, %v1257_v44 }
  0x4e   :  { %809 = vmatpush.bf16.msra.mxu2 %v1080_v57  ;;  %v1208_v57 = vor.u32 %v1444_v46, %v1207_v45 }
  0x4f   :  { %796 = vmatpush.bf16.msra.mxu3 %v952_v55  ;;  %v1113_v55 = vld [vmem:[%s2222_s1 + $0x158] sm:$0xf0] }
  0x50   :  { %818 = vmatpush.bf16.msra.mxu0 %v1272_v5  ;;  %v1116_v0 = vor.u32 %v1418_v54, %v1113_v55  ;;  %v969_v5 = vld [vmem:[%s2222_s1 + $0x38] sm:$0xf0] }
  0x51   :  { %854 = vmatpush.bf16.msrb.mxu1 %v1196_v63  ;;  %810 = vmatmul.bf16.vlgmr.msra.gmra.mxu2 %v1764_v61  ;;  %v988_v63 = vor.u32 %v1386_v49, %v985_v53 }
  0x52   :  { %867 = vmatpush.bf16.msrb.mxu2 %v1324_v1  ;;  %797 = vmatmul.bf16.vlgmr.msra.gmra.mxu3 %v1762_v60  ;;  %v1382_v1 = vld [vmem:[%s2222_s1 + $0x2c] sm:$0xf] }
  0x53   :  { %841 = vmatpush.bf16.msrb.mxu3 %v1068_v62  ;;  %v1372_v62 = vor.u32 %v1482_v50, %v1369_v51  ;;  %v896_v50 = vperm.slane %v2195_v30, 1 }
  0x54   :  { %819 = vmatpush.bf16.msra.mxu0 %v1256_v17  ;;  %1375 = vmatmul.msk.bf16.vlgmr.msra.gmra.mxu1 %vm681_vm0, %v1729_v40  ;;  %v953_v17 = vld [vmem:[%s2222_s1 + $0x18] sm:$0xf0] }
  0x55   :  { %855 = vmatpush.bf16.msrb.mxu1 %v1180_v11  ;;  %v972_v11 = vor.u32 %v1382_v1, %v969_v5 }
  0x56   :  { %868 = vmatpush.bf16.msrb.mxu2 %v1308_v13  ;;  %v1378_v13 = vld [vmem:[%s2222_s1 + $0xc] sm:$0xf] }
  0x57   :  { %842 = vmatpush.bf16.msrb.mxu3 %v1052_v10  ;;  %v1356_v10 = vor.u32 %v1478_v2, %v1353_v3 }
  0x58   :  { %820 = vmatpush.bf16.msra.mxu0 %v1240_v29 }
  0x59   :  { %856 = vmatpush.bf16.msrb.mxu1 %v1164_v23  ;;  %v956_v23 = vor.u32 %v1378_v13, %v953_v17 }
  0x5a   :  { %869 = vmatpush.bf16.msrb.mxu2 %v1292_v25  ;;  %v1212_v25 = vor.u32 %v1442_v20, %v1209_v21 }
  0x5b   :  { %843 = vmatpush.bf16.msrb.mxu3 %v1036_v22  ;;  %v1340_v22 = vor.u32 %v1474_v14, %v1337_v15 }
  0x5c   :  { %821 = vmatpush.bf16.msra.mxu0 %v1224_v42 }
  0x5d   :  { %857 = vmatpush.bf16.msrb.mxu1 %v1148_v35 }
  0x5e   :  { %870 = vmatpush.bf16.msrb.mxu2 %v1276_v37 }
  0x5f   :  { %844 = vmatpush.bf16.msrb.mxu3 %v1020_v34 }
  0x60   :  { %822 = vmatpush.bf16.msra.mxu0 %v1208_v57 }
  0x61   :  { %858 = vmatpush.bf16.msrb.mxu1 %v1132_v48 }
  0x62   :  { %871 = vmatpush.bf16.msrb.mxu2 %v1260_v52 }
  0x63   :  { %845 = vmatpush.bf16.msrb.mxu3 %v1004_v47  ;;  %823 = vmatmul.bf16.vlgmr.msra.gmra.mxu0 %v1751_v56 }
  0x64   :  { %885 = vmatpush.bf16.msrb.mxu0 %v1372_v62 }
  0x65   :  { %859 = vmatpush.bf16.msrb.mxu1 %v1116_v0 }
  0x66   :  { %872 = vmatpush.bf16.msrb.mxu2 %v1244_v4 }
  0x67   :  { %846 = vmatpush.bf16.msrb.mxu3 %v988_v63 }
  0x68   :  { %886 = vmatpush.bf16.msrb.mxu0 %v1356_v10 }
  0x69   :  { %860 = vmatpush.bf16.msrb.mxu1 %v1100_v12 }
  0x6a   :  { %873 = vmatpush.bf16.msrb.mxu2 %v1228_v16 }
  0x6b   :  { %847 = vmatpush.bf16.msrb.mxu3 %v972_v11 }
  0x6c   :  { %887 = vmatpush.bf16.msrb.mxu0 %v1340_v22  ;;  %v898_v22 = vperm.slane %v2195_v30, 3 }
  0x6d   :  { %861 = vmatpush.bf16.msrb.mxu1 %v1084_v24 }
  0x6e   :  { %874 = vmatpush.bf16.msrb.mxu2 %v1212_v25 }
  0x6f   :  { %848 = vmatpush.bf16.msrb.mxu3 %v956_v23 }
  0x70   :  { %862 = vmatmul.bf16.vlgmr.msrb.gmra.mxu1 %v1764_v61 }
  0x71   :  { %875 = vmatmul.bf16.vlgmr.msrb.gmra.mxu2 %v1751_v56  ;;  %v895_v56 = vperm.slane %v2195_v30, 0 }
  0x72   :  { %849 = vmatmul.bf16.vlgmr.msrb.gmra.mxu3 %v1762_v60  ;;  %v2200_v60 = vld [vmem:[%s2225_s3] sm:$0xf] }
  0x73   :  { %1376 = vmatmul.msk.bf16.vlgmr.msrb.gmra.mxu0 %vm681_vm0, %v1729_v40  ;;  %v909_v34 = vperm.slane %v2200_v60, 0  ;;  %v910_v52 = vperm.slane %v2200_v60, 1  ;;  %v911_v9 = vperm.slane %v2200_v60, 2  ;;  %v912_v24 = vperm.slane %v2200_v60, 3 }
  0x95   :  { %v733_v26 = vpop.f32.mrf.mxu3 }
  0x9d   :  { %v735_v32 = vpop.f32.mrf.mxu3 }
  0xa0   :  { %v694_v27 = vpop.f32.mrf.mxu0 }
  0xa1   :  { %v707_v28 = vpop.f32.mrf.mxu1 }
  0xa2   :  { %v708_v29 = vadd.f32 %v707_v28, %v694_v27 }
  0xa8   :  { %v720_v31 = vpop.f32.mrf.mxu2  ;;  %v696_v40 = vpop.f32.mrf.mxu0 }
  0xa9   :  { %v721_v61 = vadd.f32 %v720_v31, %v708_v29  ;;  %v709_v35 = vpop.f32.mrf.mxu1 }
  0xab   :  { %v734_v33 = vadd.f32 %v733_v26, %v721_v61 }
  0xad   :  { %v903_v36 = vmul.f32 %v895_v56, %v734_v33 }
  0xaf   :  { %v917_v37 = vadd.f32 %v909_v34, %v903_v36 }
  0xb0   :  { %v722_v38 = vpop.f32.mrf.mxu2 }
  0xb1   :  { %vm921_vm1 = vcmp.gt.f32.partialorder %v917_v37, 0.0  ;;  %v925_v39 = vmul.f32 0.01, %v917_v37 }
  0xb3   :  { %v929_v41 = vsel %vm921_vm1, %v917_v37, %v925_v39 }
  0xb4   :  { %933 = vst [vmem:[%s2226_s4] sm:$0xff] %v929_v41 }
  0xb5   :  { %v746_v42 = vpop.f32.mrf.mxu3 }
  0xb8   :  { %v785_v43 = vpop.f32.mrf.mxu2 }
  0xbd   :  { %v748_v44 = vpop.f32.mrf.mxu3 }
  0xc0   :  { %v759_v46 = vpop.f32.mrf.mxu0  ;;  %v787_v48 = vpop.f32.mrf.mxu2 }
  0xc1   :  { %v772_v45 = vpop.f32.mrf.mxu1  ;;  %v760_v47 = vadd.f32 %v759_v46, %v746_v42 }
  0xc3   :  { %v773_v49 = vadd.f32 %v772_v45, %v760_v47 }
  0xc5   :  { %v786_v51 = vadd.f32 %v785_v43, %v773_v49 }
  0xc7   :  { %v904_v53 = vmul.f32 %v896_v50, %v786_v51 }
  0xc8   :  { %v761_v55 = vpop.f32.mrf.mxu0 }
  0xc9   :  { %v774_v54 = vpop.f32.mrf.mxu1  ;;  %v918_v57 = vadd.f32 %v910_v52, %v904_v53 }
  0xcb   :  { %vm922_vm2 = vcmp.gt.f32.partialorder %v918_v57, 0.0  ;;  %v926_v58 = vmul.f32 0.01, %v918_v57 }
  0xcd   :  { %v930_v59 = vsel %vm922_vm2, %v918_v57, %v926_v58 }
  0xce   :  { %934 = vst [vmem:[%s2226_s4 + $0x8] sm:$0xff] %v930_v59 }
  0xd1   :  { %v837_v63 = vpop.f32.mrf.mxu1 }
  0xd4   :  { %v811_v0 = vpop.f32.mrf.mxu2 }
  0xd5   :  { %v798_v62 = vpop.f32.mrf.mxu3 }
  0xd6   :  { %v812_v4 = vadd.f32 %v811_v0, %v798_v62 }
  0xd9   :  { %v839_v2 = vpop.f32.mrf.mxu1 }
  0xdc   :  { %v813_v3 = vpop.f32.mrf.mxu2 }
  0xdd   :  { %v800_v1 = vpop.f32.mrf.mxu3 }
  0xe0   :  { %v824_v5 = vpop.f32.mrf.mxu0 }
  0xe1   :  { %v825_v6 = vadd.f32 %v824_v5, %v812_v4 }
  0xe3   :  { %v838_v8 = vadd.f32 %v837_v63, %v825_v6 }
  0xe5   :  { %v905_v10 = vmul.f32 %v897_v7, %v838_v8 }
  0xe7   :  { %v919_v11 = vadd.f32 %v911_v9, %v905_v10 }
  0xe8   :  { %v826_v12 = vpop.f32.mrf.mxu0 }
  0xe9   :  { %vm923_vm3 = vcmp.gt.f32.partialorder %v919_v11, 0.0  ;;  %v927_v13 = vmul.f32 0.01, %v919_v11 }
  0xeb   :  { %v931_v15 = vsel %vm923_vm3, %v919_v11, %v927_v13 }
  0xec   :  { %935 = vst [vmem:[%s2226_s4 + $0x10] sm:$0xff] %v931_v15 }
  0xed   :  { %v863_v14 = vpop.f32.mrf.mxu1 }
  0xf0   :  { %v889_v17 = vpop.f32.mrf.mxu0 }
  0xf4   :  { %v876_v19 = vpop.f32.mrf.mxu2 }
  0xf5   :  { %v850_v16 = vpop.f32.mrf.mxu3  ;;  %v865_v20 = vpop.f32.mrf.mxu1 }
  0xf6   :  { %v864_v18 = vadd.f32 %v863_v14, %v850_v16 }
  0xf8   :  { %v877_v21 = vadd.f32 %v876_v19, %v864_v18  ;;  %v891_v27 = vpop.f32.mrf.mxu0 }
  0xfa   :  { %v890_v23 = vadd.f32 %v889_v17, %v877_v21 }
  0xfc   :  { %v906_v25 = vmul.f32 %v898_v22, %v890_v23  ;;  %v878_v29 = vpop.f32.mrf.mxu2 }
  0xfd   :  { %v852_v26 = vpop.f32.mrf.mxu3 }
  0xfe   :  { %v920_v28 = vadd.f32 %v912_v24, %v906_v25 }
 0x100   :  { %vm924_vm4 = vcmp.gt.f32.partialorder %v920_v28, 0.0  ;;  %v928_v31 = vmul.f32 0.01, %v920_v28 }
 0x102   :  { %v932_v61 = vsel %vm924_vm4, %v920_v28, %v928_v31 }
 0x103   :  { %936 = vst [vmem:[%s2226_s4 + $0x18] sm:$0xff] %v932_v61 }

</bundles_post_ra>
